<compile_context>
chip_gen: v7x
topology: tpu7x:2x2x1
jax: 0.10.0
libtpu: 0.0.40
codegen_flags: <defaults>
</compile_context>

<pallas_src>
import numpy as np
import jax
import jax.numpy as jnp
from jax.experimental import pallas as pl
from jax.experimental.pallas import tpu as pltpu


# --------------------------------------------------------------------------
# Host-side constants: 3x3-tap boundary masks and bilinear upsample matrices
# --------------------------------------------------------------------------

_TAPS = [(dy, dx) for dy in (-1, 0, 1) for dx in (-1, 0, 1)]


def _make_tap_masks_np(H, W):
    """(9, H*W) f32 validity masks for the 9 conv taps (center = all ones)."""
    hw = H * W
    hh = np.arange(hw) // W
    ww = np.arange(hw) % W
    masks = []
    for dy, dx in _TAPS:
        valid = np.ones(hw, dtype=bool)
        if dy == -1:
            valid &= hh >= 1
        elif dy == 1:
            valid &= hh < H - 1
        if dx == -1:
            valid &= ww >= 1
        elif dx == 1:
            valid &= ww < W - 1
        masks.append(valid.astype(np.float32))
    return np.stack(masks, axis=0)


def _interp_matrix_np(n_in, n_out):
    """(n_out, n_in) 1-D bilinear interpolation matrix, align_corners=True."""
    if n_in == 1:
        return np.ones((n_out, 1), np.float32)
    pos = np.arange(n_out, dtype=np.float64) * (n_in - 1) / (n_out - 1)
    i0 = np.clip(np.floor(pos).astype(np.int64), 0, n_in - 2)
    frac = (pos - i0).astype(np.float32)
    m = np.zeros((n_out, n_in), np.float32)
    m[np.arange(n_out), i0] += 1.0 - frac
    m[np.arange(n_out), i0 + 1] += frac
    return m


def _upsample_matrix_T_np(hin, win, hout, wout):
    """U^T of shape (hin*win, hout*wout): up(x)_flat = x_flat @ U^T."""
    ah = _interp_matrix_np(hin, hout)          # (hout, hin)
    aw = _interp_matrix_np(win, wout)          # (wout, win)
    return np.kron(ah, aw).T.astype(np.float32)


# --------------------------------------------------------------------------
# In-kernel helpers
# --------------------------------------------------------------------------

def _conv3x3_flat(x, w_bf16, bias_f32, masks, H, W):
    """3x3 conv (stride 1, pad 1) + folded-BN bias, channels-x-flat-spatial.

    x:        (Cin, H*W)  f32
    w_bf16:   (Cout, 9*Cin) bf16  (BN scale already folded in)
    bias_f32: (Cout, 1)   f32
    masks:    (9, H*W)    f32 boundary masks (precomputed constants)
    returns   (Cout, H*W) f32
    """
    cin, hw = x.shape
    cols = []
    for t, (dy, dx) in enumerate(_TAPS):
        if dy == 0 and dx == 0:
            cols.append(x)
        else:
            d = dy * W + dx
            # shifted[:, i] = x[:, i + d]; invalid wrap positions masked to 0
            shifted = pltpu.roll(x, shift=(-d) % hw, axis=1)
            cols.append(shifted * masks[t:t + 1, :])
    xcol = jnp.concatenate(cols, axis=0).astype(jnp.bfloat16)      # (9*Cin, HW)
    y = jnp.dot(w_bf16, xcol, preferred_element_type=jnp.float32)
    return y + bias_f32


def _make_pd_kernel(C, H2, W2, H3, W3):
    f32 = jnp.float32
    bf16 = jnp.bfloat16

    def kernel(x1_ref, x2_ref, x3_ref, m2_ref, m3_ref,
               u12_ref, u23_ref, u13_ref, *rest):
        (w14, b14, w_cu2, b_cu2, w_cu3, b_cu3, w_cu5, b_cu5,
         w_cc2, b_cc2, w_cc3, b_cc3, w_c45, b_c45, o_ref) = rest

        x1 = x1_ref[0].astype(f32)      # (C, H1*W1)
        x2 = x2_ref[0].astype(f32)      # (C, H2*W2)
        x3 = x3_ref[0].astype(f32)      # (C, H3*W3)

        # masks loaded once per resolution, reused by every conv at that size
        m2 = m2_ref[...]
        m3 = m3_ref[...]

        # bilinear x2 upsampling (align_corners=True) as lane-dense bf16 matmuls
        x1b = x1.astype(bf16)
        x1_up = jnp.dot(x1b, u12_ref[...], preferred_element_type=f32)   # (C, H2W2)
        x1_upp = jnp.dot(x1b, u13_ref[...], preferred_element_type=f32)  # (C, H3W3)
        x2_up = jnp.dot(x2.astype(bf16), u23_ref[...],
                        preferred_element_type=f32)                      # (C, H3W3)

        def conv(x, w_ref, b_ref, masks, H, W):
            return _conv3x3_flat(x, w_ref[...], b_ref[...], masks, H, W)

        # conv_upsample1 and conv_upsample4 share the same input (up(x1)):
        # stacked weights -> one im2col, one matmul with M=2C.
        y14 = conv(x1_up, w14, b14, m2, H2, W2)          # (2C, H2W2)
        x2_1 = y14[:C] * x2                              # conv_upsample1(.) * x2
        u4 = y14[C:]                                     # conv_upsample4(up(x1))

        # x3_1 = cu2(up(up(x1))) * cu3(up(x2)) * x3
        x3_1 = (conv(x1_upp, w_cu2, b_cu2, m3, H3, W3)
                * conv(x2_up, w_cu3, b_cu3, m3, H3, W3)
                * x3)

        # x2_2 = conv_concat2(cat(x2_1, u4))
        x2_2 = conv(jnp.concatenate([x2_1, u4], axis=0), w_cc2, b_cc2, m2, H2, W2)

        # x3_2 = conv_concat3(cat(x3_1, conv_upsample5(up(x2_2))))
        x2_2_up = jnp.dot(x2_2.astype(bf16), u23_ref[...],
                          preferred_element_type=f32)                    # (2C, H3W3)
        u5 = conv(x2_2_up, w_cu5, b_cu5, m3, H3, W3)
        x3_2 = conv(jnp.concatenate([x3_1, u5], axis=0), w_cc3, b_cc3, m3, H3, W3)

        # out = conv5(conv4(x3_2)): both linear, pre-folded into a single
        # (1, 9*3C) weight -> one small matmul, no sublane reduction.
        out = conv(x3_2, w_c45, b_c45, m3, H3, W3)                       # (1, H3W3)
        o_ref[0] = out.astype(o_ref.dtype)

    return kernel


# --------------------------------------------------------------------------
# PD forward (single fused pallas_call; matches PyTorch PD.forward, eval BN)
# --------------------------------------------------------------------------

def pd_forward(params, x1, x2, x3):
    """x1/x2/x3 in NCHW (x2 = 2x, x3 = 4x spatial of x1); returns (N,1,H3,W3)."""
    N, C, H1, W1 = x1.shape
    H2, W2 = x2.shape[2], x2.shape[3]
    H3, W3 = x3.shape[2], x3.shape[3]

    # flatten spatial dims (free reshape for NCHW row-major data)
    x1f = x1.reshape(N, C, H1 * W1)
    x2f = x2.reshape(N, C, H2 * W2)
    x3f = x3.reshape(N, C, H3 * W3)

    # host-side numpy constants (baked into the program at trace time)
    u12 = _upsample_matrix_T_np(H1, W1, H2, W2)            # (H1W1, H2W2)
    u23 = _upsample_matrix_T_np(H2, W2, H3, W3)            # (H2W2, H3W3)
    u13 = (u12 @ u23).astype(np.float32)                   # up(up(.))
    m2 = _make_tap_masks_np(H2, W2)                        # (9, H2W2)
    m3 = _make_tap_masks_np(H3, W3)                        # (9, H3W3)

    consts = [jnp.asarray(m2, jnp.float32),
              jnp.asarray(m3, jnp.float32),
              jnp.asarray(u12, jnp.bfloat16),
              jnp.asarray(u23, jnp.bfloat16),
              jnp.asarray(u13, jnp.bfloat16)]

    wnames = ('w_cu14', 'b_cu14', 'w_cu2', 'b_cu2', 'w_cu3', 'b_cu3',
              'w_cu5', 'b_cu5', 'w_cc2', 'b_cc2', 'w_cc3', 'b_cc3',
              'w_c45', 'b_c45')
    weights = [params[n] for n in wnames]

    args = [x1f, x2f, x3f] + consts + weights

    def batch_spec(a):
        return pl.BlockSpec((1,) + a.shape[1:], lambda n: (n, 0, 0))

    def const_spec(a):
        nd = a.ndim
        return pl.BlockSpec(a.shape, lambda n, _nd=nd: (0,) * _nd)

    in_specs = [batch_spec(x1f), batch_spec(x2f), batch_spec(x3f)]
    in_specs += [const_spec(a) for a in args[3:]]

    out = pl.pallas_call(
        _make_pd_kernel(C, H2, W2, H3, W3),
        out_shape=jax.ShapeDtypeStruct((N, 1, H3 * W3), x1.dtype),
        grid=(N,),
        in_specs=in_specs,
        out_specs=pl.BlockSpec((1, 1, H3 * W3), lambda n: (n, 0, 0)),
        compiler_params=pltpu.CompilerParams(
            dimension_semantics=("parallel",),
            vmem_limit_bytes=48 * 1024 * 1024),
    )(*args)
    return out.reshape(N, 1, H3, W3)


# --------------------------------------------------------------------------
# Parameters: raw PyTorch-layout params -> folded kernel weights (host-side)
# --------------------------------------------------------------------------

def _make_raw_conv(key, cin, cout):
    """Raw BasicConv2d params: conv weight (OIHW, no bias) + BN stats."""
    k1, k2, k3, k4, k5 = jax.random.split(key, 5)
    w = jax.random.normal(k1, (cout, cin, 3, 3), jnp.float32) * 0.1
    gamma = jax.random.uniform(k2, (cout,), jnp.float32, 0.5, 1.5)
    beta = jax.random.normal(k3, (cout,), jnp.float32) * 0.1
    mean = jax.random.normal(k4, (cout,), jnp.float32) * 0.1
    var = jax.random.uniform(k5, (cout,), jnp.float32, 0.5, 1.5)
    return tuple(np.asarray(a) for a in (w, gamma, beta, mean, var))


def _fold_conv_bn(raw, eps=1e-5):
    """Fold eval-mode BN into the conv: returns (w_flat*scale, bias)."""
    w, gamma, beta, mean, var = raw
    cout, cin = w.shape[0], w.shape[1]
    scale = gamma / np.sqrt(var + eps)
    # (cout, cin, kh, kw) -> (cout, (kh*3+kw)*cin + cin_idx)  == im2col order
    w_flat = np.transpose(w, (0, 2, 3, 1)).reshape(cout, 9 * cin)
    w_folded = (w_flat * scale[:, None]).astype(np.float32)
    bias = (beta - mean * scale).astype(np.float32)[:, None]       # (cout, 1)
    return w_folded, bias


def make_pd_params(key, channel):
    C = channel
    keys = jax.random.split(key, 10)

    w_cu1, b_cu1 = _fold_conv_bn(_make_raw_conv(keys[0], C, C))
    w_cu2, b_cu2 = _fold_conv_bn(_make_raw_conv(keys[1], C, C))
    w_cu3, b_cu3 = _fold_conv_bn(_make_raw_conv(keys[2], C, C))
    w_cu4, b_cu4 = _fold_conv_bn(_make_raw_conv(keys[3], C, C))
    w_cu5, b_cu5 = _fold_conv_bn(_make_raw_conv(keys[4], 2 * C, 2 * C))
    w_cc2, b_cc2 = _fold_conv_bn(_make_raw_conv(keys[5], 2 * C, 2 * C))
    w_cc3, b_cc3 = _fold_conv_bn(_make_raw_conv(keys[6], 3 * C, 3 * C))
    w_c4, b_c4 = _fold_conv_bn(_make_raw_conv(keys[7], 3 * C, 3 * C))

    # nn.Conv2d(3C, 1, 1) with bias
    w5 = np.asarray(jax.random.normal(keys[8], (1, 3 * C, 1, 1), jnp.float32)) * 0.1
    b5 = np.asarray(jax.random.normal(keys[9], (1,), jnp.float32)) * 0.1
    w5_2d = w5.reshape(1, 3 * C)

    # stack conv_upsample1 + conv_upsample4 (both convolve up(x1) at (H2,W2))
    w_cu14 = np.concatenate([w_cu1, w_cu4], axis=0)        # (2C, 9C)
    b_cu14 = np.concatenate([b_cu1, b_cu4], axis=0)

    # fold conv4 -> conv5: out = (w5 . W4) @ xcol + (w5 . b4 + b5)
    w_c45 = w5_2d @ w_c4                                   # (1, 9*3C)
    b_c45 = w5_2d @ b_c4 + b5.reshape(1, 1)                # (1, 1)

    def W(a):  # matmul operands in bf16
        return jnp.asarray(a, jnp.bfloat16)

    def B(a):  # bias adds stay f32
        return jnp.asarray(a, jnp.float32)

    return {
        'w_cu14': W(w_cu14), 'b_cu14': B(b_cu14),
        'w_cu2': W(w_cu2), 'b_cu2': B(b_cu2),
        'w_cu3': W(w_cu3), 'b_cu3': B(b_cu3),
        'w_cu5': W(w_cu5), 'b_cu5': B(b_cu5),
        'w_cc2': W(w_cc2), 'b_cc2': B(b_cc2),
        'w_cc3': W(w_cc3), 'b_cc3': B(b_cc3),
        'w_c45': W(w_c45), 'b_c45': B(b_c45),
    }


# --------------------------------------------------------------------------
# Main
# --------------------------------------------------------------------------

if __name__ == "__main__":
    key = jax.random.PRNGKey(0)
    k_param, k1, k2, k3 = jax.random.split(key, 4)

    channel = 8
    N, H, W = 2, 8, 8  # x1 is the coarsest feature map
    params = make_pd_params(k_param, channel)

    x1 = jax.random.normal(k1, (N, channel, H, W), jnp.float32)
    x2 = jax.random.normal(k2, (N, channel, 2 * H, 2 * W), jnp.float32)
    x3 = jax.random.normal(k3, (N, channel, 4 * H, 4 * W), jnp.float32)

    pd = jax.jit(pd_forward)
    out = jax.block_until_ready(pd(params, x1, x2, x3))
    assert out.shape == (N, 1, 4 * H, 4 * W), out.shape
    print("KERNEL_OK")
</pallas_src>

<mosaic_0001>
module attributes {stable_mosaic.version = 11 : i64} {
  func.func @kernel(%arg0: i32, %arg1: memref<1x8x64xf32, #tpu.memory_space<vmem>>, %arg2: memref<1x8x256xf32, #tpu.memory_space<vmem>>, %arg3: memref<1x8x1024xf32, #tpu.memory_space<vmem>>, %arg4: memref<9x256xf32, #tpu.memory_space<vmem>>, %arg5: memref<9x1024xf32, #tpu.memory_space<vmem>>, %arg6: memref<64x256xbf16, #tpu.memory_space<vmem>>, %arg7: memref<256x1024xbf16, #tpu.memory_space<vmem>>, %arg8: memref<64x1024xbf16, #tpu.memory_space<vmem>>, %arg9: memref<16x72xbf16, #tpu.memory_space<vmem>>, %arg10: memref<16x1xf32, #tpu.memory_space<vmem>>, %arg11: memref<8x72xbf16, #tpu.memory_space<vmem>>, %arg12: memref<8x1xf32, #tpu.memory_space<vmem>>, %arg13: memref<8x72xbf16, #tpu.memory_space<vmem>>, %arg14: memref<8x1xf32, #tpu.memory_space<vmem>>, %arg15: memref<16x144xbf16, #tpu.memory_space<vmem>>, %arg16: memref<16x1xf32, #tpu.memory_space<vmem>>, %arg17: memref<16x144xbf16, #tpu.memory_space<vmem>>, %arg18: memref<16x1xf32, #tpu.memory_space<vmem>>, %arg19: memref<24x216xbf16, #tpu.memory_space<vmem>>, %arg20: memref<24x1xf32, #tpu.memory_space<vmem>>, %arg21: memref<1x216xbf16, #tpu.memory_space<vmem>>, %arg22: memref<1x1xf32, #tpu.memory_space<vmem>>, %arg23: memref<1x1x1024xf32, #tpu.memory_space<vmem>>) attributes {dimension_semantics = [#tpu.dimension_semantics<parallel>], iteration_bounds = array<i64: 2>, scalar_prefetch = 0 : i64, scratch_operands = 0 : i64, tpu.core_type = #tpu.core_type<tc>, window_params = [{transform_indices = @transform_0, window_bounds = array<i64: 1, 8, 64>}, {transform_indices = @transform_1, window_bounds = array<i64: 1, 8, 256>}, {transform_indices = @transform_2, window_bounds = array<i64: 1, 8, 1024>}, {pipeline_mode = #tpu.pipeline_mode<synchronous>, transform_indices = @transform_3, window_bounds = array<i64: 9, 256>}, {pipeline_mode = #tpu.pipeline_mode<synchronous>, transform_indices = @transform_4, window_bounds = array<i64: 9, 1024>}, {pipeline_mode = #tpu.pipeline_mode<synchronous>, transform_indices = @transform_5, window_bounds = array<i64: 64, 256>}, {pipeline_mode = #tpu.pipeline_mode<synchronous>, transform_indices = @transform_6, window_bounds = array<i64: 256, 1024>}, {pipeline_mode = #tpu.pipeline_mode<synchronous>, transform_indices = @transform_7, window_bounds = array<i64: 64, 1024>}, {pipeline_mode = #tpu.pipeline_mode<synchronous>, transform_indices = @transform_8, window_bounds = array<i64: 16, 72>}, {pipeline_mode = #tpu.pipeline_mode<synchronous>, transform_indices = @transform_9, window_bounds = array<i64: 16, 1>}, {pipeline_mode = #tpu.pipeline_mode<synchronous>, transform_indices = @transform_10, window_bounds = array<i64: 8, 72>}, {pipeline_mode = #tpu.pipeline_mode<synchronous>, transform_indices = @transform_11, window_bounds = array<i64: 8, 1>}, {pipeline_mode = #tpu.pipeline_mode<synchronous>, transform_indices = @transform_12, window_bounds = array<i64: 8, 72>}, {pipeline_mode = #tpu.pipeline_mode<synchronous>, transform_indices = @transform_13, window_bounds = array<i64: 8, 1>}, {pipeline_mode = #tpu.pipeline_mode<synchronous>, transform_indices = @transform_14, window_bounds = array<i64: 16, 144>}, {pipeline_mode = #tpu.pipeline_mode<synchronous>, transform_indices = @transform_15, window_bounds = array<i64: 16, 1>}, {pipeline_mode = #tpu.pipeline_mode<synchronous>, transform_indices = @transform_16, window_bounds = array<i64: 16, 144>}, {pipeline_mode = #tpu.pipeline_mode<synchronous>, transform_indices = @transform_17, window_bounds = array<i64: 16, 1>}, {pipeline_mode = #tpu.pipeline_mode<synchronous>, transform_indices = @transform_18, window_bounds = array<i64: 24, 216>}, {pipeline_mode = #tpu.pipeline_mode<synchronous>, transform_indices = @transform_19, window_bounds = array<i64: 24, 1>}, {pipeline_mode = #tpu.pipeline_mode<synchronous>, transform_indices = @transform_20, window_bounds = array<i64: 1, 216>}, {pipeline_mode = #tpu.pipeline_mode<synchronous>, transform_indices = @transform_21, window_bounds = array<i64: 1, 1>}, {transform_indices = @transform_22, window_bounds = array<i64: 1, 1, 1024>}]} {
    %c0 = arith.constant 0 : index
    %c0_0 = arith.constant 0 : index
    %c0_1 = arith.constant 0 : index
    %0 = vector.load %arg1[%c0, %c0_0, %c0_1] : memref<1x8x64xf32, #tpu.memory_space<vmem>>, vector<1x8x64xf32>
    %1 = vector.shape_cast %0 : vector<1x8x64xf32> to vector<8x64xf32>
    %c0_2 = arith.constant 0 : index
    %c0_3 = arith.constant 0 : index
    %c0_4 = arith.constant 0 : index
    %2 = vector.load %arg2[%c0_2, %c0_3, %c0_4] : memref<1x8x256xf32, #tpu.memory_space<vmem>>, vector<1x8x256xf32>
    %3 = vector.shape_cast %2 : vector<1x8x256xf32> to vector<8x256xf32>
    %c0_5 = arith.constant 0 : index
    %c0_6 = arith.constant 0 : index
    %c0_7 = arith.constant 0 : index
    %4 = vector.load %arg3[%c0_5, %c0_6, %c0_7] : memref<1x8x1024xf32, #tpu.memory_space<vmem>>, vector<1x8x1024xf32>
    %5 = vector.shape_cast %4 : vector<1x8x1024xf32> to vector<8x1024xf32>
    %c0_8 = arith.constant 0 : index
    %c0_9 = arith.constant 0 : index
    %6 = vector.load %arg4[%c0_8, %c0_9] : memref<9x256xf32, #tpu.memory_space<vmem>>, vector<9x256xf32>
    %c0_10 = arith.constant 0 : index
    %c0_11 = arith.constant 0 : index
    %7 = vector.load %arg5[%c0_10, %c0_11] : memref<9x1024xf32, #tpu.memory_space<vmem>>, vector<9x1024xf32>
    %8 = arith.truncf %1 : vector<8x64xf32> to vector<8x64xbf16>
    %c0_12 = arith.constant 0 : index
    %c0_13 = arith.constant 0 : index
    %9 = vector.load %arg6[%c0_12, %c0_13] : memref<64x256xbf16, #tpu.memory_space<vmem>>, vector<64x256xbf16>
    %cst = arith.constant dense<0.000000e+00> : vector<8x256xf32>
    %10 = tpu.matmul %8, %9, %cst {dimension_numbers = #tpu.dot_dimension_numbers<[1], [0], [0], [1], [0, 0, 1, 1], [], []>} : vector<8x64xbf16>, vector<64x256xbf16>, vector<8x256xf32> -> vector<8x256xf32>
    %c0_14 = arith.constant 0 : index
    %c0_15 = arith.constant 0 : index
    %11 = vector.load %arg8[%c0_14, %c0_15] : memref<64x1024xbf16, #tpu.memory_space<vmem>>, vector<64x1024xbf16>
    %cst_16 = arith.constant dense<0.000000e+00> : vector<8x1024xf32>
    %12 = tpu.matmul %8, %11, %cst_16 {dimension_numbers = #tpu.dot_dimension_numbers<[1], [0], [0], [1], [0, 0, 1, 1], [], []>} : vector<8x64xbf16>, vector<64x1024xbf16>, vector<8x1024xf32> -> vector<8x1024xf32>
    %13 = arith.truncf %3 : vector<8x256xf32> to vector<8x256xbf16>
    %c0_17 = arith.constant 0 : index
    %c0_18 = arith.constant 0 : index
    %14 = vector.load %arg7[%c0_17, %c0_18] : memref<256x1024xbf16, #tpu.memory_space<vmem>>, vector<256x1024xbf16>
    %cst_19 = arith.constant dense<0.000000e+00> : vector<8x1024xf32>
    %15 = tpu.matmul %13, %14, %cst_19 {dimension_numbers = #tpu.dot_dimension_numbers<[1], [0], [0], [1], [0, 0, 1, 1], [], []>} : vector<8x256xbf16>, vector<256x1024xbf16>, vector<8x1024xf32> -> vector<8x1024xf32>
    %c0_20 = arith.constant 0 : index
    %c0_21 = arith.constant 0 : index
    %16 = vector.load %arg9[%c0_20, %c0_21] : memref<16x72xbf16, #tpu.memory_space<vmem>>, vector<16x72xbf16>
    %c0_22 = arith.constant 0 : index
    %c0_23 = arith.constant 0 : index
    %17 = vector.load %arg10[%c0_22, %c0_23] : memref<16x1xf32, #tpu.memory_space<vmem>>, vector<16x1xf32>
    %c17_i32 = arith.constant 17 : i32
    %18 = tpu.dynamic_rotate %10 by %c17_i32 dim 1 : vector<8x256xf32>, i32 -> vector<8x256xf32>
    %19 = vector.extract_strided_slice %6 {offsets = [0, 0], sizes = [1, 256], strides = [1, 1]} : vector<9x256xf32> to vector<1x256xf32>
    %20 = vector.broadcast %19 : vector<1x256xf32> to vector<8x256xf32>
    %21 = arith.mulf %18, %20 : vector<8x256xf32>
    %c16_i32 = arith.constant 16 : i32
    %22 = tpu.dynamic_rotate %10 by %c16_i32 dim 1 : vector<8x256xf32>, i32 -> vector<8x256xf32>
    %23 = vector.extract_strided_slice %6 {offsets = [1, 0], sizes = [1, 256], strides = [1, 1]} : vector<9x256xf32> to vector<1x256xf32>
    %24 = vector.broadcast %23 : vector<1x256xf32> to vector<8x256xf32>
    %25 = arith.mulf %22, %24 : vector<8x256xf32>
    %c15_i32 = arith.constant 15 : i32
    %26 = tpu.dynamic_rotate %10 by %c15_i32 dim 1 : vector<8x256xf32>, i32 -> vector<8x256xf32>
    %27 = vector.extract_strided_slice %6 {offsets = [2, 0], sizes = [1, 256], strides = [1, 1]} : vector<9x256xf32> to vector<1x256xf32>
    %28 = vector.broadcast %27 : vector<1x256xf32> to vector<8x256xf32>
    %29 = arith.mulf %26, %28 : vector<8x256xf32>
    %c1_i32 = arith.constant 1 : i32
    %30 = tpu.dynamic_rotate %10 by %c1_i32 dim 1 : vector<8x256xf32>, i32 -> vector<8x256xf32>
    %31 = vector.extract_strided_slice %6 {offsets = [3, 0], sizes = [1, 256], strides = [1, 1]} : vector<9x256xf32> to vector<1x256xf32>
    %32 = vector.broadcast %31 : vector<1x256xf32> to vector<8x256xf32>
    %33 = arith.mulf %30, %32 : vector<8x256xf32>
    %c255_i32 = arith.constant 255 : i32
    %34 = tpu.dynamic_rotate %10 by %c255_i32 dim 1 : vector<8x256xf32>, i32 -> vector<8x256xf32>
    %35 = vector.extract_strided_slice %6 {offsets = [5, 0], sizes = [1, 256], strides = [1, 1]} : vector<9x256xf32> to vector<1x256xf32>
    %36 = vector.broadcast %35 : vector<1x256xf32> to vector<8x256xf32>
    %37 = arith.mulf %34, %36 : vector<8x256xf32>
    %c241_i32 = arith.constant 241 : i32
    %38 = tpu.dynamic_rotate %10 by %c241_i32 dim 1 : vector<8x256xf32>, i32 -> vector<8x256xf32>
    %39 = vector.extract_strided_slice %6 {offsets = [6, 0], sizes = [1, 256], strides = [1, 1]} : vector<9x256xf32> to vector<1x256xf32>
    %40 = vector.broadcast %39 : vector<1x256xf32> to vector<8x256xf32>
    %41 = arith.mulf %38, %40 : vector<8x256xf32>
    %c240_i32 = arith.constant 240 : i32
    %42 = tpu.dynamic_rotate %10 by %c240_i32 dim 1 : vector<8x256xf32>, i32 -> vector<8x256xf32>
    %43 = vector.extract_strided_slice %6 {offsets = [7, 0], sizes = [1, 256], strides = [1, 1]} : vector<9x256xf32> to vector<1x256xf32>
    %44 = vector.broadcast %43 : vector<1x256xf32> to vector<8x256xf32>
    %45 = arith.mulf %42, %44 : vector<8x256xf32>
    %c239_i32 = arith.constant 239 : i32
    %46 = tpu.dynamic_rotate %10 by %c239_i32 dim 1 : vector<8x256xf32>, i32 -> vector<8x256xf32>
    %47 = vector.extract_strided_slice %6 {offsets = [8, 0], sizes = [1, 256], strides = [1, 1]} : vector<9x256xf32> to vector<1x256xf32>
    %48 = vector.broadcast %47 : vector<1x256xf32> to vector<8x256xf32>
    %49 = arith.mulf %46, %48 : vector<8x256xf32>
    %50 = tpu.concatenate %21, %25, %29, %33, %10, %37, %41, %45, %49 in 0 : vector<8x256xf32>, vector<8x256xf32>, vector<8x256xf32>, vector<8x256xf32>, vector<8x256xf32>, vector<8x256xf32>, vector<8x256xf32>, vector<8x256xf32>, vector<8x256xf32> -> vector<72x256xf32>
    %51 = arith.truncf %50 : vector<72x256xf32> to vector<72x256xbf16>
    %cst_24 = arith.constant dense<0.000000e+00> : vector<16x256xf32>
    %52 = tpu.matmul %16, %51, %cst_24 {dimension_numbers = #tpu.dot_dimension_numbers<[1], [0], [0], [1], [0, 0, 1, 1], [], []>} : vector<16x72xbf16>, vector<72x256xbf16>, vector<16x256xf32> -> vector<16x256xf32>
    %53 = vector.broadcast %17 : vector<16x1xf32> to vector<16x256xf32>
    %54 = arith.addf %52, %53 : vector<16x256xf32>
    %55 = vector.extract_strided_slice %54 {offsets = [0, 0], sizes = [8, 256], strides = [1, 1]} : vector<16x256xf32> to vector<8x256xf32>
    %56 = arith.mulf %55, %3 : vector<8x256xf32>
    %57 = vector.extract_strided_slice %54 {offsets = [8, 0], sizes = [8, 256], strides = [1, 1]} : vector<16x256xf32> to vector<8x256xf32>
    %c0_25 = arith.constant 0 : index
    %c0_26 = arith.constant 0 : index
    %58 = vector.load %arg11[%c0_25, %c0_26] : memref<8x72xbf16, #tpu.memory_space<vmem>>, vector<8x72xbf16>
    %c0_27 = arith.constant 0 : index
    %c0_28 = arith.constant 0 : index
    %59 = vector.load %arg12[%c0_27, %c0_28] : memref<8x1xf32, #tpu.memory_space<vmem>>, vector<8x1xf32>
    %c33_i32 = arith.constant 33 : i32
    %60 = tpu.dynamic_rotate %12 by %c33_i32 dim 1 : vector<8x1024xf32>, i32 -> vector<8x1024xf32>
    %61 = vector.extract_strided_slice %7 {offsets = [0, 0], sizes = [1, 1024], strides = [1, 1]} : vector<9x1024xf32> to vector<1x1024xf32>
    %62 = vector.broadcast %61 : vector<1x1024xf32> to vector<8x1024xf32>
    %63 = arith.mulf %60, %62 : vector<8x1024xf32>
    %c32_i32 = arith.constant 32 : i32
    %64 = tpu.dynamic_rotate %12 by %c32_i32 dim 1 : vector<8x1024xf32>, i32 -> vector<8x1024xf32>
    %65 = vector.extract_strided_slice %7 {offsets = [1, 0], sizes = [1, 1024], strides = [1, 1]} : vector<9x1024xf32> to vector<1x1024xf32>
    %66 = vector.broadcast %65 : vector<1x1024xf32> to vector<8x1024xf32>
    %67 = arith.mulf %64, %66 : vector<8x1024xf32>
    %c31_i32 = arith.constant 31 : i32
    %68 = tpu.dynamic_rotate %12 by %c31_i32 dim 1 : vector<8x1024xf32>, i32 -> vector<8x1024xf32>
    %69 = vector.extract_strided_slice %7 {offsets = [2, 0], sizes = [1, 1024], strides = [1, 1]} : vector<9x1024xf32> to vector<1x1024xf32>
    %70 = vector.broadcast %69 : vector<1x1024xf32> to vector<8x1024xf32>
    %71 = arith.mulf %68, %70 : vector<8x1024xf32>
    %c1_i32_29 = arith.constant 1 : i32
    %72 = tpu.dynamic_rotate %12 by %c1_i32_29 dim 1 : vector<8x1024xf32>, i32 -> vector<8x1024xf32>
    %73 = vector.extract_strided_slice %7 {offsets = [3, 0], sizes = [1, 1024], strides = [1, 1]} : vector<9x1024xf32> to vector<1x1024xf32>
    %74 = vector.broadcast %73 : vector<1x1024xf32> to vector<8x1024xf32>
    %75 = arith.mulf %72, %74 : vector<8x1024xf32>
    %c1023_i32 = arith.constant 1023 : i32
    %76 = tpu.dynamic_rotate %12 by %c1023_i32 dim 1 : vector<8x1024xf32>, i32 -> vector<8x1024xf32>
    %77 = vector.extract_strided_slice %7 {offsets = [5, 0], sizes = [1, 1024], strides = [1, 1]} : vector<9x1024xf32> to vector<1x1024xf32>
    %78 = vector.broadcast %77 : vector<1x1024xf32> to vector<8x1024xf32>
    %79 = arith.mulf %76, %78 : vector<8x1024xf32>
    %c993_i32 = arith.constant 993 : i32
    %80 = tpu.dynamic_rotate %12 by %c993_i32 dim 1 : vector<8x1024xf32>, i32 -> vector<8x1024xf32>
    %81 = vector.extract_strided_slice %7 {offsets = [6, 0], sizes = [1, 1024], strides = [1, 1]} : vector<9x1024xf32> to vector<1x1024xf32>
    %82 = vector.broadcast %81 : vector<1x1024xf32> to vector<8x1024xf32>
    %83 = arith.mulf %80, %82 : vector<8x1024xf32>
    %c992_i32 = arith.constant 992 : i32
    %84 = tpu.dynamic_rotate %12 by %c992_i32 dim 1 : vector<8x1024xf32>, i32 -> vector<8x1024xf32>
    %85 = vector.extract_strided_slice %7 {offsets = [7, 0], sizes = [1, 1024], strides = [1, 1]} : vector<9x1024xf32> to vector<1x1024xf32>
    %86 = vector.broadcast %85 : vector<1x1024xf32> to vector<8x1024xf32>
    %87 = arith.mulf %84, %86 : vector<8x1024xf32>
    %c991_i32 = arith.constant 991 : i32
    %88 = tpu.dynamic_rotate %12 by %c991_i32 dim 1 : vector<8x1024xf32>, i32 -> vector<8x1024xf32>
    %89 = vector.extract_strided_slice %7 {offsets = [8, 0], sizes = [1, 1024], strides = [1, 1]} : vector<9x1024xf32> to vector<1x1024xf32>
    %90 = vector.broadcast %89 : vector<1x1024xf32> to vector<8x1024xf32>
    %91 = arith.mulf %88, %90 : vector<8x1024xf32>
    %92 = tpu.concatenate %63, %67, %71, %75, %12, %79, %83, %87, %91 in 0 : vector<8x1024xf32>, vector<8x1024xf32>, vector<8x1024xf32>, vector<8x1024xf32>, vector<8x1024xf32>, vector<8x1024xf32>, vector<8x1024xf32>, vector<8x1024xf32>, vector<8x1024xf32> -> vector<72x1024xf32>
    %93 = arith.truncf %92 : vector<72x1024xf32> to vector<72x1024xbf16>
    %cst_30 = arith.constant dense<0.000000e+00> : vector<8x1024xf32>
    %94 = tpu.matmul %58, %93, %cst_30 {dimension_numbers = #tpu.dot_dimension_numbers<[1], [0], [0], [1], [0, 0, 1, 1], [], []>} : vector<8x72xbf16>, vector<72x1024xbf16>, vector<8x1024xf32> -> vector<8x1024xf32>
    %95 = vector.broadcast %59 : vector<8x1xf32> to vector<8x1024xf32>
    %96 = arith.addf %94, %95 : vector<8x1024xf32>
    %c0_31 = arith.constant 0 : index
    %c0_32 = arith.constant 0 : index
    %97 = vector.load %arg13[%c0_31, %c0_32] : memref<8x72xbf16, #tpu.memory_space<vmem>>, vector<8x72xbf16>
    %c0_33 = arith.constant 0 : index
    %c0_34 = arith.constant 0 : index
    %98 = vector.load %arg14[%c0_33, %c0_34] : memref<8x1xf32, #tpu.memory_space<vmem>>, vector<8x1xf32>
    %c33_i32_35 = arith.constant 33 : i32
    %99 = tpu.dynamic_rotate %15 by %c33_i32_35 dim 1 : vector<8x1024xf32>, i32 -> vector<8x1024xf32>
    %100 = vector.extract_strided_slice %7 {offsets = [0, 0], sizes = [1, 1024], strides = [1, 1]} : vector<9x1024xf32> to vector<1x1024xf32>
    %101 = vector.broadcast %100 : vector<1x1024xf32> to vector<8x1024xf32>
    %102 = arith.mulf %99, %101 : vector<8x1024xf32>
    %c32_i32_36 = arith.constant 32 : i32
    %103 = tpu.dynamic_rotate %15 by %c32_i32_36 dim 1 : vector<8x1024xf32>, i32 -> vector<8x1024xf32>
    %104 = vector.extract_strided_slice %7 {offsets = [1, 0], sizes = [1, 1024], strides = [1, 1]} : vector<9x1024xf32> to vector<1x1024xf32>
    %105 = vector.broadcast %104 : vector<1x1024xf32> to vector<8x1024xf32>
    %106 = arith.mulf %103, %105 : vector<8x1024xf32>
    %c31_i32_37 = arith.constant 31 : i32
    %107 = tpu.dynamic_rotate %15 by %c31_i32_37 dim 1 : vector<8x1024xf32>, i32 -> vector<8x1024xf32>
    %108 = vector.extract_strided_slice %7 {offsets = [2, 0], sizes = [1, 1024], strides = [1, 1]} : vector<9x1024xf32> to vector<1x1024xf32>
    %109 = vector.broadcast %108 : vector<1x1024xf32> to vector<8x1024xf32>
    %110 = arith.mulf %107, %109 : vector<8x1024xf32>
    %c1_i32_38 = arith.constant 1 : i32
    %111 = tpu.dynamic_rotate %15 by %c1_i32_38 dim 1 : vector<8x1024xf32>, i32 -> vector<8x1024xf32>
    %112 = vector.extract_strided_slice %7 {offsets = [3, 0], sizes = [1, 1024], strides = [1, 1]} : vector<9x1024xf32> to vector<1x1024xf32>
    %113 = vector.broadcast %112 : vector<1x1024xf32> to vector<8x1024xf32>
    %114 = arith.mulf %111, %113 : vector<8x1024xf32>
    %c1023_i32_39 = arith.constant 1023 : i32
    %115 = tpu.dynamic_rotate %15 by %c1023_i32_39 dim 1 : vector<8x1024xf32>, i32 -> vector<8x1024xf32>
    %116 = vector.extract_strided_slice %7 {offsets = [5, 0], sizes = [1, 1024], strides = [1, 1]} : vector<9x1024xf32> to vector<1x1024xf32>
    %117 = vector.broadcast %116 : vector<1x1024xf32> to vector<8x1024xf32>
    %118 = arith.mulf %115, %117 : vector<8x1024xf32>
    %c993_i32_40 = arith.constant 993 : i32
    %119 = tpu.dynamic_rotate %15 by %c993_i32_40 dim 1 : vector<8x1024xf32>, i32 -> vector<8x1024xf32>
    %120 = vector.extract_strided_slice %7 {offsets = [6, 0], sizes = [1, 1024], strides = [1, 1]} : vector<9x1024xf32> to vector<1x1024xf32>
    %121 = vector.broadcast %120 : vector<1x1024xf32> to vector<8x1024xf32>
    %122 = arith.mulf %119, %121 : vector<8x1024xf32>
    %c992_i32_41 = arith.constant 992 : i32
    %123 = tpu.dynamic_rotate %15 by %c992_i32_41 dim 1 : vector<8x1024xf32>, i32 -> vector<8x1024xf32>
    %124 = vector.extract_strided_slice %7 {offsets = [7, 0], sizes = [1, 1024], strides = [1, 1]} : vector<9x1024xf32> to vector<1x1024xf32>
    %125 = vector.broadcast %124 : vector<1x1024xf32> to vector<8x1024xf32>
    %126 = arith.mulf %123, %125 : vector<8x1024xf32>
    %c991_i32_42 = arith.constant 991 : i32
    %127 = tpu.dynamic_rotate %15 by %c991_i32_42 dim 1 : vector<8x1024xf32>, i32 -> vector<8x1024xf32>
    %128 = vector.extract_strided_slice %7 {offsets = [8, 0], sizes = [1, 1024], strides = [1, 1]} : vector<9x1024xf32> to vector<1x1024xf32>
    %129 = vector.broadcast %128 : vector<1x1024xf32> to vector<8x1024xf32>
    %130 = arith.mulf %127, %129 : vector<8x1024xf32>
    %131 = tpu.concatenate %102, %106, %110, %114, %15, %118, %122, %126, %130 in 0 : vector<8x1024xf32>, vector<8x1024xf32>, vector<8x1024xf32>, vector<8x1024xf32>, vector<8x1024xf32>, vector<8x1024xf32>, vector<8x1024xf32>, vector<8x1024xf32>, vector<8x1024xf32> -> vector<72x1024xf32>
    %132 = arith.truncf %131 : vector<72x1024xf32> to vector<72x1024xbf16>
    %cst_43 = arith.constant dense<0.000000e+00> : vector<8x1024xf32>
    %133 = tpu.matmul %97, %132, %cst_43 {dimension_numbers = #tpu.dot_dimension_numbers<[1], [0], [0], [1], [0, 0, 1, 1], [], []>} : vector<8x72xbf16>, vector<72x1024xbf16>, vector<8x1024xf32> -> vector<8x1024xf32>
    %134 = vector.broadcast %98 : vector<8x1xf32> to vector<8x1024xf32>
    %135 = arith.addf %133, %134 : vector<8x1024xf32>
    %136 = arith.mulf %96, %135 : vector<8x1024xf32>
    %137 = arith.mulf %136, %5 : vector<8x1024xf32>
    %138 = tpu.concatenate %56, %57 in 0 : vector<8x256xf32>, vector<8x256xf32> -> vector<16x256xf32>
    %c0_44 = arith.constant 0 : index
    %c0_45 = arith.constant 0 : index
    %139 = vector.load %arg17[%c0_44, %c0_45] : memref<16x144xbf16, #tpu.memory_space<vmem>>, vector<16x144xbf16>
    %c0_46 = arith.constant 0 : index
    %c0_47 = arith.constant 0 : index
    %140 = vector.load %arg18[%c0_46, %c0_47] : memref<16x1xf32, #tpu.memory_space<vmem>>, vector<16x1xf32>
    %c17_i32_48 = arith.constant 17 : i32
    %141 = tpu.dynamic_rotate %138 by %c17_i32_48 dim 1 : vector<16x256xf32>, i32 -> vector<16x256xf32>
    %142 = vector.extract_strided_slice %6 {offsets = [0, 0], sizes = [1, 256], strides = [1, 1]} : vector<9x256xf32> to vector<1x256xf32>
    %143 = vector.broadcast %142 : vector<1x256xf32> to vector<16x256xf32>
    %144 = arith.mulf %141, %143 : vector<16x256xf32>
    %c16_i32_49 = arith.constant 16 : i32
    %145 = tpu.dynamic_rotate %138 by %c16_i32_49 dim 1 : vector<16x256xf32>, i32 -> vector<16x256xf32>
    %146 = vector.extract_strided_slice %6 {offsets = [1, 0], sizes = [1, 256], strides = [1, 1]} : vector<9x256xf32> to vector<1x256xf32>
    %147 = vector.broadcast %146 : vector<1x256xf32> to vector<16x256xf32>
    %148 = arith.mulf %145, %147 : vector<16x256xf32>
    %c15_i32_50 = arith.constant 15 : i32
    %149 = tpu.dynamic_rotate %138 by %c15_i32_50 dim 1 : vector<16x256xf32>, i32 -> vector<16x256xf32>
    %150 = vector.extract_strided_slice %6 {offsets = [2, 0], sizes = [1, 256], strides = [1, 1]} : vector<9x256xf32> to vector<1x256xf32>
    %151 = vector.broadcast %150 : vector<1x256xf32> to vector<16x256xf32>
    %152 = arith.mulf %149, %151 : vector<16x256xf32>
    %c1_i32_51 = arith.constant 1 : i32
    %153 = tpu.dynamic_rotate %138 by %c1_i32_51 dim 1 : vector<16x256xf32>, i32 -> vector<16x256xf32>
    %154 = vector.extract_strided_slice %6 {offsets = [3, 0], sizes = [1, 256], strides = [1, 1]} : vector<9x256xf32> to vector<1x256xf32>
    %155 = vector.broadcast %154 : vector<1x256xf32> to vector<16x256xf32>
    %156 = arith.mulf %153, %155 : vector<16x256xf32>
    %c255_i32_52 = arith.constant 255 : i32
    %157 = tpu.dynamic_rotate %138 by %c255_i32_52 dim 1 : vector<16x256xf32>, i32 -> vector<16x256xf32>
    %158 = vector.extract_strided_slice %6 {offsets = [5, 0], sizes = [1, 256], strides = [1, 1]} : vector<9x256xf32> to vector<1x256xf32>
    %159 = vector.broadcast %158 : vector<1x256xf32> to vector<16x256xf32>
    %160 = arith.mulf %157, %159 : vector<16x256xf32>
    %c241_i32_53 = arith.constant 241 : i32
    %161 = tpu.dynamic_rotate %138 by %c241_i32_53 dim 1 : vector<16x256xf32>, i32 -> vector<16x256xf32>
    %162 = vector.extract_strided_slice %6 {offsets = [6, 0], sizes = [1, 256], strides = [1, 1]} : vector<9x256xf32> to vector<1x256xf32>
    %163 = vector.broadcast %162 : vector<1x256xf32> to vector<16x256xf32>
    %164 = arith.mulf %161, %163 : vector<16x256xf32>
    %c240_i32_54 = arith.constant 240 : i32
    %165 = tpu.dynamic_rotate %138 by %c240_i32_54 dim 1 : vector<16x256xf32>, i32 -> vector<16x256xf32>
    %166 = vector.extract_strided_slice %6 {offsets = [7, 0], sizes = [1, 256], strides = [1, 1]} : vector<9x256xf32> to vector<1x256xf32>
    %167 = vector.broadcast %166 : vector<1x256xf32> to vector<16x256xf32>
    %168 = arith.mulf %165, %167 : vector<16x256xf32>
    %c239_i32_55 = arith.constant 239 : i32
    %169 = tpu.dynamic_rotate %138 by %c239_i32_55 dim 1 : vector<16x256xf32>, i32 -> vector<16x256xf32>
    %170 = vector.extract_strided_slice %6 {offsets = [8, 0], sizes = [1, 256], strides = [1, 1]} : vector<9x256xf32> to vector<1x256xf32>
    %171 = vector.broadcast %170 : vector<1x256xf32> to vector<16x256xf32>
    %172 = arith.mulf %169, %171 : vector<16x256xf32>
    %173 = tpu.concatenate %144, %148, %152, %156, %138, %160, %164, %168, %172 in 0 : vector<16x256xf32>, vector<16x256xf32>, vector<16x256xf32>, vector<16x256xf32>, vector<16x256xf32>, vector<16x256xf32>, vector<16x256xf32>, vector<16x256xf32>, vector<16x256xf32> -> vector<144x256xf32>
    %174 = arith.truncf %173 : vector<144x256xf32> to vector<144x256xbf16>
    %cst_56 = arith.constant dense<0.000000e+00> : vector<16x256xf32>
    %175 = tpu.matmul %139, %174, %cst_56 {dimension_numbers = #tpu.dot_dimension_numbers<[1], [0], [0], [1], [0, 0, 1, 1], [], []>} : vector<16x144xbf16>, vector<144x256xbf16>, vector<16x256xf32> -> vector<16x256xf32>
    %176 = vector.broadcast %140 : vector<16x1xf32> to vector<16x256xf32>
    %177 = arith.addf %175, %176 : vector<16x256xf32>
    %178 = arith.truncf %177 : vector<16x256xf32> to vector<16x256xbf16>
    %c0_57 = arith.constant 0 : index
    %c0_58 = arith.constant 0 : index
    %179 = vector.load %arg7[%c0_57, %c0_58] : memref<256x1024xbf16, #tpu.memory_space<vmem>>, vector<256x1024xbf16>
    %cst_59 = arith.constant dense<0.000000e+00> : vector<16x1024xf32>
    %180 = tpu.matmul %178, %179, %cst_59 {dimension_numbers = #tpu.dot_dimension_numbers<[1], [0], [0], [1], [0, 0, 1, 1], [], []>} : vector<16x256xbf16>, vector<256x1024xbf16>, vector<16x1024xf32> -> vector<16x1024xf32>
    %c0_60 = arith.constant 0 : index
    %c0_61 = arith.constant 0 : index
    %181 = vector.load %arg15[%c0_60, %c0_61] : memref<16x144xbf16, #tpu.memory_space<vmem>>, vector<16x144xbf16>
    %c0_62 = arith.constant 0 : index
    %c0_63 = arith.constant 0 : index
    %182 = vector.load %arg16[%c0_62, %c0_63] : memref<16x1xf32, #tpu.memory_space<vmem>>, vector<16x1xf32>
    %c33_i32_64 = arith.constant 33 : i32
    %183 = tpu.dynamic_rotate %180 by %c33_i32_64 dim 1 : vector<16x1024xf32>, i32 -> vector<16x1024xf32>
    %184 = vector.extract_strided_slice %7 {offsets = [0, 0], sizes = [1, 1024], strides = [1, 1]} : vector<9x1024xf32> to vector<1x1024xf32>
    %185 = vector.broadcast %184 : vector<1x1024xf32> to vector<16x1024xf32>
    %186 = arith.mulf %183, %185 : vector<16x1024xf32>
    %c32_i32_65 = arith.constant 32 : i32
    %187 = tpu.dynamic_rotate %180 by %c32_i32_65 dim 1 : vector<16x1024xf32>, i32 -> vector<16x1024xf32>
    %188 = vector.extract_strided_slice %7 {offsets = [1, 0], sizes = [1, 1024], strides = [1, 1]} : vector<9x1024xf32> to vector<1x1024xf32>
    %189 = vector.broadcast %188 : vector<1x1024xf32> to vector<16x1024xf32>
    %190 = arith.mulf %187, %189 : vector<16x1024xf32>
    %c31_i32_66 = arith.constant 31 : i32
    %191 = tpu.dynamic_rotate %180 by %c31_i32_66 dim 1 : vector<16x1024xf32>, i32 -> vector<16x1024xf32>
    %192 = vector.extract_strided_slice %7 {offsets = [2, 0], sizes = [1, 1024], strides = [1, 1]} : vector<9x1024xf32> to vector<1x1024xf32>
    %193 = vector.broadcast %192 : vector<1x1024xf32> to vector<16x1024xf32>
    %194 = arith.mulf %191, %193 : vector<16x1024xf32>
    %c1_i32_67 = arith.constant 1 : i32
    %195 = tpu.dynamic_rotate %180 by %c1_i32_67 dim 1 : vector<16x1024xf32>, i32 -> vector<16x1024xf32>
    %196 = vector.extract_strided_slice %7 {offsets = [3, 0], sizes = [1, 1024], strides = [1, 1]} : vector<9x1024xf32> to vector<1x1024xf32>
    %197 = vector.broadcast %196 : vector<1x1024xf32> to vector<16x1024xf32>
    %198 = arith.mulf %195, %197 : vector<16x1024xf32>
    %c1023_i32_68 = arith.constant 1023 : i32
    %199 = tpu.dynamic_rotate %180 by %c1023_i32_68 dim 1 : vector<16x1024xf32>, i32 -> vector<16x1024xf32>
    %200 = vector.extract_strided_slice %7 {offsets = [5, 0], sizes = [1, 1024], strides = [1, 1]} : vector<9x1024xf32> to vector<1x1024xf32>
    %201 = vector.broadcast %200 : vector<1x1024xf32> to vector<16x1024xf32>
    %202 = arith.mulf %199, %201 : vector<16x1024xf32>
    %c993_i32_69 = arith.constant 993 : i32
    %203 = tpu.dynamic_rotate %180 by %c993_i32_69 dim 1 : vector<16x1024xf32>, i32 -> vector<16x1024xf32>
    %204 = vector.extract_strided_slice %7 {offsets = [6, 0], sizes = [1, 1024], strides = [1, 1]} : vector<9x1024xf32> to vector<1x1024xf32>
    %205 = vector.broadcast %204 : vector<1x1024xf32> to vector<16x1024xf32>
    %206 = arith.mulf %203, %205 : vector<16x1024xf32>
    %c992_i32_70 = arith.constant 992 : i32
    %207 = tpu.dynamic_rotate %180 by %c992_i32_70 dim 1 : vector<16x1024xf32>, i32 -> vector<16x1024xf32>
    %208 = vector.extract_strided_slice %7 {offsets = [7, 0], sizes = [1, 1024], strides = [1, 1]} : vector<9x1024xf32> to vector<1x1024xf32>
    %209 = vector.broadcast %208 : vector<1x1024xf32> to vector<16x1024xf32>
    %210 = arith.mulf %207, %209 : vector<16x1024xf32>
    %c991_i32_71 = arith.constant 991 : i32
    %211 = tpu.dynamic_rotate %180 by %c991_i32_71 dim 1 : vector<16x1024xf32>, i32 -> vector<16x1024xf32>
    %212 = vector.extract_strided_slice %7 {offsets = [8, 0], sizes = [1, 1024], strides = [1, 1]} : vector<9x1024xf32> to vector<1x1024xf32>
    %213 = vector.broadcast %212 : vector<1x1024xf32> to vector<16x1024xf32>
    %214 = arith.mulf %211, %213 : vector<16x1024xf32>
    %215 = tpu.concatenate %186, %190, %194, %198, %180, %202, %206, %210, %214 in 0 : vector<16x1024xf32>, vector<16x1024xf32>, vector<16x1024xf32>, vector<16x1024xf32>, vector<16x1024xf32>, vector<16x1024xf32>, vector<16x1024xf32>, vector<16x1024xf32>, vector<16x1024xf32> -> vector<144x1024xf32>
    %216 = arith.truncf %215 : vector<144x1024xf32> to vector<144x1024xbf16>
    %cst_72 = arith.constant dense<0.000000e+00> : vector<16x1024xf32>
    %217 = tpu.matmul %181, %216, %cst_72 {dimension_numbers = #tpu.dot_dimension_numbers<[1], [0], [0], [1], [0, 0, 1, 1], [], []>} : vector<16x144xbf16>, vector<144x1024xbf16>, vector<16x1024xf32> -> vector<16x1024xf32>
    %218 = vector.broadcast %182 : vector<16x1xf32> to vector<16x1024xf32>
    %219 = arith.addf %217, %218 : vector<16x1024xf32>
    %220 = tpu.concatenate %137, %219 in 0 : vector<8x1024xf32>, vector<16x1024xf32> -> vector<24x1024xf32>
    %c0_73 = arith.constant 0 : index
    %c0_74 = arith.constant 0 : index
    %221 = vector.load %arg19[%c0_73, %c0_74] : memref<24x216xbf16, #tpu.memory_space<vmem>>, vector<24x216xbf16>
    %c0_75 = arith.constant 0 : index
    %c0_76 = arith.constant 0 : index
    %222 = vector.load %arg20[%c0_75, %c0_76] : memref<24x1xf32, #tpu.memory_space<vmem>>, vector<24x1xf32>
    %c33_i32_77 = arith.constant 33 : i32
    %223 = tpu.dynamic_rotate %220 by %c33_i32_77 dim 1 : vector<24x1024xf32>, i32 -> vector<24x1024xf32>
    %224 = vector.extract_strided_slice %7 {offsets = [0, 0], sizes = [1, 1024], strides = [1, 1]} : vector<9x1024xf32> to vector<1x1024xf32>
    %225 = vector.broadcast %224 : vector<1x1024xf32> to vector<24x1024xf32>
    %226 = arith.mulf %223, %225 : vector<24x1024xf32>
    %c32_i32_78 = arith.constant 32 : i32
    %227 = tpu.dynamic_rotate %220 by %c32_i32_78 dim 1 : vector<24x1024xf32>, i32 -> vector<24x1024xf32>
    %228 = vector.extract_strided_slice %7 {offsets = [1, 0], sizes = [1, 1024], strides = [1, 1]} : vector<9x1024xf32> to vector<1x1024xf32>
    %229 = vector.broadcast %228 : vector<1x1024xf32> to vector<24x1024xf32>
    %230 = arith.mulf %227, %229 : vector<24x1024xf32>
    %c31_i32_79 = arith.constant 31 : i32
    %231 = tpu.dynamic_rotate %220 by %c31_i32_79 dim 1 : vector<24x1024xf32>, i32 -> vector<24x1024xf32>
    %232 = vector.extract_strided_slice %7 {offsets = [2, 0], sizes = [1, 1024], strides = [1, 1]} : vector<9x1024xf32> to vector<1x1024xf32>
    %233 = vector.broadcast %232 : vector<1x1024xf32> to vector<24x1024xf32>
    %234 = arith.mulf %231, %233 : vector<24x1024xf32>
    %c1_i32_80 = arith.constant 1 : i32
    %235 = tpu.dynamic_rotate %220 by %c1_i32_80 dim 1 : vector<24x1024xf32>, i32 -> vector<24x1024xf32>
    %236 = vector.extract_strided_slice %7 {offsets = [3, 0], sizes = [1, 1024], strides = [1, 1]} : vector<9x1024xf32> to vector<1x1024xf32>
    %237 = vector.broadcast %236 : vector<1x1024xf32> to vector<24x1024xf32>
    %238 = arith.mulf %235, %237 : vector<24x1024xf32>
    %c1023_i32_81 = arith.constant 1023 : i32
    %239 = tpu.dynamic_rotate %220 by %c1023_i32_81 dim 1 : vector<24x1024xf32>, i32 -> vector<24x1024xf32>
    %240 = vector.extract_strided_slice %7 {offsets = [5, 0], sizes = [1, 1024], strides = [1, 1]} : vector<9x1024xf32> to vector<1x1024xf32>
    %241 = vector.broadcast %240 : vector<1x1024xf32> to vector<24x1024xf32>
    %242 = arith.mulf %239, %241 : vector<24x1024xf32>
    %c993_i32_82 = arith.constant 993 : i32
    %243 = tpu.dynamic_rotate %220 by %c993_i32_82 dim 1 : vector<24x1024xf32>, i32 -> vector<24x1024xf32>
    %244 = vector.extract_strided_slice %7 {offsets = [6, 0], sizes = [1, 1024], strides = [1, 1]} : vector<9x1024xf32> to vector<1x1024xf32>
    %245 = vector.broadcast %244 : vector<1x1024xf32> to vector<24x1024xf32>
    %246 = arith.mulf %243, %245 : vector<24x1024xf32>
    %c992_i32_83 = arith.constant 992 : i32
    %247 = tpu.dynamic_rotate %220 by %c992_i32_83 dim 1 : vector<24x1024xf32>, i32 -> vector<24x1024xf32>
    %248 = vector.extract_strided_slice %7 {offsets = [7, 0], sizes = [1, 1024], strides = [1, 1]} : vector<9x1024xf32> to vector<1x1024xf32>
    %249 = vector.broadcast %248 : vector<1x1024xf32> to vector<24x1024xf32>
    %250 = arith.mulf %247, %249 : vector<24x1024xf32>
    %c991_i32_84 = arith.constant 991 : i32
    %251 = tpu.dynamic_rotate %220 by %c991_i32_84 dim 1 : vector<24x1024xf32>, i32 -> vector<24x1024xf32>
    %252 = vector.extract_strided_slice %7 {offsets = [8, 0], sizes = [1, 1024], strides = [1, 1]} : vector<9x1024xf32> to vector<1x1024xf32>
    %253 = vector.broadcast %252 : vector<1x1024xf32> to vector<24x1024xf32>
    %254 = arith.mulf %251, %253 : vector<24x1024xf32>
    %255 = tpu.concatenate %226, %230, %234, %238, %220, %242, %246, %250, %254 in 0 : vector<24x1024xf32>, vector<24x1024xf32>, vector<24x1024xf32>, vector<24x1024xf32>, vector<24x1024xf32>, vector<24x1024xf32>, vector<24x1024xf32>, vector<24x1024xf32>, vector<24x1024xf32> -> vector<216x1024xf32>
    %256 = arith.truncf %255 : vector<216x1024xf32> to vector<216x1024xbf16>
    %cst_85 = arith.constant dense<0.000000e+00> : vector<24x1024xf32>
    %257 = tpu.matmul %221, %256, %cst_85 {dimension_numbers = #tpu.dot_dimension_numbers<[1], [0], [0], [1], [0, 0, 1, 1], [], []>} : vector<24x216xbf16>, vector<216x1024xbf16>, vector<24x1024xf32> -> vector<24x1024xf32>
    %258 = vector.broadcast %222 : vector<24x1xf32> to vector<24x1024xf32>
    %259 = arith.addf %257, %258 : vector<24x1024xf32>
    %c0_86 = arith.constant 0 : index
    %c0_87 = arith.constant 0 : index
    %260 = vector.load %arg21[%c0_86, %c0_87] : memref<1x216xbf16, #tpu.memory_space<vmem>>, vector<1x216xbf16>
    %c0_88 = arith.constant 0 : index
    %c0_89 = arith.constant 0 : index
    %261 = vector.load %arg22[%c0_88, %c0_89] : memref<1x1xf32, #tpu.memory_space<vmem>>, vector<1x1xf32>
    %c33_i32_90 = arith.constant 33 : i32
    %262 = tpu.dynamic_rotate %259 by %c33_i32_90 dim 1 : vector<24x1024xf32>, i32 -> vector<24x1024xf32>
    %263 = vector.extract_strided_slice %7 {offsets = [0, 0], sizes = [1, 1024], strides = [1, 1]} : vector<9x1024xf32> to vector<1x1024xf32>
    %264 = vector.broadcast %263 : vector<1x1024xf32> to vector<24x1024xf32>
    %265 = arith.mulf %262, %264 : vector<24x1024xf32>
    %c32_i32_91 = arith.constant 32 : i32
    %266 = tpu.dynamic_rotate %259 by %c32_i32_91 dim 1 : vector<24x1024xf32>, i32 -> vector<24x1024xf32>
    %267 = vector.extract_strided_slice %7 {offsets = [1, 0], sizes = [1, 1024], strides = [1, 1]} : vector<9x1024xf32> to vector<1x1024xf32>
    %268 = vector.broadcast %267 : vector<1x1024xf32> to vector<24x1024xf32>
    %269 = arith.mulf %266, %268 : vector<24x1024xf32>
    %c31_i32_92 = arith.constant 31 : i32
    %270 = tpu.dynamic_rotate %259 by %c31_i32_92 dim 1 : vector<24x1024xf32>, i32 -> vector<24x1024xf32>
    %271 = vector.extract_strided_slice %7 {offsets = [2, 0], sizes = [1, 1024], strides = [1, 1]} : vector<9x1024xf32> to vector<1x1024xf32>
    %272 = vector.broadcast %271 : vector<1x1024xf32> to vector<24x1024xf32>
    %273 = arith.mulf %270, %272 : vector<24x1024xf32>
    %c1_i32_93 = arith.constant 1 : i32
    %274 = tpu.dynamic_rotate %259 by %c1_i32_93 dim 1 : vector<24x1024xf32>, i32 -> vector<24x1024xf32>
    %275 = vector.extract_strided_slice %7 {offsets = [3, 0], sizes = [1, 1024], strides = [1, 1]} : vector<9x1024xf32> to vector<1x1024xf32>
    %276 = vector.broadcast %275 : vector<1x1024xf32> to vector<24x1024xf32>
    %277 = arith.mulf %274, %276 : vector<24x1024xf32>
    %c1023_i32_94 = arith.constant 1023 : i32
    %278 = tpu.dynamic_rotate %259 by %c1023_i32_94 dim 1 : vector<24x1024xf32>, i32 -> vector<24x1024xf32>
    %279 = vector.extract_strided_slice %7 {offsets = [5, 0], sizes = [1, 1024], strides = [1, 1]} : vector<9x1024xf32> to vector<1x1024xf32>
    %280 = vector.broadcast %279 : vector<1x1024xf32> to vector<24x1024xf32>
    %281 = arith.mulf %278, %280 : vector<24x1024xf32>
    %c993_i32_95 = arith.constant 993 : i32
    %282 = tpu.dynamic_rotate %259 by %c993_i32_95 dim 1 : vector<24x1024xf32>, i32 -> vector<24x1024xf32>
    %283 = vector.extract_strided_slice %7 {offsets = [6, 0], sizes = [1, 1024], strides = [1, 1]} : vector<9x1024xf32> to vector<1x1024xf32>
    %284 = vector.broadcast %283 : vector<1x1024xf32> to vector<24x1024xf32>
    %285 = arith.mulf %282, %284 : vector<24x1024xf32>
    %c992_i32_96 = arith.constant 992 : i32
    %286 = tpu.dynamic_rotate %259 by %c992_i32_96 dim 1 : vector<24x1024xf32>, i32 -> vector<24x1024xf32>
    %287 = vector.extract_strided_slice %7 {offsets = [7, 0], sizes = [1, 1024], strides = [1, 1]} : vector<9x1024xf32> to vector<1x1024xf32>
    %288 = vector.broadcast %287 : vector<1x1024xf32> to vector<24x1024xf32>
    %289 = arith.mulf %286, %288 : vector<24x1024xf32>
    %c991_i32_97 = arith.constant 991 : i32
    %290 = tpu.dynamic_rotate %259 by %c991_i32_97 dim 1 : vector<24x1024xf32>, i32 -> vector<24x1024xf32>
    %291 = vector.extract_strided_slice %7 {offsets = [8, 0], sizes = [1, 1024], strides = [1, 1]} : vector<9x1024xf32> to vector<1x1024xf32>
    %292 = vector.broadcast %291 : vector<1x1024xf32> to vector<24x1024xf32>
    %293 = arith.mulf %290, %292 : vector<24x1024xf32>
    %294 = tpu.concatenate %265, %269, %273, %277, %259, %281, %285, %289, %293 in 0 : vector<24x1024xf32>, vector<24x1024xf32>, vector<24x1024xf32>, vector<24x1024xf32>, vector<24x1024xf32>, vector<24x1024xf32>, vector<24x1024xf32>, vector<24x1024xf32>, vector<24x1024xf32> -> vector<216x1024xf32>
    %295 = arith.truncf %294 : vector<216x1024xf32> to vector<216x1024xbf16>
    %cst_98 = arith.constant dense<0.000000e+00> : vector<1x1024xf32>
    %296 = tpu.matmul %260, %295, %cst_98 {dimension_numbers = #tpu.dot_dimension_numbers<[1], [0], [0], [1], [0, 0, 1, 1], [], []>} : vector<1x216xbf16>, vector<216x1024xbf16>, vector<1x1024xf32> -> vector<1x1024xf32>
    %297 = vector.broadcast %261 : vector<1x1xf32> to vector<1x1024xf32>
    %298 = arith.addf %296, %297 : vector<1x1024xf32>
    %c0_99 = arith.constant 0 : index
    %c0_100 = arith.constant 0 : index
    %c0_101 = arith.constant 0 : index
    %299 = vector.load %arg23[%c0_99, %c0_100, %c0_101] : memref<1x1x1024xf32, #tpu.memory_space<vmem>>, vector<1x1x1024xf32>
    %300 = vector.shape_cast %299 : vector<1x1x1024xf32> to vector<1x1024xf32>
    %301 = vector.shape_cast %298 : vector<1x1024xf32> to vector<1x1x1024xf32>
    tpu.vector_store %arg23[%c0_99, %c0_100, %c0_101], %301 {strides = array<i32>} : memref<1x1x1024xf32, #tpu.memory_space<vmem>>, vector<1x1x1024xf32>,
    return
  }
  func.func @transform_0(%arg0: i32) -> (i32, i32, i32) {
    %c0_i32 = arith.constant 0 : i32
    %c0_i32_0 = arith.constant 0 : i32
    %c0_i32_1 = arith.constant 0 : i32
    return %arg0, %c0_i32, %c0_i32_0 : i32, i32, i32
  }
  func.func @transform_1(%arg0: i32) -> (i32, i32, i32) {
    %c0_i32 = arith.constant 0 : i32
    %c0_i32_0 = arith.constant 0 : i32
    %c0_i32_1 = arith.constant 0 : i32
    return %arg0, %c0_i32, %c0_i32_0 : i32, i32, i32
  }
  func.func @transform_2(%arg0: i32) -> (i32, i32, i32) {
    %c0_i32 = arith.constant 0 : i32
    %c0_i32_0 = arith.constant 0 : i32
    %c0_i32_1 = arith.constant 0 : i32
    return %arg0, %c0_i32, %c0_i32_0 : i32, i32, i32
  }
  func.func @transform_3(%arg0: i32) -> (i32, i32) {
    %c0_i32 = arith.constant 0 : i32
    %c0_i32_0 = arith.constant 0 : i32
    %c0_i32_1 = arith.constant 0 : i32
    return %c0_i32, %c0_i32_0 : i32, i32
  }
  func.func @transform_4(%arg0: i32) -> (i32, i32) {
    %c0_i32 = arith.constant 0 : i32
    %c0_i32_0 = arith.constant 0 : i32
    %c0_i32_1 = arith.constant 0 : i32
    return %c0_i32, %c0_i32_0 : i32, i32
  }
  func.func @transform_5(%arg0: i32) -> (i32, i32) {
    %c0_i32 = arith.constant 0 : i32
    %c0_i32_0 = arith.constant 0 : i32
    %c0_i32_1 = arith.constant 0 : i32
    return %c0_i32, %c0_i32_0 : i32, i32
  }
  func.func @transform_6(%arg0: i32) -> (i32, i32) {
    %c0_i32 = arith.constant 0 : i32
    %c0_i32_0 = arith.constant 0 : i32
    %c0_i32_1 = arith.constant 0 : i32
    return %c0_i32, %c0_i32_0 : i32, i32
  }
  func.func @transform_7(%arg0: i32) -> (i32, i32) {
    %c0_i32 = arith.constant 0 : i32
    %c0_i32_0 = arith.constant 0 : i32
    %c0_i32_1 = arith.constant 0 : i32
    return %c0_i32, %c0_i32_0 : i32, i32
  }
  func.func @transform_8(%arg0: i32) -> (i32, i32) {
    %c0_i32 = arith.constant 0 : i32
    %c0_i32_0 = arith.constant 0 : i32
    %c0_i32_1 = arith.constant 0 : i32
    return %c0_i32, %c0_i32_0 : i32, i32
  }
  func.func @transform_9(%arg0: i32) -> (i32, i32) {
    %c0_i32 = arith.constant 0 : i32
    %c0_i32_0 = arith.constant 0 : i32
    %c0_i32_1 = arith.constant 0 : i32
    return %c0_i32, %c0_i32_0 : i32, i32
  }
  func.func @transform_10(%arg0: i32) -> (i32, i32) {
    %c0_i32 = arith.constant 0 : i32
    %c0_i32_0 = arith.constant 0 : i32
    %c0_i32_1 = arith.constant 0 : i32
    return %c0_i32, %c0_i32_0 : i32, i32
  }
  func.func @transform_11(%arg0: i32) -> (i32, i32) {
    %c0_i32 = arith.constant 0 : i32
    %c0_i32_0 = arith.constant 0 : i32
    %c0_i32_1 = arith.constant 0 : i32
    return %c0_i32, %c0_i32_0 : i32, i32
  }
  func.func @transform_12(%arg0: i32) -> (i32, i32) {
    %c0_i32 = arith.constant 0 : i32
    %c0_i32_0 = arith.constant 0 : i32
    %c0_i32_1 = arith.constant 0 : i32
    return %c0_i32, %c0_i32_0 : i32, i32
  }
  func.func @transform_13(%arg0: i32) -> (i32, i32) {
    %c0_i32 = arith.constant 0 : i32
    %c0_i32_0 = arith.constant 0 : i32
    %c0_i32_1 = arith.constant 0 : i32
    return %c0_i32, %c0_i32_0 : i32, i32
  }
  func.func @transform_14(%arg0: i32) -> (i32, i32) {
    %c0_i32 = arith.constant 0 : i32
    %c0_i32_0 = arith.constant 0 : i32
    %c0_i32_1 = arith.constant 0 : i32
    return %c0_i32, %c0_i32_0 : i32, i32
  }
  func.func @transform_15(%arg0: i32) -> (i32, i32) {
    %c0_i32 = arith.constant 0 : i32
    %c0_i32_0 = arith.constant 0 : i32
    %c0_i32_1 = arith.constant 0 : i32
    return %c0_i32, %c0_i32_0 : i32, i32
  }
  func.func @transform_16(%arg0: i32) -> (i32, i32) {
    %c0_i32 = arith.constant 0 : i32
    %c0_i32_0 = arith.constant 0 : i32
    %c0_i32_1 = arith.constant 0 : i32
    return %c0_i32, %c0_i32_0 : i32, i32
  }
  func.func @transform_17(%arg0: i32) -> (i32, i32) {
    %c0_i32 = arith.constant 0 : i32
    %c0_i32_0 = arith.constant 0 : i32
    %c0_i32_1 = arith.constant 0 : i32
    return %c0_i32, %c0_i32_0 : i32, i32
  }
  func.func @transform_18(%arg0: i32) -> (i32, i32) {
    %c0_i32 = arith.constant 0 : i32
    %c0_i32_0 = arith.constant 0 : i32
    %c0_i32_1 = arith.constant 0 : i32
    return %c0_i32, %c0_i32_0 : i32, i32
  }
  func.func @transform_19(%arg0: i32) -> (i32, i32) {
    %c0_i32 = arith.constant 0 : i32
    %c0_i32_0 = arith.constant 0 : i32
    %c0_i32_1 = arith.constant 0 : i32
    return %c0_i32, %c0_i32_0 : i32, i32
  }
  func.func @transform_20(%arg0: i32) -> (i32, i32) {
    %c0_i32 = arith.constant 0 : i32
    %c0_i32_0 = arith.constant 0 : i32
    %c0_i32_1 = arith.constant 0 : i32
    return %c0_i32, %c0_i32_0 : i32, i32
  }
  func.func @transform_21(%arg0: i32) -> (i32, i32) {
    %c0_i32 = arith.constant 0 : i32
    %c0_i32_0 = arith.constant 0 : i32
    %c0_i32_1 = arith.constant 0 : i32
    return %c0_i32, %c0_i32_0 : i32, i32
  }
  func.func @transform_22(%arg0: i32) -> (i32, i32, i32) {
    %c0_i32 = arith.constant 0 : i32
    %c0_i32_0 = arith.constant 0 : i32
    %c0_i32_1 = arith.constant 0 : i32
    return %arg0, %c0_i32, %c0_i32_0 : i32, i32, i32
  }
}

</mosaic_0001>

<bundles_post_ra>
// kernel: pd_forward.1
= control target key start
LH: loop header
LB: loop body
LE: loop exit
PB: predicated region body
PF: predicated region fallthrough
CT: control target
= control target key end

     0   :  { %s7666_s29 = smov 0   ;;  %s15546_s0 = inlined_call_operand.vmem [shape: f32[2,8,64], index: 0, kind: input, shape index: {}]   ;;  %s15547_s1 = inlined_call_operand.vmem [shape: f32[2,8,256], index: 1, kind: input, shape index: {}]   ;;  %s15548_s2 = inlined_call_operand.vmem [shape: f32[2,8,1024], index: 2, kind: input, shape index: {}]   ;;  %s15549_s3 = inlined_call_operand.vmem [shape: f32[9,256], index: 3, kind: input, shape index: {}]   ;;  %s15550_s4 = inlined_call_operand.vmem [shape: f32[9,1024], index: 4, kind: input, shape index: {}]   ;;  %s15551_s5 = inlined_call_operand.vmem [shape: bf16[64,256], index: 5, kind: input, shape index: {}]   ;;  %s15552_s6 = inlined_call_operand.vmem [shape: bf16[256,1024], index: 6, kind: input, shape index: {}]   ;;  %s15553_s7 = inlined_call_operand.vmem [shape: bf16[64,1024], index: 7, kind: input, shape index: {}]   ;;  %s15554_s8 = inlined_call_operand.vmem [shape: bf16[16,72], index: 8, kind: input, shape index: {}]   ;;  %s15555_s9 = inlined_call_operand.vmem [shape: f32[16,1], index: 9, kind: input, shape index: {}]   ;;  %s15556_s10 = inlined_call_operand.vmem [shape: bf16[8,72], index: 10, kind: input, shape index: {}]   ;;  %s15557_s11 = inlined_call_operand.vmem [shape: f32[8,1], index: 11, kind: input, shape index: {}]   ;;  %s15558_s12 = inlined_call_operand.vmem [shape: bf16[8,72], index: 12, kind: input, shape index: {}]   ;;  %s15559_s13 = inlined_call_operand.vmem [shape: f32[8,1], index: 13, kind: input, shape index: {}]   ;;  %s15560_s14 = inlined_call_operand.vmem [shape: bf16[16,144], index: 14, kind: input, shape index: {}]   ;;  %s15561_s15 = inlined_call_operand.vmem [shape: f32[16,1], index: 15, kind: input, shape index: {}]   ;;  %s15562_s16 = inlined_call_operand.vmem [shape: bf16[16,144], index: 16, kind: input, shape index: {}]   ;;  %s15563_s17 = inlined_call_operand.vmem [shape: f32[16,1], index: 17, kind: input, shape index: {}]   ;;  %s15564_s18 = inlined_call_operand.vmem [shape: bf16[24,216], index: 18, kind: input, shape index: {}]   ;;  %s15565_s19 = inlined_call_operand.vmem [shape: f32[24,1], index: 19, kind: input, shape index: {}]   ;;  %s15566_s20 = inlined_call_operand.vmem [shape: bf16[1,216], index: 20, kind: input, shape index: {}]   ;;  %s15567_s21 = inlined_call_operand.<no memory space> [shape: f32[1,1], index: 21, kind: input, shape index: {}]   ;;  %s15568_s22 = inlined_call_operand.vmem [shape: f32[2,1,1024], index: 22, kind: output, shape index: {}]  }
   0x1   :  { %16376 = sst [smem:[#allocation245_spill]] %s15546_s0  ;;  %v27_v0 = vstv %s15567_s21 }
   0x2   :  { %16377 = sst [smem:[#allocation246_spill]] %s15547_s1  ;;  %28 = vst [vmem:[#allocation2] sm:$0x1] %v27_v0 }
   0x3   :  { %16378 = sst [smem:[#allocation247_spill]] %s15548_s2 }
   0x4   :  { %16379 = sst [smem:[#allocation248_spill]] %s15549_s3 }
   0x5   :  { %16380 = sst [smem:[#allocation249_spill]] %s15550_s4 }
   0x6   :  { %16381 = sst [smem:[#allocation250_spill]] %s15551_s5 }
   0x7   :  { %16382 = sst [smem:[#allocation251_spill]] %s15552_s6 }
   0x8   :  { %16383 = sst [smem:[#allocation252_spill]] %s15553_s7 }
   0x9   :  { %16384 = sst [smem:[#allocation253_spill]] %s15554_s8 }
   0xa   :  { %16385 = sst [smem:[#allocation254_spill]] %s15555_s9 }
   0xb LB: > { %16386 = sst [smem:[#allocation3_spill]] %s7530_s29  ;;  %s7191_s30 = sadd.s32 4294967295, %s7530_s29   ;;  %s7530_s29 = sphi %s7666_s29, %s34_s29  }
   0xc   : > { %p7195_p0 = scmp.ge.s32.totalorder %s7530_s29, 1  ;;  %p633_p1 = scmp.lt.s32.totalorder %s7530_s29, 3 }
   0xe   : > { %p634_p2 = pnand %p7195_p0, %p633_p1 }
  0x10   : > { %637 = sbr.rel (%p634_p2) target bundleno = 3038 (0xbde), region = 108 }
  0x17   : > { %s16387_s23 = sld [smem:[#allocation250_spill]]  ;;  %p703_p3 = scmp.lt.s32.totalorder %s7191_s30, 1  ;;  %v15573_v3 = vmov 0   ;;  %vm802_vm0 = vcmask 523264   ;;  %vm2308_vm9 = vcmask 1043456   ;;  %vm15864_vm10 = vcmask 588800  }
  0x18   : > { %838 = vmatprep.mubr.bf16.mxu1 %v15573_v3  ;;  %1112 = vmatprep.mubr.bf16.mxu0 %v15573_v3  ;;  %s16388_s7 = sld [smem:[#allocation252_spill]]  ;;  %s16389_s5 = sld [smem:[#allocation245_spill]] }
  0x19   : > { %s17761_s30 = smov (!%p703_p3, %s7191_s30), 1  ;;  %7467 = vset.pattern.permute.xlu0 %v15573_v3  ;;  %7466 = vset.pattern.permute.xlu1 %v15573_v3  ;;  %s16390_s26 = sld [smem:[#allocation251_spill]] }
  0x1a   : > { %s15652_s27 = sshll.u32 %s17761_s30, 3  ;;  %s16391_s4 = sld [smem:[#allocation246_spill]] }
  0x1b   : > { %s15671_s21 = smov 16   ;;  %s15673_s1 = smov 17  }
  0x1c   : > { %s15669_s6 = smov 15   ;;  %s15778_s25 = smov 1  }
  0x1d   : > { %v7468_v1 = vld [vmem:[%s16387_s23 + $0x4] ss:$8 sps:$4 sm:$0xff]   ;;  %v7470_v2 = vld [vmem:[%s16387_s23] ss:$8 sps:$4 sm:$0xff]   ;;  %v7471_v4 = vld [vmem:[%s16387_s23 + $0x14] ss:$8 sps:$4 sm:$0xff]  }
  0x1e   : > { %806 = vmatprep.subr.bf16.mxu1 %v7468_v1  ;;  %v7473_v5 = vld [vmem:[%s16387_s23 + $0x10] ss:$8 sps:$4 sm:$0xff]   ;;  %v7474_v6 = vld [vmem:[%s16387_s23 + $0x24] ss:$8 sps:$4 sm:$0xff]   ;;  %v7476_v13 = vld [vmem:[%s16387_s23 + $0x20] ss:$8 sps:$4 sm:$0xff]   ;;  %s706_s24 = scalar_lea.vmem %s16389_s5, %s15652_s27 }
  0x1f   : > { %807 = vmatpush1.bf16.msra.mxu1 %v7470_v2  ;;  %v848_v7 = vld [vmem:[%s16388_s7 + $0x8] sm:$0xff]  ;;  %v7477_v17 = vld [vmem:[%s16387_s23 + $0x34] ss:$8 sps:$4 sm:$0xff]   ;;  %v847_v19 = vld [vmem:[%s16388_s7] sm:$0xff]  ;;  %s7440_s5 = sshll.u32 %s17761_s30, 4  ;;  %s15653_s2 = smov 112  }
  0x20   : > { %808 = vmatprep.subr.bf16.mxu1 %v7471_v4  ;;  %v852_v8 = vld [vmem:[%s16388_s7 + $0x28] sm:$0xff]  ;;  %v851_v20 = vld [vmem:[%s16388_s7 + $0x20] sm:$0xff]  ;;  %v7479_v21 = vld [vmem:[%s16387_s23 + $0x30] ss:$8 sps:$4 sm:$0xff]   ;;  %s7812_s0 = scalar_lea.vmem %s16391_s4, %s7440_s5  ;;  %s15710_s5 = smov 127  }
  0x21   : > { %v7214_v9 = vcombine.high %v848_v7, %v852_v8  ;;  %v7213_v10 = vcombine.low %v848_v7, %v852_v8  ;;  %v856_v11 = vld [vmem:[%s16388_s7 + $0x48] sm:$0xff]  ;;  %v722_v23 = vld [vmem:[%s706_s24] sm:$0xff]  ;;  %v7212_v26 = vcombine.high %v847_v19, %v851_v20  ;;  %v7211_v32 = vcombine.low %v847_v19, %v851_v20  ;;  %v850_v33 = vld [vmem:[%s16388_s7 + $0x18] sm:$0xff]  ;;  %s15659_s24 = smov 113   ;;  %s15657_s3 = smov 111  }
  0x22   : > { %v860_v12 = vld [vmem:[%s16388_s7 + $0x68] sm:$0xff]  ;;  %v855_v28 = vld [vmem:[%s16388_s7 + $0x40] sm:$0xff]  ;;  %v7746_v30 = vpack.c.bf16 %v722_v23, %v722_v23  ;;  %v854_v34 = vld [vmem:[%s16388_s7 + $0x38] sm:$0xff]  ;;  %s16525_s9 = sld [smem:[#allocation254_spill]]  ;;  %s15729_s28 = smov 97  }
  0x23   : > { %809 = vmatpush1.bf16.msra.mxu1 %v7473_v5  ;;  %v7222_v14 = vcombine.high %v856_v11, %v860_v12  ;;  %v864_v15 = vld [vmem:[%s16388_s7 + $0x88] sm:$0xff]  ;;  %1080 = vmatprep.subr.bf16.mxu0 %v7214_v9  ;;  %v7221_v18 = vcombine.low %v856_v11, %v860_v12  ;;  %v859_v29 = vld [vmem:[%s16388_s7 + $0x60] sm:$0xff]  ;;  %v7218_v39 = vcombine.high %v850_v33, %v854_v34  ;;  %v858_v41 = vld [vmem:[%s16388_s7 + $0x58] sm:$0xff]  ;;  %s15676_s4 = smov 32   ;;  %s15678_s27 = smov 33  }
  0x24   : > { %v868_v16 = vld [vmem:[%s16388_s7 + $0xa8] sm:$0xff]  ;;  %810 = vmatprep.subr.bf16.mxu1 %v7474_v6  ;;  %1081 = vmatpush1.bf16.msra.mxu0 %v7213_v10  ;;  %v7220_v35 = vcombine.high %v855_v28, %v859_v29  ;;  %v863_v37 = vld [vmem:[%s16388_s7 + $0x80] sm:$0xff]  ;;  %v7219_v40 = vcombine.low %v855_v28, %v859_v29  ;;  %v862_v42 = vld [vmem:[%s16388_s7 + $0x78] sm:$0xff]  ;;  %v7217_v44 = vcombine.low %v850_v33, %v854_v34  ;;  %s16553_s8 = sld [smem:[#allocation253_spill]] }
  0x25   : > { %1082 = vmatprep.subr.bf16.mxu0 %v7222_v14  ;;  %v7230_v22 = vcombine.high %v864_v15, %v868_v16  ;;  %v872_v24 = vld [vmem:[%s16388_s7 + $0xc8] sm:$0xff]  ;;  %v7229_v27 = vcombine.low %v864_v15, %v868_v16  ;;  %v867_v38 = vld [vmem:[%s16388_s7 + $0xa0] sm:$0xff]  ;;  %v7226_v47 = vcombine.high %v858_v41, %v862_v42  ;;  %v866_v49 = vld [vmem:[%s16388_s7 + $0x98] sm:$0xff]  ;;  %v7225_v52 = vcombine.low %v858_v41, %v862_v42 }
  0x26   : > { %v876_v25 = vld [vmem:[%s16388_s7 + $0xe8] sm:$0xff]  ;;  %v7228_v43 = vcombine.high %v863_v37, %v867_v38  ;;  %v871_v45 = vld [vmem:[%s16388_s7 + $0xc0] sm:$0xff]  ;;  %v7227_v48 = vcombine.low %v863_v37, %v867_v38  ;;  %v870_v50 = vld [vmem:[%s16388_s7 + $0xb8] sm:$0xff] }
  0x27   : > { %811 = vmatpush1.bf16.msra.mxu1 %v7476_v13  ;;  %v7238_v31 = vcombine.high %v872_v24, %v876_v25  ;;  %v7237_v36 = vcombine.low %v872_v24, %v876_v25  ;;  %v875_v46 = vld [vmem:[%s16388_s7 + $0xe0] sm:$0xff]  ;;  %v849_v53 = vld [vmem:[%s16388_s7 + $0x10] sm:$0xff]  ;;  %v7234_v55 = vcombine.high %v866_v49, %v870_v50  ;;  %v874_v57 = vld [vmem:[%s16388_s7 + $0xd8] sm:$0xff]  ;;  %v7233_v60 = vcombine.low %v866_v49, %v870_v50 }
  0x28   : > { %812 = vmatprep.subr.bf16.mxu1 %v7477_v17  ;;  %1083 = vmatpush1.bf16.msra.mxu0 %v7221_v18  ;;  %v7236_v51 = vcombine.high %v871_v45, %v875_v46  ;;  %v853_v54 = vld [vmem:[%s16388_s7 + $0x30] sm:$0xff]  ;;  %v7235_v56 = vcombine.low %v871_v45, %v875_v46  ;;  %v878_v58 = vld [vmem:[%s16388_s7 + $0xf8] sm:$0xff]  ;;  %v1206_v1 = vld [vmem:[%s16390_s26 + $0x8] sm:$0xff] }
  0x29   : > { %1084 = vmatprep.subr.bf16.mxu0 %v7230_v22  ;;  %v7216_v59 = vcombine.high %v849_v53, %v853_v54  ;;  %v857_v61 = vld [vmem:[%s16388_s7 + $0x50] sm:$0xff]  ;;  %v7242_v63 = vcombine.high %v874_v57, %v878_v58  ;;  %v7215_v0 = vcombine.low %v849_v53, %v853_v54  ;;  %v1210_v2 = vld [vmem:[%s16390_s26 + $0x28] sm:$0xff]  ;;  %v7241_v5 = vcombine.low %v874_v57, %v878_v58  ;;  %v1205_v24 = vld [vmem:[%s16390_s26] sm:$0xff] }
  0x2a   : > { %v861_v62 = vld [vmem:[%s16388_s7 + $0x70] sm:$0xff]  ;;  %v7822_v8 = vcombine.high %v1206_v1, %v1210_v2  ;;  %v1214_v10 = vld [vmem:[%s16390_s26 + $0x48] sm:$0xff]  ;;  %v7832_v14 = vcombine.low %v1206_v1, %v1210_v2  ;;  %v1209_v25 = vld [vmem:[%s16390_s26 + $0x20] sm:$0xff] }
  0x2b   : > { %813 = vmatpush1.bf16.msra.mxu1 %v7479_v21  ;;  %v7224_v4 = vcombine.high %v857_v61, %v861_v62  ;;  %v865_v6 = vld [vmem:[%s16388_s7 + $0x90] sm:$0xff]  ;;  %v7223_v9 = vcombine.low %v857_v61, %v861_v62  ;;  %v1218_v11 = vld [vmem:[%s16390_s26 + $0x68] sm:$0xff]  ;;  %v1213_v33 = vld [vmem:[%s16390_s26 + $0x40] sm:$0xff] }
  0x2c   : > { %1039 = vmatprep.subr.bf16.mxu1 %v7212_v26  ;;  %1085 = vmatpush1.bf16.msra.mxu0 %v7229_v27  ;;  %v869_v7 = vld [vmem:[%s16388_s7 + $0xb0] sm:$0xff]  ;;  %16392 = vst [vmem:[#allocation4_spill] sm:$0xff] %v7822_v8  ;;  %v724_v12 = vld [vmem:[%s7812_s0 + $0x8] sm:$0xff]  ;;  %16393 = vst [vmem:[#allocation5_spill] sm:$0xff] %v7832_v14  ;;  %v7843_v18 = vcombine.high %v1214_v10, %v1218_v11  ;;  %v7854_v23 = vcombine.low %v1214_v10, %v1218_v11 }
  0x2d   : > { %1086 = vmatprep.subr.bf16.mxu0 %v7238_v31  ;;  %v7232_v13 = vcombine.high %v865_v6, %v869_v7  ;;  %v873_v15 = vld [vmem:[%s16388_s7 + $0xd0] sm:$0xff]  ;;  %v7840_v17 = vpack.c.bf16 %v724_v12, %v724_v12  ;;  %v7231_v19 = vcombine.low %v865_v6, %v869_v7  ;;  %v1222_v20 = vld [vmem:[%s16390_s26 + $0x88] sm:$0xff]  ;;  %v7872_v31 = vcombine.high %v1205_v24, %v1209_v25  ;;  %v1217_v34 = vld [vmem:[%s16390_s26 + $0x60] sm:$0xff] }
  0x2e   : > { %7210 = vmatmul.mubr.msk.bf16.vlgmr.msra.gmra.mrb[0].mxu1 %vm802_vm0, %v7746_v30  ;;  %v877_v16 = vld [vmem:[%s16388_s7 + $0xf0] sm:$0xff]  ;;  %16394 = vst [vmem:[#allocation6_spill] sm:$0xff] %v7843_v18  ;;  %v1226_v21 = vld [vmem:[%s16390_s26 + $0xa8] sm:$0xff]  ;;  %16395 = vst [vmem:[#allocation7_spill] sm:$0xff] %v7854_v23  ;;  %s16652_s7 = smov 17  }
  0x2f   : > { %1040 = vmatpush1.bf16.msra.mxu1 %v7211_v32  ;;  %1071 = vmatprep.mubr.bf16.mxu1 %v15573_v3  ;;  %v7240_v22 = vcombine.high %v873_v15, %v877_v16  ;;  %v7864_v26 = vcombine.high %v1222_v20, %v1226_v21  ;;  %v7239_v27 = vcombine.low %v873_v15, %v877_v16  ;;  %v1230_v28 = vld [vmem:[%s16390_s26 + $0xc8] sm:$0xff]  ;;  %v1221_v41 = vld [vmem:[%s16390_s26 + $0x80] sm:$0xff] }
  0x30   : > { %1041 = vmatprep.subr.bf16.mxu1 %v7220_v35  ;;  %1087 = vmatpush1.bf16.msra.mxu0 %v7237_v36  ;;  %v1234_v29 = vld [vmem:[%s16390_s26 + $0xe8] sm:$0xff]  ;;  %16397 = vst [vmem:[#allocation9_spill] sm:$0xff] %v7872_v31  ;;  %v7875_v32 = vcombine.low %v1222_v20, %v1226_v21  ;;  %v7886_v36 = vcombine.low %v1205_v24, %v1209_v25  ;;  %v1225_v42 = vld [vmem:[%s16390_s26 + $0xa0] sm:$0xff] }
  0x31   : > { %1162 = vmatprep.subr.bf16.mxu0 %v7218_v39  ;;  %16396 = vst [vmem:[#allocation8_spill] sm:$0xff] %v7864_v26  ;;  %v7884_v35 = vcombine.high %v1230_v28, %v1234_v29  ;;  %v1238_v37 = vld [vmem:[%s16390_s26 + $0x108] sm:$0xff]  ;;  %v7895_v39 = vcombine.high %v1213_v33, %v1217_v34  ;;  %v1233_v49 = vld [vmem:[%s16390_s26 + $0xe0] sm:$0xff] }
  0x32   : > { %16398 = vst [vmem:[#allocation10_spill] sm:$0xff] %v7875_v32  ;;  %16400 = vst [vmem:[#allocation12_spill] sm:$0xff] %v7886_v36  ;;  %v1242_v38 = vld [vmem:[%s16390_s26 + $0x128] sm:$0xff]  ;;  %v1241_v57 = vld [vmem:[%s16390_s26 + $0x120] sm:$0xff] }
  0x33   : > { %1042 = vmatpush1.bf16.msra.mxu1 %v7219_v40  ;;  %7244 = vmatmul.mubr.msk.bf16.vlgmr.msra.gmra.mrb[0].mxu0 %vm802_vm0, %v7746_v30  ;;  %16399 = vst [vmem:[#allocation11_spill] sm:$0xff] %v7884_v35  ;;  %16401 = vst [vmem:[#allocation13_spill] sm:$0xff] %v7895_v39  ;;  %v7898_v40 = vcombine.low %v1230_v28, %v1234_v29  ;;  %v1246_v45 = vld [vmem:[%s16390_s26 + $0x148] sm:$0xff]  ;;  %v1245_v62 = vld [vmem:[%s16390_s26 + $0x140] sm:$0xff] }
  0x34   : > { %1043 = vmatprep.subr.bf16.mxu1 %v7228_v43  ;;  %1163 = vmatpush1.bf16.msra.mxu0 %v7217_v44  ;;  %v7907_v43 = vcombine.high %v1238_v37, %v1242_v38  ;;  %v7912_v44 = vcombine.low %v1213_v33, %v1217_v34  ;;  %v1250_v46 = vld [vmem:[%s16390_s26 + $0x168] sm:$0xff]  ;;  %v1253_v10 = vld [vmem:[%s16390_s26 + $0x180] sm:$0xff] }
  0x35   : > { %1194 = vmatprep.mubr.bf16.mxu0 %v15573_v3  ;;  %1164 = vmatprep.subr.bf16.mxu0 %v7226_v47  ;;  %16402 = vst [vmem:[#allocation14_spill] sm:$0xff] %v7898_v40  ;;  %v7922_v47 = vcombine.high %v1221_v41, %v1225_v42  ;;  %v7934_v50 = vcombine.high %v1246_v45, %v1250_v46  ;;  %v1258_v53 = vld [vmem:[%s16390_s26 + $0x1a8] sm:$0xff]  ;;  %v1257_v11 = vld [vmem:[%s16390_s26 + $0x1a0] sm:$0xff] }
  0x36   : > { %16403 = vst [vmem:[#allocation15_spill] sm:$0xff] %v7907_v43  ;;  %16404 = vst [vmem:[#allocation16_spill] sm:$0xff] %v7912_v44  ;;  %v1274_v6 = vld [vmem:[%s16390_s26 + $0x228] sm:$0xff]  ;;  %v1261_v21 = vld [vmem:[%s16390_s26 + $0x1c0] sm:$0xff]  ;;  %v8033_v25 = vcombine.low %v1253_v10, %v1257_v11 }
  0x37   : > { %1044 = vmatpush1.bf16.msra.mxu1 %v7227_v48  ;;  %16405 = vst [vmem:[#allocation17_spill] sm:$0xff] %v7922_v47  ;;  %v1229_v48 = vld [vmem:[%s16390_s26 + $0xc0] sm:$0xff]  ;;  %16407 = vst [vmem:[#allocation19_spill] sm:$0xff] %v7934_v50  ;;  %v1278_v15 = vld [vmem:[%s16390_s26 + $0x248] sm:$0xff] }
  0x38   : > { %1045 = vmatprep.subr.bf16.mxu1 %v7236_v51  ;;  %1165 = vmatpush1.bf16.msra.mxu0 %v7225_v52  ;;  %v7937_v51 = vcombine.low %v1221_v41, %v1225_v42  ;;  %v1254_v52 = vld [vmem:[%s16390_s26 + $0x188] sm:$0xff]  ;;  %v7946_v54 = vcombine.high %v1229_v48, %v1233_v49  ;;  %v7967_v61 = vcombine.low %v1229_v48, %v1233_v49  ;;  %v1269_v34 = vld [vmem:[%s16390_s26 + $0x200] sm:$0xff] }
  0x39   : > { %1166 = vmatprep.subr.bf16.mxu0 %v7234_v55  ;;  %v7949_v55 = vcombine.low %v1246_v45, %v1250_v46  ;;  %v7958_v58 = vcombine.high %v1254_v52, %v1258_v53  ;;  %v7979_v1 = vcombine.low %v1254_v52, %v1258_v53  ;;  %v1282_v16 = vld [vmem:[%s16390_s26 + $0x268] sm:$0xff]  ;;  %16424 = vst [vmem:[#allocation36_spill] sm:$0xff] %v8033_v25  ;;  %v1277_v49 = vld [vmem:[%s16390_s26 + $0x240] sm:$0xff] }
  0x3a   : > { %16408 = vst [vmem:[#allocation20_spill] sm:$0xff] %v7937_v51  ;;  %16409 = vst [vmem:[#allocation21_spill] sm:$0xff] %v7946_v54  ;;  %v8030_v24 = vcombine.high %v1278_v15, %v1282_v16  ;;  %v1290_v28 = vld [vmem:[%s16390_s26 + $0x2a8] sm:$0xff]  ;;  %v8045_v33 = vcombine.low %v1278_v15, %v1282_v16  ;;  %v1281_v52 = vld [vmem:[%s16390_s26 + $0x260] sm:$0xff] }
  0x3b   : > { %1046 = vmatpush1.bf16.msra.mxu1 %v7235_v56  ;;  %16410 = vst [vmem:[#allocation22_spill] sm:$0xff] %v7949_v55  ;;  %v1237_v56 = vld [vmem:[%s16390_s26 + $0x100] sm:$0xff]  ;;  %16411 = vst [vmem:[#allocation23_spill] sm:$0xff] %v7958_v58  ;;  %v1294_v42 = vld [vmem:[%s16390_s26 + $0x2c8] sm:$0xff] }
  0x3c   : > { %1121 = vmatprep.subr.bf16.mxu1 %v7216_v59  ;;  %1167 = vmatpush1.bf16.msra.mxu0 %v7233_v60  ;;  %v1262_v59 = vld [vmem:[%s16390_s26 + $0x1c8] sm:$0xff]  ;;  %16412 = vst [vmem:[#allocation24_spill] sm:$0xff] %v7967_v61  ;;  %16414 = vst [vmem:[#allocation26_spill] sm:$0xff] %v7979_v1 }
  0x3d   : > { %1168 = vmatprep.subr.bf16.mxu0 %v7242_v63  ;;  %v1266_v60 = vld [vmem:[%s16390_s26 + $0x1e8] sm:$0xff]  ;;  %v1249_v63 = vld [vmem:[%s16390_s26 + $0x160] sm:$0xff]  ;;  %16423 = vst [vmem:[#allocation35_spill] sm:$0xff] %v8030_v24  ;;  %16426 = vst [vmem:[#allocation38_spill] sm:$0xff] %v8045_v33 }
  0x3e   : > { %7243 = vmatmul.mubr.msk.bf16.vlgmr.msra.gmra.mrb[4].mxu1 %vm802_vm0, %v7746_v30  ;;  %v7982_v2 = vcombine.high %v1262_v59, %v1266_v60  ;;  %v7994_v7 = vcombine.high %v1245_v62, %v1249_v63  ;;  %v1298_v45 = vld [vmem:[%s16390_s26 + $0x2e8] sm:$0xff] }
  0x3f   : > { %1122 = vmatpush1.bf16.msra.mxu1 %v7215_v0  ;;  %1153 = vmatprep.mubr.bf16.mxu1 %v15573_v3  ;;  %v7976_v0 = vcombine.high %v1237_v56, %v1241_v57  ;;  %v8078_v53 = vcombine.high %v1294_v42, %v1298_v45  ;;  %v1314_v15 = vld [vmem:[%s16390_s26 + $0x368] sm:$0xff] }
  0x40   : > { %1123 = vmatprep.subr.bf16.mxu1 %v7224_v4  ;;  %1169 = vmatpush1.bf16.msra.mxu0 %v7241_v5  ;;  %16415 = vst [vmem:[#allocation27_spill] sm:$0xff] %v7982_v2  ;;  %v7985_v4 = vcombine.low %v1237_v56, %v1241_v57  ;;  %v1270_v5 = vld [vmem:[%s16390_s26 + $0x208] sm:$0xff]  ;;  %16417 = vst [vmem:[#allocation29_spill] sm:$0xff] %v7994_v7 }
  0x41   : > { %2014 = vmatprep.subr.bf16.mxu0 %v7822_v8  ;;  %16413 = vst [vmem:[#allocation25_spill] sm:$0xff] %v7976_v0  ;;  %v8006_v12 = vcombine.high %v1270_v5, %v1274_v6  ;;  %v8021_v20 = vcombine.low %v1270_v5, %v1274_v6  ;;  %16431 = vst [vmem:[#allocation43_spill] sm:$0xff] %v8078_v53  ;;  %v1302_v57 = vld [vmem:[%s16390_s26 + $0x308] sm:$0xff]  ;;  %v1289_v5 = vld [vmem:[%s16390_s26 + $0x2a0] sm:$0xff] }
  0x42   : > { %16416 = vst [vmem:[#allocation28_spill] sm:$0xff] %v7985_v4 }
  0x43   : > { %1124 = vmatpush1.bf16.msra.mxu1 %v7223_v9  ;;  %7246 = vmatmul.mubr.msk.bf16.vlgmr.msra.gmra.mrb[4].mxu0 %vm802_vm0, %v7746_v30  ;;  %v7997_v9 = vcombine.low %v1262_v59, %v1266_v60  ;;  %16419 = vst [vmem:[#allocation31_spill] sm:$0xff] %v8006_v12  ;;  %16422 = vst [vmem:[#allocation34_spill] sm:$0xff] %v8021_v20  ;;  %v1306_v59 = vld [vmem:[%s16390_s26 + $0x328] sm:$0xff]  ;;  %v8090_v60 = vcombine.high %v1277_v49, %v1281_v52 }
  0x44   : > { %1125 = vmatprep.subr.bf16.mxu1 %v7232_v13  ;;  %2015 = vmatpush1.bf16.msra.mxu0 %v7832_v14  ;;  %v8009_v13 = vcombine.low %v1245_v62, %v1249_v63  ;;  %v8093_v62 = vcombine.low %v1294_v42, %v1298_v45  ;;  %v1285_v63 = vld [vmem:[%s16390_s26 + $0x280] sm:$0xff]  ;;  %v8102_v6 = vcombine.high %v1302_v57, %v1306_v59  ;;  %v1322_v42 = vld [vmem:[%s16390_s26 + $0x3a8] sm:$0xff] }
  0x45   : > { %2046 = vmatprep.mubr.bf16.mxu0 %v7840_v17  ;;  %2016 = vmatprep.subr.bf16.mxu0 %v7843_v18  ;;  %16418 = vst [vmem:[#allocation30_spill] sm:$0xff] %v7997_v9  ;;  %16433 = vst [vmem:[#allocation45_spill] sm:$0xff] %v8090_v60  ;;  %v8114_v16 = vcombine.high %v1285_v63, %v1289_v5 }
  0x46   : > { %16420 = vst [vmem:[#allocation32_spill] sm:$0xff] %v8009_v13  ;;  %16434 = vst [vmem:[#allocation46_spill] sm:$0xff] %v8093_v62 }
  0x47   : > { %1126 = vmatpush1.bf16.msra.mxu1 %v7231_v19  ;;  %v8018_v19 = vcombine.high %v1253_v10, %v1257_v11  ;;  %16435 = vst [vmem:[#allocation47_spill] sm:$0xff] %v8102_v6  ;;  %v8105_v10 = vcombine.low %v1277_v49, %v1281_v52  ;;  %v1310_v11 = vld [vmem:[%s16390_s26 + $0x348] sm:$0xff]  ;;  %16437 = vst [vmem:[#allocation49_spill] sm:$0xff] %v8114_v16  ;;  %v1301_v52 = vld [vmem:[%s16390_s26 + $0x300] sm:$0xff] }
  0x48   : > { %1127 = vmatprep.subr.bf16.mxu1 %v7240_v22  ;;  %2017 = vmatpush1.bf16.msra.mxu0 %v7854_v23  ;;  %v1265_v22 = vld [vmem:[%s16390_s26 + $0x1e0] sm:$0xff]  ;;  %v8141_v49 = vcombine.low %v1310_v11, %v1314_v15 }
  0x49   : > { %2018 = vmatprep.subr.bf16.mxu0 %v7864_v26  ;;  %16421 = vst [vmem:[#allocation33_spill] sm:$0xff] %v8018_v19  ;;  %v8042_v29 = vcombine.high %v1261_v21, %v1265_v22  ;;  %v8057_v41 = vcombine.low %v1261_v21, %v1265_v22  ;;  %16436 = vst [vmem:[#allocation48_spill] sm:$0xff] %v8105_v10  ;;  %v8117_v21 = vcombine.low %v1302_v57, %v1306_v59  ;;  %v1293_v22 = vld [vmem:[%s16390_s26 + $0x2c0] sm:$0xff] }
  0x4a   : > { %16442 = vst [vmem:[#allocation54_spill] sm:$0xff] %v8141_v49  ;;  %v1305_v57 = vld [vmem:[%s16390_s26 + $0x320] sm:$0xff] }
  0x4b   : > { %1128 = vmatpush1.bf16.msra.mxu1 %v7239_v27  ;;  %v1286_v27 = vld [vmem:[%s16390_s26 + $0x288] sm:$0xff]  ;;  %16425 = vst [vmem:[#allocation37_spill] sm:$0xff] %v8042_v29  ;;  %16428 = vst [vmem:[#allocation40_spill] sm:$0xff] %v8057_v41 }
  0x4c   : > { %1973 = vmatprep.subr.bf16.mxu1 %v7872_v31  ;;  %2019 = vmatpush1.bf16.msra.mxu0 %v7875_v32  ;;  %v8069_v48 = vcombine.low %v1286_v27, %v1290_v28  ;;  %16438 = vst [vmem:[#allocation50_spill] sm:$0xff] %v8117_v21 }
  0x4d   : > { %2020 = vmatprep.subr.bf16.mxu0 %v7884_v35 }
  0x4e   : > { %7245 = vmatmul.mubr.msk.bf16.vlgmr.msra.gmra.mrb[8].mxu1 %vm802_vm0, %v7746_v30  ;;  %v7925_v30 = vcombine.low %v1238_v37, %v1242_v38  ;;  %v1273_v37 = vld [vmem:[%s16390_s26 + $0x220] sm:$0xff]  ;;  %v8054_v38 = vcombine.high %v1286_v27, %v1290_v28  ;;  %16430 = vst [vmem:[#allocation42_spill] sm:$0xff] %v8069_v48  ;;  %v8126_v28 = vcombine.high %v1310_v11, %v1314_v15  ;;  %v1330_v11 = vld [vmem:[%s16390_s26 + $0x3e8] sm:$0xff] }
  0x4f   : > { %1974 = vmatpush1.bf16.msra.mxu1 %v7886_v36  ;;  %2005 = vmatprep.mubr.bf16.mxu1 %v7840_v17  ;;  %v8066_v46 = vcombine.high %v1269_v34, %v1273_v37  ;;  %v8081_v56 = vcombine.low %v1269_v34, %v1273_v37  ;;  %v1297_v27 = vld [vmem:[%s16390_s26 + $0x2e0] sm:$0xff]  ;;  %v8129_v34 = vcombine.low %v1285_v63, %v1289_v5  ;;  %v1318_v37 = vld [vmem:[%s16390_s26 + $0x388] sm:$0xff] }
  0x50   : > { %1975 = vmatprep.subr.bf16.mxu1 %v7895_v39  ;;  %2021 = vmatpush1.bf16.msra.mxu0 %v7898_v40  ;;  %16406 = vst [vmem:[#allocation18_spill] sm:$0xff] %v7925_v30  ;;  %16427 = vst [vmem:[#allocation39_spill] sm:$0xff] %v8054_v38  ;;  %v8138_v45 = vcombine.high %v1293_v22, %v1297_v27  ;;  %v8150_v59 = vcombine.high %v1318_v37, %v1322_v42  ;;  %v1326_v5 = vld [vmem:[%s16390_s26 + $0x3c8] sm:$0xff] }
  0x51   : > { %2022 = vmatprep.subr.bf16.mxu0 %v7907_v43  ;;  %16429 = vst [vmem:[#allocation41_spill] sm:$0xff] %v8066_v46  ;;  %16432 = vst [vmem:[#allocation44_spill] sm:$0xff] %v8081_v56  ;;  %v8153_v63 = vcombine.low %v1293_v22, %v1297_v27  ;;  %v8162_v15 = vcombine.high %v1301_v52, %v1305_v57  ;;  %v8165_v3 = vcombine.low %v1318_v37, %v1322_v42  ;;  %v1309_v22 = vld [vmem:[%s16390_s26 + $0x340] sm:$0xff]  ;;  %v1208_v37 = vld [vmem:[%s16390_s26 + $0x18] sm:$0xff] }
  0x52   : > { %16439 = vst [vmem:[#allocation51_spill] sm:$0xff] %v8126_v28  ;;  %16440 = vst [vmem:[#allocation52_spill] sm:$0xff] %v8129_v34  ;;  %v1313_v27 = vld [vmem:[%s16390_s26 + $0x360] sm:$0xff]  ;;  %v1212_v42 = vld [vmem:[%s16390_s26 + $0x38] sm:$0xff] }
  0x53   : > { %1976 = vmatpush1.bf16.msra.mxu1 %v7912_v44  ;;  %16441 = vst [vmem:[#allocation53_spill] sm:$0xff] %v8138_v45  ;;  %16443 = vst [vmem:[#allocation55_spill] sm:$0xff] %v8150_v59 }
  0x54   : > { %1977 = vmatprep.subr.bf16.mxu1 %v7922_v47  ;;  %2023 = vmatpush1.bf16.msra.mxu0 %v7925_v30  ;;  %16444 = vst [vmem:[#allocation56_spill] sm:$0xff] %v8153_v63  ;;  %16445 = vst [vmem:[#allocation57_spill] sm:$0xff] %v8162_v15 }
  0x55   : > { %2024 = vmatprep.subr.bf16.mxu0 %v7934_v50  ;;  %16446 = vst [vmem:[#allocation58_spill] sm:$0xff] %v8165_v3 }
  0x57   : > { %1978 = vmatpush1.bf16.msra.mxu1 %v7937_v51 }
  0x58   : > { %1979 = vmatprep.subr.bf16.mxu1 %v7946_v54  ;;  %2025 = vmatpush1.bf16.msra.mxu0 %v7949_v55 }
  0x59   : > { %2026 = vmatprep.subr.bf16.mxu0 %v7958_v58 }
  0x5b   : > { %1980 = vmatpush1.bf16.msra.mxu1 %v7967_v61 }
  0x5c   : > { %1981 = vmatprep.subr.bf16.mxu1 %v7976_v0  ;;  %2027 = vmatpush1.bf16.msra.mxu0 %v7979_v1 }
  0x5d   : > { %2028 = vmatprep.subr.bf16.mxu0 %v7982_v2 }
  0x5f   : > { %1982 = vmatpush1.bf16.msra.mxu1 %v7985_v4 }
  0x60   : > { %1983 = vmatprep.subr.bf16.mxu1 %v7994_v7  ;;  %2029 = vmatpush1.bf16.msra.mxu0 %v7997_v9 }
  0x61   : > { %2030 = vmatprep.subr.bf16.mxu0 %v8006_v12 }
  0x63   : > { %1984 = vmatpush1.bf16.msra.mxu1 %v8009_v13 }
  0x64   : > { %1985 = vmatprep.subr.bf16.mxu1 %v8018_v19  ;;  %2031 = vmatpush1.bf16.msra.mxu0 %v8021_v20 }
  0x65   : > { %2032 = vmatprep.subr.bf16.mxu0 %v8030_v24 }
  0x67   : > { %1986 = vmatpush1.bf16.msra.mxu1 %v8033_v25 }
  0x68   : > { %1987 = vmatprep.subr.bf16.mxu1 %v8042_v29  ;;  %2033 = vmatpush1.bf16.msra.mxu0 %v8045_v33 }
  0x69   : > { %2034 = vmatprep.subr.bf16.mxu0 %v8054_v38 }
  0x6b   : > { %1988 = vmatpush1.bf16.msra.mxu1 %v8057_v41  ;;  %v8216_v41 = vcombine.low %v1208_v37, %v1212_v42 }
  0x6c   : > { %1989 = vmatprep.subr.bf16.mxu1 %v8066_v46  ;;  %2035 = vmatpush1.bf16.msra.mxu0 %v8069_v48 }
  0x6d   : > { %2036 = vmatprep.subr.bf16.mxu0 %v8078_v53  ;;  %16454 = vst [vmem:[#allocation66_spill] sm:$0xff] %v8216_v41 }
  0x6f   : > { %1990 = vmatpush1.bf16.msra.mxu1 %v8081_v56 }
  0x70   : > { %1991 = vmatprep.subr.bf16.mxu1 %v8090_v60  ;;  %2037 = vmatpush1.bf16.msra.mxu0 %v8093_v62  ;;  %v723_v60 = vld [vmem:[%s7812_s0] sm:$0xff] }
  0x71   : > { %2038 = vmatprep.subr.bf16.mxu0 %v8102_v6  ;;  %v8210_v56 = vpack.c.bf16 %v723_v60, %v723_v60 }
  0x73   : > { %1992 = vmatpush1.bf16.msra.mxu1 %v8105_v10  ;;  %v8189_v10 = vcombine.low %v1326_v5, %v1330_v11 }
  0x74   : > { %1993 = vmatprep.subr.bf16.mxu1 %v8114_v16  ;;  %2039 = vmatpush1.bf16.msra.mxu0 %v8117_v21  ;;  %v8186_v16 = vcombine.high %v1309_v22, %v1313_v27 }
  0x75   : > { %2040 = vmatprep.subr.bf16.mxu0 %v8126_v28  ;;  %16450 = vst [vmem:[#allocation62_spill] sm:$0xff] %v8189_v10 }
  0x76   : > { %16449 = vst [vmem:[#allocation61_spill] sm:$0xff] %v8186_v16 }
  0x77   : > { %1994 = vmatpush1.bf16.msra.mxu1 %v8129_v34  ;;  %v8174_v34 = vcombine.high %v1326_v5, %v1330_v11  ;;  %v1216_v5 = vld [vmem:[%s16390_s26 + $0x58] sm:$0xff] }
  0x78   : > { %1995 = vmatprep.subr.bf16.mxu1 %v8138_v45  ;;  %2041 = vmatpush1.bf16.msra.mxu0 %v8141_v49  ;;  %v8177_v45 = vcombine.low %v1301_v52, %v1305_v57  ;;  %v1317_v52 = vld [vmem:[%s16390_s26 + $0x380] sm:$0xff]  ;;  %v1220_v11 = vld [vmem:[%s16390_s26 + $0x78] sm:$0xff] }
  0x79   : > { %2042 = vmatprep.subr.bf16.mxu0 %v8150_v59  ;;  %16447 = vst [vmem:[#allocation59_spill] sm:$0xff] %v8174_v34  ;;  %v1321_v57 = vld [vmem:[%s16390_s26 + $0x3a0] sm:$0xff]  ;;  %v8225_v60 = vcombine.high %v1216_v5, %v1220_v11  ;;  %v8241_v29 = vcombine.low %v1216_v5, %v1220_v11  ;;  %v1232_v5 = vld [vmem:[%s16390_s26 + $0xd8] sm:$0xff] }
  0x7a   : > { %16448 = vst [vmem:[#allocation60_spill] sm:$0xff] %v8177_v45  ;;  %v8213_v46 = vcombine.high %v1317_v52, %v1321_v57  ;;  %v1236_v11 = vld [vmem:[%s16390_s26 + $0xf8] sm:$0xff] }
  0x7b   : > { %1996 = vmatpush1.bf16.msra.mxu1 %v8153_v63  ;;  %v8199_v63 = vcombine.high %v1208_v37, %v1212_v42  ;;  %16455 = vst [vmem:[#allocation67_spill] sm:$0xff] %v8225_v60  ;;  %v1224_v37 = vld [vmem:[%s16390_s26 + $0x98] sm:$0xff]  ;;  %16458 = vst [vmem:[#allocation70_spill] sm:$0xff] %v8241_v29 }
  0x7c   : > { %1997 = vmatprep.subr.bf16.mxu1 %v8162_v15  ;;  %2043 = vmatpush1.bf16.msra.mxu0 %v8165_v3  ;;  %v8202_v15 = vcombine.low %v1309_v22, %v1313_v27  ;;  %16453 = vst [vmem:[#allocation65_spill] sm:$0xff] %v8213_v46  ;;  %v1325_v22 = vld [vmem:[%s16390_s26 + $0x3c0] sm:$0xff]  ;;  %v1228_v42 = vld [vmem:[%s16390_s26 + $0xb8] sm:$0xff] }
  0x7d   : > { %2044 = vmatprep.subr.bf16.mxu0 %v8174_v34  ;;  %16451 = vst [vmem:[#allocation63_spill] sm:$0xff] %v8199_v63  ;;  %v1329_v27 = vld [vmem:[%s16390_s26 + $0x3e0] sm:$0xff] }
  0x7e   : > { %16452 = vst [vmem:[#allocation64_spill] sm:$0xff] %v8202_v15 }
  0x7f   : > { %1998 = vmatpush1.bf16.msra.mxu1 %v8177_v45  ;;  %v8238_v45 = vcombine.high %v1325_v22, %v1329_v27 }
  0x80   : > { %1999 = vmatprep.subr.bf16.mxu1 %v8186_v16  ;;  %2045 = vmatpush1.bf16.msra.mxu0 %v8189_v10  ;;  %v8228_v16 = vcombine.low %v1317_v52, %v1321_v57  ;;  %v1207_v52 = vld [vmem:[%s16390_s26 + $0x10] sm:$0xff] }
  0x81   : > { %2096 = vmatprep.subr.bf16.mxu0 %v8199_v63  ;;  %16457 = vst [vmem:[#allocation69_spill] sm:$0xff] %v8238_v45  ;;  %v1211_v57 = vld [vmem:[%s16390_s26 + $0x30] sm:$0xff] }
  0x82   : > { %16456 = vst [vmem:[#allocation68_spill] sm:$0xff] %v8228_v16 }
  0x83   : > { %2000 = vmatpush1.bf16.msra.mxu1 %v8202_v15  ;;  %2047 = vmatmul.mubr.bf16.vlgmr.msra.gmra.mrb[8].mxu0 %v8210_v56  ;;  %v8251_v15 = vcombine.high %v1224_v37, %v1228_v42 }
  0x84   : > { %2001 = vmatprep.subr.bf16.mxu1 %v8213_v46  ;;  %2097 = vmatpush1.bf16.msra.mxu0 %v8216_v41  ;;  %v8254_v46 = vcombine.low %v1325_v22, %v1329_v27  ;;  %v8263_v41 = vcombine.high %v1207_v52, %v1211_v57  ;;  %v1215_v22 = vld [vmem:[%s16390_s26 + $0x50] sm:$0xff] }
  0x85   : > { %2128 = vmatprep.mubr.bf16.mxu0 %v7840_v17  ;;  %2098 = vmatprep.subr.bf16.mxu0 %v8225_v60  ;;  %16459 = vst [vmem:[#allocation71_spill] sm:$0xff] %v8251_v15  ;;  %v8266_v60 = vcombine.low %v1224_v37, %v1228_v42  ;;  %v1219_v27 = vld [vmem:[%s16390_s26 + $0x70] sm:$0xff]  ;;  %v1240_v37 = vld [vmem:[%s16390_s26 + $0x118] sm:$0xff] }
  0x86   : > { %16460 = vst [vmem:[#allocation72_spill] sm:$0xff] %v8254_v46  ;;  %16461 = vst [vmem:[#allocation73_spill] sm:$0xff] %v8263_v41  ;;  %v1244_v42 = vld [vmem:[%s16390_s26 + $0x138] sm:$0xff] }
  0x87   : > { %2002 = vmatpush1.bf16.msra.mxu1 %v8228_v16  ;;  %16462 = vst [vmem:[#allocation74_spill] sm:$0xff] %v8266_v60  ;;  %v8275_v16 = vcombine.high %v1232_v5, %v1236_v11 }
  0x88   : > { %2003 = vmatprep.subr.bf16.mxu1 %v8238_v45  ;;  %2099 = vmatpush1.bf16.msra.mxu0 %v8241_v29  ;;  %v8278_v45 = vcombine.low %v1207_v52, %v1211_v57  ;;  %v8287_v29 = vcombine.high %v1215_v22, %v1219_v27  ;;  %v1223_v52 = vld [vmem:[%s16390_s26 + $0x90] sm:$0xff] }
  0x89   : > { %2100 = vmatprep.subr.bf16.mxu0 %v8251_v15  ;;  %16463 = vst [vmem:[#allocation75_spill] sm:$0xff] %v8275_v16  ;;  %v8290_v15 = vcombine.low %v1232_v5, %v1236_v11  ;;  %v1227_v57 = vld [vmem:[%s16390_s26 + $0xb0] sm:$0xff]  ;;  %v1248_v5 = vld [vmem:[%s16390_s26 + $0x158] sm:$0xff] }
  0x8a   : > { %16464 = vst [vmem:[#allocation76_spill] sm:$0xff] %v8278_v45  ;;  %16465 = vst [vmem:[#allocation77_spill] sm:$0xff] %v8287_v29  ;;  %v1252_v11 = vld [vmem:[%s16390_s26 + $0x178] sm:$0xff] }
  0x8b   : > { %2004 = vmatpush1.bf16.msra.mxu1 %v8254_v46  ;;  %16466 = vst [vmem:[#allocation78_spill] sm:$0xff] %v8290_v15  ;;  %v8299_v46 = vcombine.high %v1240_v37, %v1244_v42 }
  0x8c   : > { %2055 = vmatprep.subr.bf16.mxu1 %v8263_v41  ;;  %2101 = vmatpush1.bf16.msra.mxu0 %v8266_v60  ;;  %v8303_v41 = vcombine.low %v1215_v22, %v1219_v27  ;;  %v8316_v60 = vcombine.low %v1240_v37, %v1244_v42  ;;  %v1231_v22 = vld [vmem:[%s16390_s26 + $0xd0] sm:$0xff]  ;;  %v1256_v37 = vld [vmem:[%s16390_s26 + $0x198] sm:$0xff] }
  0x8d   : > { %2102 = vmatprep.subr.bf16.mxu0 %v8275_v16  ;;  %16467 = vst [vmem:[#allocation79_spill] sm:$0xff] %v8299_v46  ;;  %v8313_v16 = vcombine.high %v1223_v52, %v1227_v57  ;;  %v1235_v27 = vld [vmem:[%s16390_s26 + $0xf0] sm:$0xff]  ;;  %v1260_v42 = vld [vmem:[%s16390_s26 + $0x1b8] sm:$0xff] }
  0x8e   : > { %2006 = vmatmul.mubr.bf16.vlgmr.msra.gmra.mrb[12].mxu1 %v8210_v56  ;;  %16468 = vst [vmem:[#allocation80_spill] sm:$0xff] %v8303_v41  ;;  %16470 = vst [vmem:[#allocation82_spill] sm:$0xff] %v8316_v60 }
  0x8f   : > { %2056 = vmatpush1.bf16.msra.mxu1 %v8278_v45  ;;  %2087 = vmatprep.mubr.bf16.mxu1 %v7840_v17  ;;  %16469 = vst [vmem:[#allocation81_spill] sm:$0xff] %v8313_v16  ;;  %v8325_v45 = vcombine.high %v1248_v5, %v1252_v11  ;;  %v8328_v17 = vcombine.low %v1223_v52, %v1227_v57  ;;  %v1239_v52 = vld [vmem:[%s16390_s26 + $0x110] sm:$0xff] }
  0x90   : > { %2057 = vmatprep.subr.bf16.mxu1 %v8287_v29  ;;  %2103 = vmatpush1.bf16.msra.mxu0 %v8290_v15  ;;  %v8337_v15 = vcombine.high %v1231_v22, %v1235_v27  ;;  %v1243_v57 = vld [vmem:[%s16390_s26 + $0x130] sm:$0xff] }
  0x91   : > { %2104 = vmatprep.subr.bf16.mxu0 %v8299_v46  ;;  %16471 = vst [vmem:[#allocation83_spill] sm:$0xff] %v8325_v45  ;;  %16472 = vst [vmem:[#allocation84_spill] sm:$0xff] %v8328_v17  ;;  %v8340_v46 = vcombine.low %v1248_v5, %v1252_v11  ;;  %v1264_v5 = vld [vmem:[%s16390_s26 + $0x1d8] sm:$0xff] }
  0x92   : > { %16473 = vst [vmem:[#allocation85_spill] sm:$0xff] %v8337_v15  ;;  %v1268_v11 = vld [vmem:[%s16390_s26 + $0x1f8] sm:$0xff] }
  0x93   : > { %2058 = vmatpush1.bf16.msra.mxu1 %v8303_v41  ;;  %16474 = vst [vmem:[#allocation86_spill] sm:$0xff] %v8340_v46  ;;  %v8349_v41 = vcombine.high %v1256_v37, %v1260_v42 }
  0x94   : > { %2059 = vmatprep.subr.bf16.mxu1 %v8313_v16  ;;  %2105 = vmatpush1.bf16.msra.mxu0 %v8316_v60  ;;  %v8352_v16 = vcombine.low %v1231_v22, %v1235_v27  ;;  %v8361_v60 = vcombine.high %v1239_v52, %v1243_v57  ;;  %v1247_v22 = vld [vmem:[%s16390_s26 + $0x150] sm:$0xff] }
  0x95   : > { %2106 = vmatprep.subr.bf16.mxu0 %v8325_v45  ;;  %16475 = vst [vmem:[#allocation87_spill] sm:$0xff] %v8349_v41  ;;  %v8364_v45 = vcombine.low %v1256_v37, %v1260_v42  ;;  %v1251_v27 = vld [vmem:[%s16390_s26 + $0x170] sm:$0xff]  ;;  %v1272_v37 = vld [vmem:[%s16390_s26 + $0x218] sm:$0xff] }
  0x96   : > { %16476 = vst [vmem:[#allocation88_spill] sm:$0xff] %v8352_v16  ;;  %16477 = vst [vmem:[#allocation89_spill] sm:$0xff] %v8361_v60  ;;  %v1276_v42 = vld [vmem:[%s16390_s26 + $0x238] sm:$0xff] }
  0x97   : > { %2060 = vmatpush1.bf16.msra.mxu1 %v8328_v17  ;;  %16478 = vst [vmem:[#allocation90_spill] sm:$0xff] %v8364_v45  ;;  %v8373_v17 = vcombine.high %v1264_v5, %v1268_v11 }
  0x98   : > { %2061 = vmatprep.subr.bf16.mxu1 %v8337_v15  ;;  %2107 = vmatpush1.bf16.msra.mxu0 %v8340_v46  ;;  %v8376_v15 = vcombine.low %v1239_v52, %v1243_v57  ;;  %v8385_v46 = vcombine.high %v1247_v22, %v1251_v27  ;;  %v1255_v52 = vld [vmem:[%s16390_s26 + $0x190] sm:$0xff] }
  0x99   : > { %2108 = vmatprep.subr.bf16.mxu0 %v8349_v41  ;;  %16479 = vst [vmem:[#allocation91_spill] sm:$0xff] %v8373_v17  ;;  %v8388_v41 = vcombine.low %v1264_v5, %v1268_v11  ;;  %v1259_v57 = vld [vmem:[%s16390_s26 + $0x1b0] sm:$0xff]  ;;  %v1280_v5 = vld [vmem:[%s16390_s26 + $0x258] sm:$0xff] }
  0x9a   : > { %16480 = vst [vmem:[#allocation92_spill] sm:$0xff] %v8376_v15  ;;  %16481 = vst [vmem:[#allocation93_spill] sm:$0xff] %v8385_v46  ;;  %v1284_v11 = vld [vmem:[%s16390_s26 + $0x278] sm:$0xff] }
  0x9b   : > { %2062 = vmatpush1.bf16.msra.mxu1 %v8352_v16  ;;  %16482 = vst [vmem:[#allocation94_spill] sm:$0xff] %v8388_v41  ;;  %v8397_v16 = vcombine.high %v1272_v37, %v1276_v42 }
  0x9c   : > { %2063 = vmatprep.subr.bf16.mxu1 %v8361_v60  ;;  %2109 = vmatpush1.bf16.msra.mxu0 %v8364_v45  ;;  %v8400_v60 = vcombine.low %v1247_v22, %v1251_v27  ;;  %v8409_v45 = vcombine.high %v1255_v52, %v1259_v57  ;;  %v1263_v22 = vld [vmem:[%s16390_s26 + $0x1d0] sm:$0xff] }
  0x9d   : > { %2110 = vmatprep.subr.bf16.mxu0 %v8373_v17  ;;  %16483 = vst [vmem:[#allocation95_spill] sm:$0xff] %v8397_v16  ;;  %v8412_v17 = vcombine.low %v1272_v37, %v1276_v42  ;;  %v1267_v27 = vld [vmem:[%s16390_s26 + $0x1f0] sm:$0xff]  ;;  %v1288_v37 = vld [vmem:[%s16390_s26 + $0x298] sm:$0xff] }
  0x9e   : > { %16484 = vst [vmem:[#allocation96_spill] sm:$0xff] %v8400_v60  ;;  %16485 = vst [vmem:[#allocation97_spill] sm:$0xff] %v8409_v45  ;;  %v1292_v42 = vld [vmem:[%s16390_s26 + $0x2b8] sm:$0xff] }
  0x9f   : > { %2064 = vmatpush1.bf16.msra.mxu1 %v8376_v15  ;;  %16486 = vst [vmem:[#allocation98_spill] sm:$0xff] %v8412_v17  ;;  %v8421_v15 = vcombine.high %v1280_v5, %v1284_v11 }
  0xa0   : > { %2065 = vmatprep.subr.bf16.mxu1 %v8385_v46  ;;  %2111 = vmatpush1.bf16.msra.mxu0 %v8388_v41  ;;  %v8424_v46 = vcombine.low %v1255_v52, %v1259_v57  ;;  %v8433_v41 = vcombine.high %v1263_v22, %v1267_v27  ;;  %v1271_v52 = vld [vmem:[%s16390_s26 + $0x210] sm:$0xff] }
  0xa1   : > { %2112 = vmatprep.subr.bf16.mxu0 %v8397_v16  ;;  %16487 = vst [vmem:[#allocation99_spill] sm:$0xff] %v8421_v15  ;;  %v8436_v16 = vcombine.low %v1280_v5, %v1284_v11  ;;  %v1275_v57 = vld [vmem:[%s16390_s26 + $0x230] sm:$0xff]  ;;  %v1296_v5 = vld [vmem:[%s16390_s26 + $0x2d8] sm:$0xff] }
  0xa2   : > { %16488 = vst [vmem:[#allocation100_spill] sm:$0xff] %v8424_v46  ;;  %16489 = vst [vmem:[#allocation101_spill] sm:$0xff] %v8433_v41  ;;  %v1300_v11 = vld [vmem:[%s16390_s26 + $0x2f8] sm:$0xff] }
  0xa3   : > { %2066 = vmatpush1.bf16.msra.mxu1 %v8400_v60  ;;  %16490 = vst [vmem:[#allocation102_spill] sm:$0xff] %v8436_v16  ;;  %v8445_v60 = vcombine.high %v1288_v37, %v1292_v42 }
  0xa4   : > { %2067 = vmatprep.subr.bf16.mxu1 %v8409_v45  ;;  %2113 = vmatpush1.bf16.msra.mxu0 %v8412_v17  ;;  %v8448_v45 = vcombine.low %v1263_v22, %v1267_v27  ;;  %v8457_v17 = vcombine.high %v1271_v52, %v1275_v57  ;;  %v1279_v22 = vld [vmem:[%s16390_s26 + $0x250] sm:$0xff] }
  0xa5   : > { %2114 = vmatprep.subr.bf16.mxu0 %v8421_v15  ;;  %16491 = vst [vmem:[#allocation103_spill] sm:$0xff] %v8445_v60  ;;  %v8460_v15 = vcombine.low %v1288_v37, %v1292_v42  ;;  %v1283_v27 = vld [vmem:[%s16390_s26 + $0x270] sm:$0xff]  ;;  %v1304_v37 = vld [vmem:[%s16390_s26 + $0x318] sm:$0xff] }
  0xa6   : > { %16492 = vst [vmem:[#allocation104_spill] sm:$0xff] %v8448_v45  ;;  %16493 = vst [vmem:[#allocation105_spill] sm:$0xff] %v8457_v17  ;;  %v1308_v42 = vld [vmem:[%s16390_s26 + $0x338] sm:$0xff] }
  0xa7   : > { %2068 = vmatpush1.bf16.msra.mxu1 %v8424_v46  ;;  %16494 = vst [vmem:[#allocation106_spill] sm:$0xff] %v8460_v15  ;;  %v8469_v46 = vcombine.high %v1296_v5, %v1300_v11 }
  0xa8   : > { %2069 = vmatprep.subr.bf16.mxu1 %v8433_v41  ;;  %2115 = vmatpush1.bf16.msra.mxu0 %v8436_v16  ;;  %v8472_v41 = vcombine.low %v1271_v52, %v1275_v57  ;;  %v8481_v16 = vcombine.high %v1279_v22, %v1283_v27  ;;  %v1287_v52 = vld [vmem:[%s16390_s26 + $0x290] sm:$0xff] }
  0xa9   : > { %2116 = vmatprep.subr.bf16.mxu0 %v8445_v60  ;;  %16495 = vst [vmem:[#allocation107_spill] sm:$0xff] %v8469_v46  ;;  %v8484_v60 = vcombine.low %v1296_v5, %v1300_v11  ;;  %v1291_v57 = vld [vmem:[%s16390_s26 + $0x2b0] sm:$0xff]  ;;  %v1312_v5 = vld [vmem:[%s16390_s26 + $0x358] sm:$0xff] }
  0xaa   : > { %16496 = vst [vmem:[#allocation108_spill] sm:$0xff] %v8472_v41  ;;  %16497 = vst [vmem:[#allocation109_spill] sm:$0xff] %v8481_v16  ;;  %v1316_v11 = vld [vmem:[%s16390_s26 + $0x378] sm:$0xff] }
  0xab   : > { %2070 = vmatpush1.bf16.msra.mxu1 %v8448_v45  ;;  %16498 = vst [vmem:[#allocation110_spill] sm:$0xff] %v8484_v60  ;;  %v8493_v45 = vcombine.high %v1304_v37, %v1308_v42 }
  0xac   : > { %2071 = vmatprep.subr.bf16.mxu1 %v8457_v17  ;;  %2117 = vmatpush1.bf16.msra.mxu0 %v8460_v15  ;;  %v8496_v17 = vcombine.low %v1279_v22, %v1283_v27  ;;  %v8505_v15 = vcombine.high %v1287_v52, %v1291_v57  ;;  %v1295_v22 = vld [vmem:[%s16390_s26 + $0x2d0] sm:$0xff] }
  0xad   : > { %2118 = vmatprep.subr.bf16.mxu0 %v8469_v46  ;;  %16499 = vst [vmem:[#allocation111_spill] sm:$0xff] %v8493_v45  ;;  %v8508_v46 = vcombine.low %v1304_v37, %v1308_v42  ;;  %v1299_v27 = vld [vmem:[%s16390_s26 + $0x2f0] sm:$0xff]  ;;  %v1320_v37 = vld [vmem:[%s16390_s26 + $0x398] sm:$0xff] }
  0xae   : > { %16500 = vst [vmem:[#allocation112_spill] sm:$0xff] %v8496_v17  ;;  %16501 = vst [vmem:[#allocation113_spill] sm:$0xff] %v8505_v15  ;;  %v1324_v42 = vld [vmem:[%s16390_s26 + $0x3b8] sm:$0xff] }
  0xaf   : > { %2072 = vmatpush1.bf16.msra.mxu1 %v8472_v41  ;;  %16502 = vst [vmem:[#allocation114_spill] sm:$0xff] %v8508_v46  ;;  %v8517_v41 = vcombine.high %v1312_v5, %v1316_v11 }
  0xb0   : > { %2073 = vmatprep.subr.bf16.mxu1 %v8481_v16  ;;  %2119 = vmatpush1.bf16.msra.mxu0 %v8484_v60  ;;  %v8520_v16 = vcombine.low %v1287_v52, %v1291_v57  ;;  %v8529_v60 = vcombine.high %v1295_v22, %v1299_v27  ;;  %v1303_v52 = vld [vmem:[%s16390_s26 + $0x310] sm:$0xff] }
  0xb1   : > { %2120 = vmatprep.subr.bf16.mxu0 %v8493_v45  ;;  %16503 = vst [vmem:[#allocation115_spill] sm:$0xff] %v8517_v41  ;;  %v8532_v45 = vcombine.low %v1312_v5, %v1316_v11  ;;  %v1307_v57 = vld [vmem:[%s16390_s26 + $0x330] sm:$0xff]  ;;  %v1328_v5 = vld [vmem:[%s16390_s26 + $0x3d8] sm:$0xff] }
  0xb2   : > { %16504 = vst [vmem:[#allocation116_spill] sm:$0xff] %v8520_v16  ;;  %16505 = vst [vmem:[#allocation117_spill] sm:$0xff] %v8529_v60  ;;  %v1332_v11 = vld [vmem:[%s16390_s26 + $0x3f8] sm:$0xff] }
  0xb3   : > { %2074 = vmatpush1.bf16.msra.mxu1 %v8496_v17  ;;  %16506 = vst [vmem:[#allocation118_spill] sm:$0xff] %v8532_v45  ;;  %v8541_v17 = vcombine.high %v1320_v37, %v1324_v42 }
  0xb4   : > { %2075 = vmatprep.subr.bf16.mxu1 %v8505_v15  ;;  %2121 = vmatpush1.bf16.msra.mxu0 %v8508_v46  ;;  %v8544_v15 = vcombine.low %v1295_v22, %v1299_v27  ;;  %v8553_v46 = vcombine.high %v1303_v52, %v1307_v57  ;;  %v1311_v22 = vld [vmem:[%s16390_s26 + $0x350] sm:$0xff] }
  0xb5   : > { %2122 = vmatprep.subr.bf16.mxu0 %v8517_v41  ;;  %16507 = vst [vmem:[#allocation119_spill] sm:$0xff] %v8541_v17  ;;  %v8556_v41 = vcombine.low %v1320_v37, %v1324_v42  ;;  %v1315_v27 = vld [vmem:[%s16390_s26 + $0x370] sm:$0xff]  ;;  %v8574_v42 = vcombine.low %v1328_v5, %v1332_v11 }
  0xb6   : > { %16508 = vst [vmem:[#allocation120_spill] sm:$0xff] %v8544_v15  ;;  %16509 = vst [vmem:[#allocation121_spill] sm:$0xff] %v8553_v46  ;;  %v8571_v37 = vcombine.high %v1311_v22, %v1315_v27 }
  0xb7   : > { %2076 = vmatpush1.bf16.msra.mxu1 %v8520_v16  ;;  %16510 = vst [vmem:[#allocation122_spill] sm:$0xff] %v8556_v41  ;;  %v8565_v16 = vcombine.high %v1328_v5, %v1332_v11  ;;  %16514 = vst [vmem:[#allocation126_spill] sm:$0xff] %v8574_v42  ;;  %v1327_v5 = vld [vmem:[%s16390_s26 + $0x3d0] sm:$0xff] }
  0xb8   : > { %2077 = vmatprep.subr.bf16.mxu1 %v8529_v60  ;;  %2123 = vmatpush1.bf16.msra.mxu0 %v8532_v45  ;;  %v8568_v60 = vcombine.low %v1303_v52, %v1307_v57  ;;  %16513 = vst [vmem:[#allocation125_spill] sm:$0xff] %v8571_v37  ;;  %v1319_v45 = vld [vmem:[%s16390_s26 + $0x390] sm:$0xff]  ;;  %v8584_v52 = vcombine.low %v1311_v22, %v1315_v27  ;;  %v16519_v27 = vmov 0  }
  0xb9   : > { %2124 = vmatprep.subr.bf16.mxu0 %v8541_v17  ;;  %16511 = vst [vmem:[#allocation123_spill] sm:$0xff] %v8565_v16  ;;  %v1323_v17 = vld [vmem:[%s16390_s26 + $0x3b0] sm:$0xff] }
  0xba   : > { %16512 = vst [vmem:[#allocation124_spill] sm:$0xff] %v8568_v60  ;;  %16515 = vst [vmem:[#allocation127_spill] sm:$0xff] %v8584_v52  ;;  %v8587_v57 = vcombine.high %v1319_v45, %v1323_v17  ;;  %v1331_v11 = vld [vmem:[%s16390_s26 + $0x3f0] sm:$0xff]  ;;  %s7441_s26 = sshll.u32 %s17761_s30, 6 }
  0xbb   : > { %2078 = vmatpush1.bf16.msra.mxu1 %v8544_v15  ;;  %v8601_v22 = vcombine.high %v1327_v5, %v1331_v11 }
  0xbc   : > { %2079 = vmatprep.subr.bf16.mxu1 %v8553_v46  ;;  %2125 = vmatpush1.bf16.msra.mxu0 %v8556_v41  ;;  %16516 = vst [vmem:[#allocation128_spill] sm:$0xff] %v8587_v57 }
  0xbd   : > { %2126 = vmatprep.subr.bf16.mxu0 %v8565_v16  ;;  %v8597_v16 = vcombine.low %v1319_v45, %v1323_v17  ;;  %16518 = vst [vmem:[#allocation130_spill] sm:$0xff] %v8601_v22 }
  0xbf   : > { %2080 = vmatpush1.bf16.msra.mxu1 %v8568_v60  ;;  %16517 = vst [vmem:[#allocation129_spill] sm:$0xff] %v8597_v16 }
  0xc0   : > { %2081 = vmatprep.subr.bf16.mxu1 %v8571_v37  ;;  %2127 = vmatpush1.bf16.msra.mxu0 %v8574_v42  ;;  %v8605_v42 = vcombine.low %v1327_v5, %v1331_v11 }
  0xc2   : > { %16520 = vst [vmem:[#allocation131_spill] sm:$0xff] %v8605_v42 }
  0xc3   : > { %2082 = vmatpush1.bf16.msra.mxu1 %v8584_v52  ;;  %2129 = vmatmul.mubr.bf16.vlgmr.msra.gmra.mrb[12].mxu0 %v8210_v56 }
  0xc4   : > { %2083 = vmatprep.subr.bf16.mxu1 %v8587_v57  ;;  %2984 = vmatprep.mubr.bf16.mxu0 %v16519_v27 }
  0xc7   : > { %2084 = vmatpush1.bf16.msra.mxu1 %v8597_v16 }
  0xc8   : > { %2085 = vmatprep.subr.bf16.mxu1 %v8601_v22 }
  0xcb   : > { %2086 = vmatpush1.bf16.msra.mxu1 %v8605_v42 }
  0xce   : > { %2088 = vmatmul.mubr.bf16.vlgmr.msra.gmra.mrb[16].mxu1 %v8210_v56 }
  0xcf   : > { %2347 = vmatprep.mubr.bf16.mxu1 %v16519_v27 }
 0x101   : > { %v8611_v45 = vpop.f32.mrb[0].mxu1 }
 0x102   : > { %2160 = vrot.lane.b32.xlu1 %v8611_v45, %s15671_s21  ;;  %2141 = vrot.lane.b32.xlu0 %v8611_v45, %s15673_s1  ;;  %v8617_v17 = vpop.f32.mrb[1].mxu1 }
 0x103   : > { %v844_v5 = vpop.f32.mrb[2].mxu1 }
 0x104   : > { %v845_v11 = vpop.f32.mrb[3].mxu1 }
 0x106   : > { %2177 = vrot.lane.b32.xlu0 %v8611_v45, %s15669_s6  ;;  %2162 = vrot.lane.b32.xlu1 %v8617_v17, %s15671_s21  ;;  %v8623_v56 = vpop.f32.mrb[0].mxu0  ;;  %s16551_s21 = smov 33  }
 0x107   : > { %16521 = vst [vmem:[#allocation132_spill] sm:$0xff] %v8623_v56  ;;  %v8625_v42 = vpop.f32.mrb[1].mxu0 }
 0x108   : > { %16522 = vst [vmem:[#allocation133_spill] sm:$0xff] %v8625_v42  ;;  %v1118_v22 = vpop.f32.mrb[2].mxu0 }
 0x109   : > { %v1119_v5 = vpop.f32.mrb[3].mxu0 }
 0x10a   : > { %2194 = vrot.lane.b32.xlu0 %v8611_v45, %s15778_s25  ;;  %2179 = vrot.lane.b32.xlu1 %v8617_v17, %s15669_s6  ;;  %s16656_s6 = smov 113  }
 0x10e   : > { %2196 = vrot.lane.b32.xlu1 %v8617_v17, %s15778_s25  ;;  %2143 = vrot.lane.b32.xlu0 %v8617_v17, %s15673_s1  ;;  %s16530_s1 = sld [smem:[#allocation248_spill]] }
 0x111   : > { %v8635_v11 = vpop.f32.mrb[4].mxu1 }
 0x112   : > { %2213 = vrot.lane.b32.xlu1 %v8617_v17, %s15710_s5  ;;  %2211 = vrot.lane.b32.xlu0 %v8611_v45, %s15710_s5  ;;  %v8641_v22 = vpop.f32.mrb[5].mxu1 }
 0x113   : > { %v1077_v41 = vpop.f32.mrb[6].mxu1 }
 0x114   : > { %v1078_v16 = vpop.f32.mrb[7].mxu1  ;;  %v8771_v61 = vld [vmem:[%s16530_s1] sm:$0xff] }
 0x115   : > { %v2140_v16 = vld [vmem:[%s16525_s9 + $0x8] sm:$0xff] }
 0x116   : > { %2230 = vrot.lane.b32.xlu1 %v8617_v17, %s15659_s24  ;;  %2228 = vrot.lane.b32.xlu0 %v8611_v45, %s15659_s24  ;;  %v8647_v5 = vpop.f32.mrb[4].mxu0  ;;  %s15708_s24 = smov 96  }
 0x117   : > { %16523 = vst [vmem:[#allocation134_spill] sm:$0xff] %v8647_v5  ;;  %v8649_v57 = vpop.f32.mrb[5].mxu0 }
 0x118   : > { %16524 = vst [vmem:[#allocation135_spill] sm:$0xff] %v8649_v57  ;;  %v1200_v52 = vpop.f32.mrb[6].mxu0 }
 0x119   : > { %v1201_v41 = vpop.f32.mrb[7].mxu0 }
 0x11a   : > { %2247 = vrot.lane.b32.xlu1 %v8617_v17, %s15653_s2  ;;  %2245 = vrot.lane.b32.xlu0 %v8611_v45, %s15653_s2  ;;  %v2139_v41 = vld [vmem:[%s16525_s9] sm:$0xff]  ;;  %s15776_s2 = smov 31   ;;  %s16658_s9 = smov 111  }
 0x11e   : > { %2264 = vrot.lane.b32.xlu1 %v8617_v17, %s15657_s3  ;;  %2262 = vrot.lane.b32.xlu0 %v8611_v45, %s15657_s3  ;;  %s15720_s3 = smov 95  }
 0x121   : > { %v8662_v52 = vpop.f32.mrb[8].mxu1 }
 0x122   : > { %2625 = vrot.lane.b32.xlu1 %v8623_v56, %s15710_s5  ;;  %2296 = vperm.xlu0 %7467, %v2140_v16   ;;  %v8666_v37 = vpop.f32.mrb[9].mxu1 }
 0x123   : > { %v1159_v60 = vpop.f32.mrb[10].mxu1 }
 0x124   : > { %v1160_v46 = vpop.f32.mrb[11].mxu1 }
 0x126   : > { %2291 = vperm.xlu1 %7466, %v2139_v41   ;;  %2819 = vrot.lane.b32.xlu0 %v8623_v56, %s15720_s3 }
 0x12a   : > { %2689 = vrot.lane.b32.xlu1 %v8623_v56, %s15729_s28  ;;  %2433 = vrot.lane.b32.xlu0 %v8625_v42, %s15676_s4 }
 0x12e   : > { %2754 = vrot.lane.b32.xlu1 %v8623_v56, %s15708_s24  ;;  %2563 = vrot.lane.b32.xlu0 %v8625_v42, %s15778_s25 }
 0x132   : > { %2368 = vrot.lane.b32.xlu1 %v8625_v42, %s15678_s27  ;;  %2362 = vrot.lane.b32.xlu0 %v8635_v11, %s15678_s27 }
 0x136   : > { %2498 = vrot.lane.b32.xlu1 %v8625_v42, %s15776_s2  ;;  %2427 = vrot.lane.b32.xlu0 %v8635_v11, %s15676_s4 }
 0x13a   : > { %2685 = vrot.lane.b32.xlu1 %v8635_v11, %s15729_s28  ;;  %2492 = vrot.lane.b32.xlu0 %v8635_v11, %s15776_s2 }
 0x13e   : > { %2750 = vrot.lane.b32.xlu1 %v8635_v11, %s15708_s24  ;;  %2557 = vrot.lane.b32.xlu0 %v8635_v11, %s15778_s25 }
 0x142   : > { %2697 = vrot.lane.b32.xlu1 %v8647_v5, %s15729_s28  ;;  %2621 = vrot.lane.b32.xlu0 %v8635_v11, %s15710_s5 }
 0x146   : > { %2762 = vrot.lane.b32.xlu1 %v8647_v5, %s15708_s24  ;;  %2815 = vrot.lane.b32.xlu0 %v8635_v11, %s15720_s3 }
 0x14a   : > { %2633 = vrot.lane.b32.xlu0 %v8647_v5, %s15710_s5  ;;  %2364 = vrot.lane.b32.xlu1 %v8641_v22, %s15678_s27 }
 0x14e   : > { %2827 = vrot.lane.b32.xlu0 %v8647_v5, %s15720_s3  ;;  %2429 = vrot.lane.b32.xlu1 %v8641_v22, %s15676_s4 }
 0x152   : > { %2376 = vrot.lane.b32.xlu0 %v8649_v57, %s15678_s27  ;;  %2441 = vrot.lane.b32.xlu1 %v8649_v57, %s15676_s4 }
 0x156   : > { %2506 = vrot.lane.b32.xlu0 %v8649_v57, %s15776_s2  ;;  %2494 = vrot.lane.b32.xlu1 %v8641_v22, %s15776_s2  ;;  %v8721_v46 = vpop.f32.mrb[8].mxu0 }
 0x157   : > { %16526 = vst [vmem:[#allocation136_spill] sm:$0xff] %v8721_v46  ;;  %v8723_v60 = vpop.f32.mrb[9].mxu0 }
 0x158   : > { %16527 = vst [vmem:[#allocation137_spill] sm:$0xff] %v8723_v60  ;;  %v2052_v16 = vpop.f32.mrb[10].mxu0 }
 0x159   : > { %v2053_v41 = vpop.f32.mrb[11].mxu0 }
 0x15a   : > { %2623 = vrot.lane.b32.xlu0 %v8641_v22, %s15710_s5  ;;  %2559 = vrot.lane.b32.xlu1 %v8641_v22, %s15778_s25 }
 0x15e   : > { %2687 = vrot.lane.b32.xlu0 %v8641_v22, %s15729_s28  ;;  %2571 = vrot.lane.b32.xlu1 %v8649_v57, %s15778_s25 }
 0x161   : > { %v8733_v15 = vpop.f32.mrb[12].mxu1 }
 0x162   : > { %2752 = vrot.lane.b32.xlu0 %v8641_v22, %s15708_s24  ;;  %2817 = vrot.lane.b32.xlu1 %v8641_v22, %s15720_s3  ;;  %v8739_v16 = vpop.f32.mrb[13].mxu1 }
 0x163   : > { %v2011_v29 = vpop.f32.mrb[14].mxu1 }
 0x164   : > { %v2012_v25 = vpop.f32.mrb[15].mxu1  ;;  %v2145_v29 = vlaneseq }
 0x166   : > { %2693 = vrot.lane.b32.xlu0 %v8662_v52, %s15729_s28  ;;  %2370 = vrot.lane.b32.xlu1 %v8662_v52, %s15678_s27  ;;  %v8757_v19 = vshrl.u32 %v2145_v29, 7  ;;  %v8759_v13 = vand.u32 127, %v2145_v29  ;;  %v8776_v29 = vld [vmem:[%s16530_s1 + $0x8] sm:$0xff] }
 0x168   : > { %16528 = vst [vmem:[#allocation138_spill] sm:$0xff] %v8757_v19  ;;  %v8766_v4 = vsub.s32 1, %v8757_v19  ;;  %vm2164_vm1 = vcmp.lt.s32.totalorder %v8759_v13, 16  ;;  %v8780_v54 = vsub.s32 3, %v8757_v19  ;;  %v8783_v51 = vsub.s32 0, %v8757_v19 }
 0x169   : > { %v8790_v47 = vsub.s32 2, %v8757_v19  ;;  %v8801_v63 = vsub.s32 5, %v8757_v19  ;;  %vm2198_vm2 = vcmp.lt.s32.totalorder %v8759_v13, 1  ;;  %vm2181_vm3 = vcmp.lt.s32.totalorder %v8759_v13, 15 }
 0x16a   : > { %2823 = vrot.lane.b32.xlu0 %v8662_v52, %s15720_s3  ;;  %2435 = vrot.lane.b32.xlu1 %v8662_v52, %s15676_s4  ;;  %16529 = vst [vmem:[#allocation139_spill] sm:$0xff] %v8766_v4  ;;  %16531 = vst [vmem:[#allocation140_spill] sm:$0xff] %v8780_v54  ;;  %v8794_v44 = vrot.slane %v8771_v61, %v8766_v4  ;;  %v8798_v39 = vrot.slane %v8776_v29, %v8766_v4  ;;  %vm2147_vm4 = vcmp.lt.s32.totalorder %v8759_v13, 17 }
 0x16b   : > { %16532 = vst [vmem:[#allocation141_spill] sm:$0xff] %v8783_v51  ;;  %16533 = vst [vmem:[#allocation142_spill] sm:$0xff] %v8790_v47  ;;  %v8811_v3 = vrot.slane %v8776_v29, %v8780_v54  ;;  %v8816_v59 = vrot.slane %v8771_v61, %v8783_v51  ;;  %v8820_v49 = vrot.slane %v8776_v29, %v8783_v51  ;;  %vm2215_vm5 = vcmp.lt.s32.totalorder %v8759_v13, 127 }
 0x16c   : > { %16534 = vst [vmem:[#allocation143_spill] sm:$0xff] %v8794_v44  ;;  %16535 = vst [vmem:[#allocation144_spill] sm:$0xff] %v8798_v39  ;;  %v8835_v21 = vrot.slane %v8771_v61, %v8780_v54  ;;  %v8839_v53 = vrot.slane %v8776_v29, %v8801_v63  ;;  %v8858_v9 = vrot.slane %v8771_v61, %v8790_v47  ;;  %v8873_v58 = vsub.s32 6, %v8757_v19 }
 0x16d   : > { %16536 = vst [vmem:[#allocation145_spill] sm:$0xff] %v8801_v63  ;;  %16537 = vst [vmem:[#allocation146_spill] sm:$0xff] %v8811_v3  ;;  %v8868_v2 = vrot.slane %v8771_v61, %v8801_v63  ;;  %vm2232_vm6 = vcmp.lt.s32.totalorder %v8759_v13, 113  ;;  %vm2249_vm7 = vcmp.lt.s32.totalorder %v8759_v13, 112  ;;  %vm2266_vm8 = vcmp.lt.s32.totalorder %v8759_v13, 111 }
 0x16e   : > { %2500 = vrot.lane.b32.xlu1 %v8662_v52, %s15776_s2  ;;  %2372 = vrot.lane.b32.xlu0 %v8666_v37, %s15678_s27  ;;  %16538 = vst [vmem:[#allocation147_spill] sm:$0xff] %v8816_v59  ;;  %16539 = vst [vmem:[#allocation148_spill] sm:$0xff] %v8820_v49  ;;  %s16563_s27 = smov 96   ;;  %vm2378_vm11 = vcmp.lt.s32.totalorder %v8759_v13, 33  ;;  %vm2443_vm12 = vcmp.lt.s32.totalorder %v8759_v13, 32  ;;  %vm2508_vm13 = vcmp.lt.s32.totalorder %v8759_v13, 31 }
 0x16f   : > { %16541 = vst [vmem:[#allocation150_spill] sm:$0xff] %v8835_v21  ;;  %16542 = vst [vmem:[#allocation151_spill] sm:$0xff] %v8839_v53  ;;  %vm2701_vm14 = vcmp.lt.s32.totalorder %v8759_v13, 97  ;;  %vm2766_vm15 = vcmp.lt.s32.totalorder %v8759_v13, 96  ;;  %vm2831_vm0 = vcmp.lt.s32.totalorder %v8759_v13, 95 }
 0x170   : > { %16543 = vst [vmem:[#allocation152_spill] sm:$0xff] %v8858_v9  ;;  %16544 = vst [vmem:[#allocation153_spill] sm:$0xff] %v8868_v2 }
 0x171   : > { %16545 = vst [vmem:[#allocation154_spill] sm:$0xff] %v8873_v58 }
 0x172   : > { %2565 = vrot.lane.b32.xlu1 %v8662_v52, %s15778_s25  ;;  %2437 = vrot.lane.b32.xlu0 %v8666_v37, %s15676_s4  ;;  %s16560_s4 = smov 127  }
 0x174   : > { %v2161_v25 = vpop.permute.xlu1 %2160  ;;  %v2142_v41 = vpop.permute.xlu0 %2141 }
 0x176   : > { %2629 = vrot.lane.b32.xlu1 %v8662_v52, %s15710_s5  ;;  %2502 = vrot.lane.b32.xlu0 %v8666_v37, %s15776_s2 }
 0x178   : > { %v2178_v7 = vpop.permute.xlu0 %2177  ;;  %v2163_v0 = vpop.permute.xlu1 %2162 }
 0x179   : > { %v2165_v10 = vsel %vm2164_vm1, %v2161_v25, %v2163_v0  ;;  %v2166_v34 = vsel %vm2164_vm1, %v2163_v0, %v2161_v25  ;;  %v8829_v0 = vrot.slane %v8776_v29, %v8790_v47 }
 0x17a   : > { %2758 = vrot.lane.b32.xlu1 %v8662_v52, %s15708_s24  ;;  %2567 = vrot.lane.b32.xlu0 %v8666_v37, %s15778_s25  ;;  %v2175_v25 = vmul.f32 %v8794_v44, %v2166_v34  ;;  %v2176_v28 = vmul.f32 %v8798_v39, %v2165_v10 }
 0x17b   : > { %16540 = vst [vmem:[#allocation149_spill] sm:$0xff] %v8829_v0 }
 0x17c   : > { %v2195_v36 = vpop.permute.xlu0 %2194  ;;  %v2180_v31 = vpop.permute.xlu1 %2179 }
 0x17d   : > { %v2182_v48 = vsel %vm2181_vm3, %v2178_v7, %v2180_v31 }
 0x17e   : > { %2631 = vrot.lane.b32.xlu1 %v8666_v37, %s15710_s5  ;;  %2695 = vrot.lane.b32.xlu0 %v8666_v37, %s15729_s28 }
 0x180   : > { %v2197_v6 = vpop.permute.xlu1 %2196  ;;  %v2144_v62 = vpop.permute.xlu0 %2143 }
 0x181   : > { %v2199_v38 = vsel %vm2198_vm2, %v2195_v36, %v2197_v6  ;;  %v2148_v34 = vsel %vm2147_vm4, %v2142_v41, %v2144_v62  ;;  %v2149_v10 = vsel %vm2147_vm4, %v2144_v62, %v2142_v41  ;;  %v2200_v33 = vsel %vm2198_vm2, %v2197_v6, %v2195_v36 }
 0x182   : > { %v2210_v24 = vmul.f32 %v8811_v3, %v2199_v38  ;;  %v2158_v20 = vmul.f32 %v8816_v59, %v2149_v10  ;;  %v2159_v12 = vmul.f32 %v8820_v49, %v2148_v34  ;;  %2825 = vrot.lane.b32.xlu1 %v8666_v37, %s15720_s3  ;;  %2760 = vrot.lane.b32.xlu0 %v8666_v37, %s15708_s24 }
 0x183   : > { %v2183_v62 = vsel %vm2181_vm3, %v2180_v31, %v2178_v7  ;;  %v2193_v36 = vmul.f32 %v8829_v0, %v2182_v48  ;;  %v2209_v34 = vmul.f32 %v8835_v21, %v2200_v33 }
 0x184   : > { %v2279_v38 = vpack.c.bf16 %v2175_v25, %v2158_v20  ;;  %v2214_v6 = vpop.permute.xlu1 %2213  ;;  %v2212_v41 = vpop.permute.xlu0 %2211  ;;  %v2280_v10 = vpack.c.bf16 %v2176_v28, %v2159_v12  ;;  %v8879_v12 = vsub.s32 7, %v8757_v19  ;;  %v2192_v33 = vmul.f32 %v8858_v9, %v2183_v62 }
 0x185   : > { %v2217_v1 = vsel %vm2215_vm5, %v2214_v6, %v2212_v41  ;;  %v2216_v31 = vsel %vm2215_vm5, %v2212_v41, %v2214_v6  ;;  %v2282_v20 = vpack.c.bf16 %v2210_v24, %v2193_v36  ;;  %v8890_v25 = vrot.slane %v8771_v61, %v8873_v58 }
 0x186   : > { %v2227_v7 = vmul.f32 %v8839_v53, %v2217_v1  ;;  %2315 = vmatprep.subr.bf16.mxu1 %v2280_v10  ;;  %16546 = vst [vmem:[#allocation155_spill] sm:$0xff] %v8879_v12  ;;  %3282 = vrot.lane.b32.xlu1 %v8721_v46, %s15729_s28  ;;  %v2281_v1 = vpack.c.bf16 %v2209_v34, %v2192_v33 }
 0x187   : > { %2316 = vmatpush1.bf16.msra.mxu1 %v2279_v38  ;;  %3250 = vrot.lane.b32.xlu0 %v8721_v46, %s15710_s5  ;;  %v2226_v24 = vmul.f32 %v8868_v2, %v2216_v31  ;;  %16547 = vst [vmem:[#allocation156_spill] sm:$0xff] %v8890_v25  ;;  %v8894_v36 = vrot.slane %v8776_v29, %v8873_v58  ;;  %s16552_s5 = smov 32  }
 0x188   : > { %v2231_v48 = vpop.permute.xlu1 %2230  ;;  %2317 = vmatprep.subr.bf16.mxu1 %v2282_v20  ;;  %v2229_v28 = vpop.permute.xlu0 %2228  ;;  %v2284_v62 = vpack.c.bf16 %v2227_v7, %v8617_v17  ;;  %v8900_v38 = vrot.slane %v8771_v61, %v8879_v12  ;;  %v8904_v6 = vrot.slane %v8776_v29, %v8879_v12 }
 0x189   : > { %16548 = vst [vmem:[#allocation157_spill] sm:$0xff] %v8894_v36  ;;  %v2233_v41 = vsel %vm2232_vm6, %v2229_v28, %v2231_v48  ;;  %v2234_v10 = vsel %vm2232_vm6, %v2231_v48, %v2229_v28  ;;  %v2283_v34 = vpack.c.bf16 %v2226_v24, %v8611_v45  ;;  %v7375_v45 = vld [vmem:[%s16530_s1 + $0x10] ss:$0 sm:$0xff]  ;;  %v7376_v28 = vld [vmem:[%s16530_s1 + $0x18] ss:$0 sm:$0xff] }
 0x18a   : > { %16549 = vst [vmem:[#allocation158_spill] sm:$0xff] %v8900_v38  ;;  %16550 = vst [vmem:[#allocation159_spill] sm:$0xff] %v8904_v6  ;;  %3314 = vrot.lane.b32.xlu1 %v8721_v46, %s15708_s24  ;;  %v2243_v7 = vmul.f32 %v8890_v25, %v2233_v41  ;;  %v2244_v20 = vmul.f32 %v8894_v36, %v2234_v10  ;;  %s16579_s24 = smov 95  }
 0x18b   : > { %2318 = vmatpush1.bf16.msra.mxu1 %v2281_v1  ;;  %3346 = vrot.lane.b32.xlu0 %v8721_v46, %s15720_s3 }
 0x18c   : > { %v2248_v17 = vpop.permute.xlu1 %2247  ;;  %2319 = vmatprep.subr.bf16.mxu1 %v2284_v62  ;;  %v2246_v61 = vpop.permute.xlu0 %2245 }
 0x18d   : > { %v2250_v29 = vsel %vm2249_vm7, %v2246_v61, %v2248_v17  ;;  %v2251_v31 = vsel %vm2249_vm7, %v2248_v17, %v2246_v61 }
 0x18e   : > { %v2260_v33 = vmul.f32 %v8900_v38, %v2250_v29  ;;  %v2261_v48 = vmul.f32 %v8904_v6, %v2251_v31  ;;  %3124 = vrot.lane.b32.xlu1 %v8723_v60, %s16551_s21 }
 0x18f   : > { %2320 = vmatpush1.bf16.msra.mxu1 %v2283_v34  ;;  %3156 = vrot.lane.b32.xlu0 %v8723_v60, %s16552_s5 }
 0x190   : > { %v2285_v1 = vpack.c.bf16 %v2260_v33, %v2243_v7  ;;  %v2265_v24 = vpop.permute.xlu1 %2264  ;;  %v2263_v62 = vpop.permute.xlu0 %2262  ;;  %v2286_v41 = vpack.c.bf16 %v2261_v48, %v2244_v20  ;;  %v7480_v20 = vld [vmem:[%s16553_s8] sm:$0xff]   ;;  %s16657_s8 = smov 112  }
 0x191   : > { %v2267_v10 = vsel %vm2266_vm8, %v2263_v62, %v2265_v24  ;;  %v2268_v17 = vsel %vm2266_vm8, %v2265_v24, %v2263_v62 }
 0x192   : > { %v2277_v61 = vmul.f32 %v7375_v45, %v2267_v10  ;;  %v2278_v34 = vmul.f32 %v7376_v28, %v2268_v17  ;;  %2321 = vmatprep.subr.bf16.mxu1 %v2286_v41  ;;  %3188 = vrot.lane.b32.xlu1 %v8723_v60, %s15776_s2 }
 0x193   : > { %2322 = vmatpush1.bf16.msra.mxu1 %v2285_v1  ;;  %3220 = vrot.lane.b32.xlu0 %v8723_v60, %s15778_s25 }
 0x194   : > { %v2287_v29 = vpack.c.bf16 %v2277_v61, %v2277_v61  ;;  %v2288_v31 = vpack.c.bf16 %v2278_v34, %v2278_v34  ;;  %v8963_v1 = vpop.permute.xlu1 %2625 }
 0x195   : > { %16556 = vst [vmem:[#allocation162_spill] sm:$0xff] %v8963_v1 }
 0x196   : > { %7378 = vmatprep.subr.msk.bf16.mxu1 %vm2308_vm9, %v2288_v31  ;;  %v2310_v7 = vsel %vm2308_vm9, %v2287_v29, 0  ;;  %3118 = vrot.lane.b32.xlu1 %v8733_v15, %s16551_s21  ;;  %v8951_v33 = vpop.f32.mrb[12].mxu0 }
 0x197   : > { %2324 = vmatpush1.bf16.msra.mxu1 %v2310_v7  ;;  %3278 = vrot.lane.b32.xlu0 %v8733_v15, %s15729_s28  ;;  %16554 = vst [vmem:[#allocation160_spill] sm:$0xff] %v8951_v33  ;;  %v8953_v48 = vpop.f32.mrb[13].mxu0 }
 0x198   : > { %16555 = vst [vmem:[#allocation161_spill] sm:$0xff] %v8953_v48  ;;  %v2134_v45 = vpop.f32.mrb[14].mxu0 }
 0x199   : > { %v2135_v28 = vpop.f32.mrb[15].mxu0 }
 0x19a   : > { %7379 = vmatmul.mubr.msk.bf16.vlgmr.msra.gmra.mrb[20].mxu1 %vm15864_vm10, %v7480_v20  ;;  %3150 = vrot.lane.b32.xlu1 %v8733_v15, %s16552_s5 }
 0x19b   : > { %3342 = vrot.lane.b32.xlu0 %v8733_v15, %s15720_s3  ;;  %3025 = vmatprep.mubr.bf16.mxu1 %v16519_v27 }
 0x19e   : > { %3182 = vrot.lane.b32.xlu1 %v8733_v15, %s15776_s2 }
 0x19f   : > { %3120 = vrot.lane.b32.xlu0 %v8739_v16, %s16551_s21 }
 0x1a1   : > { %v8967_v24 = vpop.permute.xlu0 %2296  ;;  %v8969_v62 = vpop.f32.mrb[16].mxu1 }
 0x1a2   : > { %16557 = vst [vmem:[#allocation163_spill] sm:$0xff] %v8967_v24  ;;  %3214 = vrot.lane.b32.xlu1 %v8733_v15, %s15778_s25  ;;  %v8973_v41 = vpop.f32.mrb[17].mxu1 }
 0x1a3   : > { %3152 = vrot.lane.b32.xlu0 %v8739_v16, %s16552_s5  ;;  %v2093_v10 = vpop.f32.mrb[18].mxu1 }
 0x1a4   : > { %v2094_v17 = vpop.f32.mrb[19].mxu1 }
 0x1a5   : > { %v8977_v61 = vpop.permute.xlu1 %2291  ;;  %v8979_v34 = vpop.permute.xlu0 %2819 }
 0x1a6   : > { %16558 = vst [vmem:[#allocation164_spill] sm:$0xff] %v8977_v61  ;;  %16559 = vst [vmem:[#allocation165_spill] sm:$0xff] %v8979_v34  ;;  %3246 = vrot.lane.b32.xlu1 %v8733_v15, %s16560_s4 }
 0x1a7   : > { %3184 = vrot.lane.b32.xlu0 %v8739_v16, %s15776_s2 }
 0x1a9   : > { %v8985_v29 = vpop.permute.xlu1 %2689  ;;  %v8987_v31 = vpop.permute.xlu0 %2433 }
 0x1aa   : > { %16561 = vst [vmem:[#allocation166_spill] sm:$0xff] %v8985_v29  ;;  %16562 = vst [vmem:[#allocation167_spill] sm:$0xff] %v8987_v31  ;;  %3310 = vrot.lane.b32.xlu1 %v8733_v15, %s16563_s27 }
 0x1ab   : > { %3216 = vrot.lane.b32.xlu0 %v8739_v16, %s15778_s25 }
 0x1ad   : > { %v8993_v7 = vpop.permute.xlu1 %2754  ;;  %v8995_v20 = vpop.permute.xlu0 %2563 }
 0x1ae   : > { %16564 = vst [vmem:[#allocation168_spill] sm:$0xff] %v8993_v7  ;;  %16565 = vst [vmem:[#allocation169_spill] sm:$0xff] %v8995_v20  ;;  %3248 = vrot.lane.b32.xlu1 %v8739_v16, %s16560_s4 }
 0x1af   : > { %3280 = vrot.lane.b32.xlu0 %v8739_v16, %s15729_s28 }
 0x1b1   : > { %v9001_v45 = vpop.permute.xlu1 %2368  ;;  %v2363_v28 = vpop.permute.xlu0 %2362 }
 0x1b2   : > { %16566 = vst [vmem:[#allocation170_spill] sm:$0xff] %v9001_v45  ;;  %3344 = vrot.lane.b32.xlu1 %v8739_v16, %s15720_s3 }
 0x1b3   : > { %3312 = vrot.lane.b32.xlu0 %v8739_v16, %s16563_s27 }
 0x1b5   : > { %v9007_v10 = vpop.permute.xlu1 %2498  ;;  %v2428_v17 = vpop.permute.xlu0 %2427 }
 0x1b6   : > { %16567 = vst [vmem:[#allocation171_spill] sm:$0xff] %v9007_v10  ;;  %3290 = vrot.lane.b32.xlu1 %v8951_v33, %s15729_s28 }
 0x1b7   : > { %3258 = vrot.lane.b32.xlu0 %v8951_v33, %s16560_s4 }
 0x1b9   : > { %v9013_v19 = vpop.permute.xlu1 %2685  ;;  %v2493_v55 = vpop.permute.xlu0 %2492 }
 0x1ba   : > { %16568 = vst [vmem:[#allocation172_spill] sm:$0xff] %v9013_v19  ;;  %3322 = vrot.lane.b32.xlu1 %v8951_v33, %s16563_s27 }
 0x1bb   : > { %3354 = vrot.lane.b32.xlu0 %v8951_v33, %s15720_s3  ;;  %s16574_s3 = sld [smem:[#allocation249_spill]] }
 0x1bd   : > { %v9019_v50 = vpop.permute.xlu1 %2750  ;;  %v9021_v30 = vpop.permute.xlu0 %2557 }
 0x1be   : > { %16569 = vst [vmem:[#allocation173_spill] sm:$0xff] %v9019_v50  ;;  %3132 = vrot.lane.b32.xlu1 %v8953_v48, %s16551_s21 }
 0x1bf   : > { %3164 = vrot.lane.b32.xlu0 %v8953_v48, %s16552_s5 }
 0x1c1   : > { %v9027_v43 = vpop.permute.xlu1 %2697  ;;  %v9029_v40 = vpop.permute.xlu0 %2621  ;;  %v9042_v26 = vld [vmem:[%s16574_s3 + $0x8] sm:$0xff]  ;;  %v737_v38 = vld [vmem:[%s16574_s3] sm:$0xff] }
 0x1c2   : > { %16570 = vst [vmem:[#allocation174_spill] sm:$0xff] %v9027_v43  ;;  %16571 = vst [vmem:[#allocation175_spill] sm:$0xff] %v9029_v40  ;;  %3196 = vrot.lane.b32.xlu1 %v8953_v48, %s15776_s2  ;;  %v9053_v18 = vrot.slane %v9042_v26, %v8783_v51  ;;  %v9065_v6 = vrot.slane %v9042_v26, %v8766_v4  ;;  %v9084_v3 = vrot.slane %v737_v38, %v8783_v51 }
 0x1c3   : > { %3228 = vrot.lane.b32.xlu0 %v8953_v48, %s15778_s25  ;;  %v9087_v21 = vrot.slane %v737_v38, %v8766_v4  ;;  %v9152_v59 = vrot.slane %v737_v38, %v8780_v54  ;;  %v9172_v46 = vrot.slane %v737_v38, %v8873_v58 }
 0x1c4   : > { %16576 = vst [vmem:[#allocation179_spill] sm:$0xff] %v9053_v18  ;;  %16578 = vst [vmem:[#allocation181_spill] sm:$0xff] %v9065_v6 }
 0x1c5   : > { %v9035_v35 = vpop.permute.xlu1 %2762  ;;  %v9037_v32 = vpop.permute.xlu0 %2815  ;;  %16582 = vst [vmem:[#allocation184_spill] sm:$0xff] %v9084_v3  ;;  %16583 = vst [vmem:[#allocation185_spill] sm:$0xff] %v9087_v21 }
 0x1c6   : > { %16572 = vst [vmem:[#allocation176_spill] sm:$0xff] %v9035_v35  ;;  %16573 = vst [vmem:[#allocation177_spill] sm:$0xff] %v9037_v32  ;;  %3126 = vrot.lane.b32.xlu1 %v8969_v62, %s16551_s21 }
 0x1c7   : > { %3286 = vrot.lane.b32.xlu0 %v8969_v62, %s15729_s28  ;;  %16593 = vst [vmem:[#allocation195_spill] sm:$0xff] %v9152_v59  ;;  %16597 = vst [vmem:[#allocation199_spill] sm:$0xff] %v9172_v46  ;;  %s16600_s28 = smov 97  }
 0x1c9   : > { %v9049_v23 = vpop.permute.xlu0 %2633  ;;  %v9055_v14 = vpop.permute.xlu1 %2364 }
 0x1ca   : > { %16575 = vst [vmem:[#allocation178_spill] sm:$0xff] %v9049_v23  ;;  %16577 = vst [vmem:[#allocation180_spill] sm:$0xff] %v9055_v14  ;;  %v2385_v8 = vsel %vm2378_vm11, %v2363_v28, %v9055_v14  ;;  %3158 = vrot.lane.b32.xlu1 %v8969_v62, %s16552_s5 }
 0x1cb   : > { %3350 = vrot.lane.b32.xlu0 %v8969_v62, %s16579_s24  ;;  %v2420_v36 = vmul.f32 %v9053_v18, %v2385_v8 }
 0x1cd   : > { %v9073_v25 = vpop.permute.xlu0 %2827  ;;  %v9075_v14 = vpop.permute.xlu1 %2429 }
 0x1ce   : > { %16580 = vst [vmem:[#allocation182_spill] sm:$0xff] %v9073_v25  ;;  %16581 = vst [vmem:[#allocation183_spill] sm:$0xff] %v9075_v14  ;;  %v2450_v53 = vsel %vm2443_vm12, %v2428_v17, %v9075_v14  ;;  %3190 = vrot.lane.b32.xlu1 %v8969_v62, %s15776_s2 }
 0x1cf   : > { %v2485_v2 = vmul.f32 %v9065_v6, %v2450_v53  ;;  %3128 = vrot.lane.b32.xlu0 %v8973_v41, %s16551_s21 }
 0x1d1   : > { %v9091_v8 = vpop.permute.xlu0 %2376  ;;  %v9093_v0 = vpop.permute.xlu1 %2441  ;;  %v2881_v9 = vpack.c.bf16 %v2485_v2, %v2420_v36 }
 0x1d2   : > { %16584 = vst [vmem:[#allocation186_spill] sm:$0xff] %v9091_v8  ;;  %16585 = vst [vmem:[#allocation187_spill] sm:$0xff] %v9093_v0  ;;  %v2386_v14 = vsel %vm2378_vm11, %v9091_v8, %v2363_v28  ;;  %v2451_v53 = vsel %vm2443_vm12, %v9093_v0, %v2428_v17  ;;  %3222 = vrot.lane.b32.xlu1 %v8969_v62, %s15778_s25  ;;  %v9112_v28 = vrot.slane %v9042_v26, %v8790_v47 }
 0x1d3   : > { %v2419_v39 = vmul.f32 %v9084_v3, %v2386_v14  ;;  %v2484_v44 = vmul.f32 %v9087_v21, %v2451_v53  ;;  %2952 = vmatprep.subr.bf16.mxu0 %v2881_v9  ;;  %3160 = vrot.lane.b32.xlu0 %v8973_v41, %s16552_s5  ;;  %v9123_v14 = vrot.slane %v9042_v26, %v8780_v54 }
 0x1d4   : > { %16587 = vst [vmem:[#allocation189_spill] sm:$0xff] %v9112_v28  ;;  %v9133_v9 = vrot.slane %v9042_v26, %v8801_v63 }
 0x1d5   : > { %v2880_v2 = vpack.c.bf16 %v2484_v44, %v2419_v39  ;;  %v9108_v36 = vpop.permute.xlu0 %2506  ;;  %v9114_v17 = vpop.permute.xlu1 %2494  ;;  %16589 = vst [vmem:[#allocation191_spill] sm:$0xff] %v9123_v14  ;;  %v9128_v39 = vrot.slane %v737_v38, %v8790_v47 }
 0x1d6   : > { %16586 = vst [vmem:[#allocation188_spill] sm:$0xff] %v9108_v36  ;;  %16588 = vst [vmem:[#allocation190_spill] sm:$0xff] %v9114_v17  ;;  %v2515_v8 = vsel %vm2508_vm13, %v2493_v55, %v9114_v17  ;;  %3254 = vrot.lane.b32.xlu1 %v8969_v62, %s16560_s4  ;;  %v2516_v17 = vsel %vm2508_vm13, %v9108_v36, %v2493_v55  ;;  %v9158_v55 = vrot.slane %v737_v38, %v8801_v63 }
 0x1d7   : > { %2953 = vmatpush1.bf16.msra.mxu0 %v2880_v2  ;;  %3192 = vrot.lane.b32.xlu0 %v8973_v41, %s15776_s2  ;;  %16590 = vst [vmem:[#allocation192_spill] sm:$0xff] %v9128_v39  ;;  %v2550_v44 = vmul.f32 %v9112_v28, %v2515_v8  ;;  %16591 = vst [vmem:[#allocation193_spill] sm:$0xff] %v9133_v9  ;;  %v2549_v36 = vmul.f32 %v9128_v39, %v2516_v17  ;;  %s16655_s2 = smov 1  }
 0x1d8   : > { %16594 = vst [vmem:[#allocation196_spill] sm:$0xff] %v9158_v55 }
 0x1d9   : > { %v2624_v53 = vpop.permute.xlu0 %2623  ;;  %v9135_v0 = vpop.permute.xlu1 %2559 }
 0x1da   : > { %16592 = vst [vmem:[#allocation194_spill] sm:$0xff] %v9135_v0  ;;  %v2642_v2 = vsel %vm2215_vm5, %v2624_v53, %v8963_v1  ;;  %v2579_v8 = vsel %vm2198_vm2, %v9021_v30, %v9135_v0  ;;  %3318 = vrot.lane.b32.xlu1 %v8969_v62, %s16563_s27  ;;  %v9164_v0 = vrot.slane %v9042_v26, %v8873_v58 }
 0x1db   : > { %v2614_v49 = vmul.f32 %v9123_v14, %v2579_v8  ;;  %3224 = vrot.lane.b32.xlu0 %v8973_v41, %s15778_s25  ;;  %v2678_v1 = vmul.f32 %v9133_v9, %v2642_v2  ;;  %v2643_v60 = vsel %vm2215_vm5, %v9029_v40, %v2624_v53  ;;  %v9190_v53 = vrot.slane %v9042_v26, %v8879_v12  ;;  %v9207_v26 = vld [vmem:[%s16574_s3 + $0x48] ss:$0 sm:$0xff]  ;;  %s16653_s25 = smov 16  }
 0x1dc   : > { %16595 = vst [vmem:[#allocation197_spill] sm:$0xff] %v9164_v0  ;;  %v2677_v40 = vmul.f32 %v9158_v55, %v2643_v60 }
 0x1dd   : > { %v2688_v8 = vpop.permute.xlu0 %2687  ;;  %v9166_v48 = vpop.permute.xlu1 %2571  ;;  %v2889_v33 = vpack.c.bf16 %v2614_v49, %v2550_v44  ;;  %v9186_v44 = vrot.slane %v737_v38, %v8879_v12  ;;  %16599 = vst [vmem:[#allocation201_spill] sm:$0xff] %v9190_v53  ;;  %v9202_v38 = vld [vmem:[%s16574_s3 + $0x40] ss:$0 sm:$0xff]  ;;  %v2897_v57 = vpack.c.bf16 %v2678_v1, %v8641_v22 }
 0x1de   : > { %16596 = vst [vmem:[#allocation198_spill] sm:$0xff] %v9166_v48  ;;  %v2707_v17 = vsel %vm2701_vm14, %v2688_v8, %v8985_v29  ;;  %v2580_v2 = vsel %vm2198_vm2, %v9166_v48, %v9021_v30  ;;  %3256 = vrot.lane.b32.xlu1 %v8973_v41, %s16560_s4  ;;  %v2708_v30 = vsel %vm2701_vm14, %v9013_v19, %v2688_v8 }
 0x1df   : > { %v2613_v49 = vmul.f32 %v9152_v59, %v2580_v2  ;;  %16598 = vst [vmem:[#allocation200_spill] sm:$0xff] %v9186_v44  ;;  %2954 = vmatprep.subr.bf16.mxu0 %v2889_v33  ;;  %3288 = vrot.lane.b32.xlu0 %v8973_v41, %s16600_s28  ;;  %v2743_v48 = vmul.f32 %v9164_v0, %v2707_v17 }
 0x1e0   : > { %v2742_v22 = vmul.f32 %v9172_v46, %v2708_v30 }
 0x1e1   : > { %v2888_v2 = vpack.c.bf16 %v2613_v49, %v2549_v36  ;;  %v2753_v29 = vpop.permute.xlu0 %2752  ;;  %v2818_v33 = vpop.permute.xlu1 %2817 }
 0x1e2   : > { %v2772_v60 = vsel %vm2766_vm15, %v2753_v29, %v8993_v7  ;;  %v2773_v36 = vsel %vm2766_vm15, %v9019_v50, %v2753_v29  ;;  %v2837_v8 = vsel %vm2831_vm0, %v2818_v33, %v8979_v34  ;;  %v2838_v17 = vsel %vm2831_vm0, %v9037_v32, %v2818_v33  ;;  %3352 = vrot.lane.b32.xlu1 %v8973_v41, %s16579_s24 }
 0x1e3   : > { %v2807_v1 = vmul.f32 %v9186_v44, %v2773_v36  ;;  %v2808_v49 = vmul.f32 %v9190_v53, %v2772_v60  ;;  %2955 = vmatpush1.bf16.msra.mxu0 %v2888_v2  ;;  %v2872_v29 = vmul.f32 %v9202_v38, %v2838_v17  ;;  %v2873_v50 = vmul.f32 %v9207_v26, %v2837_v8  ;;  %v741_v2 = vld [vmem:[%s16574_s3 + $0x20] sm:$0xff] }
 0x1e4   : > { %2956 = vmatprep.subr.bf16.mxu0 %v2897_v57  ;;  %3320 = vrot.lane.b32.xlu0 %v8973_v41, %s16563_s27  ;;  %v2896_v33 = vpack.c.bf16 %v2677_v40, %v8635_v11  ;;  %v742_v40 = vld [vmem:[%s16574_s3 + $0x28] sm:$0xff]  ;;  %v9243_v11 = vrot.slane %v741_v2, %v8783_v51 }
 0x1e5   : > { %v9232_v32 = vpop.permute.xlu0 %2693  ;;  %v2371_v19 = vpop.permute.xlu1 %2370  ;;  %v2905_v7 = vpack.c.bf16 %v2808_v49, %v2743_v48  ;;  %v2904_v30 = vpack.c.bf16 %v2807_v1, %v2742_v22  ;;  %v2912_v36 = vpack.c.bf16 %v2872_v29, %v2872_v29  ;;  %v2913_v34 = vpack.c.bf16 %v2873_v50, %v2873_v50  ;;  %v9270_v29 = vld [vmem:[%s15556_s10] sm:$0xf] }
 0x1e6   : > { %16601 = vst [vmem:[#allocation202_spill] sm:$0xff] %v9232_v32  ;;  %16603 = vst [vmem:[#allocation204_spill] sm:$0xff] %v9243_v11  ;;  %v9246_v48 = vrot.slane %v741_v2, %v8766_v4  ;;  %v9257_v22 = vrot.slane %v742_v40, %v8783_v51  ;;  %v9265_v49 = vrot.slane %v742_v40, %v8766_v4 }
 0x1e7   : > { %2957 = vmatpush1.bf16.msra.mxu0 %v2896_v33  ;;  %v2929_v50 = vsel %vm2308_vm9, %v2912_v36, 0  ;;  %v9307_v4 = vrot.slane %v742_v40, %v8780_v54 }
 0x1e8   : > { %2958 = vmatprep.subr.bf16.mxu0 %v2905_v7  ;;  %16604 = vst [vmem:[#allocation205_spill] sm:$0xff] %v9246_v48  ;;  %v2382_v7 = vsel %vm2378_vm11, %v9001_v45, %v2371_v19  ;;  %16605 = vst [vmem:[#allocation206_spill] sm:$0xff] %v9257_v22 }
 0x1e9   : > { %v9237_v60 = vpop.permute.xlu0 %2823  ;;  %v2436_v57 = vpop.permute.xlu1 %2435  ;;  %16607 = vst [vmem:[#allocation208_spill] sm:$0xff] %v9265_v49  ;;  %v2423_v33 = vmul.f32 %v9243_v11, %v2382_v7  ;;  %v9285_v7 = vrot.slane %v741_v2, %v8790_v47  ;;  %16614 = vst [vmem:[#allocation215_spill] sm:$0xff] %v9307_v4 }
 0x1ea   : > { %16602 = vst [vmem:[#allocation203_spill] sm:$0xff] %v9237_v60  ;;  %v2447_v8 = vsel %vm2443_vm12, %v8987_v31, %v2436_v57 }
 0x1eb   : > { %2959 = vmatpush1.bf16.msra.mxu0 %v2904_v30  ;;  %v2488_v30 = vmul.f32 %v9246_v48, %v2447_v8  ;;  %16609 = vst [vmem:[#allocation210_spill] sm:$0xff] %v9285_v7  ;;  %v9288_v8 = vrot.slane %v741_v2, %v8780_v54 }
 0x1ec   : > { %7388 = vmatprep.subr.msk.bf16.mxu0 %vm2308_vm9, %v2913_v34 }
 0x1ed   : > { %v2501_v17 = vpop.permute.xlu1 %2500  ;;  %v9259_v1 = vpop.permute.xlu0 %2372  ;;  %16610 = vst [vmem:[#allocation211_spill] sm:$0xff] %v9288_v8 }
 0x1ee   : > { %16606 = vst [vmem:[#allocation207_spill] sm:$0xff] %v9259_v1  ;;  %v2381_v34 = vsel %vm2378_vm11, %v2371_v19, %v9259_v1  ;;  %v2884_v1 = vpack.c.bf16 %v2488_v30, %v2423_v33 }
 0x1ef   : > { %2961 = vmatpush1.bf16.msra.mxu0 %v2929_v50  ;;  %v2424_v36 = vmul.f32 %v9257_v22, %v2381_v34  ;;  %v2512_v34 = vsel %vm2508_vm13, %v9007_v10, %v2501_v17 }
 0x1f0   : > { %v2553_v10 = vmul.f32 %v9285_v7, %v2512_v34  ;;  %v9324_v34 = vrot.slane %v742_v40, %v8801_v63 }
 0x1f1   : > { %v2566_v45 = vpop.permute.xlu1 %2565  ;;  %v9275_v31 = vpop.permute.xlu0 %2437 }
 0x1f2   : > { %16608 = vst [vmem:[#allocation209_spill] sm:$0xff] %v9275_v31  ;;  %v2446_v19 = vsel %vm2443_vm12, %v2436_v57, %v9275_v31  ;;  %7389 = vmatmul.mubr.msk.bf16.vlgmr.msra.gmra.mrb[16].mxu0 %vm15864_vm10, %v9270_v29  ;;  %v2576_v57 = vsel %vm2198_vm2, %v8995_v20, %v2566_v45  ;;  %16618 = vst [vmem:[#allocation219_spill] sm:$0xff] %v9324_v34 }
 0x1f3   : > { %v2489_v50 = vmul.f32 %v9265_v49, %v2446_v19  ;;  %3066 = vmatprep.mubr.bf16.mxu0 %v16519_v27  ;;  %v9299_v19 = vrot.slane %v742_v40, %v8790_v47  ;;  %v2617_v20 = vmul.f32 %v9288_v8, %v2576_v57 }
 0x1f5   : > { %v9296_v31 = vpop.permute.xlu1 %2629  ;;  %16612 = vst [vmem:[#allocation213_spill] sm:$0xff] %v9299_v19  ;;  %v9301_v33 = vpop.permute.xlu0 %2502  ;;  %v2885_v30 = vpack.c.bf16 %v2489_v50, %v2424_v36  ;;  %v9321_v50 = vrot.slane %v741_v2, %v8801_v63  ;;  %v2892_v57 = vpack.c.bf16 %v2617_v20, %v2553_v10 }
 0x1f6   : > { %16611 = vst [vmem:[#allocation212_spill] sm:$0xff] %v9296_v31  ;;  %16613 = vst [vmem:[#allocation214_spill] sm:$0xff] %v9301_v33  ;;  %v2511_v51 = vsel %vm2508_vm13, %v2501_v17, %v9301_v33 }
 0x1f7   : > { %3034 = vmatprep.subr.bf16.mxu0 %v2885_v30  ;;  %v2554_v5 = vmul.f32 %v9299_v19, %v2511_v51  ;;  %16617 = vst [vmem:[#allocation218_spill] sm:$0xff] %v9321_v50  ;;  %v9327_v51 = vrot.slane %v741_v2, %v8873_v58  ;;  %v9330_v30 = vrot.slane %v742_v40, %v8873_v58 }
 0x1f8   : > { %3035 = vmatpush1.bf16.msra.mxu0 %v2884_v1 }
 0x1f9   : > { %v9312_v47 = vpop.permute.xlu1 %2758  ;;  %v9314_v42 = vpop.permute.xlu0 %2567  ;;  %16619 = vst [vmem:[#allocation220_spill] sm:$0xff] %v9327_v51  ;;  %16620 = vst [vmem:[#allocation221_spill] sm:$0xff] %v9330_v30 }
 0x1fa   : > { %16615 = vst [vmem:[#allocation216_spill] sm:$0xff] %v9312_v47  ;;  %16616 = vst [vmem:[#allocation217_spill] sm:$0xff] %v9314_v42  ;;  %v2575_v36 = vsel %vm2198_vm2, %v2566_v45, %v9314_v42 }
 0x1fb   : > { %v2618_v17 = vmul.f32 %v9307_v4, %v2575_v36 }
 0x1fd   : > { %v2632_v1 = vpop.permute.xlu1 %2631  ;;  %v2696_v33 = vpop.permute.xlu0 %2695  ;;  %v2893_v54 = vpack.c.bf16 %v2618_v17, %v2554_v5  ;;  %v9347_v17 = vrot.slane %v741_v2, %v8879_v12 }
 0x1fe   : > { %v2638_v45 = vsel %vm2215_vm5, %v2632_v1, %v9049_v23  ;;  %v2639_v36 = vsel %vm2215_vm5, %v9296_v31, %v2632_v1  ;;  %v2703_v20 = vsel %vm2701_vm14, %v2696_v33, %v9027_v43  ;;  %v2704_v10 = vsel %vm2701_vm14, %v9232_v32, %v2696_v33  ;;  %v9355_v1 = vld [vmem:[%s16574_s3 + $0x60] ss:$0 sm:$0xff]  ;;  %v9360_v33 = vld [vmem:[%s16574_s3 + $0x68] ss:$0 sm:$0xff] }
 0x1ff   : > { %v2681_v42 = vmul.f32 %v9321_v50, %v2639_v36  ;;  %v2682_v5 = vmul.f32 %v9324_v34, %v2638_v45  ;;  %3036 = vmatprep.subr.bf16.mxu0 %v2893_v54  ;;  %16621 = vst [vmem:[#allocation222_spill] sm:$0xff] %v9347_v17  ;;  %v9350_v23 = vrot.slane %v742_v40, %v8879_v12  ;;  %16623 = vst [vmem:[#allocation224_spill] sm:$0xff] %v9355_v1 }
 0x200   : > { %3037 = vmatpush1.bf16.msra.mxu0 %v2892_v57  ;;  %16624 = vst [vmem:[#allocation225_spill] sm:$0xff] %v9360_v33  ;;  %v2746_v54 = vmul.f32 %v9327_v51, %v2704_v10  ;;  %v2747_v2 = vmul.f32 %v9330_v30, %v2703_v20 }
 0x201   : > { %16622 = vst [vmem:[#allocation223_spill] sm:$0xff] %v9350_v23  ;;  %v2900_v45 = vpack.c.bf16 %v2681_v42, %v8662_v52  ;;  %v2826_v36 = vpop.permute.xlu1 %2825  ;;  %v2761_v40 = vpop.permute.xlu0 %2760  ;;  %v2901_v57 = vpack.c.bf16 %v2682_v5, %v8666_v37 }
 0x202   : > { %v2833_v43 = vsel %vm2831_vm0, %v2826_v36, %v9073_v25  ;;  %v2834_v12 = vsel %vm2831_vm0, %v9237_v60, %v2826_v36  ;;  %v2768_v42 = vsel %vm2766_vm15, %v2761_v40, %v9035_v35  ;;  %v2769_v52 = vsel %vm2766_vm15, %v9312_v47, %v2761_v40 }
 0x203   : > { %v2876_v20 = vmul.f32 %v9355_v1, %v2834_v12  ;;  %v2877_v37 = vmul.f32 %v9360_v33, %v2833_v43  ;;  %v2811_v10 = vmul.f32 %v9347_v17, %v2769_v52  ;;  %v2812_v5 = vmul.f32 %v9350_v23, %v2768_v42  ;;  %3038 = vmatprep.subr.bf16.mxu0 %v2901_v57 }
 0x204   : > { %3039 = vmatpush1.bf16.msra.mxu0 %v2900_v45 }
 0x205   : > { %v2916_v25 = vpack.c.bf16 %v2876_v20, %v2876_v20  ;;  %v2917_v36 = vpack.c.bf16 %v2877_v37, %v2877_v37  ;;  %v2908_v60 = vpack.c.bf16 %v2811_v10, %v2746_v54  ;;  %v9382_v31 = vpop.permute.xlu1 %3282  ;;  %v9384_v35 = vpop.permute.xlu0 %3250  ;;  %v2909_v32 = vpack.c.bf16 %v2812_v5, %v2747_v2 }
 0x207   : > { %3040 = vmatprep.subr.bf16.mxu0 %v2909_v32  ;;  %v2941_v43 = vsel %vm2308_vm9, %v2916_v25, 0 }
 0x208   : > { %3041 = vmatpush1.bf16.msra.mxu0 %v2908_v60 }
 0x209   : > { %v9386_v40 = vpop.permute.xlu1 %3314  ;;  %v9388_v12 = vpop.permute.xlu0 %3346  ;;  %7392 = vmatprep.subr.msk.bf16.mxu0 %vm2308_vm9, %v2917_v36 }
 0x20c   : > { %3043 = vmatpush1.bf16.msra.mxu0 %v2941_v43 }
 0x20d   : > { %v9392_v45 = vpop.permute.xlu1 %3124  ;;  %v9394_v57 = vpop.permute.xlu0 %3156 }
 0x20f   : > { %7393 = vmatmul.mubr.msk.bf16.vlgmr.msra.gmra.mrb[20].mxu0 %vm15864_vm10, %v9270_v29 }
 0x210   : > { %3478 = vmatprep.mubr.bf16.mxu0 %v16519_v27 }
 0x211   : > { %v9399_v32 = vpop.permute.xlu1 %3188  ;;  %v9401_v60 = vpop.permute.xlu0 %3220 }
 0x215   : > { %v9403_v54 = vpop.permute.xlu0 %3278  ;;  %v3119_v2 = vpop.permute.xlu1 %3118 }
 0x216   : > { %16625 = vst [vmem:[#allocation226_spill] sm:$0xff] %v9403_v54 }
 0x219   : > { %v9405_v42 = vpop.permute.xlu0 %3342  ;;  %v3151_v25 = vpop.permute.xlu1 %3150 }
 0x21a   : > { %16626 = vst [vmem:[#allocation227_spill] sm:$0xff] %v9405_v42 }
 0x21d   : > { %v3183_v52 = vpop.permute.xlu1 %3182  ;;  %v9407_v20 = vpop.permute.xlu0 %3120 }
 0x21e   : > { %16627 = vst [vmem:[#allocation228_spill] sm:$0xff] %v9407_v20  ;;  %v3140_v37 = vsel %vm2378_vm11, %v3119_v2, %v9407_v20 }
 0x21f   : > { %v3143_v29 = vmul.f32 %v3140_v37, %v9053_v18 }
 0x221   : > { %v3215_v10 = vpop.permute.xlu1 %3214  ;;  %v9413_v5 = vpop.permute.xlu0 %3152 }
 0x222   : > { %16628 = vst [vmem:[#allocation229_spill] sm:$0xff] %v9413_v5  ;;  %v3172_v36 = vsel %vm2443_vm12, %v3151_v25, %v9413_v5 }
 0x223   : > { %v3175_v43 = vmul.f32 %v3172_v36, %v9065_v6 }
 0x225   : > { %v9419_v47 = vpop.permute.xlu1 %3246  ;;  %v9421_v58 = vpop.permute.xlu0 %3184  ;;  %v3375_v63 = vpack.c.bf16 %v3175_v43, %v3143_v29 }
 0x226   : > { %16629 = vst [vmem:[#allocation230_spill] sm:$0xff] %v9419_v47  ;;  %16630 = vst [vmem:[#allocation231_spill] sm:$0xff] %v9421_v58  ;;  %v3204_v36 = vsel %vm2508_vm13, %v3183_v52, %v9421_v58 }
 0x227   : > { %3446 = vmatprep.subr.bf16.mxu0 %v3375_v63  ;;  %v3207_v6 = vmul.f32 %v3204_v36, %v9112_v28 }
 0x229   : > { %v9423_v56 = vpop.permute.xlu1 %3310  ;;  %v9425_v20 = vpop.permute.xlu0 %3216 }
 0x22a   : > { %16631 = vst [vmem:[#allocation232_spill] sm:$0xff] %v9423_v56  ;;  %16632 = vst [vmem:[#allocation233_spill] sm:$0xff] %v9425_v20  ;;  %v3236_v63 = vsel %vm2198_vm2, %v3215_v10, %v9425_v20 }
 0x22b   : > { %v3239_v5 = vmul.f32 %v3236_v63, %v9123_v14 }
 0x22d   : > { %v3249_v37 = vpop.permute.xlu1 %3248  ;;  %v3281_v18 = vpop.permute.xlu0 %3280  ;;  %v3383_v14 = vpack.c.bf16 %v3239_v5, %v3207_v6 }
 0x22e   : > { %v3299_v28 = vsel %vm2701_vm14, %v3281_v18, %v9382_v31 }
 0x231   : > { %v3345_v24 = vpop.permute.xlu1 %3344  ;;  %v3313_v61 = vpop.permute.xlu0 %3312 }
 0x235   : > { %v9427_v33 = vpop.permute.xlu1 %3290  ;;  %v9429_v1 = vpop.permute.xlu0 %3258 }
 0x236   : > { %16633 = vst [vmem:[#allocation234_spill] sm:$0xff] %v9427_v33  ;;  %16634 = vst [vmem:[#allocation235_spill] sm:$0xff] %v9429_v1 }
 0x239   : > { %v9437_v29 = vpop.permute.xlu1 %3322  ;;  %v9439_v43 = vpop.permute.xlu0 %3354 }
 0x23a   : > { %16635 = vst [vmem:[#allocation236_spill] sm:$0xff] %v9437_v29  ;;  %16636 = vst [vmem:[#allocation237_spill] sm:$0xff] %v9439_v43  ;;  %v3267_v43 = vsel %vm2215_vm5, %v3249_v37, %v9384_v35 }
 0x23d   : > { %v9443_v23 = vpop.permute.xlu1 %3132  ;;  %v9445_v17 = vpop.permute.xlu0 %3164 }
 0x23e   : > { %16637 = vst [vmem:[#allocation238_spill] sm:$0xff] %v9443_v23  ;;  %v3141_v58 = vsel %vm2378_vm11, %v9443_v23, %v3119_v2  ;;  %v3173_v20 = vsel %vm2443_vm12, %v9445_v17, %v3151_v25  ;;  %v3331_v2 = vsel %vm2766_vm15, %v3313_v61, %v9386_v40 }
 0x23f   : > { %v3142_v36 = vmul.f32 %v3141_v58, %v9084_v3  ;;  %v3174_v63 = vmul.f32 %v3173_v20, %v9087_v21  ;;  %v3268_v58 = vsel %vm2215_vm5, %v9419_v47, %v3249_v37  ;;  %v3271_v20 = vmul.f32 %v3267_v43, %v9133_v9 }
 0x240   : > { %v3300_v21 = vsel %vm2701_vm14, %v9403_v54, %v3281_v18  ;;  %v3303_v37 = vmul.f32 %v3299_v28, %v9164_v0  ;;  %v3332_v43 = vsel %vm2766_vm15, %v9423_v56, %v3313_v61  ;;  %v16714_v56 = vld [vmem:[#allocation154_spill] sm:$0xff] }
 0x241   : > { %v3374_v23 = vpack.c.bf16 %v3174_v63, %v3142_v36  ;;  %v9464_v29 = vpop.permute.xlu1 %3196  ;;  %v9466_v25 = vpop.permute.xlu0 %3228  ;;  %v3391_v0 = vpack.c.bf16 %v3271_v20, %v8739_v16  ;;  %v3302_v61 = vmul.f32 %v3300_v21, %v9172_v46 }
 0x242   : > { %16638 = vst [vmem:[#allocation239_spill] sm:$0xff] %v9464_v29  ;;  %16639 = vst [vmem:[#allocation240_spill] sm:$0xff] %v9466_v25  ;;  %v3205_v6 = vsel %vm2508_vm13, %v9464_v29, %v3183_v52  ;;  %v3237_v5 = vsel %vm2198_vm2, %v9466_v25, %v3215_v10  ;;  %v3335_v52 = vmul.f32 %v3331_v2, %v9190_v53  ;;  %v16733_v25 = vld [vmem:[#allocation8_spill] sm:$0xff] }
 0x243   : > { %v3206_v36 = vmul.f32 %v3205_v6, %v9128_v39  ;;  %v3238_v63 = vmul.f32 %v3237_v5, %v9152_v59  ;;  %3447 = vmatpush1.bf16.msra.mxu0 %v3374_v23  ;;  %v3270_v10 = vmul.f32 %v3268_v58, %v9158_v55  ;;  %v3363_v6 = vsel %vm2831_vm0, %v3345_v24, %v9388_v12 }
 0x244   : > { %3448 = vmatprep.subr.bf16.mxu0 %v3383_v14  ;;  %v3364_v23 = vsel %vm2831_vm0, %v9405_v42, %v3345_v24  ;;  %v3334_v14 = vmul.f32 %v3332_v43, %v9186_v44  ;;  %v3367_v58 = vmul.f32 %v9207_v26, %v3363_v6  ;;  %v3399_v53 = vpack.c.bf16 %v3335_v52, %v3303_v37 }
 0x245   : > { %v3382_v18 = vpack.c.bf16 %v3238_v63, %v3206_v36  ;;  %v9495_v5 = vpop.permute.xlu0 %3286  ;;  %v3127_v28 = vpop.permute.xlu1 %3126  ;;  %v3366_v2 = vmul.f32 %v9202_v38, %v3364_v23  ;;  %v3390_v9 = vpack.c.bf16 %v3270_v10, %v8733_v15  ;;  %v3116_v23 = vld [vmem:[%s15558_s12] sm:$0xf] }
 0x246   : > { %v3398_v63 = vpack.c.bf16 %v3334_v14, %v3302_v61  ;;  %v3407_v16 = vpack.c.bf16 %v3367_v58, %v3367_v58  ;;  %v3137_v21 = vsel %vm2378_vm11, %v9392_v45, %v3127_v28 }
 0x247   : > { %3449 = vmatpush1.bf16.msra.mxu0 %v3382_v18  ;;  %v3406_v55 = vpack.c.bf16 %v3366_v2, %v3366_v2 }
 0x248   : > { %3450 = vmatprep.subr.bf16.mxu0 %v3391_v0 }
 0x249   : > { %v9503_v24 = vpop.permute.xlu0 %3350  ;;  %v3159_v36 = vpop.permute.xlu1 %3158  ;;  %v3423_v20 = vsel %vm2308_vm9, %v3406_v55, 0 }
 0x24a   : > { %v3169_v38 = vsel %vm2443_vm12, %v9394_v57, %v3159_v36 }
 0x24b   : > { %3451 = vmatpush1.bf16.msra.mxu0 %v3390_v9  ;;  %v3146_v9 = vmul.f32 %v3137_v21, %v9243_v11  ;;  %v2361_v11 = vld [vmem:[%s15557_s11] sm:$0xff] }
 0x24c   : > { %3452 = vmatprep.subr.bf16.mxu0 %v3399_v53  ;;  %v3178_v53 = vmul.f32 %v3169_v38, %v9246_v48 }
 0x24d   : > { %v3191_v0 = vpop.permute.xlu1 %3190  ;;  %v9511_v26 = vpop.permute.xlu0 %3128 }
 0x24e   : > { %16640 = vst [vmem:[#allocation241_spill] sm:$0xff] %v9511_v26  ;;  %v3136_v15 = vsel %vm2378_vm11, %v3127_v28, %v9511_v26  ;;  %v3378_v18 = vpack.c.bf16 %v3178_v53, %v3146_v9  ;;  %v3201_v55 = vsel %vm2508_vm13, %v9399_v32, %v3191_v0 }
 0x24f   : > { %3453 = vmatpush1.bf16.msra.mxu0 %v3398_v63  ;;  %v3147_v37 = vmul.f32 %v3136_v15, %v9257_v22  ;;  %v3117_v22 = vld [vmem:[%s15559_s13] sm:$0xff] }
 0x250   : > { %7396 = vmatprep.subr.msk.bf16.mxu0 %vm2308_vm9, %v3407_v16 }
 0x251   : > { %v3223_v43 = vpop.permute.xlu1 %3222  ;;  %v9521_v52 = vpop.permute.xlu0 %3160 }
 0x252   : > { %16641 = vst [vmem:[#allocation242_spill] sm:$0xff] %v9521_v52  ;;  %v3168_v10 = vsel %vm2443_vm12, %v3159_v36, %v9521_v52  ;;  %v3233_v28 = vsel %vm2198_vm2, %v9401_v60, %v3223_v43  ;;  %v3210_v36 = vmul.f32 %v3201_v55, %v9285_v7  ;;  %v3629_v7 = vld [vmem:[%s15563_s17 + $0x8] sm:$0xff] }
 0x253   : > { %v3179_v6 = vmul.f32 %v3168_v10, %v9265_v49  ;;  %3455 = vmatpush1.bf16.msra.mxu0 %v3423_v20  ;;  %v3242_v63 = vmul.f32 %v3233_v28, %v9288_v8 }
 0x255   : > { %v9536_v61 = vpop.permute.xlu1 %3254  ;;  %v9538_v14 = vpop.permute.xlu0 %3192  ;;  %v3379_v2 = vpack.c.bf16 %v3179_v6, %v3147_v37  ;;  %v3386_v9 = vpack.c.bf16 %v3242_v63, %v3210_v36 }
 0x256   : > { %16642 = vst [vmem:[#allocation243_spill] sm:$0xff] %v9538_v14  ;;  %v3200_v58 = vsel %vm2508_vm13, %v3191_v0, %v9538_v14  ;;  %7397 = vmatmul.mubr.msk.bf16.vlgmr.msra.gmra.mrb[24].mxu0 %vm15864_vm10, %v3116_v23 }
 0x257   : > { %3528 = vmatprep.subr.bf16.mxu0 %v3379_v2  ;;  %3560 = vmatprep.mubr.bf16.mxu0 %v16519_v27  ;;  %v3211_v16 = vmul.f32 %v3200_v58, %v9299_v19 }
 0x258   : > { %3529 = vmatpush1.bf16.msra.mxu0 %v3378_v18 }
 0x259   : > { %v9548_v21 = vpop.permute.xlu1 %3318  ;;  %v9550_v38 = vpop.permute.xlu0 %3224 }
 0x25a   : > { %16643 = vst [vmem:[#allocation244_spill] sm:$0xff] %v9550_v38  ;;  %v3232_v0 = vsel %vm2198_vm2, %v3223_v43, %v9550_v38  ;;  %v16729_v38 = vld [vmem:[#allocation203_spill] sm:$0xff] }
 0x25b   : > { %v3243_v15 = vmul.f32 %v3232_v0, %v9307_v4 }
 0x25d   : > { %v3257_v53 = vpop.permute.xlu1 %3256  ;;  %v3387_v20 = vpack.c.bf16 %v3243_v15, %v3211_v16  ;;  %v3289_v37 = vpop.permute.xlu0 %3288  ;;  %v16644_v15 = vld [vmem:[#allocation236_spill] sm:$0xff] }
 0x25e   : > { %v3263_v10 = vsel %vm2215_vm5, %v3257_v53, %v9429_v1  ;;  %v3264_v6 = vsel %vm2215_vm5, %v9536_v61, %v3257_v53  ;;  %v3295_v18 = vsel %vm2701_vm14, %v3289_v37, %v9427_v33  ;;  %v3296_v43 = vsel %vm2701_vm14, %v9495_v5, %v3289_v37  ;;  %v16722_v1 = vld [vmem:[#allocation6_spill] sm:$0xff] }
 0x25f   : > { %v3274_v55 = vmul.f32 %v3264_v6, %v9321_v50  ;;  %v3275_v28 = vmul.f32 %v3263_v10, %v9324_v34  ;;  %3530 = vmatprep.subr.bf16.mxu0 %v3387_v20  ;;  %v3306_v36 = vmul.f32 %v3296_v43, %v9327_v51  ;;  %v3307_v63 = vmul.f32 %v3295_v18, %v9330_v30  ;;  %v16645_v20 = vld [vmem:[#allocation237_spill] sm:$0xff]  ;;  %v16647_v6 = vld [vmem:[#allocation223_spill] sm:$0xff]  ;;  %v16648_v43 = vld [vmem:[#allocation224_spill] sm:$0xff] }
 0x260   : > { %3531 = vmatpush1.bf16.msra.mxu0 %v3386_v9  ;;  %v16646_v9 = vld [vmem:[#allocation222_spill] sm:$0xff] }
 0x261   : > { %v3394_v2 = vpack.c.bf16 %v3274_v55, %v8969_v62  ;;  %v3395_v58 = vpack.c.bf16 %v3275_v28, %v8973_v41  ;;  %v3321_v16 = vpop.permute.xlu0 %3320  ;;  %v3353_v0 = vpop.permute.xlu1 %3352  ;;  %v16649_v28 = vld [vmem:[#allocation225_spill] sm:$0xff] }
 0x262   : > { %v3327_v53 = vsel %vm2766_vm15, %v3321_v16, %v16644_v15  ;;  %v3328_v37 = vsel %vm2766_vm15, %v9548_v21, %v3321_v16  ;;  %v3359_v62 = vsel %vm2831_vm0, %v3353_v0, %v16645_v20  ;;  %v3360_v41 = vsel %vm2831_vm0, %v9503_v24, %v3353_v0 }
 0x263   : > { %3532 = vmatprep.subr.bf16.mxu0 %v3395_v58  ;;  %v3338_v10 = vmul.f32 %v3328_v37, %v16646_v9  ;;  %v3339_v18 = vmul.f32 %v3327_v53, %v16647_v6  ;;  %v3370_v55 = vmul.f32 %v16648_v43, %v3360_v41  ;;  %v3371_v51 = vmul.f32 %v16649_v28, %v3359_v62  ;;  %v16650_v53 = vld [vmem:[#allocation164_spill] sm:$0xff] }
 0x264   : > { %3533 = vmatpush1.bf16.msra.mxu0 %v3394_v2  ;;  %v16659_v28 = vld [vmem:[#allocation132_spill] sm:$0xff] }
 0x265   : > { %v3402_v16 = vpack.c.bf16 %v3338_v10, %v3306_v36  ;;  %v3410_v30 = vpack.c.bf16 %v3370_v55, %v3370_v55  ;;  %v3411_v50 = vpack.c.bf16 %v3371_v51, %v3371_v51  ;;  %v3403_v34 = vpack.c.bf16 %v3339_v18, %v3307_v63  ;;  %v7492_v36 = vld [vmem:[%s7812_s0] sm:$0xff] }
 0x266   : > { %v16651_v63 = vld [vmem:[#allocation163_spill] sm:$0xff]  ;;  %v7481_v55 = vld [vmem:[%s15562_s16 + $0x4] ss:$8 sps:$4 sm:$0xff]  }
 0x267   : > { %3534 = vmatprep.subr.bf16.mxu0 %v3403_v34  ;;  %v3435_v58 = vsel %vm2308_vm9, %v3410_v30, 0 }
 0x268   : > { %3535 = vmatpush1.bf16.msra.mxu0 %v3402_v16  ;;  %v16661_v16 = vld [vmem:[#allocation133_spill] sm:$0xff] }
 0x269   : > { %7400 = vmatprep.subr.msk.bf16.mxu0 %vm2308_vm9, %v3411_v50  ;;  %v7493_v50 = vld [vmem:[%s7812_s0 + $0x8] sm:$0xff]  ;;  %s16654_s0 = smov 15  }
 0x26c   : > { %3537 = vmatpush1.bf16.msra.mxu0 %v3435_v58  ;;  %v16662_v58 = vld [vmem:[#allocation134_spill] sm:$0xff] }
 0x26d   : > { %v2349_v0 = vpop.f32.mrb[20].mxu1 }
 0x26e   : > { %v2350_v37 = vadd.f32 %v2349_v0, %v16650_v53  ;;  %v2351_v41 = vpop.f32.mrb[21].mxu1  ;;  %v16663_v0 = vld [vmem:[#allocation135_spill] sm:$0xff] }
 0x26f   : > { %v2352_v62 = vadd.f32 %v2351_v41, %v16650_v53  ;;  %v2353_v2 = vpop.f32.mrb[22].mxu1  ;;  %7401 = vmatmul.mubr.msk.bf16.vlgmr.msra.gmra.mrb[28].mxu0 %vm15864_vm10, %v3116_v23  ;;  %vm3795_vm10 = vcmask 130048   ;;  %v16664_v53 = vld [vmem:[#allocation136_spill] sm:$0xff] }
 0x270   : > { %v9596_v51 = vmul.f32 %v7492_v36, %v2350_v37  ;;  %v9599_v34 = vadd.f32 %v2353_v2, %v16651_v63  ;;  %v2355_v10 = vpop.f32.mrb[23].mxu1  ;;  %7406 = vmatprep.mubr.msk.bf16.mxu0 %vm3795_vm10, %v7481_v55  ;;  %v16665_v37 = vld [vmem:[#allocation137_spill] sm:$0xff]  ;;  %v16666_v41 = vld [vmem:[#allocation160_spill] sm:$0xff] }
 0x271   : > { %v9602_v18 = vmul.f32 %v7493_v50, %v2352_v62  ;;  %v9605_v30 = vadd.f32 %v2355_v10, %v16651_v63  ;;  %v16669_v55 = vld [vmem:[#allocation161_spill] sm:$0xff] }
 0x272   : > { %3632 = vrot.lane.b32.xlu0 %v9599_v34, %s16652_s7  ;;  %3630 = vrot.lane.b32.xlu1 %v9596_v51, %s16652_s7 }
 0x276   : > { %3648 = vrot.lane.b32.xlu0 %v9599_v34, %s16653_s25  ;;  %3646 = vrot.lane.b32.xlu1 %v9596_v51, %s16653_s25 }
 0x27a   : > { %3664 = vrot.lane.b32.xlu0 %v9599_v34, %s16654_s0  ;;  %3662 = vrot.lane.b32.xlu1 %v9596_v51, %s16654_s0 }
 0x27e   : > { %3680 = vrot.lane.b32.xlu0 %v9599_v34, %s16655_s2  ;;  %3678 = vrot.lane.b32.xlu1 %v9596_v51, %s16655_s2 }
 0x282   : > { %3696 = vrot.lane.b32.xlu0 %v9599_v34, %s16560_s4  ;;  %3694 = vrot.lane.b32.xlu1 %v9596_v51, %s16560_s4 }
 0x286   : > { %3712 = vrot.lane.b32.xlu0 %v9599_v34, %s16656_s6  ;;  %3710 = vrot.lane.b32.xlu1 %v9596_v51, %s16656_s6 }
 0x28a   : > { %3728 = vrot.lane.b32.xlu0 %v9599_v34, %s16657_s8  ;;  %3726 = vrot.lane.b32.xlu1 %v9596_v51, %s16657_s8 }
 0x28e   : > { %3636 = vrot.lane.b32.xlu0 %v9605_v30, %s16652_s7  ;;  %3634 = vrot.lane.b32.xlu1 %v9602_v18, %s16652_s7 }
 0x292   : > { %3652 = vrot.lane.b32.xlu0 %v9605_v30, %s16653_s25  ;;  %3650 = vrot.lane.b32.xlu1 %v9602_v18, %s16653_s25 }
 0x296   : > { %3668 = vrot.lane.b32.xlu0 %v9605_v30, %s16654_s0  ;;  %3666 = vrot.lane.b32.xlu1 %v9602_v18, %s16654_s0  ;;  %s16660_s0 = smov 31  }
 0x29a   : > { %3684 = vrot.lane.b32.xlu0 %v9605_v30, %s16655_s2  ;;  %3682 = vrot.lane.b32.xlu1 %v9602_v18, %s16655_s2 }
 0x29e   : > { %3744 = vrot.lane.b32.xlu0 %v9599_v34, %s16658_s9  ;;  %3742 = vrot.lane.b32.xlu1 %v9596_v51, %s16658_s9 }
 0x2a2   : > { %3700 = vrot.lane.b32.xlu0 %v9605_v30, %s16560_s4  ;;  %3698 = vrot.lane.b32.xlu1 %v9602_v18, %s16560_s4 }
 0x2a6   : > { %3716 = vrot.lane.b32.xlu0 %v9605_v30, %s16656_s6  ;;  %3714 = vrot.lane.b32.xlu1 %v9602_v18, %s16656_s6 }
 0x2aa   : > { %3732 = vrot.lane.b32.xlu0 %v9605_v30, %s16657_s8  ;;  %3730 = vrot.lane.b32.xlu1 %v9602_v18, %s16657_s8 }
 0x2ae   : > { %3748 = vrot.lane.b32.xlu0 %v9605_v30, %s16658_s9  ;;  %3746 = vrot.lane.b32.xlu1 %v9602_v18, %s16658_s9  ;;  %s16824_s9 = sld [smem:[#allocation247_spill]] }
 0x2b2   : > { %2431 = vrot.lane.b32.xlu0 %v16659_v28, %s16552_s5  ;;  %2366 = vrot.lane.b32.xlu1 %v16659_v28, %s16551_s21 }
 0x2b4   : > { %s10396_s6 = scalar_lea.vmem %s16824_s9, %s7441_s26 }
 0x2b6   : > { %2561 = vrot.lane.b32.xlu0 %v16659_v28, %s16655_s2  ;;  %2496 = vrot.lane.b32.xlu1 %v16659_v28, %s16660_s0 }
 0x2ba   : > { %2691 = vrot.lane.b32.xlu0 %v16661_v16, %s16600_s28  ;;  %2627 = vrot.lane.b32.xlu1 %v16661_v16, %s16560_s4 }
 0x2be   : > { %2821 = vrot.lane.b32.xlu0 %v16661_v16, %s16579_s24  ;;  %2756 = vrot.lane.b32.xlu1 %v16661_v16, %s16563_s27 }
 0x2c2   : > { %2439 = vrot.lane.b32.xlu0 %v16662_v58, %s16552_s5  ;;  %2374 = vrot.lane.b32.xlu1 %v16662_v58, %s16551_s21 }
 0x2c5   : > { %v9735_v36 = vpop.f32.mrb[16].mxu0 }
 0x2c6   : > { %2569 = vrot.lane.b32.xlu0 %v16662_v58, %s16655_s2  ;;  %2504 = vrot.lane.b32.xlu1 %v16662_v58, %s16660_s0  ;;  %16667 = vst [vmem:[#allocation224_spill] sm:$0xff] %v9735_v36  ;;  %v9737_v50 = vpop.f32.mrb[17].mxu0  ;;  %v16673_v36 = vld [vmem:[#allocation148_spill] sm:$0xff] }
 0x2c7   : > { %16668 = vst [vmem:[#allocation225_spill] sm:$0xff] %v9737_v50  ;;  %v2990_v23 = vpop.f32.mrb[18].mxu0 }
 0x2c8   : > { %v2991_v43 = vpop.f32.mrb[19].mxu0  ;;  %v3628_v23 = vld [vmem:[%s15563_s17] sm:$0xff] }
 0x2ca   : > { %2699 = vrot.lane.b32.xlu0 %v16663_v0, %s16600_s28  ;;  %2635 = vrot.lane.b32.xlu1 %v16663_v0, %s16560_s4 }
 0x2ce   : > { %2829 = vrot.lane.b32.xlu0 %v16663_v0, %s16579_s24  ;;  %2764 = vrot.lane.b32.xlu1 %v16663_v0, %s16563_s27 }
 0x2d2   : > { %3154 = vrot.lane.b32.xlu0 %v16664_v53, %s16552_s5  ;;  %3122 = vrot.lane.b32.xlu1 %v16664_v53, %s16551_s21 }
 0x2d6   : > { %3218 = vrot.lane.b32.xlu0 %v16664_v53, %s16655_s2  ;;  %3186 = vrot.lane.b32.xlu1 %v16664_v53, %s16660_s0 }
 0x2da   : > { %3284 = vrot.lane.b32.xlu0 %v16665_v37, %s16600_s28  ;;  %3252 = vrot.lane.b32.xlu1 %v16665_v37, %s16560_s4 }
 0x2de   : > { %3348 = vrot.lane.b32.xlu0 %v16665_v37, %s16579_s24  ;;  %3316 = vrot.lane.b32.xlu1 %v16665_v37, %s16563_s27 }
 0x2e2   : > { %3162 = vrot.lane.b32.xlu0 %v16666_v41, %s16552_s5  ;;  %3130 = vrot.lane.b32.xlu1 %v16666_v41, %s16551_s21  ;;  %v9743_v8 = vpop.f32.mrb[20].mxu0 }
 0x2e3   : > { %16670 = vst [vmem:[#allocation164_spill] sm:$0xff] %v9743_v8  ;;  %v9749_v4 = vpop.f32.mrb[21].mxu0 }
 0x2e4   : > { %v3633_v62 = vpop.permute.xlu0 %3632  ;;  %v3631_v2 = vpop.permute.xlu1 %3630  ;;  %16671 = vst [vmem:[#allocation163_spill] sm:$0xff] %v9749_v4 }
 0x2e5   : > { %v3072_v43 = vpop.f32.mrb[22].mxu0 }
 0x2e6   : > { %3226 = vrot.lane.b32.xlu0 %v16666_v41, %s16655_s2  ;;  %3194 = vrot.lane.b32.xlu1 %v16666_v41, %s16660_s0  ;;  %v3073_v49 = vpop.f32.mrb[23].mxu0 }
 0x2e7   : > { %v4019_v49 = vld [vmem:[%s15561_s15 + $0x8] sm:$0xff] }
 0x2e8   : > { %v3649_v63 = vpop.permute.xlu0 %3648  ;;  %v3647_v10 = vpop.permute.xlu1 %3646 }
 0x2ea   : > { %3292 = vrot.lane.b32.xlu0 %v16669_v55, %s16600_s28  ;;  %3260 = vrot.lane.b32.xlu1 %v16669_v55, %s16560_s4 }
 0x2ec   : > { %v3665_v9 = vpop.permute.xlu0 %3664  ;;  %v3663_v6 = vpop.permute.xlu1 %3662 }
 0x2ee   : > { %3356 = vrot.lane.b32.xlu0 %v16669_v55, %s16579_s24  ;;  %3324 = vrot.lane.b32.xlu1 %v16669_v55, %s16563_s27 }
 0x2f0   : > { %v9757_v19 = vpop.permute.xlu0 %3680  ;;  %v9759_v48 = vpop.permute.xlu1 %3678 }
 0x2f2   : > { %3783 = vperm.xlu0 %7467, %v3629_v7   ;;  %3778 = vperm.xlu1 %7466, %v3628_v23   ;;  %v4018_v7 = vld [vmem:[%s15561_s15] sm:$0xff] }
 0x2f4   : > { %v9767_v44 = vpop.permute.xlu0 %3696  ;;  %v9769_v46 = vpop.permute.xlu1 %3694 }
 0x2f6   : > { %3416 = vperm.xlu0 %7467, %v3117_v22   ;;  %2922 = vperm.xlu1 %7466, %v2361_v11  }
 0x2f8   : > { %v9777_v23 = vpop.permute.xlu0 %3712  ;;  %v9779_v43 = vpop.permute.xlu1 %3710 }
 0x2fa   : > { %4611 = vperm.xlu0 %7467, %v4019_v49   ;;  %4606 = vperm.xlu1 %7466, %v4018_v7   ;;  %v16672_v49 = vld [vmem:[#allocation147_spill] sm:$0xff] }
 0x2fc   : > { %v9781_v59 = vpop.permute.xlu0 %3728  ;;  %v9783_v39 = vpop.permute.xlu1 %3726 }
 0x300   : > { %v3637_v22 = vpop.permute.xlu0 %3636  ;;  %v3635_v11 = vpop.permute.xlu1 %3634 }
 0x301   : > { %v3639_v3 = vsel %vm2147_vm4, %v3633_v62, %v3637_v22  ;;  %v3641_v4 = vsel %vm2147_vm4, %v3637_v22, %v3633_v62  ;;  %v3638_v8 = vsel %vm2147_vm4, %v3631_v2, %v3635_v11  ;;  %v3640_v50 = vsel %vm2147_vm4, %v3635_v11, %v3631_v2  ;;  %v16675_v11 = vld [vmem:[#allocation144_spill] sm:$0xff] }
 0x302   : > { %v3644_v7 = vmul.f32 %v3641_v4, %v16672_v49  ;;  %v3645_v41 = vmul.f32 %v3639_v3, %v16673_v36  ;;  %v3642_v33 = vmul.f32 %v3640_v50, %v16672_v49  ;;  %v3643_v42 = vmul.f32 %v3638_v8, %v16673_v36  ;;  %v16674_v4 = vld [vmem:[#allocation143_spill] sm:$0xff] }
 0x304   : > { %v3758_v55 = vpack.c.bf16 %v3644_v7, %v3642_v33  ;;  %v3653_v15 = vpop.permute.xlu0 %3652  ;;  %v3651_v20 = vpop.permute.xlu1 %3650  ;;  %v3759_v54 = vpack.c.bf16 %v3645_v41, %v3643_v42 }
 0x305   : > { %v3655_v62 = vsel %vm2164_vm1, %v3649_v63, %v3653_v15  ;;  %v3657_v22 = vsel %vm2164_vm1, %v3653_v15, %v3649_v63  ;;  %v3654_v2 = vsel %vm2164_vm1, %v3647_v10, %v3651_v20  ;;  %v3656_v3 = vsel %vm2164_vm1, %v3651_v20, %v3647_v10 }
 0x306   : > { %v3660_v50 = vmul.f32 %v3657_v22, %v16674_v4  ;;  %v3661_v8 = vmul.f32 %v3655_v62, %v16675_v11  ;;  %v3658_v33 = vmul.f32 %v3656_v3, %v16674_v4  ;;  %v3659_v42 = vmul.f32 %v3654_v2, %v16675_v11  ;;  %3799 = vmatprep.subr.bf16.mxu0 %v3759_v54  ;;  %v16676_v62 = vld [vmem:[#allocation152_spill] sm:$0xff]  ;;  %v16677_v54 = vld [vmem:[#allocation149_spill] sm:$0xff] }
 0x307   : > { %3800 = vmatpush1.bf16.msra.mxu0 %v3758_v55  ;;  %vm16758_vm1 = vcmask 588800  }
 0x308   : > { %v3760_v41 = vpack.c.bf16 %v3660_v50, %v3658_v33  ;;  %v3669_v36 = vpop.permute.xlu0 %3668  ;;  %v3667_v49 = vpop.permute.xlu1 %3666  ;;  %v3761_v15 = vpack.c.bf16 %v3661_v8, %v3659_v42  ;;  %vm16809_vm4 = vmmov %vm16758_vm1 }
 0x309   : > { %v3671_v63 = vsel %vm2181_vm3, %v3665_v9, %v3669_v36  ;;  %v3673_v20 = vsel %vm2181_vm3, %v3669_v36, %v3665_v9  ;;  %v3670_v10 = vsel %vm2181_vm3, %v3663_v6, %v3667_v49  ;;  %v3672_v7 = vsel %vm2181_vm3, %v3667_v49, %v3663_v6  ;;  %v16679_v49 = vld [vmem:[#allocation146_spill] sm:$0xff]  ;;  %vm16784_vm3 = vmmov %vm16758_vm1 }
 0x30a   : > { %v3676_v22 = vmul.f32 %v3673_v20, %v16676_v62  ;;  %v3677_v55 = vmul.f32 %v3671_v63, %v16677_v54  ;;  %v3674_v2 = vmul.f32 %v3672_v7, %v16676_v62  ;;  %v3675_v3 = vmul.f32 %v3670_v10, %v16677_v54  ;;  %3801 = vmatprep.subr.bf16.mxu0 %v3761_v15 }
 0x30b   : > { %3802 = vmatpush1.bf16.msra.mxu0 %v3760_v41  ;;  %v16678_v41 = vld [vmem:[#allocation150_spill] sm:$0xff] }
 0x30c   : > { %v3762_v4 = vpack.c.bf16 %v3676_v22, %v3674_v2  ;;  %v3685_v50 = vpop.permute.xlu0 %3684  ;;  %v3683_v11 = vpop.permute.xlu1 %3682  ;;  %v3763_v9 = vpack.c.bf16 %v3677_v55, %v3675_v3 }
 0x30d   : > { %v3687_v8 = vsel %vm2198_vm2, %v9757_v19, %v3685_v50  ;;  %v3689_v6 = vsel %vm2198_vm2, %v3685_v50, %v9757_v19  ;;  %v3686_v33 = vsel %vm2198_vm2, %v9759_v48, %v3683_v11  ;;  %v3688_v42 = vsel %vm2198_vm2, %v3683_v11, %v9759_v48  ;;  %v16681_v50 = vld [vmem:[#allocation153_spill] sm:$0xff] }
 0x30e   : > { %v3692_v36 = vmul.f32 %v3689_v6, %v16678_v41  ;;  %v3693_v15 = vmul.f32 %v3687_v8, %v16679_v49  ;;  %v3690_v63 = vmul.f32 %v3688_v42, %v16678_v41  ;;  %v3691_v20 = vmul.f32 %v3686_v33, %v16679_v49  ;;  %3803 = vmatprep.subr.bf16.mxu0 %v3763_v9 }
 0x30f   : > { %3804 = vmatpush1.bf16.msra.mxu0 %v3762_v4  ;;  %v16680_v48 = vpack.c.bf16 %v9605_v30, %v9602_v18  ;;  %v16682_v30 = vld [vmem:[#allocation151_spill] sm:$0xff]  ;;  %v16683_v6 = vpack.c.bf16 %v9599_v34, %v9596_v51  ;;  %v16684_v34 = vld [vmem:[#allocation156_spill] sm:$0xff] }
 0x310   : > { %v3764_v10 = vpack.c.bf16 %v3692_v36, %v3690_v63  ;;  %v3745_v19 = vpop.permute.xlu0 %3744  ;;  %v3743_v7 = vpop.permute.xlu1 %3742  ;;  %v3765_v62 = vpack.c.bf16 %v3693_v15, %v3691_v20  ;;  %v16685_v63 = vld [vmem:[#allocation157_spill] sm:$0xff] }
 0x312   : > { %3805 = vmatprep.subr.bf16.mxu0 %v3765_v62 }
 0x313   : > { %3806 = vmatpush1.bf16.msra.mxu0 %v3764_v10 }
 0x314   : > { %v3701_v22 = vpop.permute.xlu0 %3700  ;;  %3807 = vmatprep.subr.bf16.mxu0 %v16680_v48  ;;  %v3699_v54 = vpop.permute.xlu1 %3698 }
 0x315   : > { %v3703_v55 = vsel %vm2215_vm5, %v9767_v44, %v3701_v22  ;;  %v3705_v2 = vsel %vm2215_vm5, %v3701_v22, %v9767_v44  ;;  %v3702_v3 = vsel %vm2215_vm5, %v9769_v46, %v3699_v54  ;;  %v3704_v4 = vsel %vm2215_vm5, %v3699_v54, %v9769_v46 }
 0x316   : > { %v3708_v18 = vmul.f32 %v3703_v55, %v16681_v50  ;;  %v3709_v11 = vmul.f32 %v3705_v2, %v16682_v30  ;;  %v3706_v9 = vmul.f32 %v3702_v3, %v16681_v50  ;;  %v3707_v8 = vmul.f32 %v3704_v4, %v16682_v30  ;;  %v9878_v55 = vld [vmem:[%s16574_s3 + $0x10] sm:$0xff] }
 0x317   : > { %3808 = vmatpush1.bf16.msra.mxu0 %v16683_v6 }
 0x318   : > { %v3768_v44 = vpack.c.bf16 %v3708_v18, %v3706_v9  ;;  %v3717_v33 = vpop.permute.xlu0 %3716  ;;  %v3715_v42 = vpop.permute.xlu1 %3714  ;;  %v3769_v41 = vpack.c.bf16 %v3709_v11, %v3707_v8  ;;  %v16686_v18 = vld [vmem:[#allocation158_spill] sm:$0xff]  ;;  %v16687_v11 = vld [vmem:[#allocation159_spill] sm:$0xff] }
 0x319   : > { %v3719_v46 = vsel %vm2232_vm6, %v9777_v23, %v3717_v33  ;;  %v3721_v36 = vsel %vm2232_vm6, %v3717_v33, %v9777_v23  ;;  %v3718_v49 = vsel %vm2232_vm6, %v9779_v43, %v3715_v42  ;;  %v3720_v51 = vsel %vm2232_vm6, %v3715_v42, %v9779_v43  ;;  %v9883_v43 = vld [vmem:[%s16574_s3 + $0x18] sm:$0xff]  ;;  %vm16834_vm6 = vmmov %vm16758_vm1 }
 0x31a   : > { %v3724_v15 = vmul.f32 %v3719_v46, %v16684_v34  ;;  %v3725_v20 = vmul.f32 %v3721_v36, %v16685_v63  ;;  %v3722_v10 = vmul.f32 %v3718_v49, %v16684_v34  ;;  %v3723_v62 = vmul.f32 %v3720_v51, %v16685_v63  ;;  %3809 = vmatprep.subr.bf16.mxu0 %v3769_v41  ;;  %v16691_v36 = vld [vmem:[#allocation141_spill] sm:$0xff] }
 0x31b   : > { %3810 = vmatpush1.bf16.msra.mxu0 %v3768_v44  ;;  %v16688_v44 = vld [vmem:[#allocation139_spill] sm:$0xff]  ;;  %v9911_v49 = vrot.slane %v9878_v55, %v16691_v36  ;;  %v9915_v51 = vrot.slane %v9883_v43, %v16691_v36 }
 0x31c   : > { %v3770_v22 = vpack.c.bf16 %v3724_v15, %v3722_v10  ;;  %v3733_v23 = vpop.permute.xlu0 %3732  ;;  %v3731_v48 = vpop.permute.xlu1 %3730  ;;  %v3771_v54 = vpack.c.bf16 %v3725_v20, %v3723_v62  ;;  %v9907_v33 = vrot.slane %v9883_v43, %v16688_v44  ;;  %v7494_v10 = vld [vmem:[%s16530_s1 + $0x10] ss:$0 sm:$0xff] }
 0x31d   : > { %v3735_v2 = vsel %vm2249_vm7, %v9781_v59, %v3733_v23  ;;  %v3737_v3 = vsel %vm2249_vm7, %v3733_v23, %v9781_v59  ;;  %v3734_v4 = vsel %vm2249_vm7, %v9783_v39, %v3731_v48  ;;  %v3736_v50 = vsel %vm2249_vm7, %v3731_v48, %v9783_v39  ;;  %16692 = vst [vmem:[#allocation134_spill] sm:$0xff] %v9911_v49 }
 0x31e   : > { %v3740_v30 = vmul.f32 %v3735_v2, %v16686_v18  ;;  %v3741_v9 = vmul.f32 %v3737_v3, %v16687_v11  ;;  %v3738_v8 = vmul.f32 %v3734_v4, %v16686_v18  ;;  %v3739_v6 = vmul.f32 %v3736_v50, %v16687_v11  ;;  %3811 = vmatprep.subr.bf16.mxu0 %v3771_v54 }
 0x31f   : > { %3812 = vmatpush1.bf16.msra.mxu0 %v3770_v22  ;;  %v9903_v59 = vrot.slane %v9878_v55, %v16688_v44  ;;  %16690 = vst [vmem:[#allocation133_spill] sm:$0xff] %v9907_v33  ;;  %16693 = vst [vmem:[#allocation135_spill] sm:$0xff] %v9915_v51  ;;  %v7495_v22 = vld [vmem:[%s16530_s1 + $0x18] ss:$0 sm:$0xff]  ;;  %vm5714_vm7 = vcmask 719872  }
 0x320   : > { %v3772_v42 = vpack.c.bf16 %v3740_v30, %v3738_v8  ;;  %v3749_v39 = vpop.permute.xlu0 %3748  ;;  %v3747_v41 = vpop.permute.xlu1 %3746  ;;  %v3773_v46 = vpack.c.bf16 %v3741_v9, %v3739_v6  ;;  %v16697_v30 = vld [vmem:[#allocation142_spill] sm:$0xff]  ;;  %v16700_v8 = vld [vmem:[#allocation167_spill] sm:$0xff] }
 0x321   : > { %16689 = vst [vmem:[#allocation132_spill] sm:$0xff] %v9903_v59  ;;  %v3751_v34 = vsel %vm2266_vm8, %v3745_v19, %v3749_v39  ;;  %v3753_v15 = vsel %vm2266_vm8, %v3749_v39, %v3745_v19  ;;  %v3750_v63 = vsel %vm2266_vm8, %v3743_v7, %v3747_v41  ;;  %v3752_v20 = vsel %vm2266_vm8, %v3747_v41, %v3743_v7  ;;  %v16694_v19 = vld [vmem:[#allocation140_spill] sm:$0xff]  ;;  %v16702_v41 = vld [vmem:[#allocation170_spill] sm:$0xff] }
 0x322   : > { %v3756_v62 = vmul.f32 %v7494_v10, %v3751_v34  ;;  %v3757_v23 = vmul.f32 %v7495_v22, %v3753_v15  ;;  %v3754_v48 = vmul.f32 %v7494_v10, %v3750_v63  ;;  %v3755_v54 = vmul.f32 %v7495_v22, %v3752_v20  ;;  %3813 = vmatprep.subr.bf16.mxu0 %v3773_v46  ;;  %v16703_v34 = vld [vmem:[#allocation180_spill] sm:$0xff] }
 0x323   : > { %3814 = vmatpush1.bf16.msra.mxu0 %v3772_v42  ;;  %v9933_v2 = vrot.slane %v9878_v55, %v16694_v19  ;;  %v9937_v7 = vrot.slane %v9883_v43, %v16694_v19  ;;  %v9941_v11 = vrot.slane %v9878_v55, %v16697_v30  ;;  %v9945_v9 = vrot.slane %v9883_v43, %v16697_v30  ;;  %v16701_v42 = vld [vmem:[#allocation183_spill] sm:$0xff] }
 0x324   : > { %v3774_v3 = vpack.c.bf16 %v3756_v62, %v3754_v48  ;;  %v2432_v4 = vpop.permute.xlu0 %2431  ;;  %v2367_v50 = vpop.permute.xlu1 %2366  ;;  %v3775_v18 = vpack.c.bf16 %v3757_v23, %v3755_v54  ;;  %v7483_v22 = vld [vmem:[%s15562_s16] ss:$8 sps:$4 sm:$0xff]  }
 0x325   : > { %16695 = vst [vmem:[#allocation136_spill] sm:$0xff] %v9933_v2  ;;  %16696 = vst [vmem:[#allocation137_spill] sm:$0xff] %v9937_v7  ;;  %v2448_v6 = vsel %vm2443_vm12, %v2432_v4, %v16700_v8  ;;  %v2449_v39 = vsel %vm2443_vm12, %v16701_v42, %v2432_v4  ;;  %v2383_v46 = vsel %vm2378_vm11, %v2367_v50, %v16702_v41  ;;  %v16704_v8 = vld [vmem:[#allocation145_spill] sm:$0xff]  ;;  %v16707_v42 = vld [vmem:[#allocation4_spill] sm:$0xff] }
 0x326   : > { %16698 = vst [vmem:[#allocation147_spill] sm:$0xff] %v9941_v11  ;;  %16699 = vst [vmem:[#allocation148_spill] sm:$0xff] %v9945_v9  ;;  %v2384_v15 = vsel %vm2378_vm11, %v16703_v34, %v2367_v50  ;;  %v2486_v63 = vmul.f32 %v9903_v59, %v2449_v39  ;;  %v2487_v20 = vmul.f32 %v9907_v33, %v2448_v6  ;;  %3815 = vmatprep.subr.bf16.mxu0 %v3775_v18  ;;  %v16708_v18 = vld [vmem:[#allocation169_spill] sm:$0xff]  ;;  %v16709_v39 = vld [vmem:[#allocation194_spill] sm:$0xff] }
 0x327   : > { %v2421_v10 = vmul.f32 %v9911_v49, %v2384_v15  ;;  %v2422_v62 = vmul.f32 %v9915_v51, %v2383_v46  ;;  %3816 = vmatpush1.bf16.msra.mxu0 %v3774_v3  ;;  %v9968_v50 = vrot.slane %v9878_v55, %v16704_v8  ;;  %v9972_v6 = vrot.slane %v9883_v43, %v16704_v8  ;;  %v16710_v46 = vld [vmem:[#allocation171_spill] sm:$0xff]  ;;  %v16711_v15 = vld [vmem:[#allocation190_spill] sm:$0xff] }
 0x328   : > { %v2562_v48 = vpop.permute.xlu0 %2561  ;;  %v2497_v54 = vpop.permute.xlu1 %2496  ;;  %3887 = vmatprep.subr.bf16.mxu0 %v16707_v42 }
 0x329   : > { %v2882_v23 = vpack.c.bf16 %v2486_v63, %v2421_v10  ;;  %v2883_v4 = vpack.c.bf16 %v2487_v20, %v2422_v62  ;;  %16705 = vst [vmem:[#allocation143_spill] sm:$0xff] %v9968_v50  ;;  %16706 = vst [vmem:[#allocation144_spill] sm:$0xff] %v9972_v6  ;;  %v2577_v3 = vsel %vm2198_vm2, %v2562_v48, %v16708_v18  ;;  %v9987_v20 = vpop.f32.mrb[24].mxu0 }
 0x32a   : > { %v2578_v41 = vsel %vm2198_vm2, %v16709_v39, %v2562_v48  ;;  %v2513_v34 = vsel %vm2508_vm13, %v2497_v54, %v16710_v46  ;;  %v2514_v63 = vsel %vm2508_vm13, %v16711_v15, %v2497_v54  ;;  %16712 = vst [vmem:[#allocation152_spill] sm:$0xff] %v9987_v20  ;;  %v2616_v62 = vmul.f32 %v9937_v7, %v2577_v3  ;;  %v9993_v48 = vpop.f32.mrb[25].mxu0 }
 0x32b   : > { %v2615_v10 = vmul.f32 %v9933_v2, %v2578_v41  ;;  %v2551_v42 = vmul.f32 %v9941_v11, %v2514_v63  ;;  %v2552_v18 = vmul.f32 %v9945_v9, %v2513_v34  ;;  %2993 = vmatprep.subr.bf16.mxu1 %v2883_v4  ;;  %16713 = vst [vmem:[#allocation149_spill] sm:$0xff] %v9993_v48  ;;  %v3484_v39 = vpop.f32.mrb[26].mxu0  ;;  %v10006_v4 = vld [vmem:[%s16574_s3 + $0x38] sm:$0xff] }
 0x32c   : > { %3832 = vmatmul.mubr.bf16.vlgmr.msra.gmra.mrb[32].mxu0 %v7483_v22  ;;  %2994 = vmatpush1.bf16.msra.mxu1 %v2882_v23  ;;  %v9997_v54 = vrot.slane %v9878_v55, %v16714_v56  ;;  %v10001_v41 = vrot.slane %v9883_v43, %v16714_v56  ;;  %v2692_v3 = vpop.permute.xlu0 %2691  ;;  %v2628_v15 = vpop.permute.xlu1 %2627  ;;  %v16717_v22 = vld [vmem:[#allocation5_spill] sm:$0xff]  ;;  %v16718_v23 = vld [vmem:[#allocation202_spill] sm:$0xff]  ;;  %v16720_v39 = vld [vmem:[#allocation212_spill] sm:$0xff] }
 0x32d   : > { %v2890_v46 = vpack.c.bf16 %v2615_v10, %v2551_v42  ;;  %v2891_v63 = vpack.c.bf16 %v2616_v62, %v2552_v18  ;;  %3888 = vmatpush1.bf16.msra.mxu0 %v16717_v22  ;;  %v2705_v34 = vsel %vm2701_vm14, %v2692_v3, %v16718_v23  ;;  %v16719_v10 = vld [vmem:[#allocation166_spill] sm:$0xff]  ;;  %v2640_v48 = vsel %vm2215_vm5, %v2628_v15, %v16720_v39  ;;  %v3485_v20 = vpop.f32.mrb[27].mxu0  ;;  %v16723_v23 = vld [vmem:[#allocation155_spill] sm:$0xff] }
 0x32e   : > { %16715 = vst [vmem:[#allocation150_spill] sm:$0xff] %v9997_v54  ;;  %16716 = vst [vmem:[#allocation146_spill] sm:$0xff] %v10001_v41  ;;  %v2706_v42 = vsel %vm2701_vm14, %v16719_v10, %v2692_v3  ;;  %v16721_v62 = vld [vmem:[#allocation162_spill] sm:$0xff]  ;;  %3889 = vmatprep.subr.bf16.mxu0 %v16722_v1  ;;  %v2680_v47 = vmul.f32 %v9972_v6, %v2640_v48  ;;  %v10026_v14 = vrot.slane %v9878_v55, %v16723_v23  ;;  %v10035_v20 = vld [vmem:[%s16574_s3 + $0x50] ss:$0 sm:$0xff] }
 0x32f   : > { %v2641_v18 = vsel %vm2215_vm5, %v16721_v62, %v2628_v15  ;;  %2995 = vmatprep.subr.bf16.mxu1 %v2891_v63  ;;  %v10030_v3 = vrot.slane %v9883_v43, %v16723_v23  ;;  %v10040_v1 = vld [vmem:[%s16574_s3 + $0x58] ss:$0 sm:$0xff]  ;;  %v10044_v48 = vrot.slane %v10006_v4, %v16688_v44  ;;  %v10048_v55 = vrot.slane %v10006_v4, %v16691_v36  ;;  %v10057_v62 = vld [vmem:[%s16574_s3 + $0x30] sm:$0xff] }
 0x330   : > { %v2679_v22 = vmul.f32 %v9968_v50, %v2641_v18  ;;  %16724 = vst [vmem:[#allocation153_spill] sm:$0xff] %v10026_v14  ;;  %2996 = vmatpush1.bf16.msra.mxu1 %v2890_v46  ;;  %v2744_v43 = vmul.f32 %v9997_v54, %v2706_v42  ;;  %v2745_v46 = vmul.f32 %v10001_v41, %v2705_v34  ;;  %v2822_v63 = vpop.permute.xlu0 %2821  ;;  %v2757_v10 = vpop.permute.xlu1 %2756  ;;  %v16728_v18 = vld [vmem:[#allocation7_spill] sm:$0xff]  ;;  %v16730_v42 = vld [vmem:[#allocation165_spill] sm:$0xff] }
 0x331   : > { %16725 = vst [vmem:[#allocation151_spill] sm:$0xff] %v10030_v3  ;;  %16726 = vst [vmem:[#allocation156_spill] sm:$0xff] %v10044_v48  ;;  %v2899_v39 = vpack.c.bf16 %v2680_v47, %v16661_v16  ;;  %3890 = vmatpush1.bf16.msra.mxu0 %v16728_v18  ;;  %v2835_v29 = vsel %vm2831_vm0, %v2822_v63, %v16729_v38  ;;  %v2836_v34 = vsel %vm2831_vm0, %v16730_v42, %v2822_v63  ;;  %v16732_v47 = vld [vmem:[#allocation168_spill] sm:$0xff] }
 0x332   : > { %16727 = vst [vmem:[#allocation157_spill] sm:$0xff] %v10048_v55  ;;  %v2898_v15 = vpack.c.bf16 %v2679_v22, %v16659_v28  ;;  %v16731_v28 = vld [vmem:[#allocation216_spill] sm:$0xff]  ;;  %v2771_v16 = vsel %vm2766_vm15, %v16732_v47, %v2757_v10  ;;  %3891 = vmatprep.subr.bf16.mxu0 %v16733_v25  ;;  %v2874_v18 = vmul.f32 %v10035_v20, %v2836_v34 }
 0x333   : > { %v2770_v22 = vsel %vm2766_vm15, %v2757_v10, %v16731_v28  ;;  %v2875_v26 = vmul.f32 %v10040_v1, %v2835_v29  ;;  %v2809_v38 = vmul.f32 %v10026_v14, %v2771_v16  ;;  %2997 = vmatprep.subr.bf16.mxu1 %v2899_v39  ;;  %v10079_v63 = vrot.slane %v10057_v62, %v16688_v44  ;;  %v16739_v39 = vld [vmem:[#allocation209_spill] sm:$0xff] }
 0x334   : > { %v2810_v52 = vmul.f32 %v10030_v3, %v2770_v22  ;;  %2998 = vmatpush1.bf16.msra.mxu1 %v2898_v15  ;;  %v10083_v42 = vrot.slane %v10057_v62, %v16691_v36  ;;  %v2914_v10 = vpack.c.bf16 %v2874_v18, %v2874_v18  ;;  %v2440_v28 = vpop.permute.xlu0 %2439  ;;  %v2375_v34 = vpop.permute.xlu1 %2374  ;;  %v10087_v29 = vrot.slane %v10006_v4, %v16694_v19  ;;  %v16737_v22 = vld [vmem:[#allocation10_spill] sm:$0xff]  ;;  %v16738_v15 = vld [vmem:[#allocation187_spill] sm:$0xff] }
 0x335   : > { %16734 = vst [vmem:[#allocation158_spill] sm:$0xff] %v10079_v63  ;;  %v2906_v25 = vpack.c.bf16 %v2809_v38, %v2744_v43  ;;  %3892 = vmatpush1.bf16.msra.mxu0 %v16737_v22  ;;  %v2444_v44 = vsel %vm2443_vm12, %v2440_v28, %v16738_v15  ;;  %v2445_v16 = vsel %vm2443_vm12, %v16739_v39, %v2440_v28  ;;  %v16740_v36 = vld [vmem:[#allocation186_spill] sm:$0xff]  ;;  %v16741_v18 = vld [vmem:[#allocation207_spill] sm:$0xff] }
 0x336   : > { %16735 = vst [vmem:[#allocation159_spill] sm:$0xff] %v10083_v42  ;;  %v2907_v47 = vpack.c.bf16 %v2810_v52, %v2745_v46  ;;  %16736 = vst [vmem:[#allocation139_spill] sm:$0xff] %v10087_v29  ;;  %v2379_v43 = vsel %vm2378_vm11, %v2375_v34, %v16740_v36  ;;  %v2380_v52 = vsel %vm2378_vm11, %v16741_v18, %v2375_v34  ;;  %v16742_v46 = vld [vmem:[#allocation11_spill] sm:$0xff]  ;;  %v2935_v18 = vsel %vm2308_vm9, %v2914_v10, 0 }
 0x337   : > { %3893 = vmatprep.subr.bf16.mxu0 %v16742_v46  ;;  %v2915_v38 = vpack.c.bf16 %v2875_v26, %v2875_v26  ;;  %v2491_v22 = vmul.f32 %v10044_v48, %v2444_v44  ;;  %v2426_v54 = vmul.f32 %v10048_v55, %v2379_v43  ;;  %v10107_v15 = vrot.slane %v10006_v4, %v16697_v30  ;;  %v16750_v46 = vld [vmem:[#allocation15_spill] sm:$0xff] }
 0x338   : > { %2999 = vmatprep.subr.bf16.mxu1 %v2907_v47  ;;  %v10111_v36 = vrot.slane %v10057_v62, %v16694_v19  ;;  %v10115_v28 = vrot.slane %v10057_v62, %v16697_v30  ;;  %v2490_v26 = vmul.f32 %v10079_v63, %v2445_v16  ;;  %v2425_v34 = vmul.f32 %v10083_v42, %v2380_v52  ;;  %v2570_v44 = vpop.permute.xlu0 %2569  ;;  %v2505_v47 = vpop.permute.xlu1 %2504  ;;  %v16748_v19 = vld [vmem:[#allocation198_spill] sm:$0xff]  ;;  %v16749_v30 = vld [vmem:[#allocation188_spill] sm:$0xff] }
 0x339   : > { %16743 = vst [vmem:[#allocation140_spill] sm:$0xff] %v10107_v15  ;;  %3000 = vmatpush1.bf16.msra.mxu1 %v2906_v25  ;;  %v10122_v39 = vrot.slane %v10006_v4, %v16704_v8  ;;  %v16747_v25 = vld [vmem:[#allocation14_spill] sm:$0xff]  ;;  %v2573_v43 = vsel %vm2198_vm2, %v2570_v44, %v16748_v19  ;;  %v2509_v16 = vsel %vm2508_vm13, %v2505_v47, %v16749_v30 }
 0x33a   : > { %16744 = vst [vmem:[#allocation142_spill] sm:$0xff] %v10111_v36  ;;  %16745 = vst [vmem:[#allocation167_spill] sm:$0xff] %v10115_v28  ;;  %7390 = vmatprep.subr.msk.bf16.mxu1 %vm2308_vm9, %v2915_v38  ;;  %3894 = vmatpush1.bf16.msra.mxu0 %v16747_v25  ;;  %v2887_v52 = vpack.c.bf16 %v2491_v22, %v2426_v54  ;;  %v16751_v38 = vld [vmem:[#allocation217_spill] sm:$0xff]  ;;  %v2620_v63 = vmul.f32 %v10087_v29, %v2573_v43  ;;  %v16752_v25 = vld [vmem:[#allocation214_spill] sm:$0xff] }
 0x33b   : > { %16746 = vst [vmem:[#allocation183_spill] sm:$0xff] %v10122_v39  ;;  %3895 = vmatprep.subr.bf16.mxu0 %v16750_v46  ;;  %v2574_v42 = vsel %vm2198_vm2, %v16751_v38, %v2570_v44  ;;  %v2510_v55 = vsel %vm2508_vm13, %v16752_v25, %v2505_v47  ;;  %v2556_v19 = vmul.f32 %v10107_v15, %v2509_v16  ;;  %v16754_v22 = vld [vmem:[#allocation18_spill] sm:$0xff]  ;;  %v16755_v46 = vld [vmem:[#allocation175_spill] sm:$0xff] }
 0x33c   : > { %v2700_v48 = vpop.permute.xlu0 %2699  ;;  %v10143_v54 = vrot.slane %v10057_v62, %v16704_v8  ;;  %v2636_v10 = vpop.permute.xlu1 %2635  ;;  %v2886_v30 = vpack.c.bf16 %v2490_v26, %v2425_v34  ;;  %v2619_v44 = vmul.f32 %v10111_v36, %v2574_v42  ;;  %v2555_v43 = vmul.f32 %v10115_v28, %v2510_v55  ;;  %v16756_v16 = vld [vmem:[#allocation19_spill] sm:$0xff] }
 0x33d   : > { %3002 = vmatpush1.bf16.msra.mxu1 %v2935_v18  ;;  %v2644_v47 = vsel %vm2215_vm5, %v2636_v10, %v16755_v46  ;;  %v16757_v18 = vld [vmem:[#allocation178_spill] sm:$0xff]  ;;  %v10159_v26 = vld [vmem:[%s15556_s10] sm:$0xf]  ;;  %v2895_v55 = vpack.c.bf16 %v2620_v63, %v2556_v19  ;;  %v10165_v42 = vrot.slane %v10006_v4, %v16723_v23  ;;  %v10170_v34 = vrot.slane %v10006_v4, %v16714_v56 }
 0x33e   : > { %3075 = vmatprep.subr.bf16.mxu1 %v2887_v52  ;;  %16753 = vst [vmem:[#allocation170_spill] sm:$0xff] %v10143_v54  ;;  %3896 = vmatpush1.bf16.msra.mxu0 %v16754_v22  ;;  %v2637_v52 = vsel %vm2215_vm5, %v16757_v18, %v2636_v10  ;;  %v2684_v8 = vmul.f32 %v10122_v39, %v2644_v47  ;;  %v16762_v22 = vld [vmem:[#allocation22_spill] sm:$0xff]  ;;  %v16763_v19 = vld [vmem:[#allocation172_spill] sm:$0xff]  ;;  %v16764_v47 = vld [vmem:[#allocation173_spill] sm:$0xff] }
 0x33f   : > { %3897 = vmatprep.subr.bf16.mxu0 %v16756_v16  ;;  %16759 = vst [vmem:[#allocation180_spill] sm:$0xff] %v10165_v42  ;;  %16760 = vst [vmem:[#allocation145_spill] sm:$0xff] %v10170_v34  ;;  %v10174_v25 = vrot.slane %v10057_v62, %v16723_v23  ;;  %v2894_v63 = vpack.c.bf16 %v2619_v44, %v2555_v43  ;;  %v2683_v46 = vmul.f32 %v10143_v54, %v2637_v52  ;;  %v16765_v16 = vld [vmem:[#allocation23_spill] sm:$0xff]  ;;  %v10188_v23 = vld [vmem:[%s16574_s3 + $0x70] ss:$0 sm:$0xff] }
 0x340   : > { %7391 = vmatmul.mubr.msk.bf16.vlgmr.msra.gmra.mrb[24].mxu1 %vm16758_vm1, %v10159_v26  ;;  %v2830_v38 = vpop.permute.xlu0 %2829  ;;  %v2765_v10 = vpop.permute.xlu1 %2764  ;;  %v16766_v18 = vld [vmem:[#allocation182_spill] sm:$0xff]  ;;  %v16767_v43 = vld [vmem:[#allocation176_spill] sm:$0xff] }
 0x341   : > { %3076 = vmatpush1.bf16.msra.mxu1 %v2886_v30  ;;  %3107 = vmatprep.mubr.bf16.mxu1 %v16519_v27  ;;  %16761 = vst [vmem:[#allocation4_spill] sm:$0xff] %v10174_v25  ;;  %v2709_v30 = vsel %vm2701_vm14, %v2700_v48, %v16763_v19  ;;  %v2774_v4 = vsel %vm2766_vm15, %v2765_v10, %v16764_v47 }
 0x342   : > { %3077 = vmatprep.subr.bf16.mxu1 %v2895_v55  ;;  %3898 = vmatpush1.bf16.msra.mxu0 %v16762_v22  ;;  %v2832_v44 = vsel %vm2831_vm0, %v16766_v18, %v2830_v38  ;;  %v2767_v55 = vsel %vm2766_vm15, %v16767_v43, %v2765_v10  ;;  %v2814_v52 = vmul.f32 %v10165_v42, %v2774_v4  ;;  %v10198_v19 = vpop.f32.mrb[28].mxu0  ;;  %v16770_v18 = vld [vmem:[#allocation177_spill] sm:$0xff]  ;;  %v16772_v4 = vld [vmem:[#allocation174_spill] sm:$0xff] }
 0x343   : > { %3899 = vmatprep.subr.bf16.mxu0 %v16765_v16  ;;  %v2903_v22 = vpack.c.bf16 %v2684_v8, %v16663_v0  ;;  %16768 = vst [vmem:[#allocation169_spill] sm:$0xff] %v10198_v19  ;;  %v10202_v47 = vrot.slane %v10057_v62, %v16714_v56  ;;  %v10207_v16 = vld [vmem:[%s16574_s3 + $0x78] ss:$0 sm:$0xff]  ;;  %v2839_v54 = vsel %vm2831_vm0, %v2830_v38, %v16770_v18  ;;  %v10212_v10 = vpop.f32.mrb[29].mxu0 }
 0x344   : > { %16771 = vst [vmem:[#allocation171_spill] sm:$0xff] %v10212_v10  ;;  %v2702_v0 = vsel %vm2701_vm14, %v16772_v4, %v2700_v48  ;;  %v2749_v8 = vmul.f32 %v10170_v34, %v2709_v30  ;;  %v3155_v56 = vpop.permute.xlu0 %3154  ;;  %v3123_v62 = vpop.permute.xlu1 %3122  ;;  %v2902_v43 = vpack.c.bf16 %v2683_v46, %v16662_v58  ;;  %v2878_v19 = vmul.f32 %v10188_v23, %v2832_v44  ;;  %v16773_v38 = vld [vmem:[#allocation26_spill] sm:$0xff]  ;;  %v16774_v58 = vld [vmem:[#allocation27_spill] sm:$0xff] }
 0x345   : > { %16769 = vst [vmem:[#allocation194_spill] sm:$0xff] %v10202_v47  ;;  %3078 = vmatpush1.bf16.msra.mxu1 %v2894_v63  ;;  %v2813_v42 = vmul.f32 %v10174_v25, %v2767_v55  ;;  %v3566_v39 = vpop.f32.mrb[30].mxu0  ;;  %v2879_v63 = vmul.f32 %v10207_v16, %v2839_v54  ;;  %v3170_v48 = vsel %vm2443_vm12, %v3155_v56, %v9394_v57 }
 0x346   : > { %3079 = vmatprep.subr.bf16.mxu1 %v2903_v22  ;;  %3900 = vmatpush1.bf16.msra.mxu0 %v16773_v38  ;;  %v3138_v30 = vsel %vm2378_vm11, %v3123_v62, %v9392_v45  ;;  %v2911_v22 = vpack.c.bf16 %v2814_v52, %v2749_v8  ;;  %v3567_v18 = vpop.f32.mrb[31].mxu0  ;;  %v2748_v46 = vmul.f32 %v10202_v47, %v2702_v0  ;;  %v16775_v38 = vld [vmem:[#allocation30_spill] sm:$0xff]  ;;  %v16776_v45 = vld [vmem:[#allocation229_spill] sm:$0xff]  ;;  %v16777_v8 = vld [vmem:[#allocation228_spill] sm:$0xff] }
 0x347   : > { %3901 = vmatprep.subr.bf16.mxu0 %v16774_v58  ;;  %v2918_v55 = vpack.c.bf16 %v2878_v19, %v2878_v19  ;;  %v3177_v4 = vmul.f32 %v3170_v48, %v9907_v33  ;;  %v3145_v57 = vmul.f32 %v3138_v30, %v9915_v51  ;;  %v2919_v10 = vpack.c.bf16 %v2879_v63, %v2879_v63  ;;  %v16779_v18 = vld [vmem:[#allocation34_spill] sm:$0xff]  ;;  %v16780_v58 = vld [vmem:[#allocation233_spill] sm:$0xff] }
 0x348   : > { %v3219_v39 = vpop.permute.xlu0 %3218  ;;  %v3187_v44 = vpop.permute.xlu1 %3186  ;;  %v2910_v54 = vpack.c.bf16 %v2813_v42, %v2748_v46  ;;  %v3171_v52 = vsel %vm2443_vm12, %v16776_v45, %v3155_v56  ;;  %v3139_v0 = vsel %vm2378_vm11, %v16777_v8, %v3123_v62  ;;  %v16781_v46 = vld [vmem:[#allocation231_spill] sm:$0xff]  ;;  %v16783_v8 = vld [vmem:[#allocation38_spill] sm:$0xff] }
 0x349   : > { %3080 = vmatpush1.bf16.msra.mxu1 %v2902_v43  ;;  %v16778_v43 = vld [vmem:[#allocation31_spill] sm:$0xff]  ;;  %v3234_v42 = vsel %vm2198_vm2, %v3219_v39, %v9401_v60  ;;  %v3202_v19 = vsel %vm2508_vm13, %v3187_v44, %v9399_v32  ;;  %v3176_v56 = vmul.f32 %v3171_v52, %v9903_v59  ;;  %v3144_v30 = vmul.f32 %v3139_v0, %v9911_v49 }
 0x34a   : > { %3081 = vmatprep.subr.bf16.mxu1 %v2911_v22  ;;  %3902 = vmatpush1.bf16.msra.mxu0 %v16775_v38  ;;  %v2947_v62 = vsel %vm2308_vm9, %v2918_v55, 0  ;;  %v3377_v22 = vpack.c.bf16 %v3177_v4, %v3145_v57  ;;  %v3235_v60 = vsel %vm2198_vm2, %v16780_v58, %v3219_v39  ;;  %v3241_v32 = vmul.f32 %v3234_v42, %v9937_v7  ;;  %v16782_v38 = vld [vmem:[#allocation35_spill] sm:$0xff] }
 0x34b   : > { %3903 = vmatprep.subr.bf16.mxu0 %v16778_v43  ;;  %v3376_v45 = vpack.c.bf16 %v3176_v56, %v3144_v30  ;;  %v3240_v39 = vmul.f32 %v3235_v60, %v9933_v2  ;;  %v16785_v30 = vld [vmem:[#allocation39_spill] sm:$0xff] }
 0x34c   : > { %v3285_v63 = vpop.permute.xlu0 %3284  ;;  %v3253_v48 = vpop.permute.xlu1 %3252  ;;  %v16787_v58 = vld [vmem:[#allocation43_spill] sm:$0xff] }
 0x34d   : > { %3082 = vmatpush1.bf16.msra.mxu1 %v2910_v54  ;;  %v3209_v54 = vmul.f32 %v3202_v19, %v9945_v9  ;;  %v3265_v55 = vsel %vm2215_vm5, %v3253_v48, %v9536_v61 }
 0x34e   : > { %7394 = vmatprep.subr.msk.bf16.mxu1 %vm2308_vm9, %v2919_v10  ;;  %3904 = vmatpush1.bf16.msra.mxu0 %v16779_v18  ;;  %v3203_v10 = vsel %vm2508_vm13, %v16781_v46, %v3187_v44  ;;  %v3266_v44 = vsel %vm2215_vm5, %v9384_v35, %v3253_v48  ;;  %v3273_v0 = vmul.f32 %v3265_v55, %v9972_v6  ;;  %v16786_v18 = vld [vmem:[#allocation42_spill] sm:$0xff] }
 0x34f   : > { %3905 = vmatprep.subr.bf16.mxu0 %v16782_v38  ;;  %v3208_v52 = vmul.f32 %v3203_v10, %v9941_v11  ;;  %v3385_v61 = vpack.c.bf16 %v3241_v32, %v3209_v54  ;;  %v3297_v35 = vsel %vm2701_vm14, %v3285_v63, %v9495_v5  ;;  %v3272_v48 = vmul.f32 %v3266_v44, %v9968_v50  ;;  %v16788_v54 = vld [vmem:[#allocation238_spill] sm:$0xff] }
 0x350   : > { %v3349_v4 = vpop.permute.xlu0 %3348  ;;  %v3317_v57 = vpop.permute.xlu1 %3316  ;;  %v3305_v60 = vmul.f32 %v3297_v35, %v10001_v41  ;;  %v16789_v38 = vld [vmem:[#allocation46_spill] sm:$0xff] }
 0x351   : > { %3084 = vmatpush1.bf16.msra.mxu1 %v2947_v62  ;;  %v3329_v43 = vsel %vm2766_vm15, %v3317_v57, %v9548_v21  ;;  %v3384_v19 = vpack.c.bf16 %v3240_v39, %v3208_v52  ;;  %v3330_v21 = vsel %vm2766_vm15, %v9386_v40, %v3317_v57  ;;  %v3361_v5 = vsel %vm2831_vm0, %v3349_v4, %v9503_v24  ;;  %v16790_v55 = vld [vmem:[#allocation150_spill] sm:$0xff]  ;;  %v16793_v52 = vld [vmem:[#allocation157_spill] sm:$0xff] }
 0x352   : > { %3487 = vmatprep.subr.bf16.mxu1 %v3377_v22  ;;  %3906 = vmatpush1.bf16.msra.mxu0 %v16783_v8  ;;  %v3337_v62 = vmul.f32 %v3329_v43, %v10030_v3  ;;  %v3393_v22 = vpack.c.bf16 %v3273_v0, %v16665_v37  ;;  %v3392_v32 = vpack.c.bf16 %v3272_v48, %v16664_v53  ;;  %v16794_v44 = vld [vmem:[#allocation242_spill] sm:$0xff]  ;;  %v16797_v48 = vld [vmem:[#allocation240_spill] sm:$0xff] }
 0x353   : > { %3907 = vmatprep.subr.bf16.mxu0 %v16785_v30  ;;  %v3336_v46 = vmul.f32 %v3330_v21, %v10026_v14  ;;  %v3369_v10 = vmul.f32 %v10040_v1, %v3361_v5  ;;  %v16796_v35 = vld [vmem:[#allocation50_spill] sm:$0xff] }
 0x354   : > { %7395 = vmatmul.mubr.msk.bf16.vlgmr.msra.gmra.mrb[28].mxu1 %vm16784_vm3, %v10159_v26  ;;  %v3131_v42 = vpop.permute.xlu1 %3130  ;;  %v3163_v56 = vpop.permute.xlu0 %3162  ;;  %v3362_v26 = vsel %vm2831_vm0, %v9388_v12, %v3349_v4  ;;  %v3298_v12 = vsel %vm2701_vm14, %v9382_v31, %v3285_v63  ;;  %v3401_v63 = vpack.c.bf16 %v3337_v62, %v3305_v60  ;;  %v16799_v62 = vld [vmem:[#allocation51_spill] sm:$0xff]  ;;  %v16802_v60 = vld [vmem:[#allocation244_spill] sm:$0xff] }
 0x355   : > { %3488 = vmatpush1.bf16.msra.mxu1 %v3376_v45  ;;  %3519 = vmatprep.mubr.bf16.mxu1 %v16519_v27  ;;  %v3368_v37 = vmul.f32 %v10035_v20, %v3362_v26  ;;  %v3166_v24 = vsel %vm2443_vm12, %v3163_v56, %v9445_v17  ;;  %v3134_v31 = vsel %vm2378_vm11, %v3131_v42, %v16788_v54  ;;  %v16791_v20 = vld [vmem:[#allocation47_spill] sm:$0xff]  ;;  %v16792_v45 = vld [vmem:[#allocation156_spill] sm:$0xff]  ;;  %v16804_v54 = vld [vmem:[#allocation54_spill] sm:$0xff] }
 0x356   : > { %3489 = vmatprep.subr.bf16.mxu1 %v3385_v61  ;;  %3908 = vmatpush1.bf16.msra.mxu0 %v16786_v18  ;;  %v3304_v4 = vmul.f32 %v3298_v12, %v16790_v55  ;;  %v3181_v39 = vmul.f32 %v3166_v24, %v16792_v45  ;;  %v3149_v17 = vmul.f32 %v3134_v31, %v16793_v52  ;;  %v16795_v61 = vld [vmem:[#allocation241_spill] sm:$0xff]  ;;  %v16798_v26 = vld [vmem:[#allocation239_spill] sm:$0xff]  ;;  %v16805_v31 = vld [vmem:[#allocation230_spill] sm:$0xff] }
 0x357   : > { %3909 = vmatprep.subr.bf16.mxu0 %v16787_v58  ;;  %v3408_v57 = vpack.c.bf16 %v3368_v37, %v3368_v37  ;;  %v3409_v8 = vpack.c.bf16 %v3369_v10, %v3369_v10  ;;  %v3167_v0 = vsel %vm2443_vm12, %v16794_v44, %v3163_v56  ;;  %v3135_v43 = vsel %vm2378_vm11, %v16795_v61, %v3131_v42  ;;  %v16800_v56 = vld [vmem:[#allocation158_spill] sm:$0xff]  ;;  %v16801_v18 = vld [vmem:[#allocation159_spill] sm:$0xff] }
 0x358   : > { %v3195_v40 = vpop.permute.xlu1 %3194  ;;  %v3227_v53 = vpop.permute.xlu0 %3226  ;;  %v3400_v1 = vpack.c.bf16 %v3336_v46, %v3304_v4  ;;  %v3148_v42 = vmul.f32 %v3135_v43, %v16801_v18  ;;  %v3381_v12 = vpack.c.bf16 %v3181_v39, %v3149_v17  ;;  %v16803_v46 = vld [vmem:[#allocation243_spill] sm:$0xff]  ;;  %v16811_v43 = vld [vmem:[#allocation232_spill] sm:$0xff] }
 0x359   : > { %3490 = vmatpush1.bf16.msra.mxu1 %v3384_v19  ;;  %v3230_v30 = vsel %vm2198_vm2, %v3227_v53, %v16797_v48  ;;  %v3198_v21 = vsel %vm2508_vm13, %v3195_v40, %v16798_v26  ;;  %v3429_v58 = vsel %vm2308_vm9, %v3408_v57, 0  ;;  %v3199_v10 = vsel %vm2508_vm13, %v16803_v46, %v3195_v40  ;;  %v16808_v39 = vld [vmem:[#allocation183_spill] sm:$0xff]  ;;  %v16819_v46 = vld [vmem:[#allocation62_spill] sm:$0xff] }
 0x35a   : > { %3491 = vmatprep.subr.bf16.mxu1 %v3393_v22  ;;  %3910 = vmatpush1.bf16.msra.mxu0 %v16789_v38  ;;  %v3180_v22 = vmul.f32 %v3167_v0, %v16800_v56  ;;  %v3245_v37 = vmul.f32 %v3230_v30, %v10087_v29  ;;  %v3213_v24 = vmul.f32 %v3198_v21, %v10107_v15  ;;  %v16806_v38 = vld [vmem:[#allocation55_spill] sm:$0xff]  ;;  %v16810_v0 = vld [vmem:[#allocation58_spill] sm:$0xff] }
 0x35b   : > { %3911 = vmatprep.subr.bf16.mxu0 %v16791_v20  ;;  %v3212_v57 = vmul.f32 %v3199_v10, %v10115_v28  ;;  %v16813_v30 = vld [vmem:[#allocation226_spill] sm:$0xff]  ;;  %v16820_v10 = vld [vmem:[#allocation227_spill] sm:$0xff] }
 0x35c   : > { %v3261_v19 = vpop.permute.xlu1 %3260  ;;  %v3293_v5 = vpop.permute.xlu0 %3292  ;;  %v3389_v44 = vpack.c.bf16 %v3245_v37, %v3213_v24  ;;  %v16814_v21 = vld [vmem:[#allocation170_spill] sm:$0xff] }
 0x35d   : > { %3492 = vmatpush1.bf16.msra.mxu1 %v3392_v32  ;;  %v3231_v32 = vsel %vm2198_vm2, %v16802_v60, %v3227_v53  ;;  %v3380_v53 = vpack.c.bf16 %v3180_v22, %v3148_v42  ;;  %v3301_v26 = vsel %vm2701_vm14, %v3293_v5, %v16813_v30  ;;  %v16815_v22 = vld [vmem:[#allocation237_spill] sm:$0xff]  ;;  %v16817_v60 = vld [vmem:[#allocation180_spill] sm:$0xff] }
 0x35e   : > { %3493 = vmatprep.subr.bf16.mxu1 %v3401_v63  ;;  %3912 = vmatpush1.bf16.msra.mxu0 %v16796_v35  ;;  %v3269_v63 = vsel %vm2215_vm5, %v3261_v19, %v16805_v31  ;;  %v3244_v20 = vmul.f32 %v3231_v32, %v10111_v36  ;;  %v16818_v32 = vld [vmem:[#allocation161_spill] sm:$0xff]  ;;  %v16822_v31 = vld [vmem:[#allocation234_spill] sm:$0xff] }
 0x35f   : > { %3913 = vmatprep.subr.bf16.mxu0 %v16799_v62  ;;  %v3277_v17 = vmul.f32 %v3269_v63, %v16808_v39  ;;  %v3294_v63 = vsel %vm2701_vm14, %v16822_v31, %v3293_v5  ;;  %v16826_v30 = vld [vmem:[#allocation149_spill] sm:$0xff] }
 0x360   : > { %v3325_v4 = vpop.permute.xlu1 %3324  ;;  %v3357_v61 = vpop.permute.xlu0 %3356  ;;  %v3388_v48 = vpack.c.bf16 %v3244_v20, %v3212_v57  ;;  %v726_v31 = vld [vmem:[%s10396_s6 + $0x8] sm:$0xff] }
 0x361   : > { %3494 = vmatpush1.bf16.msra.mxu1 %v3400_v1  ;;  %v16807_v1 = vld [vmem:[#allocation235_spill] sm:$0xff]  ;;  %v3333_v35 = vsel %vm2766_vm15, %v3325_v4, %v16811_v43  ;;  %v3358_v42 = vsel %vm2831_vm0, %v16815_v22, %v3357_v61  ;;  %v3397_v37 = vpack.c.bf16 %v3277_v17, %v16818_v32  ;;  %v3365_v24 = vsel %vm2831_vm0, %v3357_v61, %v16820_v10  ;;  %v16830_v32 = vld [vmem:[#allocation225_spill] sm:$0xff] }
 0x362   : > { %7398 = vmatprep.subr.msk.bf16.mxu1 %vm2308_vm9, %v3409_v8  ;;  %3914 = vmatpush1.bf16.msra.mxu0 %v16804_v54  ;;  %v3262_v40 = vsel %vm2215_vm5, %v16807_v1, %v3261_v19  ;;  %v7497_v8 = vld [vmem:[%s15558_s12] sm:$0xf]  ;;  %v3372_v20 = vmul.f32 %v10188_v23, %v3358_v42  ;;  %v3373_v1 = vmul.f32 %v10207_v16, %v3365_v24 }
 0x363   : > { %3915 = vmatprep.subr.bf16.mxu0 %v16806_v38  ;;  %v16812_v19 = vld [vmem:[#allocation59_spill] sm:$0xff]  ;;  %v3276_v62 = vmul.f32 %v3262_v40, %v16814_v21  ;;  %v3309_v38 = vmul.f32 %v3301_v26, %v10170_v34  ;;  %v3308_v17 = vmul.f32 %v3294_v63, %v10202_v47  ;;  %v16833_v63 = vld [vmem:[#allocation9_spill] sm:$0xff] }
 0x364   : > { %v16821_v54 = vld [vmem:[#allocation63_spill] sm:$0xff]  ;;  %v3413_v43 = vpack.c.bf16 %v3373_v1, %v3373_v1  ;;  %v16836_v1 = vld [vmem:[#allocation12_spill] sm:$0xff] }
 0x365   : > { %3496 = vmatpush1.bf16.msra.mxu1 %v3429_v58  ;;  %v16816_v58 = vld [vmem:[#allocation236_spill] sm:$0xff]  ;;  %v16828_v42 = vld [vmem:[#allocation171_spill] sm:$0xff] }
 0x366   : > { %3569 = vmatprep.subr.bf16.mxu1 %v3381_v12  ;;  %3916 = vmatpush1.bf16.msra.mxu0 %v16810_v0  ;;  %v3326_v12 = vsel %vm2766_vm15, %v16816_v58, %v3325_v4  ;;  %v16823_v4 = vld [vmem:[#allocation160_spill] sm:$0xff]  ;;  %v16832_v24 = vld [vmem:[#allocation163_spill] sm:$0xff] }
 0x367   : > { %3917 = vmatprep.subr.bf16.mxu0 %v16812_v19  ;;  %v3340_v57 = vmul.f32 %v3326_v12, %v10174_v25  ;;  %v16825_v19 = vld [vmem:[#allocation152_spill] sm:$0xff] }
 0x368   : > { %7399 = vmatmul.mubr.msk.bf16.vlgmr.msra.gmra.mrb[32].mxu1 %vm16809_vm4, %v7497_v8  ;;  %v16829_v12 = vld [vmem:[#allocation224_spill] sm:$0xff] }
 0x369   : > { %3570 = vmatpush1.bf16.msra.mxu1 %v3380_v53  ;;  %3601 = vmatprep.mubr.bf16.mxu1 %v16519_v27  ;;  %v3341_v27 = vmul.f32 %v3333_v35, %v16817_v60  ;;  %v3396_v53 = vpack.c.bf16 %v3276_v62, %v16823_v4  ;;  %v3404_v0 = vpack.c.bf16 %v3340_v57, %v3308_v17  ;;  %v16827_v62 = vld [vmem:[#allocation169_spill] sm:$0xff]  ;;  %v16838_v17 = vld [vmem:[#allocation16_spill] sm:$0xff] }
 0x36a   : > { %3571 = vmatprep.subr.bf16.mxu1 %v3389_v44  ;;  %3918 = vmatpush1.bf16.msra.mxu0 %v16819_v46  ;;  %v3412_v44 = vpack.c.bf16 %v3372_v20, %v3372_v20  ;;  %v16831_v46 = vld [vmem:[#allocation164_spill] sm:$0xff] }
 0x36b   : > { %3973 = vmatprep.subr.bf16.mxu0 %v16821_v54  ;;  %v3405_v40 = vpack.c.bf16 %v3341_v27, %v3309_v38  ;;  %v10801_v47 = vld [vmem:[%s15560_s14 + $0x4] ss:$8 sps:$4 sm:$0xff]  }
 0x36c   : > { %v3441_v35 = vsel %vm2308_vm9, %v3412_v44, 0  ;;  %v16839_v44 = vld [vmem:[#allocation17_spill] sm:$0xff] }
 0x36d   : > { %3572 = vmatpush1.bf16.msra.mxu1 %v3388_v48 }
 0x36e   : > { %3573 = vmatprep.subr.bf16.mxu1 %v3397_v37 }
 0x371   : > { %3574 = vmatpush1.bf16.msra.mxu1 %v3396_v53  ;;  %v10387_v61 = vpop.permute.xlu0 %3783  ;;  %v10389_v5 = vpop.permute.xlu1 %3778 }
 0x372   : > { %3575 = vmatprep.subr.bf16.mxu1 %v3405_v40  ;;  %v16837_v40 = vld [vmem:[#allocation13_spill] sm:$0xff] }
 0x375   : > { %3576 = vmatpush1.bf16.msra.mxu1 %v3404_v0  ;;  %v10398_v23 = vpop.permute.xlu0 %3416  ;;  %v10400_v16 = vpop.permute.xlu1 %2922  ;;  %v16840_v0 = vld [vmem:[#allocation20_spill] sm:$0xff] }
 0x376   : > { %7402 = vmatprep.subr.msk.bf16.mxu1 %vm2308_vm9, %v3413_v43  ;;  %v3481_v48 = vadd.f32 %v16825_v19, %v10398_v23  ;;  %v3483_v26 = vadd.f32 %v16826_v30, %v10398_v23  ;;  %v3563_v22 = vadd.f32 %v16827_v62, %v10398_v23  ;;  %v3565_v58 = vadd.f32 %v16828_v42, %v10398_v23  ;;  %v16841_v43 = vld [vmem:[#allocation21_spill] sm:$0xff]  ;;  %v16844_v19 = vld [vmem:[#allocation28_spill] sm:$0xff] }
 0x377   : > { %v2987_v27 = vadd.f32 %v16829_v12, %v10400_v16  ;;  %v2989_v37 = vadd.f32 %v16830_v32, %v10400_v16  ;;  %v3069_v10 = vadd.f32 %v16831_v46, %v10400_v16  ;;  %v3071_v54 = vadd.f32 %v16832_v24, %v10400_v16  ;;  %v16846_v30 = vld [vmem:[#allocation32_spill] sm:$0xff] }
 0x378   : > { %v16848_v62 = vld [vmem:[#allocation36_spill] sm:$0xff] }
 0x379   : > { %3578 = vmatpush1.bf16.msra.mxu1 %v3441_v35  ;;  %v10421_v38 = vmul.f32 %v3481_v48, %v2987_v27  ;;  %v3611_v4 = vmul.f32 %v3483_v26, %v2989_v37  ;;  %v10423_v53 = vmul.f32 %v3563_v22, %v3069_v10  ;;  %v10425_v20 = vmul.f32 %v3565_v58, %v3071_v54  ;;  %v16843_v35 = vld [vmem:[#allocation25_spill] sm:$0xff]  ;;  %v16850_v42 = vld [vmem:[#allocation40_spill] sm:$0xff] }
 0x37a   : > { %3844 = vmatprep.subr.bf16.mxu1 %v16833_v63  ;;  %v16845_v48 = vld [vmem:[#allocation29_spill] sm:$0xff]  ;;  %v16852_v12 = vld [vmem:[#allocation44_spill] sm:$0xff] }
 0x37b   : > { %v10428_v57 = vmul.f32 %v3611_v4, %v726_v31  ;;  %v16847_v26 = vld [vmem:[#allocation33_spill] sm:$0xff]  ;;  %v16854_v32 = vld [vmem:[#allocation48_spill] sm:$0xff] }
 0x37c   : > { %7403 = vmatmul.mubr.msk.bf16.vlgmr.msra.gmra.mrb[36].mxu1 %vm16834_vm6, %v7497_v8  ;;  %v16842_v8 = vld [vmem:[#allocation24_spill] sm:$0xff]  ;;  %v16849_v22 = vld [vmem:[#allocation37_spill] sm:$0xff] }
 0x37d   : > { %16835 = vst [vmem:[#allocation190_spill] sm:$0xff] %v10428_v57  ;;  %3845 = vmatpush1.bf16.msra.mxu1 %v16836_v1  ;;  %4906 = vrot.lane.b32.xlu0 %v10428_v57, %s16552_s5  ;;  %v16851_v58 = vld [vmem:[#allocation41_spill] sm:$0xff]  ;;  %v16856_v46 = vld [vmem:[#allocation52_spill] sm:$0xff] }
 0x37e   : > { %3846 = vmatprep.subr.bf16.mxu1 %v16837_v40  ;;  %4810 = vrot.lane.b32.xlu1 %v10428_v57, %s16551_s21  ;;  %v16853_v27 = vld [vmem:[#allocation45_spill] sm:$0xff]  ;;  %v16858_v24 = vld [vmem:[#allocation56_spill] sm:$0xff] }
 0x37f   : > { %v16855_v37 = vld [vmem:[#allocation49_spill] sm:$0xff]  ;;  %v16860_v31 = vld [vmem:[#allocation60_spill] sm:$0xff] }
 0x380   : > { %v16857_v10 = vld [vmem:[#allocation53_spill] sm:$0xff]  ;;  %v16862_v4 = vld [vmem:[#allocation64_spill] sm:$0xff] }
 0x381   : > { %3847 = vmatpush1.bf16.msra.mxu1 %v16838_v17  ;;  %v16859_v54 = vld [vmem:[#allocation57_spill] sm:$0xff]  ;;  %v16864_v40 = vld [vmem:[#allocation68_spill] sm:$0xff] }
 0x382   : > { %3848 = vmatprep.subr.bf16.mxu1 %v16839_v44  ;;  %v16861_v63 = vld [vmem:[#allocation61_spill] sm:$0xff]  ;;  %v16866_v44 = vld [vmem:[#allocation72_spill] sm:$0xff] }
 0x383   : > { %v16863_v1 = vld [vmem:[#allocation65_spill] sm:$0xff] }
 0x384   : > { %v16865_v17 = vld [vmem:[#allocation69_spill] sm:$0xff] }
 0x385   : > { %3849 = vmatpush1.bf16.msra.mxu1 %v16840_v0  ;;  %v16867_v0 = vld [vmem:[#allocation73_spill] sm:$0xff] }
 0x386   : > { %3850 = vmatprep.subr.bf16.mxu1 %v16841_v43 }
 0x389   : > { %3851 = vmatpush1.bf16.msra.mxu1 %v16842_v8 }
 0x38a   : > { %3852 = vmatprep.subr.bf16.mxu1 %v16843_v35 }
 0x38d   : > { %3853 = vmatpush1.bf16.msra.mxu1 %v16844_v19 }
 0x38e   : > { %3854 = vmatprep.subr.bf16.mxu1 %v16845_v48 }
 0x391   : > { %3855 = vmatpush1.bf16.msra.mxu1 %v16846_v30 }
 0x392   : > { %3856 = vmatprep.subr.bf16.mxu1 %v16847_v26 }
 0x395   : > { %3857 = vmatpush1.bf16.msra.mxu1 %v16848_v62 }
 0x396   : > { %3858 = vmatprep.subr.bf16.mxu1 %v16849_v22 }
 0x399   : > { %3859 = vmatpush1.bf16.msra.mxu1 %v16850_v42 }
 0x39a   : > { %3860 = vmatprep.subr.bf16.mxu1 %v16851_v58  ;;  %v16868_v58 = vld [vmem:[#allocation76_spill] sm:$0xff] }
 0x39d   : > { %3861 = vmatpush1.bf16.msra.mxu1 %v16852_v12  ;;  %v16869_v12 = vld [vmem:[#allocation66_spill] sm:$0xff] }
 0x39e   : > { %3862 = vmatprep.subr.bf16.mxu1 %v16853_v27  ;;  %v16870_v27 = vld [vmem:[#allocation77_spill] sm:$0xff] }
 0x3a1   : > { %3863 = vmatpush1.bf16.msra.mxu1 %v16854_v32  ;;  %v16873_v32 = vld [vmem:[#allocation70_spill] sm:$0xff] }
 0x3a2   : > { %3864 = vmatprep.subr.bf16.mxu1 %v16855_v37  ;;  %v16874_v37 = vld [vmem:[#allocation81_spill] sm:$0xff] }
 0x3a5   : > { %3865 = vmatpush1.bf16.msra.mxu1 %v16856_v46  ;;  %v16875_v46 = vld [vmem:[#allocation71_spill] sm:$0xff] }
 0x3a6   : > { %3866 = vmatprep.subr.bf16.mxu1 %v16857_v10  ;;  %v16876_v10 = vld [vmem:[#allocation84_spill] sm:$0xff] }
 0x3a9   : > { %3867 = vmatpush1.bf16.msra.mxu1 %v16858_v24  ;;  %v16877_v24 = vld [vmem:[#allocation74_spill] sm:$0xff] }
 0x3aa   : > { %3868 = vmatprep.subr.bf16.mxu1 %v16859_v54 }
 0x3ad   : > { %3869 = vmatpush1.bf16.msra.mxu1 %v16860_v31  ;;  %v16878_v31 = vld [vmem:[#allocation85_spill] sm:$0xff] }
 0x3ae   : > { %3870 = vmatprep.subr.bf16.mxu1 %v16861_v63  ;;  %v16879_v63 = vld [vmem:[#allocation75_spill] sm:$0xff] }
 0x3b1   : > { %3871 = vmatpush1.bf16.msra.mxu1 %v16862_v4 }
 0x3b2   : > { %3872 = vmatprep.subr.bf16.mxu1 %v16863_v1 }
 0x3b5   : > { %3873 = vmatpush1.bf16.msra.mxu1 %v16864_v40  ;;  %v16880_v40 = vld [vmem:[#allocation88_spill] sm:$0xff] }
 0x3b6   : > { %3874 = vmatprep.subr.bf16.mxu1 %v16865_v17  ;;  %v16881_v17 = vld [vmem:[#allocation78_spill] sm:$0xff] }
 0x3b9   : > { %3875 = vmatpush1.bf16.msra.mxu1 %v16866_v44 }
 0x3ba   : > { %3930 = vmatprep.subr.bf16.mxu1 %v16867_v0  ;;  %v16882_v0 = vld [vmem:[#allocation89_spill] sm:$0xff] }
 0x3ff   : > { %v3833_v43 = vpop.f32.mrb[32].mxu0 }
 0x400   : > { %v3835_v8 = vpop.f32.mrb[33].mxu0  ;;  %v3834_v19 = vadd.f32 %v3833_v43, %v10389_v5  ;;  %v16883_v43 = vld [vmem:[#allocation79_spill] sm:$0xff] }
 0x401   : > { %v3837_v35 = vpop.f32.mrb[34].mxu0  ;;  %v3836_v26 = vadd.f32 %v3835_v8, %v10389_v5  ;;  %v16871_v5 = vld [vmem:[#allocation67_spill] sm:$0xff]  ;;  %v16884_v8 = vld [vmem:[#allocation92_spill] sm:$0xff] }
 0x402   : > { %v3838_v48 = vadd.f32 %v3837_v35, %v10387_v61  ;;  %v3839_v30 = vpop.f32.mrb[35].mxu0  ;;  %v16885_v35 = vld [vmem:[#allocation82_spill] sm:$0xff] }
 0x403   : > { %v3840_v62 = vadd.f32 %v3839_v30, %v10387_v61  ;;  %v16872_v61 = vld [vmem:[#allocation80_spill] sm:$0xff] }
 0x404   : > { %v10470_v22 = vpack.c.bf16 %v3838_v48, %v3834_v19  ;;  %v16886_v19 = vld [vmem:[#allocation93_spill] sm:$0xff]  ;;  %v16887_v48 = vld [vmem:[#allocation83_spill] sm:$0xff]  ;;  %v16888_v30 = vld [vmem:[#allocation96_spill] sm:$0xff] }
 0x405   : > { %v3843_v42 = vpack.c.bf16 %v3840_v62, %v3836_v26  ;;  %v16889_v26 = vld [vmem:[#allocation86_spill] sm:$0xff]  ;;  %v16890_v62 = vld [vmem:[#allocation97_spill] sm:$0xff] }
 0x407   : > { %3876 = vmatprep.mubr.bf16.mxu1 %v3843_v42  ;;  %3919 = vmatprep.mubr.bf16.mxu0 %v3843_v42 }
 0x408   : > { %3877 = vmatmul.mubr.bf16.vlgmr.msra.gmra.mrb[40].mxu1 %v10470_v22  ;;  %3920 = vmatmul.mubr.bf16.vlgmr.msra.gmra.mrb[36].mxu0 %v10470_v22 }
 0x409   : > { %3931 = vmatpush1.bf16.msra.mxu1 %v16868_v58  ;;  %3974 = vmatpush1.bf16.msra.mxu0 %v16869_v12  ;;  %v16892_v58 = vld [vmem:[#allocation100_spill] sm:$0xff]  ;;  %v16893_v12 = vld [vmem:[#allocation90_spill] sm:$0xff] }
 0x40a   : > { %3962 = vmatprep.mubr.bf16.mxu1 %v3843_v42  ;;  %4005 = vmatprep.mubr.bf16.mxu0 %v3843_v42  ;;  %v16891_v42 = vld [vmem:[#allocation87_spill] sm:$0xff] }
 0x40b   : > { %3932 = vmatprep.subr.bf16.mxu1 %v16870_v27  ;;  %3975 = vmatprep.subr.bf16.mxu0 %v16871_v5  ;;  %v16894_v27 = vld [vmem:[#allocation101_spill] sm:$0xff]  ;;  %v16895_v5 = vld [vmem:[#allocation91_spill] sm:$0xff] }
 0x40d   : > { %3933 = vmatpush1.bf16.msra.mxu1 %v16872_v61  ;;  %3976 = vmatpush1.bf16.msra.mxu0 %v16873_v32  ;;  %v16896_v61 = vld [vmem:[#allocation104_spill] sm:$0xff]  ;;  %v16897_v32 = vld [vmem:[#allocation94_spill] sm:$0xff] }
 0x40e   : > { %3934 = vmatprep.subr.bf16.mxu1 %v16874_v37  ;;  %3977 = vmatprep.subr.bf16.mxu0 %v16875_v46  ;;  %v16898_v46 = vld [vmem:[#allocation105_spill] sm:$0xff] }
 0x411   : > { %3935 = vmatpush1.bf16.msra.mxu1 %v16876_v10  ;;  %3978 = vmatpush1.bf16.msra.mxu0 %v16877_v24  ;;  %v16899_v10 = vld [vmem:[#allocation95_spill] sm:$0xff] }
 0x412   : > { %3936 = vmatprep.subr.bf16.mxu1 %v16878_v31  ;;  %3979 = vmatprep.subr.bf16.mxu0 %v16879_v63  ;;  %v16900_v63 = vld [vmem:[#allocation108_spill] sm:$0xff] }
 0x413   : > { %v3027_v54 = vpop.f32.mrb[24].mxu1 }
 0x414   : > { %v3029_v4 = vpop.f32.mrb[25].mxu1 }
 0x415   : > { %v3031_v1 = vpop.f32.mrb[26].mxu1  ;;  %3937 = vmatpush1.bf16.msra.mxu1 %v16880_v40  ;;  %3980 = vmatpush1.bf16.msra.mxu0 %v16881_v17  ;;  %v16902_v17 = vld [vmem:[#allocation109_spill] sm:$0xff] }
 0x416   : > { %v3032_v44 = vpop.f32.mrb[27].mxu1  ;;  %3938 = vmatprep.subr.bf16.mxu1 %v16882_v0  ;;  %3981 = vmatprep.subr.bf16.mxu0 %v16883_v43  ;;  %v16901_v1 = vld [vmem:[#allocation98_spill] sm:$0xff]  ;;  %v16904_v0 = vld [vmem:[#allocation112_spill] sm:$0xff] }
 0x417   : > { %v16903_v44 = vld [vmem:[#allocation99_spill] sm:$0xff]  ;;  %v16905_v43 = vld [vmem:[#allocation102_spill] sm:$0xff] }
 0x419   : > { %3939 = vmatpush1.bf16.msra.mxu1 %v16884_v8  ;;  %3982 = vmatpush1.bf16.msra.mxu0 %v16885_v35  ;;  %v16906_v8 = vld [vmem:[#allocation113_spill] sm:$0xff]  ;;  %v16907_v35 = vld [vmem:[#allocation103_spill] sm:$0xff] }
 0x41a   : > { %3940 = vmatprep.subr.bf16.mxu1 %v16886_v19  ;;  %3983 = vmatprep.subr.bf16.mxu0 %v16887_v48  ;;  %v16908_v19 = vld [vmem:[#allocation116_spill] sm:$0xff]  ;;  %v16909_v48 = vld [vmem:[#allocation106_spill] sm:$0xff] }
 0x41d   : > { %3941 = vmatpush1.bf16.msra.mxu1 %v16888_v30  ;;  %3984 = vmatpush1.bf16.msra.mxu0 %v16889_v26  ;;  %v16910_v30 = vld [vmem:[#allocation117_spill] sm:$0xff]  ;;  %v16911_v26 = vld [vmem:[#allocation107_spill] sm:$0xff] }
 0x41e   : > { %3942 = vmatprep.subr.bf16.mxu1 %v16890_v62  ;;  %3985 = vmatprep.subr.bf16.mxu0 %v16891_v42  ;;  %v16912_v62 = vld [vmem:[#allocation120_spill] sm:$0xff]  ;;  %v16913_v42 = vld [vmem:[#allocation110_spill] sm:$0xff] }
 0x421   : > { %3943 = vmatpush1.bf16.msra.mxu1 %v16892_v58  ;;  %3986 = vmatpush1.bf16.msra.mxu0 %v16893_v12  ;;  %v16914_v58 = vld [vmem:[#allocation121_spill] sm:$0xff]  ;;  %v16915_v12 = vld [vmem:[#allocation111_spill] sm:$0xff] }
 0x422   : > { %3944 = vmatprep.subr.bf16.mxu1 %v16894_v27  ;;  %3987 = vmatprep.subr.bf16.mxu0 %v16895_v5  ;;  %v16916_v27 = vld [vmem:[#allocation124_spill] sm:$0xff]  ;;  %v16917_v5 = vld [vmem:[#allocation114_spill] sm:$0xff] }
 0x425   : > { %3945 = vmatpush1.bf16.msra.mxu1 %v16896_v61  ;;  %3988 = vmatpush1.bf16.msra.mxu0 %v16897_v32  ;;  %v16918_v32 = vld [vmem:[#allocation125_spill] sm:$0xff] }
 0x426   : > { %3946 = vmatprep.subr.bf16.mxu1 %v16898_v46  ;;  %3989 = vmatprep.subr.bf16.mxu0 %v16899_v10  ;;  %v16919_v46 = vld [vmem:[#allocation115_spill] sm:$0xff]  ;;  %v3028_v10 = vadd.f32 %v3027_v54, %v10400_v16 }
 0x427   : > { %v3109_v37 = vpop.f32.mrb[28].mxu1  ;;  %v16923_v54 = vld [vmem:[#allocation119_spill] sm:$0xff] }
 0x428   : > { %v3111_v24 = vpop.f32.mrb[29].mxu1 }
 0x429   : > { %v3113_v31 = vpop.f32.mrb[30].mxu1  ;;  %3947 = vmatpush1.bf16.msra.mxu1 %v16900_v63  ;;  %3990 = vmatpush1.bf16.msra.mxu0 %v16901_v1  ;;  %v3030_v1 = vadd.f32 %v3029_v4, %v10400_v16  ;;  %v16926_v4 = vld [vmem:[#allocation129_spill] sm:$0xff] }
 0x42a   : > { %v3114_v40 = vpop.f32.mrb[31].mxu1  ;;  %3948 = vmatprep.subr.bf16.mxu1 %v16902_v17  ;;  %3991 = vmatprep.subr.bf16.mxu0 %v16903_v44 }
 0x42b   : > { %v727_v40 = vld [vmem:[%s10396_s6 + $0x10] sm:$0xff] }
 0x42d   : > { %3949 = vmatpush1.bf16.msra.mxu1 %v16904_v0  ;;  %3992 = vmatpush1.bf16.msra.mxu0 %v16905_v43  ;;  %v728_v43 = vld [vmem:[%s10396_s6 + $0x18] sm:$0xff] }
 0x42e   : > { %3950 = vmatprep.subr.bf16.mxu1 %v16906_v8  ;;  %3993 = vmatprep.subr.bf16.mxu0 %v16907_v35  ;;  %v16920_v8 = vld [vmem:[#allocation127_spill] sm:$0xff]  ;;  %v16921_v35 = vld [vmem:[#allocation118_spill] sm:$0xff] }
 0x431   : > { %3951 = vmatpush1.bf16.msra.mxu1 %v16908_v19  ;;  %3994 = vmatpush1.bf16.msra.mxu0 %v16909_v48 }
 0x432   : > { %3952 = vmatprep.subr.bf16.mxu1 %v16910_v30  ;;  %3995 = vmatprep.subr.bf16.mxu0 %v16911_v26  ;;  %v16922_v30 = vld [vmem:[#allocation128_spill] sm:$0xff] }
 0x435   : > { %3953 = vmatpush1.bf16.msra.mxu1 %v16912_v62  ;;  %3996 = vmatpush1.bf16.msra.mxu0 %v16913_v42  ;;  %v16927_v42 = vld [vmem:[#allocation122_spill] sm:$0xff] }
 0x436   : > { %3954 = vmatprep.subr.bf16.mxu1 %v16914_v58  ;;  %3997 = vmatprep.subr.bf16.mxu0 %v16915_v12  ;;  %v16928_v58 = vld [vmem:[#allocation130_spill] sm:$0xff]  ;;  %v16929_v12 = vld [vmem:[#allocation123_spill] sm:$0xff] }
 0x439   : > { %3955 = vmatpush1.bf16.msra.mxu1 %v16916_v27  ;;  %3998 = vmatpush1.bf16.msra.mxu0 %v16917_v5  ;;  %v16930_v27 = vld [vmem:[#allocation131_spill] sm:$0xff]  ;;  %v16931_v5 = vld [vmem:[#allocation126_spill] sm:$0xff] }
 0x43a   : > { %3956 = vmatprep.subr.bf16.mxu1 %v16918_v32  ;;  %3999 = vmatprep.subr.bf16.mxu0 %v16919_v46  ;;  %v3110_v32 = vadd.f32 %v3109_v37, %v10400_v16 }
 0x43b   : > { %v3521_v61 = vpop.f32.mrb[32].mxu1 }
 0x43c   : > { %v3522_v31 = vadd.f32 %v3521_v61, %v10398_v23  ;;  %v3523_v63 = vpop.f32.mrb[33].mxu1 }
 0x43d   : > { %v3524_v17 = vadd.f32 %v3523_v63, %v10398_v23  ;;  %v3525_v44 = vpop.f32.mrb[34].mxu1  ;;  %3957 = vmatpush1.bf16.msra.mxu1 %v16920_v8  ;;  %4000 = vmatpush1.bf16.msra.mxu0 %v16921_v35 }
 0x43e   : > { %v3612_v0 = vmul.f32 %v3522_v31, %v3028_v10  ;;  %v3526_v19 = vpop.f32.mrb[35].mxu1  ;;  %3958 = vmatprep.subr.bf16.mxu1 %v16922_v30  ;;  %4001 = vmatprep.subr.bf16.mxu0 %v16923_v54  ;;  %v3112_v31 = vadd.f32 %v3111_v24, %v10400_v16 }
 0x43f   : > { %v3613_v48 = vmul.f32 %v3524_v17, %v3030_v1 }
 0x440   : > { %v10536_v26 = vmul.f32 %v3612_v0, %v727_v40 }
 0x441   : > { %v10538_v62 = vmul.f32 %v3613_v48, %v728_v43  ;;  %3959 = vmatpush1.bf16.msra.mxu1 %v16926_v4  ;;  %4002 = vmatpush1.bf16.msra.mxu0 %v16927_v42 }
 0x442   : > { %16924 = vst [vmem:[#allocation154_spill] sm:$0xff] %v10536_v26  ;;  %4816 = vrot.lane.b32.xlu1 %v10536_v26, %s16551_s21  ;;  %3960 = vmatprep.subr.bf16.mxu1 %v16928_v58 }
 0x443   : > { %16925 = vst [vmem:[#allocation5_spill] sm:$0xff] %v10538_v62  ;;  %4918 = vrot.lane.b32.xlu0 %v10538_v62, %s16552_s5  ;;  %4003 = vmatprep.subr.bf16.mxu0 %v16929_v12 }
 0x445   : > { %3961 = vmatpush1.bf16.msra.mxu1 %v16930_v27  ;;  %4004 = vmatpush1.bf16.msra.mxu0 %v16931_v5 }
 0x446   : > { %4912 = vrot.lane.b32.xlu1 %v10536_v26, %s16552_s5 }
 0x448   : > { %3963 = vmatmul.mubr.bf16.vlgmr.msra.gmra.mrb[44].mxu1 %v10470_v22  ;;  %4006 = vmatmul.mubr.bf16.vlgmr.msra.gmra.mrb[40].mxu0 %v10470_v22 }
 0x449   : > { %7410 = vmatprep.mubr.msk.bf16.mxu0 %vm3795_vm10, %v10801_v47  ;;  %7409 = vmatprep.mubr.msk.bf16.mxu1 %vm3795_vm10, %v10801_v47 }
 0x44a   : > { %4822 = vrot.lane.b32.xlu1 %v10538_v62, %s16551_s21 }
 0x44f   : > { %v3603_v61 = vpop.f32.mrb[36].mxu1 }
 0x450   : > { %v3604_v46 = vadd.f32 %v3603_v61, %v10398_v23  ;;  %v3605_v10 = vpop.f32.mrb[37].mxu1 }
 0x451   : > { %v3606_v63 = vadd.f32 %v3605_v10, %v10398_v23  ;;  %v3607_v1 = vpop.f32.mrb[38].mxu1 }
 0x452   : > { %v10560_v40 = vmul.f32 %v3604_v46, %v3110_v32  ;;  %v3608_v17 = vpop.f32.mrb[39].mxu1  ;;  %v10722_v46 = vpop.permute.xlu0 %4611 }
 0x453   : > { %v10562_v44 = vmul.f32 %v3606_v63, %v3112_v31  ;;  %v10702_v63 = vpop.permute.xlu1 %4606  ;;  %16947 = vst [vmem:[#allocation186_spill] sm:$0xff] %v10722_v46 }
 0x454   : > { %16944 = vst [vmem:[#allocation10_spill] sm:$0xff] %v10702_v63 }
 0x456   : > { %v10730_v32 = vpop.permute.xlu0 %4906 }
 0x457   : > { %v10708_v1 = vpop.permute.xlu1 %4810  ;;  %16949 = vst [vmem:[#allocation11_spill] sm:$0xff] %v10730_v32 }
 0x458   : > { %16945 = vst [vmem:[#allocation187_spill] sm:$0xff] %v10708_v1 }
 0x4b4   : > { %v10714_v17 = vpop.permute.xlu1 %4816 }
 0x4b5   : > { %16946 = vst [vmem:[#allocation209_spill] sm:$0xff] %v10714_v17  ;;  %v10738_v19 = vpop.permute.xlu0 %4918 }
 0x4b6   : > { %16951 = vst [vmem:[#allocation198_spill] sm:$0xff] %v10738_v19 }
 0x4b8   : > { %v10724_v31 = vpop.permute.xlu1 %4912 }
 0x4b9   : > { %16948 = vst [vmem:[#allocation207_spill] sm:$0xff] %v10724_v31 }
 0x4bc   : > { %v10734_v10 = vpop.permute.xlu1 %4822 }
 0x4bd   : > { %16950 = vst [vmem:[#allocation14_spill] sm:$0xff] %v10734_v10 }
 0x4db   : > { %v10564_v22 = vpop.f32.mrb[40].mxu1  ;;  %v10566_v0 = vpop.f32.mrb[36].mxu0 }
 0x4dc   : > { %16932 = vst [vmem:[#allocation202_spill] sm:$0xff] %v10564_v22  ;;  %4028 = vrot.lane.b32.xlu1 %v10566_v0, %s16551_s21  ;;  %v10570_v37 = vpop.f32.mrb[41].mxu1  ;;  %v10572_v43 = vpop.f32.mrb[37].mxu0 }
 0x4dd   : > { %16933 = vst [vmem:[#allocation166_spill] sm:$0xff] %v10570_v37  ;;  %v10574_v16 = vpop.f32.mrb[42].mxu1  ;;  %v10576_v23 = vpop.f32.mrb[38].mxu0 }
 0x4de   : > { %16934 = vst [vmem:[#allocation212_spill] sm:$0xff] %v10574_v16  ;;  %4030 = vrot.lane.b32.xlu0 %v10576_v23, %s16551_s21  ;;  %v10580_v24 = vpop.f32.mrb[43].mxu1  ;;  %v10582_v8 = vpop.f32.mrb[39].mxu0 }
 0x4df   : > { %16935 = vst [vmem:[#allocation162_spill] sm:$0xff] %v10580_v24 }
 0x4e0   : > { %4020 = vrot.lane.b32.xlu1 %v10564_v22, %s16551_s21 }
 0x4e2   : > { %4022 = vrot.lane.b32.xlu0 %v10574_v16, %s16551_s21 }
 0x4e4   : > { %4092 = vrot.lane.b32.xlu1 %v10566_v0, %s16552_s5 }
 0x4e6   : > { %4094 = vrot.lane.b32.xlu0 %v10576_v23, %s16552_s5 }
 0x4e8   : > { %4084 = vrot.lane.b32.xlu1 %v10564_v22, %s16552_s5 }
 0x4ea   : > { %4086 = vrot.lane.b32.xlu0 %v10574_v16, %s16552_s5 }
 0x4ec   : > { %4156 = vrot.lane.b32.xlu1 %v10566_v0, %s16660_s0 }
 0x4ee   : > { %4158 = vrot.lane.b32.xlu0 %v10576_v23, %s16660_s0 }
 0x4f0   : > { %4148 = vrot.lane.b32.xlu1 %v10564_v22, %s16660_s0 }
 0x4f2   : > { %4150 = vrot.lane.b32.xlu0 %v10574_v16, %s16660_s0 }
 0x4f4   : > { %4220 = vrot.lane.b32.xlu1 %v10566_v0, %s16655_s2 }
 0x4f6   : > { %4222 = vrot.lane.b32.xlu0 %v10576_v23, %s16655_s2 }
 0x4f8   : > { %4212 = vrot.lane.b32.xlu1 %v10564_v22, %s16655_s2 }
 0x4fa   : > { %4214 = vrot.lane.b32.xlu0 %v10574_v16, %s16655_s2 }
 0x4fc   : > { %4284 = vrot.lane.b32.xlu1 %v10566_v0, %s16560_s4 }
 0x4fe   : > { %4286 = vrot.lane.b32.xlu0 %v10576_v23, %s16560_s4 }
 0x500   : > { %4276 = vrot.lane.b32.xlu1 %v10564_v22, %s16560_s4 }
 0x502   : > { %4278 = vrot.lane.b32.xlu0 %v10574_v16, %s16560_s4 }
 0x504   : > { %4348 = vrot.lane.b32.xlu1 %v10566_v0, %s16600_s28 }
 0x506   : > { %4350 = vrot.lane.b32.xlu0 %v10576_v23, %s16600_s28 }
 0x508   : > { %4340 = vrot.lane.b32.xlu1 %v10564_v22, %s16600_s28 }
 0x50a   : > { %4342 = vrot.lane.b32.xlu0 %v10574_v16, %s16600_s28 }
 0x50c   : > { %4412 = vrot.lane.b32.xlu1 %v10566_v0, %s16563_s27 }
 0x50e   : > { %4414 = vrot.lane.b32.xlu0 %v10576_v23, %s16563_s27 }
 0x510   : > { %4404 = vrot.lane.b32.xlu1 %v10564_v22, %s16563_s27 }
 0x512   : > { %4406 = vrot.lane.b32.xlu0 %v10574_v16, %s16563_s27 }
 0x514   : > { %4476 = vrot.lane.b32.xlu1 %v10566_v0, %s16579_s24 }
 0x516   : > { %4478 = vrot.lane.b32.xlu0 %v10576_v23, %s16579_s24 }
 0x518   : > { %4468 = vrot.lane.b32.xlu1 %v10564_v22, %s16579_s24 }
 0x51a   : > { %4470 = vrot.lane.b32.xlu0 %v10574_v16, %s16579_s24 }
 0x51b   : > { %v10652_v54 = vpop.f32.mrb[40].mxu0  ;;  %v10654_v4 = vpop.f32.mrb[44].mxu1 }
 0x51c   : > { %16936 = vst [vmem:[#allocation6_spill] sm:$0xff] %v10652_v54  ;;  %16937 = vst [vmem:[#allocation155_spill] sm:$0xff] %v10654_v4  ;;  %v10656_v42 = vpop.f32.mrb[45].mxu1  ;;  %v10658_v58 = vpop.f32.mrb[41].mxu0  ;;  %4032 = vrot.lane.b32.xlu1 %v10572_v43, %s16551_s21 }
 0x51d   : > { %16938 = vst [vmem:[#allocation7_spill] sm:$0xff] %v10656_v42  ;;  %16939 = vst [vmem:[#allocation203_spill] sm:$0xff] %v10658_v58  ;;  %v10662_v12 = vpop.f32.mrb[42].mxu0  ;;  %v10664_v27 = vpop.f32.mrb[46].mxu1 }
 0x51e   : > { %16940 = vst [vmem:[#allocation165_spill] sm:$0xff] %v10662_v12  ;;  %16941 = vst [vmem:[#allocation216_spill] sm:$0xff] %v10664_v27  ;;  %v10666_v5 = vpop.f32.mrb[47].mxu1  ;;  %v10668_v61 = vpop.f32.mrb[43].mxu0  ;;  %4034 = vrot.lane.b32.xlu0 %v10582_v8, %s16551_s21 }
 0x51f   : > { %16942 = vst [vmem:[#allocation168_spill] sm:$0xff] %v10666_v5  ;;  %16943 = vst [vmem:[#allocation8_spill] sm:$0xff] %v10668_v61 }
 0x520   : > { %4024 = vrot.lane.b32.xlu1 %v10570_v37, %s16551_s21 }
 0x522   : > { %4026 = vrot.lane.b32.xlu0 %v10580_v24, %s16551_s21 }
 0x524   : > { %4096 = vrot.lane.b32.xlu1 %v10572_v43, %s16552_s5 }
 0x526   : > { %4098 = vrot.lane.b32.xlu0 %v10582_v8, %s16552_s5 }
 0x528   : > { %4088 = vrot.lane.b32.xlu1 %v10570_v37, %s16552_s5 }
 0x52a   : > { %4090 = vrot.lane.b32.xlu0 %v10580_v24, %s16552_s5 }
 0x52c   : > { %4160 = vrot.lane.b32.xlu1 %v10572_v43, %s16660_s0 }
 0x52e   : > { %4162 = vrot.lane.b32.xlu0 %v10582_v8, %s16660_s0 }
 0x530   : > { %4152 = vrot.lane.b32.xlu1 %v10570_v37, %s16660_s0 }
 0x532   : > { %4154 = vrot.lane.b32.xlu0 %v10580_v24, %s16660_s0 }
 0x534   : > { %4224 = vrot.lane.b32.xlu1 %v10572_v43, %s16655_s2 }
 0x536   : > { %4226 = vrot.lane.b32.xlu0 %v10582_v8, %s16655_s2 }
 0x538   : > { %4216 = vrot.lane.b32.xlu1 %v10570_v37, %s16655_s2 }
 0x53a   : > { %4218 = vrot.lane.b32.xlu0 %v10580_v24, %s16655_s2 }
 0x53c   : > { %4288 = vrot.lane.b32.xlu1 %v10572_v43, %s16560_s4 }
 0x53e   : > { %4290 = vrot.lane.b32.xlu0 %v10582_v8, %s16560_s4 }
 0x540   : > { %4280 = vrot.lane.b32.xlu1 %v10570_v37, %s16560_s4 }
 0x542   : > { %4282 = vrot.lane.b32.xlu0 %v10580_v24, %s16560_s4 }
 0x544   : > { %4352 = vrot.lane.b32.xlu1 %v10572_v43, %s16600_s28 }
 0x546   : > { %4354 = vrot.lane.b32.xlu0 %v10582_v8, %s16600_s28 }
 0x548   : > { %4344 = vrot.lane.b32.xlu1 %v10570_v37, %s16600_s28 }
 0x54a   : > { %4346 = vrot.lane.b32.xlu0 %v10580_v24, %s16600_s28 }
 0x54c   : > { %4416 = vrot.lane.b32.xlu1 %v10572_v43, %s16563_s27 }
 0x54e   : > { %v10742_v30 = vpop.permute.xlu1 %4028  ;;  %4418 = vrot.lane.b32.xlu0 %v10582_v8, %s16563_s27 }
 0x550   : > { %v10746_v35 = vpop.permute.xlu0 %4030  ;;  %4408 = vrot.lane.b32.xlu1 %v10570_v37, %s16563_s27 }
 0x552   : > { %v10750_v48 = vpop.permute.xlu1 %4020  ;;  %4410 = vrot.lane.b32.xlu0 %v10580_v24, %s16563_s27 }
 0x553   : > { %16952 = vst [vmem:[#allocation188_spill] sm:$0xff] %v10750_v48 }
 0x554   : > { %4480 = vrot.lane.b32.xlu1 %v10572_v43, %s16579_s24  ;;  %v10756_v32 = vpop.permute.xlu0 %4022 }
 0x556   : > { %v10758_v31 = vpop.permute.xlu1 %4092  ;;  %4482 = vrot.lane.b32.xlu0 %v10582_v8, %s16579_s24 }
 0x558   : > { %4472 = vrot.lane.b32.xlu1 %v10570_v37, %s16579_s24  ;;  %v10764_v19 = vpop.permute.xlu0 %4094 }
 0x55a   : > { %v10766_v1 = vpop.permute.xlu1 %4084  ;;  %4474 = vrot.lane.b32.xlu0 %v10580_v24, %s16579_s24 }
 0x55b   : > { %16953 = vst [vmem:[#allocation15_spill] sm:$0xff] %v10766_v1 }
 0x55c   : > { %v10770_v17 = vpop.permute.xlu0 %4086  ;;  %4292 = vrot.lane.b32.xlu1 %v10654_v4, %s16560_s4 }
 0x55e   : > { %v10774_v10 = vpop.permute.xlu1 %4156  ;;  %5110 = vrot.lane.b32.xlu0 %v10538_v62, %s16655_s2 }
 0x560   : > { %v10778_v46 = vpop.permute.xlu0 %4158  ;;  %4356 = vrot.lane.b32.xlu1 %v10654_v4, %s16600_s28 }
 0x562   : > { %v10782_v63 = vpop.permute.xlu1 %4148  ;;  %4294 = vrot.lane.b32.xlu0 %v10664_v27, %s16560_s4 }
 0x563   : > { %16954 = vst [vmem:[#allocation217_spill] sm:$0xff] %v10782_v63 }
 0x564   : > { %v10786_v60 = vpop.permute.xlu0 %4150  ;;  %4420 = vrot.lane.b32.xlu1 %v10654_v4, %s16563_s27 }
 0x565   : > { %16955 = vst [vmem:[#allocation214_spill] sm:$0xff] %v10786_v60 }
 0x566   : > { %v10790_v25 = vpop.permute.xlu1 %4220  ;;  %4358 = vrot.lane.b32.xlu0 %v10664_v27, %s16600_s28 }
 0x568   : > { %v10794_v34 = vpop.permute.xlu0 %4222  ;;  %4484 = vrot.lane.b32.xlu1 %v10654_v4, %s16579_s24 }
 0x56a   : > { %v10803_v21 = vpop.permute.xlu1 %4212  ;;  %4422 = vrot.lane.b32.xlu0 %v10664_v27, %s16563_s27 }
 0x56b   : > { %16956 = vst [vmem:[#allocation18_spill] sm:$0xff] %v10803_v21 }
 0x56c   : > { %v10811_v39 = vpop.permute.xlu0 %4214  ;;  %4044 = vrot.lane.b32.xlu1 %v10652_v54, %s16551_s21 }
 0x56d   : > { %16957 = vst [vmem:[#allocation175_spill] sm:$0xff] %v10811_v39 }
 0x56e   : > { %v10815_v36 = vpop.permute.xlu1 %4284  ;;  %4486 = vrot.lane.b32.xlu0 %v10664_v27, %s16579_s24 }
 0x570   : > { %v10819_v28 = vpop.permute.xlu0 %4286  ;;  %4036 = vrot.lane.b32.xlu1 %v10654_v4, %s16551_s21 }
 0x572   : > { %v10823_v29 = vpop.permute.xlu1 %4276  ;;  %4046 = vrot.lane.b32.xlu0 %v10662_v12, %s16551_s21 }
 0x573   : > { %16958 = vst [vmem:[#allocation19_spill] sm:$0xff] %v10823_v29 }
 0x574   : > { %v10827_v56 = vpop.permute.xlu0 %4278  ;;  %4108 = vrot.lane.b32.xlu1 %v10652_v54, %s16552_s5 }
 0x575   : > { %16959 = vst [vmem:[#allocation178_spill] sm:$0xff] %v10827_v56 }
 0x576   : > { %v10831_v15 = vpop.permute.xlu1 %4348  ;;  %4038 = vrot.lane.b32.xlu0 %v10664_v27, %s16551_s21 }
 0x578   : > { %v10835_v18 = vpop.permute.xlu0 %4350  ;;  %4100 = vrot.lane.b32.xlu1 %v10654_v4, %s16552_s5 }
 0x57a   : > { %v10839_v45 = vpop.permute.xlu1 %4340  ;;  %4110 = vrot.lane.b32.xlu0 %v10662_v12, %s16552_s5 }
 0x57b   : > { %16960 = vst [vmem:[#allocation22_spill] sm:$0xff] %v10839_v45 }
 0x57c   : > { %v10843_v22 = vpop.permute.xlu0 %4342  ;;  %4172 = vrot.lane.b32.xlu1 %v10652_v54, %s16660_s0 }
 0x57d   : > { %16961 = vst [vmem:[#allocation172_spill] sm:$0xff] %v10843_v22 }
 0x57e   : > { %v10847_v16 = vpop.permute.xlu1 %4412  ;;  %4102 = vrot.lane.b32.xlu0 %v10664_v27, %s16552_s5 }
 0x580   : > { %v10851_v37 = vpop.permute.xlu0 %4414  ;;  %4164 = vrot.lane.b32.xlu1 %v10654_v4, %s16660_s0 }
 0x582   : > { %v10855_v24 = vpop.permute.xlu1 %4404  ;;  %4174 = vrot.lane.b32.xlu0 %v10662_v12, %s16660_s0 }
 0x583   : > { %16962 = vst [vmem:[#allocation173_spill] sm:$0xff] %v10855_v24 }
 0x584   : > { %v10859_v45 = vpop.permute.xlu0 %4406  ;;  %4236 = vrot.lane.b32.xlu1 %v10652_v54, %s16655_s2 }
 0x585   : > { %16963 = vst [vmem:[#allocation23_spill] sm:$0xff] %v10859_v45 }
 0x586   : > { %v10863_v22 = vpop.permute.xlu1 %4476  ;;  %4166 = vrot.lane.b32.xlu0 %v10664_v27, %s16660_s0 }
 0x588   : > { %v10867_v29 = vpop.permute.xlu0 %4478  ;;  %4228 = vrot.lane.b32.xlu1 %v10654_v4, %s16655_s2 }
 0x58a   : > { %v10871_v56 = vpop.permute.xlu1 %4468  ;;  %4238 = vrot.lane.b32.xlu0 %v10662_v12, %s16655_s2 }
 0x58b   : > { %16964 = vst [vmem:[#allocation182_spill] sm:$0xff] %v10871_v56 }
 0x58c   : > { %v10875_v24 = vpop.permute.xlu0 %4470  ;;  %4300 = vrot.lane.b32.xlu1 %v10652_v54, %s16560_s4 }
 0x58d   : > { %16965 = vst [vmem:[#allocation176_spill] sm:$0xff] %v10875_v24 }
 0x58e   : > { %v10879_v45 = vpop.permute.xlu1 %4032  ;;  %4230 = vrot.lane.b32.xlu0 %v10664_v27, %s16655_s2 }
 0x58f   : > { %16966 = vst [vmem:[#allocation177_spill] sm:$0xff] %v10879_v45  ;;  %v4060_v4 = vsel %vm2378_vm11, %v10742_v30, %v10879_v45 }
 0x590   : > { %v10887_v21 = vpop.permute.xlu0 %4034  ;;  %4364 = vrot.lane.b32.xlu1 %v10652_v54, %s16600_s28  ;;  %v4071_v24 = vmul.f32 %v4060_v4, %v9915_v51  ;;  %v16968_v4 = vld [vmem:[#allocation179_spill] sm:$0xff] }
 0x591   : > { %16967 = vst [vmem:[#allocation174_spill] sm:$0xff] %v10887_v21  ;;  %v4061_v56 = vsel %vm2378_vm11, %v10746_v35, %v10887_v21 }
 0x592   : > { %v4079_v39 = vmul.f32 %v4061_v56, %v9915_v51  ;;  %v4025_v27 = vpop.permute.xlu1 %4024  ;;  %4302 = vrot.lane.b32.xlu0 %v10662_v12, %s16560_s4 }
 0x593   : > { %v4062_v45 = vsel %vm2378_vm11, %v4025_v27, %v10742_v30  ;;  %v4064_v63 = vsel %vm2378_vm11, %v10750_v48, %v4025_v27 }
 0x594   : > { %v4027_v52 = vpop.permute.xlu0 %4026  ;;  %4428 = vrot.lane.b32.xlu1 %v10652_v54, %s16563_s27  ;;  %v4535_v21 = vpack.c.bf16 %v4079_v39, %v4071_v24  ;;  %v4069_v60 = vmul.f32 %v4064_v63, %v16968_v4  ;;  %v4070_v30 = vmul.f32 %v4062_v45, %v9911_v49 }
 0x595   : > { %v4063_v56 = vsel %vm2378_vm11, %v4027_v52, %v10746_v35  ;;  %v4065_v51 = vsel %vm2378_vm11, %v10756_v32, %v4027_v52 }
 0x596   : > { %v4077_v1 = vmul.f32 %v4065_v51, %v16968_v4  ;;  %v4078_v27 = vmul.f32 %v4063_v56, %v9911_v49  ;;  %v10917_v48 = vpop.permute.xlu1 %4096  ;;  %4669 = vmatprep.subr.bf16.mxu0 %v4535_v21  ;;  %4366 = vrot.lane.b32.xlu0 %v10662_v12, %s16600_s28 }
 0x597   : > { %16969 = vst [vmem:[#allocation26_spill] sm:$0xff] %v10917_v48  ;;  %v4124_v39 = vsel %vm2443_vm12, %v10758_v31, %v10917_v48 }
 0x598   : > { %v4534_v24 = vpack.c.bf16 %v4078_v27, %v4070_v30  ;;  %v10925_v35 = vpop.permute.xlu0 %4098  ;;  %4492 = vrot.lane.b32.xlu1 %v10652_v54, %s16579_s24  ;;  %v4533_v51 = vpack.c.bf16 %v4077_v1, %v4069_v60  ;;  %v4135_v52 = vmul.f32 %v4124_v39, %v9907_v33 }
 0x599   : > { %16970 = vst [vmem:[#allocation27_spill] sm:$0xff] %v10925_v35  ;;  %v4125_v45 = vsel %vm2443_vm12, %v10764_v19, %v10925_v35 }
 0x59a   : > { %v4143_v21 = vmul.f32 %v4125_v45, %v9907_v33  ;;  %v10935_v63 = vpop.permute.xlu1 %4088  ;;  %4626 = vmatprep.subr.bf16.mxu1 %v4533_v51  ;;  %4670 = vmatpush1.bf16.msra.mxu0 %v4534_v24 }
 0x59b   : > { %v4126_v56 = vsel %vm2443_vm12, %v10935_v63, %v10758_v31  ;;  %4430 = vrot.lane.b32.xlu0 %v10662_v12, %s16563_s27 }
 0x59c   : > { %v10943_v60 = vpop.permute.xlu0 %4090  ;;  %4048 = vrot.lane.b32.xlu1 %v10658_v58, %s16551_s21  ;;  %v4543_v1 = vpack.c.bf16 %v4143_v21, %v4135_v52  ;;  %v4134_v27 = vmul.f32 %v4126_v56, %v9903_v59 }
 0x59d   : > { %v4127_v30 = vsel %vm2443_vm12, %v10943_v60, %v10764_v19 }
 0x59e   : > { %v4142_v39 = vmul.f32 %v4127_v30, %v9903_v59  ;;  %v10953_v24 = vpop.permute.xlu1 %4160  ;;  %4671 = vmatprep.subr.bf16.mxu0 %v4543_v1 }
 0x59f   : > { %16971 = vst [vmem:[#allocation30_spill] sm:$0xff] %v10953_v24  ;;  %v4188_v31 = vsel %vm2508_vm13, %v10774_v10, %v10953_v24  ;;  %4494 = vrot.lane.b32.xlu0 %v10662_v12, %s16579_s24 }
 0x5a0   : > { %v4542_v51 = vpack.c.bf16 %v4142_v39, %v4134_v27  ;;  %v10961_v45 = vpop.permute.xlu0 %4162  ;;  %4112 = vrot.lane.b32.xlu1 %v10658_v58, %s16552_s5  ;;  %v4199_v52 = vmul.f32 %v4188_v31, %v9945_v9 }
 0x5a1   : > { %16972 = vst [vmem:[#allocation229_spill] sm:$0xff] %v10961_v45  ;;  %v4189_v19 = vsel %vm2508_vm13, %v10778_v46, %v10961_v45 }
 0x5a2   : > { %v4207_v21 = vmul.f32 %v4189_v19, %v9945_v9  ;;  %v10971_v56 = vpop.permute.xlu1 %4152  ;;  %4672 = vmatpush1.bf16.msra.mxu0 %v4542_v51 }
 0x5a3   : > { %v4190_v1 = vsel %vm2508_vm13, %v10971_v56, %v10774_v10  ;;  %4050 = vrot.lane.b32.xlu0 %v10668_v61, %s16551_s21 }
 0x5a4   : > { %v10979_v30 = vpop.permute.xlu0 %4154  ;;  %4176 = vrot.lane.b32.xlu1 %v10658_v58, %s16660_s0  ;;  %v4551_v27 = vpack.c.bf16 %v4207_v21, %v4199_v52  ;;  %v4198_v31 = vmul.f32 %v4190_v1, %v9941_v11 }
 0x5a5   : > { %v4191_v39 = vsel %vm2508_vm13, %v10979_v30, %v10778_v46 }
 0x5a6   : > { %v4206_v51 = vmul.f32 %v4191_v39, %v9941_v11  ;;  %v10989_v19 = vpop.permute.xlu1 %4224  ;;  %4673 = vmatprep.subr.bf16.mxu0 %v4551_v27 }
 0x5a7   : > { %16973 = vst [vmem:[#allocation228_spill] sm:$0xff] %v10989_v19  ;;  %v4252_v10 = vsel %vm2198_vm2, %v10790_v25, %v10989_v19  ;;  %4114 = vrot.lane.b32.xlu0 %v10668_v61, %s16552_s5 }
 0x5a8   : > { %v4550_v52 = vpack.c.bf16 %v4206_v51, %v4198_v31  ;;  %v10997_v21 = vpop.permute.xlu0 %4226  ;;  %4240 = vrot.lane.b32.xlu1 %v10658_v58, %s16655_s2  ;;  %v4263_v1 = vmul.f32 %v4252_v10, %v9937_v7 }
 0x5a9   : > { %16974 = vst [vmem:[#allocation31_spill] sm:$0xff] %v10997_v21  ;;  %v4253_v46 = vsel %vm2198_vm2, %v10794_v34, %v10997_v21 }
 0x5aa   : > { %v4271_v27 = vmul.f32 %v4253_v46, %v9937_v7  ;;  %v11007_v39 = vpop.permute.xlu1 %4216  ;;  %4674 = vmatpush1.bf16.msra.mxu0 %v4550_v52 }
 0x5ab   : > { %v4254_v31 = vsel %vm2198_vm2, %v11007_v39, %v10790_v25  ;;  %4178 = vrot.lane.b32.xlu0 %v10668_v61, %s16660_s0 }
 0x5ac   : > { %v11015_v51 = vpop.permute.xlu0 %4218  ;;  %5008 = vrot.lane.b32.xlu1 %v10536_v26, %s16660_s0  ;;  %v4559_v10 = vpack.c.bf16 %v4271_v27, %v4263_v1  ;;  %v4262_v52 = vmul.f32 %v4254_v31, %v9933_v2  ;;  %v729_v1 = vld [vmem:[%s10396_s6 + $0x20] sm:$0xff] }
 0x5ad   : > { %v4255_v46 = vsel %vm2198_vm2, %v11015_v51, %v10794_v34  ;;  %v16975_v34 = vpack.c.bf16 %v10582_v8, %v10572_v43 }
 0x5ae   : > { %v4270_v7 = vmul.f32 %v4255_v46, %v9933_v2  ;;  %v4289_v11 = vpop.permute.xlu1 %4288  ;;  %4675 = vmatprep.subr.bf16.mxu0 %v4559_v10  ;;  %v16977_v46 = vpack.c.bf16 %v10576_v23, %v10566_v0 }
 0x5af   : > { %4242 = vrot.lane.b32.xlu0 %v10668_v61, %s16655_s2 }
 0x5b0   : > { %v4558_v25 = vpack.c.bf16 %v4270_v7, %v4262_v52  ;;  %v4291_v9 = vpop.permute.xlu0 %4290  ;;  %5014 = vrot.lane.b32.xlu1 %v10538_v62, %s16660_s0  ;;  %v11042_v7 = vmul.f32 %v10423_v53, %v729_v1 }
 0x5b1   : > { %v4317_v4 = vsel %vm2215_vm5, %v10819_v28, %v4291_v9 }
 0x5b2   : > { %v11030_v27 = vpop.permute.xlu1 %4280  ;;  %4676 = vmatpush1.bf16.msra.mxu0 %v4558_v25  ;;  %16976 = vst [vmem:[#allocation34_spill] sm:$0xff] %v11042_v7  ;;  %v4334_v21 = vmul.f32 %v4317_v4, %v9968_v50 }
 0x5b3   : > { %5098 = vrot.lane.b32.xlu0 %v10428_v57, %s16655_s2  ;;  %4677 = vmatprep.subr.bf16.mxu0 %v16975_v34 }
 0x5b4   : > { %v11037_v31 = vpop.permute.xlu0 %4282  ;;  %4040 = vrot.lane.b32.xlu1 %v10656_v42, %s16551_s21 }
 0x5b6   : > { %v4353_v10 = vpop.permute.xlu1 %4352  ;;  %4678 = vmatpush1.bf16.msra.mxu0 %v16977_v46 }
 0x5b7   : > { %5212 = vrot.lane.b32.xlu0 %v11042_v7, %s16560_s4 }
 0x5b8   : > { %v4355_v52 = vpop.permute.xlu0 %4354  ;;  %4104 = vrot.lane.b32.xlu1 %v10656_v42, %s16552_s5 }
 0x5ba   : > { %v11051_v43 = vpop.permute.xlu1 %4344 }
 0x5bb   : > { %4042 = vrot.lane.b32.xlu0 %v10666_v5, %s16551_s21 }
 0x5bc   : > { %v11055_v8 = vpop.permute.xlu0 %4346  ;;  %4168 = vrot.lane.b32.xlu1 %v10656_v42, %s16660_s0 }
 0x5be   : > { %v4417_v53 = vpop.permute.xlu1 %4416 }
 0x5bf   : > { %4106 = vrot.lane.b32.xlu0 %v10666_v5, %s16552_s5 }
 0x5c0   : > { %v4419_v0 = vpop.permute.xlu0 %4418  ;;  %4232 = vrot.lane.b32.xlu1 %v10656_v42, %s16655_s2 }
 0x5c2   : > { %v11063_v23 = vpop.permute.xlu1 %4408 }
 0x5c3   : > { %4170 = vrot.lane.b32.xlu0 %v10666_v5, %s16660_s0 }
 0x5c4   : > { %v11067_v25 = vpop.permute.xlu0 %4410  ;;  %4304 = vrot.lane.b32.xlu1 %v10658_v58, %s16560_s4 }
 0x5c6   : > { %v4481_v1 = vpop.permute.xlu1 %4480 }
 0x5c7   : > { %4234 = vrot.lane.b32.xlu0 %v10666_v5, %s16655_s2 }
 0x5c8   : > { %v11073_v34 = vpop.permute.xlu0 %4482  ;;  %4296 = vrot.lane.b32.xlu1 %v10656_v42, %s16560_s4 }
 0x5ca   : > { %v11077_v46 = vpop.permute.xlu1 %4472 }
 0x5cb   : > { %4306 = vrot.lane.b32.xlu0 %v10668_v61, %s16560_s4 }
 0x5cc   : > { %v11081_v2 = vpop.permute.xlu0 %4474  ;;  %4368 = vrot.lane.b32.xlu1 %v10658_v58, %s16600_s28 }
 0x5ce   : > { %v11085_v59 = vpop.permute.xlu1 %4292 }
 0x5cf   : > { %16978 = vst [vmem:[#allocation233_spill] sm:$0xff] %v11085_v59  ;;  %4298 = vrot.lane.b32.xlu0 %v10666_v5, %s16560_s4  ;;  %v4314_v54 = vsel %vm2215_vm5, %v4289_v11, %v11085_v59  ;;  %v4381_v59 = vsel %vm2701_vm14, %v10835_v18, %v4355_v52 }
 0x5d0   : > { %v11089_v33 = vpop.permute.xlu0 %5110  ;;  %4360 = vrot.lane.b32.xlu1 %v10656_v42, %s16600_s28  ;;  %v4327_v45 = vmul.f32 %v4314_v54, %v9972_v6 }
 0x5d1   : > { %16979 = vst [vmem:[#allocation231_spill] sm:$0xff] %v11089_v33  ;;  %v4316_v33 = vsel %vm2215_vm5, %v10815_v36, %v4289_v11 }
 0x5d2   : > { %v11096_v49 = vpop.permute.xlu1 %4356  ;;  %v4326_v48 = vmul.f32 %v4316_v33, %v9968_v50  ;;  %v4398_v33 = vmul.f32 %v4381_v59, %v16790_v55 }
 0x5d3   : > { %16980 = vst [vmem:[#allocation35_spill] sm:$0xff] %v11096_v49  ;;  %4370 = vrot.lane.b32.xlu0 %v10668_v61, %s16600_s28  ;;  %v4378_v4 = vsel %vm2701_vm14, %v4353_v10, %v11096_v49  ;;  %v4445_v49 = vsel %vm2766_vm15, %v10851_v37, %v4419_v0 }
 0x5d4   : > { %4432 = vrot.lane.b32.xlu1 %v10658_v58, %s16563_s27  ;;  %v11108_v12 = vpop.permute.xlu0 %4294 }
 0x5d5   : > { %16981 = vst [vmem:[#allocation38_spill] sm:$0xff] %v11108_v12  ;;  %v4315_v19 = vsel %vm2215_vm5, %v4291_v9, %v11108_v12  ;;  %v4380_v9 = vsel %vm2701_vm14, %v10831_v15, %v4353_v10  ;;  %v4391_v12 = vmul.f32 %v4378_v4, %v10001_v41 }
 0x5d6   : > { %v4335_v24 = vmul.f32 %v4315_v19, %v9972_v6  ;;  %v11119_v11 = vpop.permute.xlu1 %4420  ;;  %v4574_v6 = vpack.c.bf16 %v4334_v21, %v4326_v48  ;;  %v4444_v48 = vsel %vm2766_vm15, %v10847_v16, %v4417_v53 }
 0x5d7   : > { %16982 = vst [vmem:[#allocation39_spill] sm:$0xff] %v11119_v11  ;;  %4362 = vrot.lane.b32.xlu0 %v10666_v5, %s16600_s28  ;;  %v4442_v59 = vsel %vm2766_vm15, %v4417_v53, %v11119_v11 }
 0x5d8   : > { %4424 = vrot.lane.b32.xlu1 %v10656_v42, %s16563_s27  ;;  %v11132_v54 = vpop.permute.xlu0 %4358  ;;  %v4575_v19 = vpack.c.bf16 %v4335_v24, %v4327_v45  ;;  %v4390_v24 = vmul.f32 %v4380_v9, %v16790_v55  ;;  %v4455_v53 = vmul.f32 %v4442_v59, %v10030_v3  ;;  %v7498_v59 = vld [vmem:[%s16574_s3 + $0x50] ss:$0 sm:$0xff] }
 0x5d9   : > { %16983 = vst [vmem:[#allocation42_spill] sm:$0xff] %v11132_v54  ;;  %v4379_v50 = vsel %vm2701_vm14, %v4355_v52, %v11132_v54  ;;  %v4462_v52 = vmul.f32 %v4445_v49, %v10026_v14  ;;  %v731_v54 = vld [vmem:[%s10396_s6 + $0x30] sm:$0xff] }
 0x5da   : > { %v4399_v10 = vmul.f32 %v4379_v50, %v10001_v41  ;;  %v11143_v35 = vpop.permute.xlu1 %4484  ;;  %4679 = vmatprep.subr.bf16.mxu0 %v4575_v19  ;;  %v4582_v21 = vpack.c.bf16 %v4398_v33, %v4390_v24 }
 0x5db   : > { %16984 = vst [vmem:[#allocation43_spill] sm:$0xff] %v11143_v35  ;;  %4434 = vrot.lane.b32.xlu0 %v10668_v61, %s16563_s27  ;;  %4680 = vmatpush1.bf16.msra.mxu0 %v4574_v6  ;;  %v4509_v6 = vsel %vm2831_vm0, %v10867_v29, %v11073_v34  ;;  %v4506_v49 = vsel %vm2831_vm0, %v4481_v1, %v11143_v35 }
 0x5dc   : > { %4496 = vrot.lane.b32.xlu1 %v10658_v58, %s16579_s24  ;;  %v11156_v50 = vpop.permute.xlu0 %4422  ;;  %v4583_v45 = vpack.c.bf16 %v4399_v10, %v4391_v12  ;;  %v4454_v12 = vmul.f32 %v4444_v48, %v10026_v14  ;;  %v4526_v48 = vmul.f32 %v7498_v59, %v4509_v6 }
 0x5dd   : > { %16985 = vst [vmem:[#allocation238_spill] sm:$0xff] %v11156_v50  ;;  %v4443_v4 = vsel %vm2766_vm15, %v4419_v0, %v11156_v50  ;;  %v4508_v0 = vsel %vm2831_vm0, %v10863_v22, %v4481_v1  ;;  %v7499_v1 = vld [vmem:[%s16574_s3 + $0x58] ss:$0 sm:$0xff] }
 0x5de   : > { %v4463_v9 = vmul.f32 %v4443_v4, %v10030_v3  ;;  %v11168_v19 = vpop.permute.xlu1 %4044  ;;  %4681 = vmatprep.subr.bf16.mxu0 %v4583_v45  ;;  %v4590_v24 = vpack.c.bf16 %v4462_v52, %v4454_v12  ;;  %v4518_v52 = vmul.f32 %v7498_v59, %v4508_v0  ;;  %v11206_v12 = vld [vmem:[%s15560_s14] ss:$8 sps:$4 sm:$0xff]  }
 0x5df   : > { %4426 = vrot.lane.b32.xlu0 %v10666_v5, %s16563_s27  ;;  %4682 = vmatpush1.bf16.msra.mxu0 %v4582_v21  ;;  %v4519_v21 = vmul.f32 %v7499_v1, %v4506_v49  ;;  %16987 = vst [vmem:[#allocation47_spill] sm:$0xff] %v11206_v12  ;;  %v725_v49 = vld [vmem:[%s10396_s6] sm:$0xff] }
 0x5e0   : > { %4488 = vrot.lane.b32.xlu1 %v10656_v42, %s16579_s24  ;;  %v11181_v33 = vpop.permute.xlu0 %4486  ;;  %v4591_v10 = vpack.c.bf16 %v4463_v9, %v4455_v53  ;;  %v4598_v53 = vpack.c.bf16 %v4526_v48, %v4518_v52 }
 0x5e1   : > { %16986 = vst [vmem:[#allocation46_spill] sm:$0xff] %v11181_v33  ;;  %v4507_v45 = vsel %vm2831_vm0, %v11073_v34, %v11181_v33  ;;  %v730_v33 = vld [vmem:[%s10396_s6 + $0x28] sm:$0xff] }
 0x5e2   : > { %v4527_v4 = vmul.f32 %v7499_v1, %v4507_v45  ;;  %v11193_v14 = vpop.permute.xlu1 %4036  ;;  %4683 = vmatprep.subr.bf16.mxu0 %v4591_v10  ;;  %v11216_v10 = vmul.f32 %v10421_v38, %v725_v49  ;;  %v732_v45 = vld [vmem:[%s10396_s6 + $0x38] sm:$0xff] }
 0x5e3   : > { %4498 = vrot.lane.b32.xlu0 %v10668_v61, %s16579_s24  ;;  %4684 = vmatpush1.bf16.msra.mxu0 %v4590_v24  ;;  %v11239_v1 = vmul.f32 %v10562_v44, %v732_v45  ;;  %v17006_v61 = vld [vmem:[#allocation184_spill] sm:$0xff] }
 0x5e4   : > { %5002 = vrot.lane.b32.xlu1 %v10428_v57, %s16660_s0  ;;  %v11199_v6 = vpop.permute.xlu0 %4046  ;;  %v4599_v34 = vpack.c.bf16 %v4527_v4, %v4519_v21  ;;  %16988 = vst [vmem:[#allocation242_spill] sm:$0xff] %v11216_v10 }
 0x5e5   : > { %16989 = vst [vmem:[#allocation241_spill] sm:$0xff] %v11239_v1 }
 0x5e6   : > { %v11201_v9 = vpop.permute.xlu1 %4108  ;;  %4685 = vmatprep.subr.bf16.mxu0 %v4599_v34 }
 0x5e7   : > { %4490 = vrot.lane.b32.xlu0 %v10666_v5, %s16579_s24  ;;  %4686 = vmatpush1.bf16.msra.mxu0 %v4598_v53  ;;  %v17004_v5 = vld [vmem:[#allocation181_spill] sm:$0xff] }
 0x5e8   : > { %5104 = vrot.lane.b32.xlu1 %v10536_v26, %s16655_s2  ;;  %v11213_v0 = vpop.permute.xlu0 %4038 }
 0x5ea   : > { %v11218_v24 = vpop.permute.xlu1 %4100  ;;  %4702 = vmatmul.mubr.bf16.vlgmr.msra.gmra.mrb[44].mxu0 %v11206_v12 }
 0x5eb   : > { %5302 = vrot.lane.b32.xlu0 %v10538_v62, %s16600_s28  ;;  %7412 = vmatprep.mubr.msk.bf16.mxu0 %vm3795_vm10, %v10801_v47 }
 0x5ec   : > { %4804 = vrot.lane.b32.xlu1 %v11216_v10, %s16551_s21  ;;  %v11227_v59 = vpop.permute.xlu0 %4110 }
 0x5ee   : > { %v11229_v48 = vpop.permute.xlu1 %4172 }
 0x5ef   : > { %5308 = vrot.lane.b32.xlu0 %v11042_v7, %s16600_s28 }
 0x5f0   : > { %5206 = vrot.lane.b32.xlu1 %v10538_v62, %s16560_s4  ;;  %v11236_v38 = vpop.permute.xlu0 %4102 }
 0x5f2   : > { %v11241_v47 = vpop.permute.xlu1 %4164 }
 0x5f3   : > { %5296 = vrot.lane.b32.xlu0 %v10536_v26, %s16600_s28 }
 0x5f4   : > { %4846 = vrot.lane.b32.xlu1 %v11239_v1, %s16551_s21  ;;  %v11247_v21 = vpop.permute.xlu0 %4174 }
 0x5f6   : > { %v11249_v4 = vpop.permute.xlu1 %4236 }
 0x5f7   : > { %4996 = vrot.lane.b32.xlu0 %v11216_v10, %s16660_s0 }
 0x5f8   : > { %5200 = vrot.lane.b32.xlu1 %v10536_v26, %s16560_s4  ;;  %v11255_v44 = vpop.permute.xlu0 %4166 }
 0x5fa   : > { %v11257_v52 = vpop.permute.xlu1 %4228 }
 0x5fb   : > { %16990 = vst [vmem:[#allocation50_spill] sm:$0xff] %v11257_v52  ;;  %5398 = vrot.lane.b32.xlu0 %v10538_v62, %s16563_s27 }
 0x5fc   : > { %4900 = vrot.lane.b32.xlu1 %v11216_v10, %s16552_s5  ;;  %v11263_v34 = vpop.permute.xlu0 %4238 }
 0x5fe   : > { %v11265_v53 = vpop.permute.xlu1 %4300 }
 0x5ff   : > { %16991 = vst [vmem:[#allocation240_spill] sm:$0xff] %v11265_v53  ;;  %5038 = vrot.lane.b32.xlu0 %v11239_v1, %s16660_s0  ;;  %v17007_v53 = vld [vmem:[#allocation157_spill] sm:$0xff] }
 0x600   : > { %4942 = vrot.lane.b32.xlu1 %v11239_v1, %s16552_s5  ;;  %v11271_v49 = vpop.permute.xlu0 %4230 }
 0x601   : > { %16992 = vst [vmem:[#allocation239_spill] sm:$0xff] %v11271_v49  ;;  %v17011_v49 = vld [vmem:[#allocation185_spill] sm:$0xff] }
 0x602   : > { %v11273_v45 = vpop.permute.xlu1 %4364 }
 0x603   : > { %16993 = vst [vmem:[#allocation51_spill] sm:$0xff] %v11273_v45  ;;  %5494 = vrot.lane.b32.xlu0 %v10538_v62, %s16579_s24  ;;  %v11297_v62 = vmul.f32 %v10425_v20, %v730_v33  ;;  %v4129_v20 = vsel %vm2443_vm12, %v10770_v17, %v10943_v60 }
 0x604   : > { %5404 = vrot.lane.b32.xlu1 %v11042_v7, %s16563_s27  ;;  %v11279_v3 = vpop.permute.xlu0 %4302 }
 0x605   : > { %16994 = vst [vmem:[#allocation244_spill] sm:$0xff] %v11279_v3  ;;  %16998 = vst [vmem:[#allocation55_spill] sm:$0xff] %v11297_v62 }
 0x606   : > { %v11281_v55 = vpop.permute.xlu1 %4428 }
 0x607   : > { %16995 = vst [vmem:[#allocation243_spill] sm:$0xff] %v11281_v55  ;;  %5500 = vrot.lane.b32.xlu0 %v11042_v7, %s16579_s24  ;;  %v4141_v55 = vmul.f32 %v4129_v20, %v17004_v5 }
 0x608   : > { %5392 = vrot.lane.b32.xlu1 %v10536_v26, %s16563_s27  ;;  %v11287_v41 = vpop.permute.xlu0 %4366 }
 0x609   : > { %16996 = vst [vmem:[#allocation54_spill] sm:$0xff] %v11287_v41  ;;  %v17005_v41 = vld [vmem:[#allocation214_spill] sm:$0xff] }
 0x60a   : > { %v11290_v35 = vpop.permute.xlu1 %4492  ;;  %v4193_v45 = vsel %vm2508_vm13, %v17005_v41, %v10979_v30 }
 0x60b   : > { %16997 = vst [vmem:[#allocation230_spill] sm:$0xff] %v11290_v35  ;;  %5488 = vrot.lane.b32.xlu0 %v10536_v26, %s16579_s24  ;;  %v11309_v26 = vmul.f32 %v10560_v40, %v731_v54  ;;  %v17003_v40 = vld [vmem:[#allocation15_spill] sm:$0xff] }
 0x60c   : > { %5092 = vrot.lane.b32.xlu1 %v11216_v10, %s16655_s2  ;;  %v4128_v54 = vsel %vm2443_vm12, %v17003_v40, %v10935_v63 }
 0x60d   : > { %v11299_v11 = vpop.permute.xlu0 %4430  ;;  %17001 = vst [vmem:[#allocation232_spill] sm:$0xff] %v11309_v26 }
 0x60e   : > { %16999 = vst [vmem:[#allocation235_spill] sm:$0xff] %v11299_v11  ;;  %v4049_v50 = vpop.permute.xlu1 %4048  ;;  %v17002_v11 = vld [vmem:[#allocation188_spill] sm:$0xff] }
 0x60f   : > { %4834 = vrot.lane.b32.xlu0 %v11297_v62, %s16551_s21  ;;  %v4052_v33 = vsel %vm2378_vm11, %v11168_v19, %v4049_v50 }
 0x610   : > { %5134 = vrot.lane.b32.xlu1 %v11239_v1, %s16655_s2  ;;  %v4075_v52 = vmul.f32 %v4052_v33, %v17007_v53 }
 0x611   : > { %v11306_v35 = vpop.permute.xlu0 %4494 }
 0x612   : > { %17000 = vst [vmem:[#allocation58_spill] sm:$0xff] %v11306_v35  ;;  %v11311_v42 = vpop.permute.xlu1 %4112  ;;  %v4066_v35 = vsel %vm2378_vm11, %v4049_v50, %v17002_v11 }
 0x613   : > { %5188 = vrot.lane.b32.xlu0 %v11216_v10, %s16560_s4  ;;  %v4068_v63 = vmul.f32 %v4066_v35, %v17006_v61  ;;  %v4130_v30 = vsel %vm2443_vm12, %v11311_v42, %v17003_v40  ;;  %v17008_v35 = vld [vmem:[#allocation217_spill] sm:$0xff] }
 0x614   : > { %4840 = vrot.lane.b32.xlu1 %v11309_v26, %s16551_s21  ;;  %v4192_v33 = vsel %vm2508_vm13, %v17008_v35, %v10971_v56  ;;  %v4132_v56 = vmul.f32 %v4130_v30, %v17011_v49  ;;  %v17013_v30 = vld [vmem:[#allocation191_spill] sm:$0xff] }
 0x615   : > { %v4051_v60 = vpop.permute.xlu0 %4050 }
 0x616   : > { %v4053_v11 = vsel %vm2378_vm11, %v11199_v6, %v4051_v60  ;;  %v4067_v50 = vsel %vm2378_vm11, %v4051_v60, %v10756_v32  ;;  %v11342_v58 = vpop.permute.xlu1 %4176  ;;  %v4133_v32 = vmul.f32 %v4128_v54, %v17004_v5  ;;  %v17010_v54 = vld [vmem:[#allocation175_spill] sm:$0xff] }
 0x617   : > { %v4076_v20 = vmul.f32 %v4067_v50, %v17006_v61  ;;  %v4083_v3 = vmul.f32 %v4053_v11, %v17007_v53  ;;  %4936 = vrot.lane.b32.xlu0 %v11309_v26, %s16552_s5  ;;  %v17009_v53 = vld [vmem:[#allocation189_spill] sm:$0xff]  ;;  %v4257_v5 = vsel %vm2198_vm2, %v17010_v54, %v11015_v51 }
 0x618   : > { %5194 = vrot.lane.b32.xlu1 %v10428_v57, %s16560_s4  ;;  %v4205_v61 = vmul.f32 %v4193_v45, %v17009_v53  ;;  %v17012_v45 = vld [vmem:[#allocation18_spill] sm:$0xff] }
 0x619   : > { %v4532_v60 = vpack.c.bf16 %v4076_v20, %v4068_v63  ;;  %v11361_v11 = vpop.permute.xlu0 %4114  ;;  %v4539_v50 = vpack.c.bf16 %v4083_v3, %v4075_v52  ;;  %v4541_v3 = vpack.c.bf16 %v4141_v55, %v4133_v32  ;;  %v4197_v52 = vmul.f32 %v4192_v33, %v17009_v53  ;;  %v17028_v53 = vld [vmem:[#allocation197_spill] sm:$0xff] }
 0x61a   : > { %v4131_v40 = vsel %vm2443_vm12, %v11361_v11, %v10770_v17  ;;  %v11368_v12 = vpop.permute.xlu1 %4240  ;;  %v4194_v17 = vsel %vm2508_vm13, %v11342_v58, %v17008_v35  ;;  %v4256_v51 = vsel %vm2198_vm2, %v17012_v45, %v11007_v39  ;;  %v4269_v32 = vmul.f32 %v4257_v5, %v17013_v30 }
 0x61b   : > { %v4140_v63 = vmul.f32 %v4131_v40, %v17011_v49  ;;  %4627 = vmatpush1.bf16.msra.mxu1 %v4532_v60  ;;  %4755 = vmatprep.subr.bf16.mxu0 %v4539_v50  ;;  %v4549_v60 = vpack.c.bf16 %v4205_v61, %v4197_v52  ;;  %v17015_v50 = vld [vmem:[#allocation192_spill] sm:$0xff]  ;;  %v4258_v5 = vsel %vm2198_vm2, %v11368_v12, %v17012_v45  ;;  %v17017_v52 = vld [vmem:[#allocation19_spill] sm:$0xff] }
 0x61c   : > { %4930 = vrot.lane.b32.xlu0 %v11297_v62, %s16552_s5  ;;  %4628 = vmatprep.subr.bf16.mxu1 %v4541_v3  ;;  %v4196_v40 = vmul.f32 %v4194_v17, %v17015_v50  ;;  %v4320_v17 = vsel %vm2215_vm5, %v17017_v52, %v11030_v27  ;;  %v4319_v45 = vsel %vm2215_vm5, %v11037_v31, %v10819_v28  ;;  %v17021_v49 = vld [vmem:[#allocation196_spill] sm:$0xff] }
 0x61d   : > { %v4540_v20 = vpack.c.bf16 %v4140_v63, %v4132_v56  ;;  %5290 = vrot.lane.b32.xlu1 %v10428_v57, %s16600_s28  ;;  %v11389_v55 = vpop.permute.xlu0 %4178  ;;  %v4261_v56 = vmul.f32 %v4256_v51, %v17013_v30  ;;  %v17020_v30 = vld [vmem:[#allocation195_spill] sm:$0xff] }
 0x61e   : > { %v4195_v35 = vsel %vm2508_vm13, %v11389_v55, %v17005_v41  ;;  %v11396_v33 = vpop.permute.xlu1 %5008  ;;  %v17016_v41 = vld [vmem:[#allocation178_spill] sm:$0xff]  ;;  %v4260_v28 = vmul.f32 %v4258_v5, %v17020_v30  ;;  %v17023_v5 = vld [vmem:[#allocation193_spill] sm:$0xff] }
 0x61f   : > { %17014 = vst [vmem:[#allocation59_spill] sm:$0xff] %v11396_v33  ;;  %v4204_v39 = vmul.f32 %v4195_v35, %v17015_v50  ;;  %4629 = vmatpush1.bf16.msra.mxu1 %v4540_v20  ;;  %v4321_v61 = vsel %vm2215_vm5, %v17016_v41, %v11037_v31  ;;  %v4557_v35 = vpack.c.bf16 %v4269_v32, %v4261_v56 }
 0x620   : > { %5386 = vrot.lane.b32.xlu0 %v10428_v57, %s16563_s27  ;;  %4630 = vmatprep.subr.bf16.mxu1 %v4549_v60  ;;  %v4318_v60 = vsel %vm2215_vm5, %v11030_v27, %v10815_v36  ;;  %v4383_v32 = vsel %vm2701_vm14, %v11055_v8, %v10835_v18  ;;  %v17022_v36 = vld [vmem:[#allocation23_spill] sm:$0xff]  ;;  %v4324_v56 = vmul.f32 %v4320_v17, %v17021_v49 }
 0x621   : > { %v4548_v63 = vpack.c.bf16 %v4204_v39, %v4196_v40  ;;  %5284 = vrot.lane.b32.xlu1 %v11216_v10, %s16600_s28  ;;  %v11413_v3 = vpop.permute.xlu0 %4242  ;;  %v17019_v40 = vld [vmem:[#allocation172_spill] sm:$0xff]  ;;  %v4449_v27 = vsel %vm2766_vm15, %v17022_v36, %v11067_v25  ;;  %v4325_v50 = vmul.f32 %v4318_v60, %v17023_v5  ;;  %v17031_v60 = vld [vmem:[#allocation166_spill] sm:$0xff] }
 0x622   : > { %v4259_v51 = vsel %vm2198_vm2, %v11413_v3, %v17010_v54  ;;  %v11427_v20 = vpop.permute.xlu1 %5014  ;;  %v4385_v39 = vsel %vm2701_vm14, %v17019_v40, %v11055_v8  ;;  %v11440_v54 = vmul.f32 %v4321_v61, %v17021_v49  ;;  %v17024_v61 = vld [vmem:[#allocation22_spill] sm:$0xff]  ;;  %v4382_v8 = vsel %vm2701_vm14, %v11051_v43, %v10831_v15  ;;  %v17029_v15 = vld [vmem:[#allocation200_spill] sm:$0xff] }
 0x623   : > { %17018 = vst [vmem:[#allocation226_spill] sm:$0xff] %v11427_v20  ;;  %v4268_v31 = vmul.f32 %v4259_v51, %v17020_v30  ;;  %4631 = vmatpush1.bf16.msra.mxu1 %v4548_v63  ;;  %v4333_v63 = vmul.f32 %v4319_v45, %v17023_v5  ;;  %v4384_v51 = vsel %vm2701_vm14, %v17024_v61, %v11051_v43  ;;  %v17027_v45 = vld [vmem:[#allocation173_spill] sm:$0xff] }
 0x624   : > { %5380 = vrot.lane.b32.xlu0 %v11216_v10, %s16563_s27  ;;  %4632 = vmatprep.subr.bf16.mxu1 %v4557_v35  ;;  %v17026_v35 = vld [vmem:[#allocation199_spill] sm:$0xff]  ;;  %v4448_v49 = vsel %vm2766_vm15, %v17027_v45, %v11063_v23  ;;  %v11482_v43 = vmul.f32 %v4449_v27, %v17029_v15  ;;  %v4389_v27 = vmul.f32 %v4382_v8, %v17028_v53  ;;  %v17036_v8 = vld [vmem:[#allocation182_spill] sm:$0xff] }
 0x625   : > { %v4556_v30 = vpack.c.bf16 %v4268_v31, %v4260_v28  ;;  %5032 = vrot.lane.b32.xlu1 %v11309_v26, %s16660_s0  ;;  %v11460_v18 = vpop.permute.xlu0 %5098  ;;  %v11467_v17 = vmul.f32 %v4385_v39, %v17026_v35  ;;  %v4447_v28 = vsel %vm2766_vm15, %v11067_v25, %v10851_v37  ;;  %v4572_v39 = vpack.c.bf16 %v11440_v54, %v4324_v56  ;;  %v17030_v25 = vld [vmem:[#allocation162_spill] sm:$0xff]  ;;  %v17033_v54 = vld [vmem:[#allocation201_spill] sm:$0xff] }
 0x626   : > { %17025 = vst [vmem:[#allocation237_spill] sm:$0xff] %v11460_v18  ;;  %v11477_v31 = vpop.permute.xlu1 %4040  ;;  %v4397_v18 = vmul.f32 %v4383_v32, %v17028_v53  ;;  %v11486_v33 = vmul.f32 %v4384_v51, %v17026_v35  ;;  %v4446_v37 = vsel %vm2766_vm15, %v11063_v23, %v10847_v16  ;;  %v17032_v32 = vpack.c.bf16 %v17030_v25, %v17031_v60  ;;  %v17034_v51 = vld [vmem:[#allocation176_spill] sm:$0xff]  ;;  %v17038_v53 = vld [vmem:[#allocation202_spill] sm:$0xff] }
 0x627   : > { %4633 = vmatpush1.bf16.msra.mxu1 %v4556_v30  ;;  %v11499_v30 = vmul.f32 %v4448_v49, %v17029_v15  ;;  %v11502_v56 = vmul.f32 %v4447_v28, %v17033_v54  ;;  %v4513_v16 = vsel %vm2831_vm0, %v17034_v51, %v11081_v2  ;;  %v4512_v49 = vsel %vm2831_vm0, %v17036_v8, %v11077_v46 }
 0x628   : > { %5128 = vrot.lane.b32.xlu0 %v11309_v26, %s16655_s2  ;;  %4634 = vmatprep.subr.bf16.mxu1 %v17032_v32  ;;  %v4580_v25 = vpack.c.bf16 %v11467_v17, %v11486_v33  ;;  %v4511_v28 = vsel %vm2831_vm0, %v11081_v2, %v10867_v29  ;;  %v4573_v32 = vpack.c.bf16 %v4333_v63, %v4325_v50  ;;  %v17037_v17 = vld [vmem:[#allocation212_spill] sm:$0xff]  ;;  %v7500_v29 = vld [vmem:[%s16574_s3 + $0x40] ss:$0 sm:$0xff] }
 0x629   : > { %5026 = vrot.lane.b32.xlu1 %v11297_v62, %s16660_s0  ;;  %v11510_v23 = vpop.permute.xlu0 %5212  ;;  %v4453_v15 = vmul.f32 %v4446_v37, %v17033_v54  ;;  %v4588_v35 = vpack.c.bf16 %v11482_v43, %v11499_v30  ;;  %v4117_v33 = vsel %vm2443_vm12, %v11227_v59, %v11361_v11  ;;  %v17039_v5 = vpack.c.bf16 %v17037_v17, %v17038_v53  ;;  %v17052_v30 = vld [vmem:[#allocation208_spill] sm:$0xff] }
 0x62a   : > { %17035 = vst [vmem:[#allocation236_spill] sm:$0xff] %v11510_v23  ;;  %v11522_v60 = vpop.permute.xlu1 %4104  ;;  %v4581_v23 = vpack.c.bf16 %v4397_v18, %v4389_v27  ;;  %v4510_v2 = vsel %vm2831_vm0, %v11077_v46, %v10863_v22  ;;  %v11541_v50 = vmul.f32 %v7500_v29, %v4513_v16  ;;  %v4054_v11 = vsel %vm2378_vm11, %v11477_v31, %v11168_v19  ;;  %v7501_v22 = vld [vmem:[%s16574_s3 + $0x48] ss:$0 sm:$0xff]  ;;  %v17040_v18 = vld [vmem:[#allocation177_spill] sm:$0xff]  ;;  %v17041_v27 = vld [vmem:[#allocation174_spill] sm:$0xff] }
 0x62b   : > { %4635 = vmatpush1.bf16.msra.mxu1 %v17039_v5  ;;  %v11549_v53 = vmul.f32 %v7500_v29, %v4512_v49  ;;  %v4525_v46 = vmul.f32 %v7501_v22, %v4511_v28  ;;  %v4116_v5 = vsel %vm2443_vm12, %v11201_v9, %v11311_v42  ;;  %v4589_v63 = vpack.c.bf16 %v11502_v56, %v4453_v15  ;;  %v17042_v49 = vld [vmem:[#allocation156_spill] sm:$0xff]  ;;  %v17043_v56 = vld [vmem:[#allocation159_spill] sm:$0xff] }
 0x62c   : > { %5122 = vrot.lane.b32.xlu0 %v11297_v62, %s16655_s2  ;;  %4636 = vmatprep.subr.bf16.mxu1 %v4573_v32  ;;  %v4058_v37 = vsel %vm2378_vm11, %v17040_v18, %v11193_v14  ;;  %v4059_v16 = vsel %vm2378_vm11, %v17041_v27, %v11213_v0  ;;  %v4147_v28 = vmul.f32 %v4117_v33, %v17042_v49 }
 0x62d   : > { %5482 = vrot.lane.b32.xlu1 %v10428_v57, %s16579_s24  ;;  %v4043_v19 = vpop.permute.xlu0 %4042  ;;  %v4517_v17 = vmul.f32 %v7501_v22, %v4510_v2  ;;  %v4181_v15 = vsel %vm2508_vm13, %v11247_v21, %v11389_v55  ;;  %v4074_v29 = vmul.f32 %v4054_v11, %v17043_v56  ;;  %v4139_v27 = vmul.f32 %v4116_v5, %v17042_v49  ;;  %v17044_v55 = vld [vmem:[#allocation204_spill] sm:$0xff]  ;;  %v17153_v57 = vld [vmem:[#allocation209_spill] sm:$0xff] }
 0x62e   : > { %v4055_v42 = vsel %vm2378_vm11, %v4043_v19, %v11199_v6  ;;  %v11573_v32 = vpop.permute.xlu1 %4168  ;;  %v4118_v6 = vsel %vm2443_vm12, %v11522_v60, %v11201_v9  ;;  %v11591_v2 = vmul.f32 %v4058_v37, %v17044_v55  ;;  %v11594_v11 = vmul.f32 %v4059_v16, %v17044_v55 }
 0x62f   : > { %v4082_v18 = vmul.f32 %v4055_v42, %v17043_v56  ;;  %4637 = vmatpush1.bf16.msra.mxu1 %v4572_v39  ;;  %v4597_v5 = vpack.c.bf16 %v4525_v46, %v4517_v17  ;;  %v4180_v9 = vsel %vm2508_vm13, %v11229_v48, %v11342_v58  ;;  %v17045_v42 = vld [vmem:[#allocation140_spill] sm:$0xff]  ;;  %v4547_v16 = vpack.c.bf16 %v4147_v28, %v4139_v27  ;;  %v17046_v46 = vld [vmem:[#allocation158_spill] sm:$0xff]  ;;  %v17048_v27 = vld [vmem:[#allocation139_spill] sm:$0xff] }
 0x630   : > { %5224 = vrot.lane.b32.xlu0 %v11309_v26, %s16560_s4  ;;  %4638 = vmatprep.subr.bf16.mxu1 %v4581_v23  ;;  %v4211_v33 = vmul.f32 %v4181_v15, %v17045_v42  ;;  %v4138_v17 = vmul.f32 %v4118_v6, %v17046_v46  ;;  %v4057_v58 = vsel %vm2378_vm11, %v11213_v0, %v4043_v19 }
 0x631   : > { %v4538_v39 = vpack.c.bf16 %v4082_v18, %v4074_v29  ;;  %5476 = vrot.lane.b32.xlu1 %v11216_v10, %s16579_s24  ;;  %v4107_v22 = vpop.permute.xlu0 %4106  ;;  %v4245_v29 = vsel %vm2198_vm2, %v11263_v34, %v11413_v3  ;;  %v17047_v18 = vld [vmem:[#allocation27_spill] sm:$0xff]  ;;  %v4244_v28 = vsel %vm2198_vm2, %v11249_v4, %v11368_v12  ;;  %v4182_v3 = vsel %vm2508_vm13, %v11573_v32, %v11229_v48 }
 0x632   : > { %v4119_v23 = vsel %vm2443_vm12, %v4107_v22, %v11227_v59  ;;  %v11606_v37 = vpop.permute.xlu1 %4232  ;;  %v4123_v59 = vsel %vm2443_vm12, %v17047_v18, %v11236_v38  ;;  %v4203_v0 = vmul.f32 %v4180_v9, %v17045_v42  ;;  %v4275_v6 = vmul.f32 %v4245_v29, %v17048_v27 }
 0x633   : > { %v4146_v15 = vmul.f32 %v4119_v23, %v17046_v46  ;;  %4639 = vmatpush1.bf16.msra.mxu1 %v4580_v25  ;;  %4756 = vmatpush1.bf16.msra.mxu0 %v4538_v39  ;;  %v4056_v25 = vsel %vm2378_vm11, %v11193_v14, %v11477_v31  ;;  %v17049_v23 = vld [vmem:[#allocation206_spill] sm:$0xff]  ;;  %v4121_v48 = vsel %vm2443_vm12, %v11236_v38, %v4107_v22 }
 0x634   : > { %4924 = vrot.lane.b32.xlu0 %v11042_v7, %s16552_s5  ;;  %4640 = vmatprep.subr.bf16.mxu1 %v4589_v63  ;;  %v4081_v18 = vmul.f32 %v4057_v58, %v17049_v23  ;;  %v4267_v31 = vmul.f32 %v4244_v28, %v17048_v27  ;;  %v17050_v63 = vld [vmem:[#allocation167_spill] sm:$0xff]  ;;  %v4555_v29 = vpack.c.bf16 %v4211_v33, %v4203_v0 }
 0x635   : > { %v4546_v19 = vpack.c.bf16 %v4146_v15, %v4138_v17  ;;  %4757 = vmatprep.subr.bf16.mxu0 %v4547_v16  ;;  %v4171_v12 = vpop.permute.xlu0 %4170  ;;  %4828 = vrot.lane.b32.xlu1 %v11042_v7, %s16551_s21  ;;  %v4202_v9 = vmul.f32 %v4182_v3, %v17050_v63  ;;  %v4073_v38 = vmul.f32 %v4056_v25, %v17049_v23  ;;  %v17053_v15 = vld [vmem:[#allocation205_spill] sm:$0xff]  ;;  %v17054_v3 = vld [vmem:[#allocation142_spill] sm:$0xff] }
 0x636   : > { %v4183_v39 = vsel %vm2508_vm13, %v4171_v12, %v11247_v21  ;;  %v4305_v14 = vpop.permute.xlu1 %4304  ;;  %v4120_v22 = vsel %vm2443_vm12, %v11218_v24, %v11522_v60  ;;  %v4246_v21 = vsel %vm2198_vm2, %v11606_v37, %v11249_v4  ;;  %v4536_v17 = vpack.c.bf16 %v11594_v11, %v11591_v2 }
 0x637   : > { %v4210_v16 = vmul.f32 %v4183_v39, %v17050_v63  ;;  %4641 = vmatpush1.bf16.msra.mxu1 %v4588_v35  ;;  %4758 = vmatpush1.bf16.msra.mxu0 %v4546_v19  ;;  %v17051_v35 = vld [vmem:[#allocation26_spill] sm:$0xff]  ;;  %v4145_v33 = vmul.f32 %v4121_v48, %v17052_v30  ;;  %v4144_v28 = vmul.f32 %v4123_v59, %v17053_v15 }
 0x638   : > { %4642 = vmatprep.subr.bf16.mxu1 %v4597_v5  ;;  %v4122_v43 = vsel %vm2443_vm12, %v17051_v35, %v11218_v24  ;;  %4759 = vmatprep.subr.bf16.mxu0 %v4555_v29  ;;  %v4537_v11 = vpack.c.bf16 %v4081_v18, %v4073_v38  ;;  %v4563_v5 = vpack.c.bf16 %v4275_v6, %v4267_v31  ;;  %v17056_v48 = vld [vmem:[#allocation30_spill] sm:$0xff]  ;;  %v17059_v38 = vld [vmem:[#allocation239_spill] sm:$0xff] }
 0x639   : > { %v4554_v58 = vpack.c.bf16 %v4210_v16, %v4202_v9  ;;  %v4235_v60 = vpop.permute.xlu0 %4234  ;;  %5230 = vrot.lane.b32.xlu1 %v11239_v1, %s16560_s4  ;;  %v4137_v24 = vmul.f32 %v4120_v22, %v17052_v30  ;;  %v4266_v0 = vmul.f32 %v4246_v21, %v17054_v3  ;;  %v4185_v25 = vsel %vm2508_vm13, %v11255_v44, %v4171_v12  ;;  %v17057_v12 = vld [vmem:[#allocation229_spill] sm:$0xff]  ;;  %v17060_v22 = vld [vmem:[#allocation47_spill] sm:$0xff] }
 0x63a   : > { %v4247_v4 = vsel %vm2198_vm2, %v4235_v60, %v11263_v34  ;;  %v11674_v2 = vpop.permute.xlu1 %4296  ;;  %v17055_v19 = vpack.c.bf16 %v11541_v50, %v11549_v53  ;;  %v4136_v34 = vmul.f32 %v4122_v43, %v17053_v15  ;;  %v4186_v6 = vsel %vm2508_vm13, %v17056_v48, %v11241_v47  ;;  %v17058_v16 = vld [vmem:[#allocation213_spill] sm:$0xff]  ;;  %v17061_v21 = vld [vmem:[#allocation183_spill] sm:$0xff]  ;;  %v17062_v43 = vld [vmem:[#allocation244_spill] sm:$0xff] }
 0x63b   : > { %v4274_v59 = vmul.f32 %v4247_v4, %v17054_v3  ;;  %v4322_v18 = vsel %vm2215_vm5, %v4305_v14, %v17017_v52  ;;  %4760 = vmatpush1.bf16.msra.mxu0 %v4554_v58  ;;  %v4187_v39 = vsel %vm2508_vm13, %v17057_v12, %v11255_v44  ;;  %v4184_v50 = vsel %vm2508_vm13, %v11241_v47, %v11573_v32 }
 0x63c   : > { %4643 = vmatpush1.bf16.msra.mxu1 %v17055_v19  ;;  %4761 = vmatprep.subr.bf16.mxu0 %v4563_v5  ;;  %v4545_v9 = vpack.c.bf16 %v4145_v33, %v4137_v24  ;;  %v4209_v29 = vmul.f32 %v4185_v25, %v17058_v16  ;;  %v4249_v52 = vsel %vm2198_vm2, %v17059_v38, %v4235_v60  ;;  %v17063_v60 = vld [vmem:[#allocation210_spill] sm:$0xff]  ;;  %v17068_v19 = vld [vmem:[#allocation203_spill] sm:$0xff] }
 0x63d   : > { %4712 = vmatprep.subr.bf16.mxu1 %v4537_v11  ;;  %v4562_v53 = vpack.c.bf16 %v4274_v59, %v4266_v0  ;;  %v4307_v31 = vpop.permute.xlu0 %4306  ;;  %5326 = vrot.lane.b32.xlu1 %v11239_v1, %s16600_s28  ;;  %v4544_v32 = vpack.c.bf16 %v4144_v28, %v4136_v34  ;;  %v4331_v35 = vmul.f32 %v4322_v18, %v17061_v21  ;;  %v17064_v5 = vld [vmem:[#allocation50_spill] sm:$0xff]  ;;  %v17065_v28 = vld [vmem:[#allocation240_spill] sm:$0xff]  ;;  %v17066_v0 = vld [vmem:[#allocation215_spill] sm:$0xff] }
 0x63e   : > { %v4323_v44 = vsel %vm2215_vm5, %v4307_v31, %v17016_v41  ;;  %v4369_v47 = vpop.permute.xlu1 %4368  ;;  %v4309_v33 = vsel %vm2215_vm5, %v17062_v43, %v4307_v31  ;;  %v4208_v4 = vmul.f32 %v4187_v39, %v17063_v60  ;;  %v4201_v11 = vmul.f32 %v4184_v50, %v17058_v16  ;;  %v17067_v59 = vld [vmem:[#allocation8_spill] sm:$0xff]  ;;  %v17072_v50 = vld [vmem:[#allocation170_spill] sm:$0xff] }
 0x63f   : > { %4659 = vmatmul.mubr.bf16.vlgmr.msra.gmra.mrb[48].mxu1 %v17060_v22  ;;  %v4339_v58 = vmul.f32 %v4323_v44, %v17061_v21  ;;  %v4248_v41 = vsel %vm2198_vm2, %v17064_v5, %v11606_v37  ;;  %4762 = vmatpush1.bf16.msra.mxu0 %v4562_v53  ;;  %v4308_v24 = vsel %vm2215_vm5, %v17065_v28, %v4305_v14  ;;  %v7502_v18 = vld [vmem:[%s15560_s14 + $0x4] ss:$8 sps:$4 sm:$0xff]   ;;  %v17071_v14 = vld [vmem:[#allocation31_spill] sm:$0xff] }
 0x640   : > { %4713 = vmatpush1.bf16.msra.mxu1 %v4536_v17  ;;  %v4273_v25 = vmul.f32 %v4249_v52, %v17066_v0  ;;  %v17069_v17 = vpack.c.bf16 %v17067_v59, %v17068_v19  ;;  %7411 = vmatprep.mubr.msk.bf16.mxu1 %vm3795_vm10, %v7502_v18  ;;  %v17070_v37 = vld [vmem:[#allocation228_spill] sm:$0xff]  ;;  %v4251_v39 = vsel %vm2198_vm2, %v17071_v14, %v17059_v38  ;;  %v17075_v59 = vld [vmem:[#allocation6_spill] sm:$0xff] }
 0x641   : > { %4714 = vmatprep.subr.bf16.mxu1 %v4545_v9  ;;  %v4299_v34 = vpop.permute.xlu0 %4298  ;;  %v4579_v48 = vpack.c.bf16 %v4339_v58, %v4331_v35  ;;  %v4250_v12 = vsel %vm2198_vm2, %v17070_v37, %v17064_v5  ;;  %v4338_v53 = vmul.f32 %v4309_v33, %v17072_v50  ;;  %5320 = vrot.lane.b32.xlu1 %v11309_v26, %s16600_s28  ;;  %v17073_v58 = vld [vmem:[#allocation51_spill] sm:$0xff]  ;;  %v17074_v33 = vld [vmem:[#allocation165_spill] sm:$0xff] }
 0x642   : > { %4763 = vmatprep.subr.bf16.mxu0 %v17069_v17  ;;  %v4361_v31 = vpop.permute.xlu1 %4360  ;;  %v4553_v9 = vpack.c.bf16 %v4209_v29, %v4201_v11  ;;  %v4200_v52 = vmul.f32 %v4186_v6, %v17063_v60  ;;  %v4265_v44 = vmul.f32 %v4248_v41, %v17066_v0  ;;  %v4330_v35 = vmul.f32 %v4308_v24, %v17072_v50  ;;  %v17077_v6 = vld [vmem:[#allocation211_spill] sm:$0xff] }
 0x643   : > { %v4372_v5 = vsel %vm2701_vm14, %v17073_v58, %v4369_v47  ;;  %v4386_v38 = vsel %vm2701_vm14, %v4369_v47, %v17024_v61  ;;  %v17076_v19 = vpack.c.bf16 %v17074_v33, %v17075_v59  ;;  %v4264_v11 = vmul.f32 %v4250_v12, %v17077_v6  ;;  %v17078_v61 = vld [vmem:[#allocation54_spill] sm:$0xff] }
 0x644   : > { %4715 = vmatpush1.bf16.msra.mxu1 %v4544_v32  ;;  %v4552_v29 = vpack.c.bf16 %v4208_v4, %v4200_v52  ;;  %v4272_v32 = vmul.f32 %v4251_v39, %v17077_v6  ;;  %v4561_v24 = vpack.c.bf16 %v4273_v25, %v4265_v44  ;;  %v4578_v17 = vpack.c.bf16 %v4338_v53, %v4330_v35  ;;  %v17080_v25 = vld [vmem:[#allocation145_spill] sm:$0xff]  ;;  %v17081_v52 = vld [vmem:[#allocation219_spill] sm:$0xff]  ;;  %v17083_v59 = vld [vmem:[#allocation38_spill] sm:$0xff] }
 0x645   : > { %4764 = vmatpush1.bf16.msra.mxu0 %v17076_v19  ;;  %4716 = vmatprep.subr.bf16.mxu1 %v4553_v9  ;;  %v4371_v41 = vpop.permute.xlu0 %4370  ;;  %v4311_v18 = vsel %vm2215_vm5, %v4299_v34, %v17062_v43  ;;  %v4395_v14 = vmul.f32 %v4386_v38, %v17080_v25  ;;  %v4310_v53 = vsel %vm2215_vm5, %v11674_v2, %v17065_v28  ;;  %v17082_v38 = vld [vmem:[#allocation233_spill] sm:$0xff] }
 0x646   : > { %4765 = vmatprep.subr.bf16.mxu0 %v4579_v48  ;;  %5020 = vrot.lane.b32.xlu1 %v11042_v7, %s16660_s0  ;;  %v4373_v47 = vsel %vm2701_vm14, %v17078_v61, %v4371_v41  ;;  %v4387_v4 = vsel %vm2701_vm14, %v4371_v41, %v17019_v40  ;;  %v4433_v37 = vpop.permute.xlu1 %4432  ;;  %v17079_v48 = vld [vmem:[#allocation194_spill] sm:$0xff]  ;;  %v4560_v9 = vpack.c.bf16 %v4272_v32, %v4264_v11  ;;  %v17084_v32 = vld [vmem:[#allocation243_spill] sm:$0xff] }
 0x647   : > { %v4394_v12 = vmul.f32 %v4372_v5, %v17079_v48  ;;  %v4402_v39 = vmul.f32 %v4373_v47, %v17079_v48  ;;  %v4403_v43 = vmul.f32 %v4387_v4, %v17080_v25  ;;  %v4337_v40 = vmul.f32 %v4311_v18, %v17081_v52  ;;  %v17088_v18 = vld [vmem:[#allocation218_spill] sm:$0xff] }
 0x648   : > { %4717 = vmatpush1.bf16.msra.mxu1 %v4552_v29  ;;  %v4312_v33 = vsel %vm2215_vm5, %v17082_v38, %v11674_v2  ;;  %v4313_v19 = vsel %vm2215_vm5, %v17083_v59, %v4299_v34  ;;  %v4329_v28 = vmul.f32 %v4310_v53, %v17081_v52  ;;  %v4436_v41 = vsel %vm2766_vm15, %v17084_v32, %v4433_v37  ;;  %v17091_v53 = vld [vmem:[#allocation235_spill] sm:$0xff]  ;;  %v17092_v38 = vld [vmem:[#allocation4_spill] sm:$0xff] }
 0x649   : > { %4766 = vmatpush1.bf16.msra.mxu0 %v4578_v17  ;;  %4718 = vmatprep.subr.bf16.mxu1 %v4561_v24  ;;  %v4586_v44 = vpack.c.bf16 %v4402_v39, %v4394_v12  ;;  %v4363_v35 = vpop.permute.xlu0 %4362  ;;  %v4587_v5 = vpack.c.bf16 %v4403_v43, %v4395_v14  ;;  %v4450_v2 = vsel %vm2766_vm15, %v4433_v37, %v17027_v45  ;;  %v17085_v24 = vld [vmem:[#allocation168_spill] sm:$0xff]  ;;  %v17086_v17 = vld [vmem:[#allocation7_spill] sm:$0xff]  ;;  %v17089_v39 = vld [vmem:[#allocation42_spill] sm:$0xff] }
 0x64a   : > { %v4425_v29 = vpop.permute.xlu1 %4424  ;;  %v4375_v11 = vsel %vm2701_vm14, %v4363_v35, %v17078_v61  ;;  %v17087_v34 = vpack.c.bf16 %v17085_v24, %v17086_v17  ;;  %v4328_v47 = vmul.f32 %v4312_v33, %v17088_v18  ;;  %v4336_v4 = vmul.f32 %v4313_v19, %v17088_v18  ;;  %v17090_v37 = vld [vmem:[#allocation221_spill] sm:$0xff]  ;;  %v17097_v24 = vld [vmem:[#allocation35_spill] sm:$0xff] }
 0x64b   : > { %4767 = vmatprep.subr.bf16.mxu0 %v4587_v5  ;;  %v4374_v61 = vsel %vm2701_vm14, %v4361_v31, %v17073_v58  ;;  %v4577_v14 = vpack.c.bf16 %v4337_v40, %v4329_v28  ;;  %v4377_v45 = vsel %vm2701_vm14, %v17089_v39, %v4363_v35  ;;  %v4401_v43 = vmul.f32 %v4375_v11, %v17090_v37  ;;  %v17093_v58 = vld [vmem:[#allocation180_spill] sm:$0xff]  ;;  %v17095_v28 = vld [vmem:[#allocation155_spill] sm:$0xff] }
 0x64c   : > { %4719 = vmatpush1.bf16.msra.mxu1 %v4560_v9  ;;  %v4458_v33 = vmul.f32 %v4436_v41, %v17092_v38  ;;  %v17094_v35 = vld [vmem:[#allocation216_spill] sm:$0xff]  ;;  %v4376_v17 = vsel %vm2701_vm14, %v17097_v24, %v4361_v31  ;;  %v4576_v41 = vpack.c.bf16 %v4336_v4, %v4328_v47  ;;  %v17100_v24 = vld [vmem:[#allocation39_spill] sm:$0xff] }
 0x64d   : > { %4720 = vmatprep.subr.bf16.mxu1 %v17087_v34  ;;  %4768 = vmatpush1.bf16.msra.mxu0 %v4586_v44  ;;  %v4435_v12 = vpop.permute.xlu0 %4434  ;;  %v4459_v44 = vmul.f32 %v4450_v2, %v17093_v58  ;;  %v17096_v11 = vpack.c.bf16 %v17094_v35, %v17095_v28  ;;  %v4393_v34 = vmul.f32 %v4374_v61, %v17090_v37  ;;  %v17098_v2 = vld [vmem:[#allocation220_spill] sm:$0xff]  ;;  %v17099_v28 = vld [vmem:[#allocation238_spill] sm:$0xff]  ;;  %v17101_v47 = vld [vmem:[#allocation223_spill] sm:$0xff] }
 0x64e   : > { %v4437_v9 = vsel %vm2766_vm15, %v17091_v53, %v4435_v12  ;;  %v4451_v5 = vsel %vm2766_vm15, %v4435_v12, %v17022_v36  ;;  %v4497_v19 = vpop.permute.xlu1 %4496  ;;  %v4438_v36 = vsel %vm2766_vm15, %v4425_v29, %v17084_v32  ;;  %v4400_v12 = vmul.f32 %v4377_v45, %v17098_v2  ;;  %v17102_v45 = vld [vmem:[#allocation230_spill] sm:$0xff] }
 0x64f   : > { %v4466_v40 = vmul.f32 %v4437_v9, %v17092_v38  ;;  %v4467_v59 = vmul.f32 %v4451_v5, %v17093_v58  ;;  %v4585_v61 = vpack.c.bf16 %v4401_v43, %v4393_v34  ;;  %v4440_v32 = vsel %vm2766_vm15, %v17100_v24, %v4425_v29 }
 0x650   : > { %4721 = vmatpush1.bf16.msra.mxu1 %v17096_v11  ;;  %v4392_v11 = vmul.f32 %v4376_v17, %v17098_v2  ;;  %v4457_v4 = vmul.f32 %v4438_v36, %v17101_v47  ;;  %v17104_v36 = vld [vmem:[#allocation58_spill] sm:$0xff] }
 0x651   : > { %4722 = vmatprep.subr.bf16.mxu1 %v4577_v14  ;;  %v4594_v39 = vpack.c.bf16 %v4466_v40, %v4458_v33  ;;  %v4427_v9 = vpop.permute.xlu0 %4426  ;;  %v4595_v5 = vpack.c.bf16 %v4467_v59, %v4459_v44  ;;  %v4514_v33 = vsel %vm2831_vm0, %v4497_v19, %v17036_v8  ;;  %v17103_v44 = vld [vmem:[#allocation222_spill] sm:$0xff]  ;;  %v7503_v8 = vld [vmem:[%s16574_s3 + $0x70] ss:$0 sm:$0xff] }
 0x652   : > { %v4439_v35 = vsel %vm2766_vm15, %v4427_v9, %v17091_v53  ;;  %v4441_v31 = vsel %vm2766_vm15, %v17099_v28, %v4427_v9  ;;  %v4500_v53 = vsel %vm2831_vm0, %v17102_v45, %v4497_v19  ;;  %v4584_v43 = vpack.c.bf16 %v4400_v12, %v4392_v11  ;;  %v4489_v59 = vpop.permute.xlu1 %4488  ;;  %v7504_v12 = vld [vmem:[%s16574_s3 + $0x78] ss:$0 sm:$0xff] }
 0x653   : > { %v4465_v14 = vmul.f32 %v4439_v35, %v17101_v47  ;;  %4769 = vmatprep.subr.bf16.mxu0 %v4595_v5  ;;  %v4464_v40 = vmul.f32 %v4441_v31, %v17103_v44  ;;  %v4456_v34 = vmul.f32 %v4440_v32, %v17103_v44  ;;  %v4522_v19 = vmul.f32 %v7503_v8, %v4500_v53  ;;  %v17105_v31 = vld [vmem:[#allocation43_spill] sm:$0xff] }
 0x654   : > { %4723 = vmatpush1.bf16.msra.mxu1 %v4576_v41  ;;  %4770 = vmatpush1.bf16.msra.mxu0 %v4594_v39  ;;  %v4523_v39 = vmul.f32 %v7504_v12, %v4514_v33  ;;  %v4502_v28 = vsel %vm2831_vm0, %v4489_v59, %v17102_v45  ;;  %v7505_v45 = vld [vmem:[%s16574_s3 + $0x60] ss:$0 sm:$0xff] }
 0x655   : > { %4724 = vmatprep.subr.bf16.mxu1 %v4585_v61  ;;  %v4499_v29 = vpop.permute.xlu0 %4498  ;;  %v4593_v17 = vpack.c.bf16 %v4465_v14, %v4457_v4  ;;  %v4592_v61 = vpack.c.bf16 %v4464_v40, %v4456_v34  ;;  %v17106_v14 = vld [vmem:[#allocation46_spill] sm:$0xff] }
 0x656   : > { %v4501_v41 = vsel %vm2831_vm0, %v17104_v36, %v4499_v29  ;;  %v4515_v9 = vsel %vm2831_vm0, %v4499_v29, %v17034_v51  ;;  %v4504_v51 = vsel %vm2831_vm0, %v17105_v31, %v4489_v59 }
 0x657   : > { %v4530_v5 = vmul.f32 %v7503_v8, %v4501_v41  ;;  %v4531_v35 = vmul.f32 %v7504_v12, %v4515_v9  ;;  %v4520_v33 = vmul.f32 %v7505_v45, %v4504_v51 }
 0x658   : > { %4725 = vmatpush1.bf16.msra.mxu1 %v4584_v43  ;;  %v7506_v43 = vld [vmem:[%s16574_s3 + $0x68] ss:$0 sm:$0xff] }
 0x659   : > { %4726 = vmatprep.subr.bf16.mxu1 %v4593_v17  ;;  %v4602_v11 = vpack.c.bf16 %v4530_v5, %v4522_v19  ;;  %v4491_v24 = vpop.permute.xlu0 %4490  ;;  %v4603_v32 = vpack.c.bf16 %v4531_v35, %v4523_v39  ;;  %v4521_v40 = vmul.f32 %v7506_v43, %v4502_v28  ;;  %v17107_v5 = vld [vmem:[#allocation10_spill] sm:$0xff] }
 0x65a   : > { %v4503_v4 = vsel %vm2831_vm0, %v4491_v24, %v17104_v36  ;;  %v4505_v53 = vsel %vm2831_vm0, %v17106_v14, %v4491_v24  ;;  %v11880_v36 = vpop.permute.xlu1 %5002 }
 0x65b   : > { %v4528_v59 = vmul.f32 %v7505_v45, %v4505_v53  ;;  %v4529_v29 = vmul.f32 %v7506_v43, %v4503_v4  ;;  %4771 = vmatprep.subr.bf16.mxu0 %v4603_v32 }
 0x65c   : > { %4727 = vmatpush1.bf16.msra.mxu1 %v4592_v61  ;;  %4772 = vmatpush1.bf16.msra.mxu0 %v4602_v11 }
 0x65d   : > { %v4600_v17 = vpack.c.bf16 %v4528_v59, %v4520_v33  ;;  %v4601_v34 = vpack.c.bf16 %v4529_v29, %v4521_v40  ;;  %v17115_v40 = vld [vmem:[#allocation186_spill] sm:$0xff] }
 0x65e   : > { %v11882_v41 = vpop.permute.xlu1 %5104 }
 0x65f   : > { %4728 = vmatprep.subr.bf16.mxu1 %v4601_v34  ;;  %4788 = vmatmul.mubr.bf16.vlgmr.msra.gmra.mrb[48].mxu0 %v17060_v22 }
 0x660   : > { %4729 = vmatpush1.bf16.msra.mxu1 %v4600_v17 }
 0x662   : > { %v11884_v9 = vpop.permute.xlu1 %4804 }
 0x663   : > { %4745 = vmatmul.mubr.bf16.vlgmr.msra.gmra.mrb[52].mxu1 %v17060_v22  ;;  %v11899_v22 = vpop.permute.xlu0 %5302 }
 0x666   : > { %v11886_v8 = vpop.permute.xlu1 %5206 }
 0x667   : > { %v11907_v11 = vpop.permute.xlu0 %5308 }
 0x668   : > { %17108 = vst [vmem:[#allocation161_spill] sm:$0xff] %v11907_v11 }
 0x66a   : > { %v11888_v19 = vpop.permute.xlu1 %4846 }
 0x66b   : > { %v11919_v32 = vpop.permute.xlu0 %5296 }
 0x66e   : > { %v11890_v12 = vpop.permute.xlu1 %5200 }
 0x66f   : > { %v11930_v53 = vpop.permute.xlu0 %4996 }
 0x670   : > { %17111 = vst [vmem:[#allocation63_spill] sm:$0xff] %v11930_v53 }
 0x672   : > { %v11901_v61 = vpop.permute.xlu1 %4900 }
 0x673   : > { %v11942_v33 = vpop.permute.xlu0 %5398 }
 0x674   : > { %17113 = vst [vmem:[#allocation160_spill] sm:$0xff] %v11942_v33 }
 0x676   : > { %v11909_v24 = vpop.permute.xlu1 %4942 }
 0x677   : > { %17109 = vst [vmem:[#allocation62_spill] sm:$0xff] %v11909_v24  ;;  %v11953_v29 = vpop.permute.xlu0 %5038 }
 0x678   : > { %17116 = vst [vmem:[#allocation149_spill] sm:$0xff] %v11953_v29 }
 0x67a   : > { %v11921_v4 = vpop.permute.xlu1 %5404 }
 0x67b   : > { %17110 = vst [vmem:[#allocation227_spill] sm:$0xff] %v11921_v4  ;;  %v11965_v34 = vpop.permute.xlu0 %5494  ;;  %v17194_v4 = vld [vmem:[#allocation179_spill] sm:$0xff] }
 0x67c   : > { %17118 = vst [vmem:[#allocation171_spill] sm:$0xff] %v11965_v34  ;;  %v17192_v34 = vld [vmem:[#allocation198_spill] sm:$0xff] }
 0x67e   : > { %v11932_v45 = vpop.permute.xlu1 %5392 }
 0x67f   : > { %17112 = vst [vmem:[#allocation234_spill] sm:$0xff] %v11932_v45 }
 0x682   : > { %v11944_v43 = vpop.permute.xlu1 %5092 }
 0x683   : > { %17114 = vst [vmem:[#allocation152_spill] sm:$0xff] %v11944_v43 }
 0x686   : > { %v11955_v17 = vpop.permute.xlu1 %5134 }
 0x687   : > { %17117 = vst [vmem:[#allocation169_spill] sm:$0xff] %v11955_v17 }
 0x6bd   : > { %v4703_v39 = vpop.f32.mrb[44].mxu0 }
 0x6be   : > { %v11893_v35 = vadd.f32 %v4703_v39, %v17107_v5  ;;  %v4705_v28 = vpop.f32.mrb[45].mxu0  ;;  %v11967_v39 = vpop.permute.xlu1 %4840 }
 0x6bf   : > { %v4707_v31 = vpop.f32.mrb[46].mxu0  ;;  %v11924_v14 = vadd.f32 %v4705_v28, %v17107_v5  ;;  %17119 = vst [vmem:[#allocation224_spill] sm:$0xff] %v11967_v39  ;;  %v11973_v28 = vpop.permute.xlu0 %5500 }
 0x6c0   : > { %v4709_v51 = vpop.f32.mrb[47].mxu0  ;;  %4914 = vrot.lane.b32.xlu1 %v11893_v35, %s16552_s5  ;;  %4818 = vrot.lane.b32.xlu0 %v11893_v35, %s16551_s21  ;;  %v11951_v59 = vadd.f32 %v4707_v31, %v17115_v40  ;;  %17120 = vst [vmem:[#allocation225_spill] sm:$0xff] %v11973_v28  ;;  %v17193_v28 = vld [vmem:[#allocation207_spill] sm:$0xff] }
 0x6c1   : > { %v11982_v47 = vadd.f32 %v4709_v51, %v17115_v40 }
 0x6c2   : > { %v11975_v31 = vpop.permute.xlu1 %5194 }
 0x6c3   : > { %17121 = vst [vmem:[#allocation164_spill] sm:$0xff] %v11975_v31  ;;  %v11988_v44 = vpop.permute.xlu0 %5488 }
 0x6c4   : > { %5106 = vrot.lane.b32.xlu1 %v11893_v35, %s16655_s2  ;;  %5010 = vrot.lane.b32.xlu0 %v11893_v35, %s16660_s0  ;;  %17122 = vst [vmem:[#allocation163_spill] sm:$0xff] %v11988_v44 }
 0x6c6   : > { %v11990_v2 = vpop.permute.xlu1 %5290 }
 0x6c7   : > { %17123 = vst [vmem:[#allocation9_spill] sm:$0xff] %v11990_v2  ;;  %v11996_v37 = vpop.permute.xlu0 %4834 }
 0x6c8   : > { %5298 = vrot.lane.b32.xlu1 %v11893_v35, %s16600_s28  ;;  %5202 = vrot.lane.b32.xlu0 %v11893_v35, %s16560_s4  ;;  %17124 = vst [vmem:[#allocation12_spill] sm:$0xff] %v11996_v37 }
 0x6ca   : > { %v11998_v51 = vpop.permute.xlu1 %5284 }
 0x6cb   : > { %17125 = vst [vmem:[#allocation13_spill] sm:$0xff] %v11998_v51  ;;  %v12006_v38 = vpop.permute.xlu0 %5188 }
 0x6cc   : > { %5490 = vrot.lane.b32.xlu1 %v11893_v35, %s16579_s24  ;;  %5394 = vrot.lane.b32.xlu0 %v11893_v35, %s16563_s27  ;;  %17126 = vst [vmem:[#allocation16_spill] sm:$0xff] %v12006_v38 }
 0x6ce   : > { %v12008_v58 = vpop.permute.xlu1 %5032 }
 0x6cf   : > { %17127 = vst [vmem:[#allocation17_spill] sm:$0xff] %v12008_v58  ;;  %v12012_v48 = vpop.permute.xlu0 %4936 }
 0x6d0   : > { %4920 = vrot.lane.b32.xlu1 %v11924_v14, %s16552_s5  ;;  %4824 = vrot.lane.b32.xlu0 %v11924_v14, %s16551_s21  ;;  %17128 = vst [vmem:[#allocation20_spill] sm:$0xff] %v12012_v48 }
 0x6d2   : > { %v12014_v25 = vpop.permute.xlu1 %5026 }
 0x6d3   : > { %17129 = vst [vmem:[#allocation21_spill] sm:$0xff] %v12014_v25  ;;  %v12016_v18 = vpop.permute.xlu0 %4930 }
 0x6d4   : > { %5112 = vrot.lane.b32.xlu1 %v11924_v14, %s16655_s2  ;;  %5016 = vrot.lane.b32.xlu0 %v11924_v14, %s16660_s0  ;;  %17130 = vst [vmem:[#allocation24_spill] sm:$0xff] %v12016_v18 }
 0x6d6   : > { %v12018_v50 = vpop.permute.xlu1 %5482 }
 0x6d7   : > { %17131 = vst [vmem:[#allocation25_spill] sm:$0xff] %v12018_v50  ;;  %v12020_v52 = vpop.permute.xlu0 %5386 }
 0x6d8   : > { %5304 = vrot.lane.b32.xlu1 %v11924_v14, %s16600_s28  ;;  %5208 = vrot.lane.b32.xlu0 %v11924_v14, %s16560_s4  ;;  %17132 = vst [vmem:[#allocation28_spill] sm:$0xff] %v12020_v52 }
 0x6da   : > { %v12022_v21 = vpop.permute.xlu1 %5476 }
 0x6db   : > { %17133 = vst [vmem:[#allocation29_spill] sm:$0xff] %v12022_v21  ;;  %v12031_v55 = vpop.permute.xlu0 %5380 }
 0x6dc   : > { %5496 = vrot.lane.b32.xlu1 %v11924_v14, %s16579_s24  ;;  %5400 = vrot.lane.b32.xlu0 %v11924_v14, %s16563_s27  ;;  %17135 = vst [vmem:[#allocation33_spill] sm:$0xff] %v12031_v55 }
 0x6de   : > { %v12033_v30 = vpop.permute.xlu1 %4828 }
 0x6df   : > { %17136 = vst [vmem:[#allocation36_spill] sm:$0xff] %v12033_v30 }
 0x6e0   : > { %4820 = vrot.lane.b32.xlu1 %v11951_v59, %s16551_s21  ;;  %4916 = vrot.lane.b32.xlu0 %v11951_v59, %s16552_s5 }
 0x6e2   : > { %v12041_v15 = vpop.permute.xlu1 %5230 }
 0x6e3   : > { %17138 = vst [vmem:[#allocation40_spill] sm:$0xff] %v12041_v15 }
 0x6e4   : > { %5012 = vrot.lane.b32.xlu1 %v11951_v59, %s16660_s0  ;;  %5108 = vrot.lane.b32.xlu0 %v11951_v59, %s16655_s2 }
 0x6e6   : > { %v12056_v21 = vpop.permute.xlu1 %5326 }
 0x6e7   : > { %17141 = vst [vmem:[#allocation45_spill] sm:$0xff] %v12056_v21 }
 0x6e8   : > { %5204 = vrot.lane.b32.xlu1 %v11951_v59, %s16560_s4  ;;  %5300 = vrot.lane.b32.xlu0 %v11951_v59, %s16600_s28 }
 0x6ec   : > { %5396 = vrot.lane.b32.xlu1 %v11951_v59, %s16563_s27  ;;  %5492 = vrot.lane.b32.xlu0 %v11951_v59, %s16579_s24 }
 0x6f0   : > { %5210 = vrot.lane.b32.xlu1 %v11982_v47, %s16560_s4  ;;  %4826 = vrot.lane.b32.xlu0 %v11982_v47, %s16551_s21 }
 0x6f4   : > { %5402 = vrot.lane.b32.xlu1 %v11982_v47, %s16563_s27  ;;  %4922 = vrot.lane.b32.xlu0 %v11982_v47, %s16552_s5 }
 0x6f8   : > { %5498 = vrot.lane.b32.xlu1 %v11982_v47, %s16579_s24  ;;  %5018 = vrot.lane.b32.xlu0 %v11982_v47, %s16660_s0 }
 0x6fc   : > { %5114 = vrot.lane.b32.xlu0 %v11982_v47, %s16655_s2 }
 0x700   : > { %5306 = vrot.lane.b32.xlu0 %v11982_v47, %s16600_s28 }
 0x712   : > { %v4660_v6 = vpop.f32.mrb[48].mxu1 }
 0x713   : > { %v12025_v0 = vadd.f32 %v4660_v6, %v17107_v5  ;;  %v4662_v16 = vpop.f32.mrb[49].mxu1  ;;  %v12039_v6 = vpop.permute.xlu0 %5128 }
 0x714   : > { %v4664_v60 = vpop.f32.mrb[50].mxu1  ;;  %17137 = vst [vmem:[#allocation37_spill] sm:$0xff] %v12039_v6  ;;  %v12048_v3 = vadd.f32 %v4662_v16, %v17107_v5  ;;  %v12064_v16 = vpop.permute.xlu1 %5320 }
 0x715   : > { %17134 = vst [vmem:[#allocation32_spill] sm:$0xff] %v12025_v0  ;;  %v4666_v23 = vpop.f32.mrb[51].mxu1  ;;  %4998 = vrot.lane.b32.xlu1 %v12025_v0, %s16660_s0  ;;  %4806 = vrot.lane.b32.xlu0 %v12025_v0, %s16551_s21  ;;  %17143 = vst [vmem:[#allocation49_spill] sm:$0xff] %v12064_v16 }
 0x716   : > { %17139 = vst [vmem:[#allocation41_spill] sm:$0xff] %v12048_v3 }
 0x717   : > { %v12054_v30 = vpop.permute.xlu0 %5122 }
 0x718   : > { %17140 = vst [vmem:[#allocation44_spill] sm:$0xff] %v12054_v30  ;;  %v12076_v50 = vpop.permute.xlu1 %5020 }
 0x719   : > { %5190 = vrot.lane.b32.xlu1 %v12025_v0, %s16560_s4  ;;  %4902 = vrot.lane.b32.xlu0 %v12025_v0, %s16552_s5  ;;  %17145 = vst [vmem:[#allocation53_spill] sm:$0xff] %v12076_v50 }
 0x71b   : > { %v12062_v15 = vpop.permute.xlu0 %5224 }
 0x71c   : > { %17142 = vst [vmem:[#allocation48_spill] sm:$0xff] %v12062_v15  ;;  %v12079_v15 = vadd.f32 %v4664_v60, %v17115_v40 }
 0x71d   : > { %5382 = vrot.lane.b32.xlu1 %v12025_v0, %s16563_s27  ;;  %5094 = vrot.lane.b32.xlu0 %v12025_v0, %s16655_s2 }
 0x71e   : > { %17146 = vst [vmem:[#allocation56_spill] sm:$0xff] %v12079_v15 }
 0x71f   : > { %v12074_v21 = vpop.permute.xlu0 %4924 }
 0x720   : > { %17144 = vst [vmem:[#allocation52_spill] sm:$0xff] %v12074_v21 }
 0x721   : > { %4908 = vrot.lane.b32.xlu1 %v12048_v3, %s16552_s5  ;;  %5286 = vrot.lane.b32.xlu0 %v12025_v0, %s16600_s28 }
 0x725   : > { %5100 = vrot.lane.b32.xlu1 %v12048_v3, %s16655_s2  ;;  %5478 = vrot.lane.b32.xlu0 %v12025_v0, %s16579_s24  ;;  %v12118_v0 = vadd.f32 %v4666_v23, %v17115_v40 }
 0x727   : > { %17149 = vst [vmem:[#allocation61_spill] sm:$0xff] %v12118_v0 }
 0x729   : > { %5196 = vrot.lane.b32.xlu1 %v12048_v3, %s16560_s4  ;;  %4812 = vrot.lane.b32.xlu0 %v12048_v3, %s16551_s21 }
 0x72d   : > { %5388 = vrot.lane.b32.xlu1 %v12048_v3, %s16563_s27  ;;  %5004 = vrot.lane.b32.xlu0 %v12048_v3, %s16660_s0 }
 0x731   : > { %4904 = vrot.lane.b32.xlu1 %v12079_v15, %s16552_s5  ;;  %5292 = vrot.lane.b32.xlu0 %v12048_v3, %s16600_s28 }
 0x732   : > { %v12085_v16 = vpop.permute.xlu1 %4914  ;;  %v12087_v30 = vpop.permute.xlu0 %4818 }
 0x733   : > { %v4789_v63 = vpop.f32.mrb[48].mxu0 }
 0x734   : > { %v4791_v27 = vpop.f32.mrb[49].mxu0 }
 0x735   : > { %5096 = vrot.lane.b32.xlu1 %v12079_v15, %s16655_s2  ;;  %5484 = vrot.lane.b32.xlu0 %v12048_v3, %s16579_s24  ;;  %v4793_v60 = vpop.f32.mrb[50].mxu0  ;;  %v17152_v3 = vld [vmem:[#allocation14_spill] sm:$0xff] }
 0x736   : > { %v4795_v50 = vpop.f32.mrb[51].mxu0  ;;  %v12093_v21 = vpop.f32.mrb[52].mxu1  ;;  %v4864_v46 = vsel %vm2378_vm11, %v17153_v57, %v17152_v3 }
 0x737   : > { %v12095_v42 = vpop.permute.xlu1 %5106  ;;  %v12097_v25 = vpop.permute.xlu0 %5010 }
 0x738   : > { %v12099_v6 = vpop.f32.mrb[53].mxu1 }
 0x739   : > { %5288 = vrot.lane.b32.xlu1 %v12079_v15, %s16600_s28  ;;  %4808 = vrot.lane.b32.xlu0 %v12079_v15, %s16551_s21  ;;  %v12105_v58 = vpop.f32.mrb[54].mxu1 }
 0x73a   : > { %v12107_v54 = vpop.f32.mrb[55].mxu1 }
 0x73b   : > { %v12109_v55 = vpop.permute.xlu1 %5298  ;;  %v12111_v51 = vpop.permute.xlu0 %5202 }
 0x73c   : > { %17147 = vst [vmem:[#allocation57_spill] sm:$0xff] %v12109_v55  ;;  %17148 = vst [vmem:[#allocation60_spill] sm:$0xff] %v12111_v51 }
 0x73d   : > { %5480 = vrot.lane.b32.xlu1 %v12079_v15, %s16579_s24  ;;  %5000 = vrot.lane.b32.xlu0 %v12079_v15, %s16660_s0 }
 0x73f   : > { %v12120_v10 = vpop.permute.xlu0 %5394  ;;  %v12122_v52 = vpop.permute.xlu1 %5490 }
 0x740   : > { %17150 = vst [vmem:[#allocation64_spill] sm:$0xff] %v12120_v10  ;;  %17151 = vst [vmem:[#allocation65_spill] sm:$0xff] %v12122_v52  ;;  %v17155_v10 = vld [vmem:[#allocation135_spill] sm:$0xff] }
 0x741   : > { %4814 = vrot.lane.b32.xlu1 %v12118_v0, %s16551_s21  ;;  %5192 = vrot.lane.b32.xlu0 %v12079_v15, %s16560_s4  ;;  %v4879_v52 = vmul.f32 %v4864_v46, %v17155_v10 }
 0x743   : > { %v12132_v2 = vpop.permute.xlu0 %4824  ;;  %v12144_v51 = vpop.permute.xlu1 %4920 }
 0x744   : > { %17154 = vst [vmem:[#allocation68_spill] sm:$0xff] %v12132_v2  ;;  %v4865_v23 = vsel %vm2378_vm11, %v12087_v30, %v12132_v2  ;;  %17156 = vst [vmem:[#allocation69_spill] sm:$0xff] %v12144_v51  ;;  %v12153_v2 = vadd.f32 %v4789_v63, %v17107_v5 }
 0x745   : > { %5006 = vrot.lane.b32.xlu1 %v12118_v0, %s16660_s0  ;;  %5384 = vrot.lane.b32.xlu0 %v12079_v15, %s16563_s27  ;;  %v4887_v55 = vmul.f32 %v4865_v23, %v17155_v10 }
 0x746   : > { %17158 = vst [vmem:[#allocation73_spill] sm:$0xff] %v12153_v2 }
 0x747   : > { %v12146_v3 = vpop.permute.xlu0 %5016  ;;  %v5575_v18 = vpack.c.bf16 %v4887_v55, %v4879_v52  ;;  %v12157_v46 = vpop.permute.xlu1 %5112 }
 0x748   : > { %17157 = vst [vmem:[#allocation72_spill] sm:$0xff] %v12146_v3  ;;  %17160 = vst [vmem:[#allocation66_spill] sm:$0xff] %v12157_v46 }
 0x749   : > { %5294 = vrot.lane.b32.xlu1 %v12118_v0, %s16600_s28  ;;  %4910 = vrot.lane.b32.xlu0 %v12118_v0, %s16552_s5 }
 0x74a   : > { %5796 = vmatprep.subr.bf16.mxu0 %v5575_v18  ;;  %v12178_v18 = vadd.f32 %v4791_v27, %v17107_v5 }
 0x74b   : > { %v12155_v15 = vpop.permute.xlu0 %5208  ;;  %v12169_v63 = vpop.permute.xlu1 %5304 }
 0x74c   : > { %17159 = vst [vmem:[#allocation76_spill] sm:$0xff] %v12155_v15  ;;  %17162 = vst [vmem:[#allocation67_spill] sm:$0xff] %v12169_v63  ;;  %v12193_v63 = vadd.f32 %v4793_v60, %v17115_v40  ;;  %v12212_v60 = vadd.f32 %v4795_v50, %v17115_v40  ;;  %v12228_v50 = vadd.f32 %v12093_v21, %v17107_v5 }
 0x74d   : > { %4938 = vrot.lane.b32.xlu1 %v12153_v2, %s16552_s5  ;;  %5102 = vrot.lane.b32.xlu0 %v12118_v0, %s16655_s2  ;;  %17163 = vst [vmem:[#allocation80_spill] sm:$0xff] %v12178_v18 }
 0x74e   : > { %17165 = vst [vmem:[#allocation81_spill] sm:$0xff] %v12193_v63  ;;  %17168 = vst [vmem:[#allocation74_spill] sm:$0xff] %v12212_v60 }
 0x74f   : > { %v12163_v55 = vpop.permute.xlu0 %5400  ;;  %v12180_v23 = vpop.permute.xlu1 %5496  ;;  %17171 = vst [vmem:[#allocation88_spill] sm:$0xff] %v12228_v50 }
 0x750   : > { %17161 = vst [vmem:[#allocation77_spill] sm:$0xff] %v12163_v55  ;;  %17164 = vst [vmem:[#allocation70_spill] sm:$0xff] %v12180_v23 }
 0x751   : > { %5130 = vrot.lane.b32.xlu1 %v12153_v2, %s16655_s2  ;;  %5198 = vrot.lane.b32.xlu0 %v12118_v0, %s16560_s4 }
 0x753   : > { %v12171_v52 = vpop.permute.xlu0 %4916  ;;  %v12195_v27 = vpop.permute.xlu1 %4820 }
 0x755   : > { %5226 = vrot.lane.b32.xlu1 %v12153_v2, %s16560_s4  ;;  %5390 = vrot.lane.b32.xlu0 %v12118_v0, %s16563_s27 }
 0x757   : > { %v12182_v55 = vpop.permute.xlu0 %5108 }
 0x759   : > { %5040 = vrot.lane.b32.xlu1 %v12178_v18, %s16660_s0  ;;  %5486 = vrot.lane.b32.xlu0 %v12118_v0, %s16579_s24  ;;  %v12203_v0 = vpop.permute.xlu1 %5012 }
 0x75b   : > { %v12197_v23 = vpop.permute.xlu0 %5300 }
 0x75c   : > { %17166 = vst [vmem:[#allocation71_spill] sm:$0xff] %v12197_v23 }
 0x75d   : > { %5232 = vrot.lane.b32.xlu1 %v12178_v18, %s16560_s4  ;;  %4842 = vrot.lane.b32.xlu0 %v12153_v2, %s16551_s21  ;;  %v12218_v23 = vpop.permute.xlu1 %5204 }
 0x75e   : > { %17169 = vst [vmem:[#allocation85_spill] sm:$0xff] %v12218_v23 }
 0x75f   : > { %v12205_v15 = vpop.permute.xlu0 %5492 }
 0x760   : > { %17167 = vst [vmem:[#allocation84_spill] sm:$0xff] %v12205_v15 }
 0x761   : > { %4844 = vrot.lane.b32.xlu1 %v12193_v63, %s16551_s21  ;;  %5034 = vrot.lane.b32.xlu0 %v12153_v2, %s16660_s0  ;;  %v12230_v15 = vpop.permute.xlu1 %5396 }
 0x762   : > { %17172 = vst [vmem:[#allocation78_spill] sm:$0xff] %v12230_v15  ;;  %v12252_v15 = vadd.f32 %v12099_v6, %v17107_v5  ;;  %v12276_v6 = vadd.f32 %v12105_v58, %v17115_v40 }
 0x763   : > { %v12220_v38 = vpop.permute.xlu0 %4826 }
 0x764   : > { %17170 = vst [vmem:[#allocation75_spill] sm:$0xff] %v12220_v38  ;;  %17176 = vst [vmem:[#allocation82_spill] sm:$0xff] %v12252_v15 }
 0x765   : > { %5036 = vrot.lane.b32.xlu1 %v12193_v63, %s16660_s0  ;;  %5322 = vrot.lane.b32.xlu0 %v12153_v2, %s16600_s28  ;;  %v12242_v49 = vpop.permute.xlu1 %5210  ;;  %17181 = vst [vmem:[#allocation97_spill] sm:$0xff] %v12276_v6 }
 0x766   : > { %17174 = vst [vmem:[#allocation79_spill] sm:$0xff] %v12242_v49 }
 0x767   : > { %v12232_v31 = vpop.permute.xlu0 %4922 }
 0x768   : > { %17173 = vst [vmem:[#allocation89_spill] sm:$0xff] %v12232_v31 }
 0x769   : > { %4946 = vrot.lane.b32.xlu1 %v12212_v60, %s16552_s5  ;;  %4848 = vrot.lane.b32.xlu0 %v12178_v18, %s16551_s21  ;;  %v12254_v23 = vpop.permute.xlu1 %5402 }
 0x76a   : > { %17177 = vst [vmem:[#allocation93_spill] sm:$0xff] %v12254_v23 }
 0x76b   : > { %v12244_v21 = vpop.permute.xlu0 %5018 }
 0x76c   : > { %17175 = vst [vmem:[#allocation92_spill] sm:$0xff] %v12244_v21 }
 0x76d   : > { %5138 = vrot.lane.b32.xlu1 %v12212_v60, %s16655_s2  ;;  %4944 = vrot.lane.b32.xlu0 %v12178_v18, %s16552_s5  ;;  %v12266_v49 = vpop.permute.xlu1 %5498 }
 0x76e   : > { %17179 = vst [vmem:[#allocation96_spill] sm:$0xff] %v12266_v49 }
 0x76f   : > { %v12256_v56 = vpop.permute.xlu0 %5114 }
 0x770   : > { %17178 = vst [vmem:[#allocation83_spill] sm:$0xff] %v12256_v56 }
 0x771   : > { %5136 = vrot.lane.b32.xlu0 %v12178_v18, %s16655_s2  ;;  %5310 = vrot.lane.b32.xlu1 %v12228_v50, %s16600_s28 }
 0x773   : > { %v12268_v5 = vpop.permute.xlu0 %5306 }
 0x774   : > { %17180 = vst [vmem:[#allocation86_spill] sm:$0xff] %v12268_v5 }
 0x775   : > { %5328 = vrot.lane.b32.xlu0 %v12178_v18, %s16600_s28  ;;  %5502 = vrot.lane.b32.xlu1 %v12228_v50, %s16579_s24 }
 0x779   : > { %4940 = vrot.lane.b32.xlu0 %v12193_v63, %s16552_s5  ;;  %4926 = vrot.lane.b32.xlu1 %v12228_v50, %s16552_s5 }
 0x77d   : > { %5132 = vrot.lane.b32.xlu0 %v12193_v63, %s16655_s2  ;;  %4836 = vrot.lane.b32.xlu1 %v12252_v15, %s16551_s21 }
 0x781   : > { %5228 = vrot.lane.b32.xlu0 %v12193_v63, %s16560_s4  ;;  %4932 = vrot.lane.b32.xlu1 %v12252_v15, %s16552_s5 }
 0x785   : > { %4850 = vrot.lane.b32.xlu0 %v12212_v60, %s16551_s21  ;;  %5124 = vrot.lane.b32.xlu1 %v12252_v15, %s16655_s2 }
 0x787   : > { %v12278_v23 = vpop.permute.xlu1 %4998  ;;  %v12280_v48 = vpop.permute.xlu0 %4806 }
 0x788   : > { %17182 = vst [vmem:[#allocation87_spill] sm:$0xff] %v12278_v23 }
 0x789   : > { %5042 = vrot.lane.b32.xlu0 %v12212_v60, %s16660_s0  ;;  %5216 = vrot.lane.b32.xlu1 %v12276_v6, %s16560_s4 }
 0x78b   : > { %v12286_v49 = vpop.permute.xlu1 %5190  ;;  %v12288_v5 = vpop.permute.xlu0 %4902 }
 0x78c   : > { %17183 = vst [vmem:[#allocation100_spill] sm:$0xff] %v12286_v49  ;;  %17184 = vst [vmem:[#allocation90_spill] sm:$0xff] %v12288_v5  ;;  %v4960_v5 = vsel %vm2443_vm12, %v17193_v28, %v17192_v34  ;;  %v17195_v34 = vld [vmem:[#allocation133_spill] sm:$0xff] }
 0x78d   : > { %5234 = vrot.lane.b32.xlu0 %v12212_v60, %s16560_s4  ;;  %5330 = vrot.lane.b32.xlu1 %v12212_v60, %s16600_s28 }
 0x78f   : > { %v12294_v58 = vpop.permute.xlu1 %5382  ;;  %v12296_v37 = vpop.permute.xlu0 %5094 }
 0x790   : > { %17185 = vst [vmem:[#allocation101_spill] sm:$0xff] %v12294_v58  ;;  %17186 = vst [vmem:[#allocation91_spill] sm:$0xff] %v12296_v37  ;;  %v17189_v37 = vld [vmem:[#allocation187_spill] sm:$0xff] }
 0x791   : > { %5312 = vrot.lane.b32.xlu1 %v12276_v6, %s16600_s28  ;;  %5214 = vrot.lane.b32.xlu0 %v12228_v50, %s16560_s4  ;;  %v4867_v43 = vsel %vm2378_vm11, %v17189_v37, %v17153_v57  ;;  %v17191_v57 = vld [vmem:[#allocation134_spill] sm:$0xff] }
 0x792   : > { %v4878_v45 = vmul.f32 %v4867_v43, %v17191_v57 }
 0x793   : > { %v12302_v39 = vpop.permute.xlu1 %4908  ;;  %v12304_v49 = vpop.permute.xlu0 %5286 }
 0x794   : > { %17187 = vst [vmem:[#allocation104_spill] sm:$0xff] %v12304_v49  ;;  %v4870_v49 = vsel %vm2378_vm11, %v11884_v9, %v17189_v37 }
 0x795   : > { %5408 = vrot.lane.b32.xlu1 %v12276_v6, %s16563_s27  ;;  %5406 = vrot.lane.b32.xlu0 %v12228_v50, %s16563_s27 }
 0x797   : > { %v12310_v17 = vpop.permute.xlu1 %5100  ;;  %v12312_v58 = vpop.permute.xlu0 %5478 }
 0x798   : > { %17188 = vst [vmem:[#allocation94_spill] sm:$0xff] %v12312_v58  ;;  %v4866_v58 = vsel %vm2378_vm11, %v12195_v27, %v12220_v38  ;;  %v4877_v38 = vmul.f32 %v4870_v49, %v17194_v4 }
 0x799   : > { %5324 = vrot.lane.b32.xlu1 %v12193_v63, %s16600_s28  ;;  %4830 = vrot.lane.b32.xlu0 %v12228_v50, %s16551_s21 }
 0x79b   : > { %v12330_v44 = vpop.permute.xlu1 %5196  ;;  %v4813_v23 = vpop.permute.xlu0 %4812 }
 0x79c   : > { %17190 = vst [vmem:[#allocation105_spill] sm:$0xff] %v12330_v44  ;;  %v4868_v33 = vsel %vm2378_vm11, %v4813_v23, %v12087_v30  ;;  %v4871_v37 = vsel %vm2378_vm11, %v12280_v48, %v4813_v23  ;;  %v4895_v44 = vmul.f32 %v4866_v58, %v17155_v10  ;;  %v4975_v30 = vmul.f32 %v4960_v5, %v17195_v34 }
 0x79d   : > { %v4885_v24 = vmul.f32 %v4871_v37, %v17194_v4  ;;  %v4886_v43 = vmul.f32 %v4868_v33, %v17191_v57  ;;  %5424 = vrot.lane.b32.xlu1 %v12178_v18, %s16563_s27  ;;  %5022 = vrot.lane.b32.xlu0 %v12228_v50, %s16660_s0 }
 0x79e   : > { %v5583_v58 = vpack.c.bf16 %v4975_v30, %v4895_v44  ;;  %v17202_v30 = vld [vmem:[#allocation11_spill] sm:$0xff] }
 0x79f   : > { %v5574_v29 = vpack.c.bf16 %v4886_v43, %v4878_v45  ;;  %v12352_v53 = vpop.permute.xlu1 %5388  ;;  %v12354_v23 = vpop.permute.xlu0 %5004  ;;  %v5573_v49 = vpack.c.bf16 %v4885_v24, %v4877_v38  ;;  %v12374_v24 = vadd.f32 %v12107_v54, %v17115_v40  ;;  %v12379_v45 = vld [vmem:[%s15564_s18 + $0x4] ss:$8 sps:$4 sm:$0xff]   ;;  %v4962_v43 = vsel %vm2443_vm12, %v12171_v52, %v12232_v31 }
 0x7a0   : > { %17196 = vst [vmem:[#allocation95_spill] sm:$0xff] %v12352_v53  ;;  %17199 = vst [vmem:[#allocation109_spill] sm:$0xff] %v12379_v45  ;;  %7421 = vmatprep.mubr.msk.bf16.mxu0 %vm5714_vm7, %v12379_v45  ;;  %7418 = vmatprep.mubr.msk.bf16.mxu1 %vm5714_vm7, %v12379_v45  ;;  %v4991_v31 = vmul.f32 %v4962_v43, %v17195_v34 }
 0x7a1   : > { %5745 = vmatprep.subr.bf16.mxu1 %v5573_v49  ;;  %5797 = vmatpush1.bf16.msra.mxu0 %v5574_v29  ;;  %17198 = vst [vmem:[#allocation98_spill] sm:$0xff] %v12374_v24  ;;  %v4963_v49 = vsel %vm2443_vm12, %v17202_v30, %v17193_v28 }
 0x7a2   : > { %4832 = vrot.lane.b32.xlu1 %v12276_v6, %s16551_s21  ;;  %5028 = vrot.lane.b32.xlu0 %v12252_v15, %s16660_s0 }
 0x7a3   : > { %5798 = vmatprep.subr.bf16.mxu0 %v5583_v58  ;;  %v12360_v33 = vpop.permute.xlu1 %4904  ;;  %v12362_v37 = vpop.permute.xlu0 %5292  ;;  %v4961_v58 = vsel %vm2443_vm12, %v12085_v16, %v12144_v51 }
 0x7a4   : > { %v4983_v51 = vmul.f32 %v4961_v58, %v17195_v34 }
 0x7a6   : > { %5024 = vrot.lane.b32.xlu1 %v12276_v6, %s16660_s0  ;;  %5422 = vrot.lane.b32.xlu0 %v11239_v1, %s16563_s27 }
 0x7a7   : > { %v12368_v38 = vpop.permute.xlu1 %5096  ;;  %v12370_v44 = vpop.permute.xlu0 %5484 }
 0x7a8   : > { %17197 = vst [vmem:[#allocation108_spill] sm:$0xff] %v12370_v44 }
 0x7aa   : > { %4838 = vrot.lane.b32.xlu1 %v12374_v24, %s16551_s21  ;;  %5416 = vrot.lane.b32.xlu0 %v11309_v26, %s16563_s27 }
 0x7ab   : > { %v12387_v29 = vpop.permute.xlu1 %5288  ;;  %v12389_v5 = vpop.permute.xlu0 %4808 }
 0x7ac   : > { %17200 = vst [vmem:[#allocation99_spill] sm:$0xff] %v12387_v29  ;;  %v5591_v29 = vpack.c.bf16 %v4991_v31, %v4983_v51 }
 0x7ae   : > { %5418 = vrot.lane.b32.xlu1 %v12153_v2, %s16563_s27  ;;  %5504 = vrot.lane.b32.xlu0 %v12276_v6, %s16579_s24 }
 0x7af   : > { %v12397_v54 = vpop.permute.xlu1 %5480  ;;  %v12399_v40 = vpop.permute.xlu0 %5000 }
 0x7b0   : > { %17201 = vst [vmem:[#allocation112_spill] sm:$0xff] %v12397_v54 }
 0x7b2   : > { %5118 = vrot.lane.b32.xlu1 %v12228_v50, %s16655_s2  ;;  %5116 = vrot.lane.b32.xlu0 %v11042_v7, %s16655_s2  ;;  %v17203_v50 = vld [vmem:[#allocation132_spill] sm:$0xff] }
 0x7b3   : > { %v12417_v10 = vpop.permute.xlu1 %4814  ;;  %v12419_v45 = vpop.permute.xlu0 %5192  ;;  %v4974_v54 = vmul.f32 %v4963_v49, %v17203_v50  ;;  %v4964_v49 = vsel %vm2443_vm12, %v12302_v39, %v12085_v16  ;;  %v5060_v16 = vsel %vm2508_vm13, %v12354_v23, %v12097_v25 }
 0x7b4   : > { %v4869_v28 = vsel %vm2378_vm11, %v12417_v10, %v12195_v27  ;;  %v5057_v27 = vsel %vm2508_vm13, %v12097_v25, %v12146_v3  ;;  %v4982_v34 = vmul.f32 %v4964_v49, %v17203_v50 }
 0x7b5   : > { %v4894_v44 = vmul.f32 %v4869_v28, %v17191_v57  ;;  %v5058_v28 = vsel %vm2508_vm13, %v12203_v0, %v12244_v21  ;;  %v17208_v21 = vld [vmem:[#allocation147_spill] sm:$0xff] }
 0x7b6   : > { %5030 = vrot.lane.b32.xlu1 %v12374_v24, %s16660_s0  ;;  %5426 = vrot.lane.b32.xlu0 %v12212_v60, %s16563_s27  ;;  %v5078_v3 = vmul.f32 %v5060_v16, %v17208_v21 }
 0x7b7   : > { %v5582_v7 = vpack.c.bf16 %v4974_v54, %v4894_v44  ;;  %v12433_v53 = vpop.permute.xlu1 %5006  ;;  %v12435_v43 = vpop.permute.xlu0 %5384  ;;  %v17205_v44 = vld [vmem:[#allocation59_spill] sm:$0xff]  ;;  %v17206_v54 = vld [vmem:[#allocation148_spill] sm:$0xff] }
 0x7b8   : > { %17204 = vst [vmem:[#allocation102_spill] sm:$0xff] %v12435_v43  ;;  %v5056_v31 = vsel %vm2508_vm13, %v17205_v44, %v11427_v20  ;;  %v5079_v58 = vmul.f32 %v5057_v27, %v17206_v54  ;;  %v5059_v25 = vsel %vm2508_vm13, %v11880_v36, %v17205_v44  ;;  %v5087_v44 = vmul.f32 %v5058_v28, %v17206_v54  ;;  %v17211_v28 = vld [vmem:[#allocation137_spill] sm:$0xff]  ;;  %v17262_v20 = vld [vmem:[#allocation152_spill] sm:$0xff] }
 0x7b9   : > { %5799 = vmatpush1.bf16.msra.mxu0 %v5582_v7  ;;  %v5071_v27 = vmul.f32 %v5056_v31, %v17206_v54 }
 0x7ba   : > { %5518 = vrot.lane.b32.xlu1 %v11239_v1, %s16579_s24  ;;  %5800 = vmatprep.subr.bf16.mxu0 %v5591_v29 }
 0x7bb   : > { %4928 = vrot.lane.b32.xlu0 %v12276_v6, %s16552_s5  ;;  %v12453_v51 = vpop.permute.xlu1 %5294  ;;  %v12455_v7 = vpop.permute.xlu0 %4910 }
 0x7bc   : > { %v4965_v29 = vsel %vm2443_vm12, %v12455_v7, %v12171_v52  ;;  %v17207_v52 = vld [vmem:[#allocation231_spill] sm:$0xff] }
 0x7bd   : > { %v4990_v57 = vmul.f32 %v4965_v29, %v17203_v50  ;;  %v5152_v1 = vsel %vm2198_vm2, %v11882_v41, %v17207_v52  ;;  %v5061_v50 = vsel %vm2508_vm13, %v12433_v53, %v12203_v0  ;;  %v5070_v52 = vmul.f32 %v5059_v25, %v17208_v21 }
 0x7be   : > { %5512 = vrot.lane.b32.xlu1 %v11309_v26, %s16579_s24  ;;  %v5599_v26 = vpack.c.bf16 %v5079_v58, %v5071_v27  ;;  %v5167_v54 = vmul.f32 %v5152_v1, %v17211_v28  ;;  %v5153_v0 = vsel %vm2198_vm2, %v12095_v42, %v12157_v46  ;;  %v5086_v27 = vmul.f32 %v5061_v50, %v17208_v21 }
 0x7bf   : > { %v5590_v49 = vpack.c.bf16 %v4990_v57, %v4982_v34  ;;  %4934 = vrot.lane.b32.xlu0 %v12374_v24, %s16552_s5  ;;  %v12486_v31 = vpop.permute.xlu1 %4938  ;;  %v12488_v29 = vpop.permute.xlu0 %5102  ;;  %v5154_v34 = vsel %vm2198_vm2, %v12182_v55, %v12256_v56  ;;  %v17210_v57 = vld [vmem:[#allocation237_spill] sm:$0xff]  ;;  %v5598_v58 = vpack.c.bf16 %v5078_v3, %v5070_v52  ;;  %v17213_v56 = vld [vmem:[#allocation136_spill] sm:$0xff]  ;;  %v5175_v3 = vmul.f32 %v5153_v0, %v17211_v28 }
 0x7c0   : > { %17209 = vst [vmem:[#allocation113_spill] sm:$0xff] %v12486_v31  ;;  %v5155_v16 = vsel %vm2198_vm2, %v17210_v57, %v11882_v41  ;;  %v5183_v1 = vmul.f32 %v5154_v34, %v17211_v28  ;;  %v5156_v50 = vsel %vm2198_vm2, %v12310_v17, %v12095_v42  ;;  %v17216_v42 = vld [vmem:[#allocation236_spill] sm:$0xff]  ;;  %v17260_v31 = vld [vmem:[#allocation87_spill] sm:$0xff] }
 0x7c1   : > { %5801 = vmatpush1.bf16.msra.mxu0 %v5590_v49  ;;  %v5607_v49 = vpack.c.bf16 %v5167_v54, %v5087_v44  ;;  %v5166_v46 = vmul.f32 %v5155_v16, %v17213_v56  ;;  %v5174_v16 = vmul.f32 %v5156_v50, %v17213_v56  ;;  %v5248_v50 = vsel %vm2215_vm5, %v11890_v12, %v11886_v8 }
 0x7c2   : > { %5516 = vrot.lane.b32.xlu1 %v12193_v63, %s16579_s24  ;;  %5802 = vmatprep.subr.bf16.mxu0 %v5599_v26  ;;  %v5157_v26 = vsel %vm2198_vm2, %v12488_v29, %v12182_v55  ;;  %v5615_v44 = vpack.c.bf16 %v5183_v1, %v5175_v3  ;;  %v17219_v1 = vld [vmem:[#allocation5_spill] sm:$0xff] }
 0x7c3   : > { %5420 = vrot.lane.b32.xlu0 %v12193_v63, %s16563_s27  ;;  %v12514_v25 = vpop.permute.xlu1 %5130  ;;  %v12516_v41 = vpop.permute.xlu0 %5198  ;;  %v5606_v52 = vpack.c.bf16 %v5166_v46, %v5086_v27  ;;  %v5182_v34 = vmul.f32 %v5157_v26, %v17213_v56  ;;  %v5245_v46 = vsel %vm2215_vm5, %v11886_v8, %v17216_v42  ;;  %v5623_v26 = vpack.c.bf16 %v11924_v14, %v17219_v1  ;;  %v17223_v14 = vld [vmem:[#allocation154_spill] sm:$0xff]  ;;  %v17232_v56 = vld [vmem:[#allocation181_spill] sm:$0xff]  ;;  %v17243_v63 = vld [vmem:[#allocation63_spill] sm:$0xff] }
 0x7c4   : > { %17212 = vst [vmem:[#allocation103_spill] sm:$0xff] %v12514_v25  ;;  %v17250_v42 = vld [vmem:[#allocation189_spill] sm:$0xff] }
 0x7c5   : > { %5803 = vmatpush1.bf16.msra.mxu0 %v5598_v58  ;;  %v5614_v0 = vpack.c.bf16 %v5182_v34, %v5174_v16  ;;  %v17252_v25 = vld [vmem:[#allocation185_spill] sm:$0xff] }
 0x7c6   : > { %5218 = vrot.lane.b32.xlu1 %v11297_v62, %s16560_s4  ;;  %5804 = vmatprep.subr.bf16.mxu0 %v5607_v49  ;;  %v17220_v49 = vld [vmem:[#allocation144_spill] sm:$0xff] }
 0x7c7   : > { %5120 = vrot.lane.b32.xlu0 %v12276_v6, %s16655_s2  ;;  %v12534_v55 = vpop.permute.xlu1 %5226  ;;  %v12536_v54 = vpop.permute.xlu0 %5390  ;;  %v5263_v3 = vmul.f32 %v5245_v46, %v17220_v49  ;;  %v17224_v46 = vld [vmem:[#allocation143_spill] sm:$0xff] }
 0x7c8   : > { %17214 = vst [vmem:[#allocation116_spill] sm:$0xff] %v12534_v55  ;;  %17215 = vst [vmem:[#allocation106_spill] sm:$0xff] %v12536_v54  ;;  %v5062_v55 = vsel %vm2508_vm13, %v17243_v63, %v11880_v36  ;;  %v4968_v36 = vsel %vm2443_vm12, %v12360_v33, %v12455_v7 }
 0x7c9   : > { %5805 = vmatpush1.bf16.msra.mxu0 %v5606_v52  ;;  %v5631_v16 = vpack.c.bf16 %v5263_v3, %v11982_v47  ;;  %v4801_v47 = vld [vmem:[%s15565_s19] sm:$0xff] }
 0x7ca   : > { %5316 = vrot.lane.b32.xlu1 %v12252_v15, %s16600_s28  ;;  %5806 = vmatprep.subr.bf16.mxu0 %v5615_v44  ;;  %v5622_v44 = vpack.c.bf16 %v11893_v35, %v17223_v14  ;;  %v4873_v14 = vsel %vm2378_vm11, %v11888_v19, %v11884_v9 }
 0x7cb   : > { %5126 = vrot.lane.b32.xlu0 %v12374_v24, %s16655_s2  ;;  %v12547_v58 = vpop.permute.xlu1 %5040  ;;  %v12549_v27 = vpop.permute.xlu0 %5486 }
 0x7cc   : > { %17217 = vst [vmem:[#allocation117_spill] sm:$0xff] %v12547_v58  ;;  %17218 = vst [vmem:[#allocation107_spill] sm:$0xff] %v12549_v27 }
 0x7cd   : > { %5807 = vmatpush1.bf16.msra.mxu0 %v5614_v0  ;;  %v5262_v0 = vmul.f32 %v5248_v50, %v17224_v46  ;;  %v4803_v50 = vld [vmem:[%s15565_s19 + $0x10] sm:$0xff] }
 0x7ce   : > { %5410 = vrot.lane.b32.xlu1 %v11297_v62, %s16563_s27  ;;  %5808 = vmatprep.subr.bf16.mxu0 %v5623_v26 }
 0x7cf   : > { %5520 = vrot.lane.b32.xlu0 %v12178_v18, %s16579_s24  ;;  %v12562_v52 = vpop.permute.xlu1 %5232  ;;  %v12564_v34 = vpop.permute.xlu0 %4842  ;;  %v5630_v26 = vpack.c.bf16 %v5262_v0, %v11951_v59  ;;  %v4872_v59 = vsel %vm2378_vm11, %v12389_v5, %v12417_v10  ;;  %v5069_v18 = vmul.f32 %v5062_v55, %v17250_v42 }
 0x7d0   : > { %17221 = vst [vmem:[#allocation120_spill] sm:$0xff] %v12562_v52  ;;  %17222 = vst [vmem:[#allocation110_spill] sm:$0xff] %v12564_v34  ;;  %v4893_v10 = vmul.f32 %v4872_v59, %v17194_v4  ;;  %v17248_v52 = vld [vmem:[#allocation146_spill] sm:$0xff] }
 0x7d1   : > { %5809 = vmatpush1.bf16.msra.mxu0 %v5622_v44  ;;  %v4966_v44 = vsel %vm2443_vm12, %v11901_v61, %v17202_v30 }
 0x7d2   : > { %5508 = vrot.lane.b32.xlu1 %v12252_v15, %s16579_s24  ;;  %5810 = vmatprep.subr.bf16.mxu0 %v5631_v16  ;;  %v4973_v30 = vmul.f32 %v4966_v44, %v17232_v56 }
 0x7d3   : > { %5514 = vrot.lane.b32.xlu0 %v12153_v2, %s16579_s24  ;;  %v12574_v8 = vpop.permute.xlu1 %4844  ;;  %v12576_v1 = vpop.permute.xlu0 %5034  ;;  %v17247_v2 = vld [vmem:[#allocation160_spill] sm:$0xff] }
 0x7d4   : > { %17225 = vst [vmem:[#allocation121_spill] sm:$0xff] %v12574_v8  ;;  %17226 = vst [vmem:[#allocation111_spill] sm:$0xff] %v12576_v1  ;;  %v5581_v4 = vpack.c.bf16 %v4973_v30, %v4893_v10  ;;  %v5341_v30 = vsel %vm2701_vm14, %v11899_v22, %v11907_v11 }
 0x7d5   : > { %5811 = vmatpush1.bf16.msra.mxu0 %v5630_v26  ;;  %v17231_v26 = vld [vmem:[#allocation184_spill] sm:$0xff] }
 0x7d6   : > { %5686 = vperm.xlu1 %7466, %v4801_v47   ;;  %v4876_v47 = vmul.f32 %v4873_v14, %v17231_v26 }
 0x7d7   : > { %5522 = vrot.lane.b32.xlu0 %v12212_v60, %s16579_s24  ;;  %v12584_v35 = vpop.permute.xlu1 %5036  ;;  %v12586_v3 = vpop.permute.xlu0 %5322  ;;  %v17245_v60 = vld [vmem:[#allocation62_spill] sm:$0xff] }
 0x7d8   : > { %17227 = vst [vmem:[#allocation124_spill] sm:$0xff] %v12584_v35  ;;  %17228 = vst [vmem:[#allocation114_spill] sm:$0xff] %v12586_v3 }
 0x7da   : > { %5696 = vperm.xlu1 %7466, %v4803_v50  }
 0x7db   : > { %5220 = vrot.lane.b32.xlu0 %v12252_v15, %s16560_s4  ;;  %v12605_v16 = vpop.permute.xlu1 %4946  ;;  %v12607_v0 = vpop.permute.xlu0 %4848 }
 0x7dc   : > { %17229 = vst [vmem:[#allocation125_spill] sm:$0xff] %v12605_v16  ;;  %17230 = vst [vmem:[#allocation115_spill] sm:$0xff] %v12607_v0  ;;  %v4874_v9 = vsel %vm2378_vm11, %v12607_v0, %v12280_v48 }
 0x7dd   : > { %v4884_v50 = vmul.f32 %v4874_v9, %v17231_v26 }
 0x7de   : > { %5222 = vrot.lane.b32.xlu1 %v12374_v24, %s16560_s4 }
 0x7df   : > { %v5572_v28 = vpack.c.bf16 %v4884_v50, %v4876_v47  ;;  %5314 = vrot.lane.b32.xlu0 %v11297_v62, %s16600_s28  ;;  %v12621_v21 = vpop.permute.xlu1 %5138  ;;  %v12623_v59 = vpop.permute.xlu0 %4944 }
 0x7e0   : > { %17233 = vst [vmem:[#allocation127_spill] sm:$0xff] %v12623_v59 }
 0x7e1   : > { %5746 = vmatpush1.bf16.msra.mxu1 %v5572_v28  ;;  %v4802_v28 = vld [vmem:[%s15565_s19 + $0x8] sm:$0xff] }
 0x7e2   : > { %5414 = vrot.lane.b32.xlu1 %v12374_v24, %s16563_s27  ;;  %5747 = vmatprep.subr.bf16.mxu1 %v5581_v4 }
 0x7e3   : > { %5412 = vrot.lane.b32.xlu0 %v12252_v15, %s16563_s27  ;;  %v12629_v48 = vpop.permute.xlu0 %5136  ;;  %v12631_v14 = vpop.permute.xlu1 %5310  ;;  %v12687_v15 = vmul.f32 %v5341_v30, %v17248_v52  ;;  %v17256_v30 = vld [vmem:[#allocation151_spill] sm:$0xff] }
 0x7e4   : > { %17234 = vst [vmem:[#allocation118_spill] sm:$0xff] %v12631_v14 }
 0x7e7   : > { %5506 = vrot.lane.b32.xlu0 %v11297_v62, %s16579_s24  ;;  %v12635_v44 = vpop.permute.xlu0 %5328  ;;  %v12637_v9 = vpop.permute.xlu1 %5502  ;;  %v17249_v62 = vld [vmem:[#allocation150_spill] sm:$0xff] }
 0x7e8   : > { %17235 = vst [vmem:[#allocation128_spill] sm:$0xff] %v12635_v44  ;;  %17236 = vst [vmem:[#allocation119_spill] sm:$0xff] %v12637_v9  ;;  %v17244_v44 = vld [vmem:[#allocation149_spill] sm:$0xff] }
 0x7e9   : > { %v5065_v11 = vsel %vm2508_vm13, %v17244_v44, %v17243_v63 }
 0x7eb   : > { %5691 = vperm.xlu0 %7467, %v4802_v28   ;;  %v12642_v4 = vpop.permute.xlu0 %4940  ;;  %v12644_v10 = vpop.permute.xlu1 %4926  ;;  %v5344_v28 = vsel %vm2701_vm14, %v11919_v32, %v11899_v22  ;;  %v4969_v22 = vsel %vm2443_vm12, %v17245_v60, %v11901_v61 }
 0x7ec   : > { %17237 = vst [vmem:[#allocation129_spill] sm:$0xff] %v12642_v4  ;;  %17238 = vst [vmem:[#allocation122_spill] sm:$0xff] %v12644_v10  ;;  %v12690_v63 = vmul.f32 %v5344_v28, %v17249_v62  ;;  %v4972_v35 = vmul.f32 %v4969_v22, %v17252_v25  ;;  %v4989_v28 = vmul.f32 %v4968_v36, %v17232_v56  ;;  %v17258_v22 = vld [vmem:[#allocation171_spill] sm:$0xff] }
 0x7ed   : > { %v17261_v4 = vld [vmem:[#allocation163_spill] sm:$0xff] }
 0x7ef   : > { %5318 = vrot.lane.b32.xlu0 %v12374_v24, %s16600_s28  ;;  %v12648_v47 = vpop.permute.xlu0 %5132  ;;  %v12650_v50 = vpop.permute.xlu1 %4836 }
 0x7f0   : > { %17239 = vst [vmem:[#allocation130_spill] sm:$0xff] %v12648_v47  ;;  %17240 = vst [vmem:[#allocation123_spill] sm:$0xff] %v12650_v50  ;;  %v17251_v47 = vld [vmem:[#allocation192_spill] sm:$0xff] }
 0x7f1   : > { %v12694_v61 = vmul.f32 %v5065_v11, %v17251_v47 }
 0x7f3   : > { %5510 = vrot.lane.b32.xlu0 %v12374_v24, %s16579_s24  ;;  %v12662_v6 = vpop.permute.xlu0 %5228  ;;  %v12664_v3 = vpop.permute.xlu1 %4932  ;;  %v17246_v24 = vld [vmem:[#allocation227_spill] sm:$0xff] }
 0x7f4   : > { %17241 = vst [vmem:[#allocation131_spill] sm:$0xff] %v12662_v6  ;;  %17242 = vst [vmem:[#allocation126_spill] sm:$0xff] %v12664_v3  ;;  %v5437_v6 = vsel %vm2766_vm15, %v17247_v2, %v17246_v24  ;;  %v17253_v24 = vld [vmem:[#allocation90_spill] sm:$0xff] }
 0x7f5   : > { %v4967_v10 = vsel %vm2443_vm12, %v17253_v24, %v12302_v39  ;;  %v12706_v1 = vmul.f32 %v5437_v6, %v17256_v30  ;;  %v4970_v11 = vsel %vm2443_vm12, %v12623_v59, %v17253_v24  ;;  %v17257_v39 = vld [vmem:[#allocation225_spill] sm:$0xff]  ;;  %v17259_v6 = vld [vmem:[#allocation234_spill] sm:$0xff]  ;;  %v5063_v24 = vsel %vm2508_vm13, %v17260_v31, %v12354_v23 }
 0x7f6   : > { %v5440_v36 = vsel %vm2766_vm15, %v17259_v6, %v17247_v2  ;;  %v4981_v8 = vmul.f32 %v4967_v10, %v17232_v56  ;;  %v4971_v2 = vsel %vm2443_vm12, %v12605_v16, %v12360_v33  ;;  %v17263_v23 = vld [vmem:[#allocation169_spill] sm:$0xff]  ;;  %v17267_v56 = vld [vmem:[#allocation12_spill] sm:$0xff]  ;;  %v5077_v16 = vmul.f32 %v5063_v24, %v17250_v42 }
 0x7f7   : > { %v12701_v3 = vpop.permute.xlu0 %4850  ;;  %v12703_v7 = vpop.permute.xlu1 %5124  ;;  %v4988_v24 = vmul.f32 %v4971_v2, %v17252_v25  ;;  %v17272_v2 = vld [vmem:[#allocation159_spill] sm:$0xff] }
 0x7f8   : > { %17254 = vst [vmem:[#allocation188_spill] sm:$0xff] %v12701_v3  ;;  %17255 = vst [vmem:[#allocation15_spill] sm:$0xff] %v12703_v7  ;;  %v4875_v55 = vsel %vm2378_vm11, %v12701_v3, %v12389_v5  ;;  %v5533_v7 = vsel %vm2831_vm0, %v17258_v22, %v17257_v39  ;;  %v5536_v5 = vsel %vm2831_vm0, %v17261_v4, %v17258_v22  ;;  %v17278_v4 = vld [vmem:[#allocation85_spill] sm:$0xff] }
 0x7f9   : > { %v4892_v59 = vmul.f32 %v4875_v55, %v17231_v26  ;;  %v5158_v39 = vsel %vm2198_vm2, %v17262_v20, %v17210_v57  ;;  %v5161_v55 = vsel %vm2198_vm2, %v17263_v23, %v17262_v20  ;;  %v17264_v26 = vld [vmem:[#allocation224_spill] sm:$0xff]  ;;  %v4980_v3 = vmul.f32 %v4970_v11, %v17252_v25  ;;  %v17268_v11 = vld [vmem:[#allocation153_spill] sm:$0xff] }
 0x7fa   : > { %v4852_v22 = vsel %vm2378_vm11, %v17264_v26, %v11888_v19  ;;  %v4855_v33 = vsel %vm2378_vm11, %v17267_v56, %v17264_v26  ;;  %v5066_v20 = vsel %vm2508_vm13, %v12547_v58, %v17260_v31  ;;  %v5589_v19 = vpack.c.bf16 %v4989_v28, %v4981_v8  ;;  %v12784_v31 = vld [vmem:[%s16574_s3 + $0x50] ss:$0 sm:$0xff]  ;;  %v17271_v56 = vld [vmem:[#allocation20_spill] sm:$0xff] }
 0x7fb   : > { %v5580_v57 = vpack.c.bf16 %v4972_v35, %v4892_v59  ;;  %v12752_v50 = vpop.permute.xlu0 %5042  ;;  %v12754_v10 = vpop.permute.xlu1 %5216  ;;  %v12768_v35 = vld [vmem:[%s16574_s3 + $0x58] ss:$0 sm:$0xff]  ;;  %v12774_v34 = vmul.f32 %v5440_v36, %v17268_v11  ;;  %v5064_v26 = vsel %vm2508_vm13, %v12399_v40, %v12433_v53  ;;  %v12787_v8 = vmul.f32 %v12784_v31, %v5536_v5  ;;  %v17270_v36 = vld [vmem:[#allocation195_spill] sm:$0xff]  ;;  %v17274_v25 = vld [vmem:[#allocation157_spill] sm:$0xff] }
 0x7fc   : > { %17265 = vst [vmem:[#allocation214_spill] sm:$0xff] %v12752_v50  ;;  %17266 = vst [vmem:[#allocation217_spill] sm:$0xff] %v12754_v10  ;;  %v12771_v59 = vmul.f32 %v12768_v35, %v5533_v7  ;;  %v17269_v7 = vld [vmem:[#allocation191_spill] sm:$0xff]  ;;  %v5164_v58 = vmul.f32 %v5161_v55, %v17270_v36  ;;  %v4948_v53 = vsel %vm2443_vm12, %v17271_v56, %v17245_v60 }
 0x7fd   : > { %5748 = vmatpush1.bf16.msra.mxu1 %v5580_v57  ;;  %v5165_v28 = vmul.f32 %v5158_v39, %v17269_v7  ;;  %v12796_v57 = vmul.f32 %v4855_v33, %v17272_v2  ;;  %v12799_v0 = vmul.f32 %v4852_v22, %v17274_v25  ;;  %v5076_v27 = vmul.f32 %v5066_v20, %v17251_v47  ;;  %v17277_v55 = vld [vmem:[#allocation79_spill] sm:$0xff] }
 0x7fe   : > { %5749 = vmatprep.subr.bf16.mxu1 %v5589_v19  ;;  %v5588_v5 = vpack.c.bf16 %v4988_v24, %v4980_v3  ;;  %v5250_v54 = vsel %vm2215_vm5, %v17278_v4, %v17277_v55  ;;  %v5085_v60 = vmul.f32 %v5064_v26, %v17250_v42  ;;  %v5067_v22 = vsel %vm2508_vm13, %v12752_v50, %v12399_v40  ;;  %v17279_v19 = vld [vmem:[#allocation156_spill] sm:$0xff]  ;;  %v17286_v42 = vld [vmem:[#allocation67_spill] sm:$0xff] }
 0x7ff   : > { %17273 = vst [vmem:[#allocation175_spill] sm:$0xff] %v12796_v57  ;;  %v12802_v43 = vpop.permute.xlu0 %5234  ;;  %v12804_v39 = vpop.permute.xlu1 %5330  ;;  %v5597_v33 = vpack.c.bf16 %v5077_v16, %v5069_v18  ;;  %v12816_v20 = vmul.f32 %v4948_v53, %v17279_v19  ;;  %v17281_v3 = vld [vmem:[#allocation164_spill] sm:$0xff]  ;;  %v5160_v26 = vsel %vm2198_vm2, %v12368_v38, %v12488_v29  ;;  %v5247_v29 = vsel %vm2215_vm5, %v17277_v55, %v12754_v10 }
 0x800   : > { %17275 = vst [vmem:[#allocation18_spill] sm:$0xff] %v12802_v43  ;;  %17276 = vst [vmem:[#allocation178_spill] sm:$0xff] %v12804_v39  ;;  %v5251_v24 = vsel %vm2215_vm5, %v17281_v3, %v11890_v12  ;;  %v17282_v39 = vld [vmem:[#allocation16_spill] sm:$0xff]  ;;  %v5596_v50 = vpack.c.bf16 %v5076_v27, %v12694_v61  ;;  %v5181_v57 = vmul.f32 %v5160_v26, %v17269_v7  ;;  %v17290_v27 = vld [vmem:[#allocation57_spill] sm:$0xff] }
 0x801   : > { %17280 = vst [vmem:[#allocation19_spill] sm:$0xff] %v12816_v20  ;;  %v5254_v43 = vsel %vm2215_vm5, %v17282_v39, %v17281_v3  ;;  %5750 = vmatpush1.bf16.msra.mxu1 %v5588_v5  ;;  %v17283_v18 = vld [vmem:[#allocation24_spill] sm:$0xff]  ;;  %v5342_v3 = vsel %vm2701_vm14, %v17286_v42, %v12631_v14  ;;  %v5278_v5 = vmul.f32 %v5250_v54, %v17224_v46 }
 0x802   : > { %v4951_v40 = vsel %vm2443_vm12, %v17283_v18, %v17271_v56  ;;  %v17284_v16 = vld [vmem:[#allocation76_spill] sm:$0xff]  ;;  %5751 = vmatprep.subr.bf16.mxu1 %v5597_v33  ;;  %v17287_v56 = vld [vmem:[#allocation91_spill] sm:$0xff]  ;;  %v5084_v20 = vmul.f32 %v5067_v22, %v17251_v47  ;;  %v5605_v55 = vpack.c.bf16 %v5165_v28, %v5085_v60  ;;  %v5345_v61 = vsel %vm2701_vm14, %v17290_v27, %v17286_v42  ;;  %v17291_v60 = vld [vmem:[#allocation86_spill] sm:$0xff] }
 0x803   : > { %v17285_v53 = vld [vmem:[#allocation60_spill] sm:$0xff]  ;;  %v5159_v39 = vsel %vm2198_vm2, %v17287_v56, %v12310_v17  ;;  %v12853_v19 = vpop.permute.xlu1 %5312  ;;  %v12855_v14 = vpop.permute.xlu0 %5214  ;;  %v5162_v54 = vsel %vm2198_vm2, %v12629_v48, %v17287_v56  ;;  %v5367_v22 = vmul.f32 %v5342_v3, %v17248_v52  ;;  %v5279_v33 = vmul.f32 %v5247_v29, %v17220_v49 }
 0x804   : > { %v5249_v12 = vsel %vm2215_vm5, %v17285_v53, %v17284_v16  ;;  %17288 = vst [vmem:[#allocation172_spill] sm:$0xff] %v12853_v19  ;;  %17289 = vst [vmem:[#allocation23_spill] sm:$0xff] %v12855_v14  ;;  %v5246_v17 = vsel %vm2215_vm5, %v17284_v16, %v12855_v14  ;;  %v5173_v47 = vmul.f32 %v5159_v39, %v17269_v7  ;;  %v17292_v16 = vld [vmem:[#allocation9_spill] sm:$0xff] }
 0x805   : > { %v5271_v26 = vmul.f32 %v5246_v17, %v17220_v49  ;;  %5752 = vmatpush1.bf16.msra.mxu1 %v5596_v50  ;;  %v5270_v56 = vmul.f32 %v5249_v12, %v17224_v46  ;;  %v5163_v28 = vsel %vm2198_vm2, %v12621_v21, %v12368_v38  ;;  %v5343_v42 = vsel %vm2701_vm14, %v17291_v60, %v12853_v19  ;;  %v17295_v49 = vld [vmem:[#allocation71_spill] sm:$0xff] }
 0x806   : > { %5753 = vmatprep.subr.bf16.mxu1 %v5605_v55  ;;  %v5347_v50 = vsel %vm2701_vm14, %v17292_v16, %v11919_v32  ;;  %v5172_v12 = vmul.f32 %v5162_v54, %v17270_v36  ;;  %v5604_v3 = vpack.c.bf16 %v5164_v58, %v5084_v20  ;;  %v5366_v38 = vmul.f32 %v5345_v61, %v17249_v62  ;;  %v17296_v20 = vld [vmem:[#allocation196_spill] sm:$0xff]  ;;  %v17298_v61 = vld [vmem:[#allocation77_spill] sm:$0xff] }
 0x807   : > { %v12888_v39 = vpop.permute.xlu1 %5408  ;;  %v12890_v29 = vpop.permute.xlu0 %5406  ;;  %v5639_v17 = vpack.c.bf16 %v5279_v33, %v5271_v26  ;;  %v5638_v46 = vpack.c.bf16 %v5278_v5, %v5270_v56  ;;  %v5346_v55 = vsel %vm2701_vm14, %v17295_v49, %v17291_v60  ;;  %v5613_v7 = vpack.c.bf16 %v5181_v57, %v5173_v47  ;;  %v17297_v33 = vld [vmem:[#allocation93_spill] sm:$0xff]  ;;  %v17300_v56 = vld [vmem:[#allocation158_spill] sm:$0xff] }
 0x808   : > { %17293 = vst [vmem:[#allocation22_spill] sm:$0xff] %v12888_v39  ;;  %17294 = vst [vmem:[#allocation173_spill] sm:$0xff] %v12890_v29  ;;  %v5180_v19 = vmul.f32 %v5163_v28, %v17270_v36  ;;  %v5375_v32 = vmul.f32 %v5343_v42, %v17248_v52  ;;  %v5647_v58 = vpack.c.bf16 %v5367_v22, %v12687_v15  ;;  %v17299_v57 = vld [vmem:[#allocation193_spill] sm:$0xff] }
 0x809   : > { %5754 = vmatpush1.bf16.msra.mxu1 %v5604_v3  ;;  %5812 = vmatprep.subr.bf16.mxu0 %v5639_v17  ;;  %v5260_v54 = vmul.f32 %v5254_v43, %v17296_v20  ;;  %v5439_v5 = vsel %vm2766_vm15, %v17297_v33, %v12888_v39  ;;  %v5438_v47 = vsel %vm2766_vm15, %v17298_v61, %v12890_v29  ;;  %v17301_v15 = vld [vmem:[#allocation197_spill] sm:$0xff]  ;;  %v17303_v17 = vld [vmem:[#allocation78_spill] sm:$0xff] }
 0x80a   : > { %5755 = vmatprep.subr.bf16.mxu1 %v5613_v7  ;;  %5813 = vmatpush1.bf16.msra.mxu0 %v5638_v46  ;;  %v5261_v26 = vmul.f32 %v5251_v24, %v17299_v57  ;;  %v12911_v28 = vmul.f32 %v4951_v40, %v17300_v56  ;;  %v12914_v22 = vmul.f32 %v5347_v50, %v17301_v15  ;;  %v17304_v24 = vld [vmem:[#allocation190_spill] sm:$0xff]  ;;  %v17305_v40 = vld [vmem:[#allocation41_spill] sm:$0xff] }
 0x80b   : > { %v5612_v43 = vpack.c.bf16 %v5180_v19, %v5172_v12  ;;  %v12916_v60 = vpop.permute.xlu1 %5324  ;;  %5814 = vmatprep.subr.bf16.mxu0 %v5647_v58  ;;  %v12918_v42 = vpop.permute.xlu0 %4830  ;;  %v5646_v3 = vpack.c.bf16 %v5366_v38, %v12690_v63  ;;  %v5442_v46 = vsel %vm2766_vm15, %v17303_v17, %v17297_v33  ;;  %v5374_v7 = vmul.f32 %v5346_v55, %v17249_v62  ;;  %v17306_v38 = vld [vmem:[#allocation28_spill] sm:$0xff]  ;;  %v17307_v58 = vld [vmem:[#allocation70_spill] sm:$0xff]  ;;  %v17339_v29 = vld [vmem:[#allocation29_spill] sm:$0xff] }
 0x80c   : > { %17302 = vst [vmem:[#allocation162_spill] sm:$0xff] %v12916_v60  ;;  %v5621_v52 = vpack.c.bf16 %v17305_v40, %v17304_v24  ;;  %v5253_v19 = vsel %vm2215_vm5, %v12516_v41, %v17278_v4  ;;  %v5471_v50 = vmul.f32 %v5439_v5, %v17256_v30  ;;  %v5463_v12 = vmul.f32 %v5438_v47, %v17256_v30  ;;  %v17308_v4 = vld [vmem:[#allocation242_spill] sm:$0xff]  ;;  %v17309_v24 = vld [vmem:[#allocation32_spill] sm:$0xff]  ;;  %v17310_v47 = vld [vmem:[#allocation65_spill] sm:$0xff] }
 0x80d   : > { %5756 = vmatpush1.bf16.msra.mxu1 %v5612_v43  ;;  %v5655_v63 = vpack.c.bf16 %v12706_v1, %v5375_v32  ;;  %v5443_v55 = vsel %vm2766_vm15, %v17306_v38, %v17259_v6  ;;  %v5534_v33 = vsel %vm2831_vm0, %v17307_v58, %v12637_v9  ;;  %v5620_v5 = vpack.c.bf16 %v17309_v24, %v17308_v4  ;;  %v17311_v32 = vld [vmem:[#allocation64_spill] sm:$0xff]  ;;  %v17312_v43 = vld [vmem:[#allocation105_spill] sm:$0xff]  ;;  %v17338_v9 = vld [vmem:[#allocation102_spill] sm:$0xff] }
 0x80e   : > { %5757 = vmatprep.subr.bf16.mxu1 %v5621_v52  ;;  %5815 = vmatpush1.bf16.msra.mxu0 %v5646_v3  ;;  %v5537_v1 = vsel %vm2831_vm0, %v17310_v47, %v17307_v58  ;;  %v5441_v6 = vsel %vm2766_vm15, %v17311_v32, %v17298_v61  ;;  %v5252_v40 = vsel %vm2215_vm5, %v17312_v43, %v17285_v53  ;;  %v17314_v3 = vld [vmem:[#allocation61_spill] sm:$0xff] }
 0x80f   : > { %v12957_v52 = vpop.permute.xlu1 %5424  ;;  %5816 = vmatprep.subr.bf16.mxu0 %v5655_v63  ;;  %v5629_v4 = vpack.c.bf16 %v5261_v26, %v17314_v3  ;;  %v5470_v24 = vmul.f32 %v5442_v46, %v17268_v11  ;;  %v5654_v30 = vpack.c.bf16 %v12774_v34, %v5374_v7  ;;  %v5256_v58 = vsel %vm2215_vm5, %v12419_v45, %v12516_v41  ;;  %v12967_v62 = vpop.permute.xlu0 %5022  ;;  %v17315_v53 = vld [vmem:[#allocation13_spill] sm:$0xff]  ;;  %v17316_v7 = vld [vmem:[#allocation100_spill] sm:$0xff] }
 0x810   : > { %17313 = vst [vmem:[#allocation166_spill] sm:$0xff] %v12957_v52  ;;  %v5277_v61 = vmul.f32 %v5253_v19, %v17299_v57  ;;  %v5350_v63 = vsel %vm2701_vm14, %v17315_v53, %v17292_v16  ;;  %v5348_v26 = vsel %vm2701_vm14, %v12362_v37, %v17290_v27  ;;  %v5559_v34 = vmul.f32 %v12768_v35, %v5534_v33  ;;  %v17317_v16 = vld [vmem:[#allocation33_spill] sm:$0xff] }
 0x811   : > { %5758 = vmatpush1.bf16.msra.mxu1 %v5620_v5  ;;  %v5663_v46 = vpack.c.bf16 %v5471_v50, %v5463_v12  ;;  %v5462_v41 = vmul.f32 %v5441_v6, %v17268_v11  ;;  %v5255_v19 = vsel %vm2215_vm5, %v17316_v7, %v17312_v43  ;;  %v5269_v3 = vmul.f32 %v5252_v40, %v17299_v57  ;;  %v17318_v12 = vld [vmem:[#allocation56_spill] sm:$0xff]  ;;  %v17320_v57 = vld [vmem:[#allocation201_spill] sm:$0xff] }
 0x812   : > { %5759 = vmatprep.subr.bf16.mxu1 %v5629_v4  ;;  %5817 = vmatpush1.bf16.msra.mxu0 %v5654_v30  ;;  %v5446_v27 = vsel %vm2766_vm15, %v17317_v16, %v17306_v38  ;;  %v5558_v33 = vmul.f32 %v12784_v31, %v5537_v1  ;;  %v5276_v50 = vmul.f32 %v5256_v58, %v17296_v20  ;;  %v17319_v11 = vld [vmem:[#allocation104_spill] sm:$0xff] }
 0x813   : > { %5818 = vmatprep.subr.bf16.mxu0 %v5663_v46  ;;  %v5628_v5 = vpack.c.bf16 %v5260_v54, %v17318_v12  ;;  %v5662_v6 = vpack.c.bf16 %v5470_v24, %v5462_v41  ;;  %v5351_v43 = vsel %vm2701_vm14, %v17319_v11, %v12362_v37  ;;  %v5365_v30 = vmul.f32 %v5348_v26, %v17301_v15  ;;  %v17321_v37 = vld [vmem:[#allocation17_spill] sm:$0xff]  ;;  %v17324_v41 = vld [vmem:[#allocation199_spill] sm:$0xff] }
 0x814   : > { %v12996_v40 = vpop.permute.xlu1 %4832  ;;  %v5637_v4 = vpack.c.bf16 %v5277_v61, %v5269_v3  ;;  %v5453_v38 = vmul.f32 %v5443_v55, %v17320_v57  ;;  %v5268_v1 = vmul.f32 %v5255_v19, %v17296_v20  ;;  %v5349_v54 = vsel %vm2701_vm14, %v12453_v51, %v17295_v49  ;;  %v13004_v24 = vpop.permute.xlu0 %5028  ;;  %v17322_v61 = vld [vmem:[#allocation37_spill] sm:$0xff] }
 0x815   : > { %5760 = vmatpush1.bf16.msra.mxu1 %v5628_v5  ;;  %v5671_v58 = vpack.c.bf16 %v5559_v34, %v12771_v59  ;;  %v5044_v26 = vsel %vm2508_vm13, %v17321_v37, %v17244_v44  ;;  %v5140_v55 = vsel %vm2198_vm2, %v17322_v61, %v17263_v23  ;;  %v17323_v46 = vld [vmem:[#allocation21_spill] sm:$0xff]  ;;  %v5356_v19 = vmul.f32 %v5350_v63, %v17324_v41  ;;  %v17325_v59 = vld [vmem:[#allocation200_spill] sm:$0xff]  ;;  %v17326_v5 = vld [vmem:[#allocation99_spill] sm:$0xff] }
 0x816   : > { %v5047_v49 = vsel %vm2508_vm13, %v17323_v46, %v17321_v37  ;;  %5761 = vmatprep.subr.bf16.mxu1 %v5637_v4  ;;  %5819 = vmatpush1.bf16.msra.mxu0 %v5662_v6  ;;  %v5452_v34 = vmul.f32 %v5446_v27, %v17325_v59  ;;  %v5364_v3 = vmul.f32 %v5351_v43, %v17324_v41  ;;  %v17327_v63 = vld [vmem:[#allocation140_spill] sm:$0xff]  ;;  %v17328_v27 = vld [vmem:[#allocation139_spill] sm:$0xff] }
 0x817   : > { %v5636_v12 = vpack.c.bf16 %v5276_v50, %v5268_v1  ;;  %5820 = vmatprep.subr.bf16.mxu0 %v5671_v58  ;;  %v5670_v44 = vpack.c.bf16 %v5558_v33, %v12787_v8  ;;  %v5352_v23 = vsel %vm2701_vm14, %v17326_v5, %v12453_v51  ;;  %v5373_v20 = vmul.f32 %v5349_v54, %v17301_v15  ;;  %v17329_v50 = vld [vmem:[#allocation167_spill] sm:$0xff]  ;;  %v17330_v8 = vld [vmem:[#allocation106_spill] sm:$0xff]  ;;  %v17332_v54 = vld [vmem:[#allocation44_spill] sm:$0xff] }
 0x818   : > { %v13028_v37 = vpop.permute.xlu1 %5024  ;;  %v5645_v6 = vpack.c.bf16 %v5365_v30, %v12914_v22  ;;  %v13032_v4 = vmul.f32 %v5044_v26, %v17327_v63  ;;  %v13035_v43 = vmul.f32 %v5140_v55, %v17328_v27  ;;  %v13038_v1 = vmul.f32 %v5047_v49, %v17329_v50  ;;  %v13044_v33 = vpop.permute.xlu0 %5422  ;;  %v17333_v30 = vld [vmem:[#allocation163_spill] sm:$0xff]  ;;  %v17334_v58 = vld [vmem:[#allocation25_spill] sm:$0xff]  ;;  %v17335_v55 = vld [vmem:[#allocation96_spill] sm:$0xff] }
 0x819   : > { %v5445_v51 = vsel %vm2766_vm15, %v17330_v8, %v17303_v17  ;;  %17331 = vst [vmem:[#allocation176_spill] sm:$0xff] %v13044_v33  ;;  %5762 = vmatpush1.bf16.msra.mxu1 %v5636_v12  ;;  %v5143_v22 = vsel %vm2198_vm2, %v17332_v54, %v17322_v61  ;;  %v5539_v26 = vsel %vm2831_vm0, %v17334_v58, %v17333_v30  ;;  %v17336_v49 = vld [vmem:[#allocation84_spill] sm:$0xff]  ;;  %v17337_v17 = vld [vmem:[#allocation95_spill] sm:$0xff] }
 0x81a   : > { %v5538_v15 = vsel %vm2831_vm0, %v17336_v49, %v17335_v55  ;;  %5763 = vmatprep.subr.bf16.mxu1 %v5645_v6  ;;  %5821 = vmatpush1.bf16.msra.mxu0 %v5670_v44  ;;  %v5444_v12 = vsel %vm2766_vm15, %v17337_v17, %v17311_v32  ;;  %v5644_v36 = vpack.c.bf16 %v5364_v3, %v5356_v19  ;;  %v17340_v44 = vld [vmem:[#allocation101_spill] sm:$0xff]  ;;  %v17376_v33 = vld [vmem:[#allocation19_spill] sm:$0xff] }
 0x81b   : > { %v5372_v61 = vmul.f32 %v5352_v23, %v17324_v41  ;;  %v5448_v30 = vsel %vm2766_vm15, %v17338_v9, %v17330_v8  ;;  %v5542_v39 = vsel %vm2831_vm0, %v17339_v29, %v17334_v58  ;;  %v5447_v6 = vsel %vm2766_vm15, %v17340_v44, %v17337_v17  ;;  %v17341_v23 = vld [vmem:[#allocation142_spill] sm:$0xff]  ;;  %v7509_v8 = vld [vmem:[%s16574_s3 + $0x48] ss:$0 sm:$0xff] }
 0x81c   : > { %v5469_v32 = vmul.f32 %v5445_v51, %v17320_v57  ;;  %v13076_v19 = vpop.permute.xlu1 %4838  ;;  %v5653_v3 = vpack.c.bf16 %v5453_v38, %v5373_v20  ;;  %v13079_v41 = vmul.f32 %v5143_v22, %v17341_v23  ;;  %v5549_v10 = vmul.f32 %v7509_v8, %v5539_v26  ;;  %v17342_v58 = vld [vmem:[#allocation52_spill] sm:$0xff]  ;;  %v13092_v29 = vpop.permute.xlu0 %5416  ;;  %v17345_v20 = vld [vmem:[#allocation198_spill] sm:$0xff] }
 0x81d   : > { %v4954_v14 = vsel %vm2443_vm12, %v17342_v58, %v17283_v18  ;;  %v17343_v17 = vld [vmem:[#allocation108_spill] sm:$0xff]  ;;  %17344 = vst [vmem:[#allocation182_spill] sm:$0xff] %v13092_v29  ;;  %5764 = vmatpush1.bf16.msra.mxu1 %v5644_v36  ;;  %v4957_v38 = vsel %vm2443_vm12, %v17345_v20, %v17342_v58  ;;  %v5566_v22 = vmul.f32 %v12784_v31, %v5538_v15  ;;  %v7510_v18 = vld [vmem:[%s16574_s3 + $0x40] ss:$0 sm:$0xff]  ;;  %v17346_v36 = vld [vmem:[#allocation94_spill] sm:$0xff] }
 0x81e   : > { %v5540_v51 = vsel %vm2831_vm0, %v17343_v17, %v17310_v47  ;;  %v5461_v26 = vmul.f32 %v5444_v12, %v17320_v57  ;;  %v5468_v52 = vmul.f32 %v5448_v30, %v17325_v59  ;;  %5765 = vmatprep.subr.bf16.mxu1 %v5653_v3  ;;  %v5548_v47 = vmul.f32 %v7510_v18, %v5542_v39  ;;  %v17347_v31 = vld [vmem:[#allocation107_spill] sm:$0xff]  ;;  %v17348_v15 = vld [vmem:[#allocation112_spill] sm:$0xff]  ;;  %v17350_v3 = vld [vmem:[#allocation110_spill] sm:$0xff] }
 0x81f   : > { %v5460_v44 = vmul.f32 %v5447_v6, %v17325_v59  ;;  %v5543_v60 = vsel %vm2831_vm0, %v17346_v36, %v17343_v17  ;;  %v5652_v58 = vpack.c.bf16 %v5452_v34, %v5372_v61  ;;  %v5557_v20 = vmul.f32 %v7509_v8, %v5540_v51  ;;  %v17349_v30 = vld [vmem:[#allocation115_spill] sm:$0xff]  ;;  %v17352_v59 = vld [vmem:[#allocation205_spill] sm:$0xff]  ;;  %v17353_v29 = vld [vmem:[#allocation208_spill] sm:$0xff] }
 0x820   : > { %v5544_v12 = vsel %vm2831_vm0, %v17348_v15, %v17347_v31  ;;  %v4853_v57 = vsel %vm2378_vm11, %v17350_v3, %v17349_v30  ;;  %v13117_v39 = vpop.permute.xlu1 %5418  ;;  %v5661_v6 = vpack.c.bf16 %v5469_v32, %v5461_v26  ;;  %v13120_v9 = vmul.f32 %v4957_v38, %v17352_v59  ;;  %v17354_v34 = vld [vmem:[#allocation36_spill] sm:$0xff]  ;;  %v17355_v61 = vld [vmem:[#allocation14_spill] sm:$0xff]  ;;  %v13133_v30 = vpop.permute.xlu0 %5504  ;;  %v17357_v36 = vld [vmem:[#allocation123_spill] sm:$0xff] }
 0x821   : > { %17351 = vst [vmem:[#allocation212_spill] sm:$0xff] %v13117_v39  ;;  %v13123_v17 = vmul.f32 %v4954_v14, %v17353_v29  ;;  %v4861_v51 = vsel %vm2378_vm11, %v17355_v61, %v17354_v34  ;;  %v5541_v15 = vsel %vm2831_vm0, %v17347_v31, %v17336_v49  ;;  %17356 = vst [vmem:[#allocation202_spill] sm:$0xff] %v13133_v30  ;;  %5766 = vmatpush1.bf16.msra.mxu1 %v5652_v58 }
 0x822   : > { %v5678_v32 = vpack.c.bf16 %v5566_v22, %v5566_v22  ;;  %v5556_v26 = vmul.f32 %v7510_v18, %v5543_v60  ;;  %v5660_v38 = vpack.c.bf16 %v5468_v52, %v5460_v44  ;;  %v5535_v14 = vsel %vm2831_vm0, %v17335_v55, %v13133_v30  ;;  %5767 = vmatprep.subr.bf16.mxu1 %v5661_v6  ;;  %v4800_v60 = vld [vmem:[%s15564_s18 + $0x10] sm:$0xff]  ;;  %v17358_v52 = vld [vmem:[#allocation12_spill] sm:$0xff] }
 0x823   : > { %v5564_v39 = vmul.f32 %v7510_v18, %v5544_v12  ;;  %v4891_v61 = vmul.f32 %v4853_v57, %v17274_v25  ;;  %v4856_v49 = vsel %vm2378_vm11, %v17357_v36, %v17350_v3  ;;  %v5567_v31 = vmul.f32 %v12768_v35, %v5535_v14  ;;  %v17359_v22 = vld [vmem:[#allocation188_spill] sm:$0xff]  ;;  %v17360_v18 = vld [vmem:[#allocation121_spill] sm:$0xff]  ;;  %v17363_v14 = vld [vmem:[#allocation226_spill] sm:$0xff] }
 0x824   : > { %v4858_v55 = vsel %vm2378_vm11, %v17354_v34, %v17358_v52  ;;  %v5565_v44 = vmul.f32 %v7509_v8, %v5541_v15  ;;  %v4854_v57 = vsel %vm2378_vm11, %v17360_v18, %v17359_v22  ;;  %v13156_v58 = vpop.permute.xlu1 %5118  ;;  %v5669_v12 = vpack.c.bf16 %v5557_v20, %v5549_v10  ;;  %v17361_v3 = vld [vmem:[#allocation204_spill] sm:$0xff]  ;;  %v17362_v6 = vld [vmem:[#allocation53_spill] sm:$0xff]  ;;  %v13169_v34 = vpop.permute.xlu0 %5116 }
 0x825   : > { %v13159_v35 = vmul.f32 %v4861_v51, %v17361_v3  ;;  %v5053_v30 = vsel %vm2508_vm13, %v17363_v14, %v17362_v6  ;;  %v4859_v8 = vsel %vm2378_vm11, %v12918_v42, %v17357_v36  ;;  %v5679_v15 = vpack.c.bf16 %v5567_v31, %v5567_v31  ;;  %5768 = vmatpush1.bf16.msra.mxu1 %v5660_v38  ;;  %v17366_v31 = vld [vmem:[#allocation68_spill] sm:$0xff] }
 0x826   : > { %v5668_v52 = vpack.c.bf16 %v5556_v26, %v5548_v47  ;;  %v4890_v10 = vmul.f32 %v4856_v49, %v17272_v2  ;;  %5769 = vmatprep.subr.bf16.mxu1 %v5669_v12  ;;  %v5728_v20 = vsel %vm2308_vm9, %v5678_v32, 0  ;;  %v13173_v51 = vcombine.high %v4800_v60, %v4800_v60  ;;  %v13185_v47 = vld [vmem:[%s15564_s18] ss:$8 sps:$4 sm:$0xff]  }
 0x827   : > { %v5676_v22 = vpack.c.bf16 %v5564_v39, %v5564_v39  ;;  %v4899_v14 = vmul.f32 %v4854_v57, %v17274_v25  ;;  %v4857_v36 = vsel %vm2378_vm11, %v13076_v19, %v17360_v18  ;;  %7420 = vmatprep.subr.msk.bf16.mxu0 %vm2308_vm9, %v5679_v15  ;;  %v5579_v38 = vpack.c.bf16 %v4891_v61, %v12799_v0  ;;  %v17364_v26 = vld [vmem:[#allocation125_spill] sm:$0xff]  ;;  %v17367_v57 = vld [vmem:[#allocation206_spill] sm:$0xff]  ;;  %v17372_v25 = vld [vmem:[#allocation175_spill] sm:$0xff] }
 0x828   : > { %v5677_v32 = vpack.c.bf16 %v5565_v44, %v5565_v44  ;;  %v17365_v49 = vld [vmem:[#allocation129_spill] sm:$0xff]  ;;  %v4862_v18 = vsel %vm2378_vm11, %v17366_v31, %v12918_v42  ;;  %v4889_v12 = vmul.f32 %v4859_v8, %v17367_v57  ;;  %5823 = vmatpush1.bf16.msra.mxu0 %v5728_v20  ;;  %v13196_v0 = vpop.permute.xlu1 %5030  ;;  %v4881_v61 = vmul.f32 %v4858_v55, %v17367_v57  ;;  %v17369_v42 = vld [vmem:[#allocation210_spill] sm:$0xff]  ;;  %v17370_v20 = vld [vmem:[#allocation127_spill] sm:$0xff] }
 0x829   : > { %v4950_v39 = vsel %vm2443_vm12, %v17365_v49, %v17364_v26  ;;  %v5050_v44 = vsel %vm2508_vm13, %v17362_v6, %v17323_v46  ;;  %v4860_v15 = vsel %vm2378_vm11, %v12996_v40, %v13076_v19  ;;  %5898 = vmatprep.subr.bf16.mxu0 %v5579_v38  ;;  %v13207_v26 = vpop.permute.xlu0 %5426  ;;  %5770 = vmatpush1.bf16.msra.mxu1 %v5668_v52  ;;  %v17371_v31 = vld [vmem:[#allocation113_spill] sm:$0xff]  ;;  %v17374_v19 = vld [vmem:[#allocation111_spill] sm:$0xff]  ;;  %v17375_v52 = vld [vmem:[#allocation156_spill] sm:$0xff] }
 0x82a   : > { %17368 = vst [vmem:[#allocation177_spill] sm:$0xff] %v13207_v26  ;;  %v13210_v8 = vmul.f32 %v5053_v30, %v17369_v42  ;;  %v4949_v55 = vsel %vm2443_vm12, %v17371_v31, %v17370_v20  ;;  %v5578_v5 = vpack.c.bf16 %v4890_v10, %v17372_v25  ;;  %v4898_v46 = vmul.f32 %v4857_v36, %v17272_v2  ;;  %v17373_v6 = vld [vmem:[#allocation117_spill] sm:$0xff]  ;;  %v17377_v20 = vld [vmem:[#allocation75_spill] sm:$0xff]  ;;  %v17380_v2 = vld [vmem:[#allocation122_spill] sm:$0xff] }
 0x82b   : > { %7417 = vmatprep.subr.msk.bf16.mxu1 %vm2308_vm9, %v5677_v32  ;;  %v5045_v38 = vsel %vm2508_vm13, %v17374_v19, %v17373_v6  ;;  %v4995_v26 = vmul.f32 %v4950_v39, %v17375_v52  ;;  %v4888_v30 = vmul.f32 %v4862_v18, %v17361_v3  ;;  %5829 = vmatmul.mubr.bf16.vlgmr.msra.gmra.mrb[52].mxu0 %v13185_v47  ;;  %v5722_v32 = vsel %vm2308_vm9, %v5676_v22, 0  ;;  %v17378_v39 = vld [vmem:[#allocation213_spill] sm:$0xff] }
 0x82c   : > { %v5587_v16 = vpack.c.bf16 %v17376_v33, %v4899_v14  ;;  %v4863_v25 = vsel %vm2378_vm11, %v17377_v20, %v12996_v40  ;;  %v4897_v10 = vmul.f32 %v4860_v15, %v17367_v57  ;;  %5899 = vmatpush1.bf16.msra.mxu0 %v5578_v5  ;;  %v13232_v36 = vpop.permute.xlu1 %5518  ;;  %v5577_v6 = vpack.c.bf16 %v4889_v12, %v4881_v61  ;;  %v17379_v14 = vld [vmem:[#allocation126_spill] sm:$0xff]  ;;  %v17382_v57 = vld [vmem:[#allocation89_spill] sm:$0xff] }
 0x82d   : > { %7422 = vmatprep.mubr.msk.bf16.mxu0 %vm5714_vm7, %v13173_v51  ;;  %v13238_v18 = vmul.f32 %v5050_v44, %v17378_v39  ;;  %v4987_v33 = vmul.f32 %v4949_v55, %v17375_v52  ;;  %v4955_v40 = vsel %vm2443_vm12, %v17380_v2, %v17379_v14  ;;  %v4929_v5 = vpop.permute.xlu0 %4928  ;;  %5772 = vmatpush1.bf16.msra.mxu1 %v5722_v32  ;;  %v17381_v44 = vld [vmem:[#allocation69_spill] sm:$0xff]  ;;  %v17524_v52 = vld [vmem:[#allocation134_spill] sm:$0xff] }
 0x82e   : > { %5900 = vmatprep.subr.bf16.mxu0 %v5587_v16  ;;  %v5083_v15 = vmul.f32 %v5045_v38, %v17327_v63  ;;  %v4952_v22 = vsel %vm2443_vm12, %v17379_v14, %v17371_v31  ;;  %v5586_v12 = vpack.c.bf16 %v12911_v28, %v4898_v46  ;;  %5847 = vmatprep.subr.bf16.mxu1 %v5577_v6  ;;  %v17383_v46 = vld [vmem:[#allocation214_spill] sm:$0xff] }
 0x82f   : > { %v13251_v61 = vcombine.low %v4800_v60, %v4800_v60  ;;  %v4958_v55 = vsel %vm2443_vm12, %v17381_v44, %v17380_v2  ;;  %v5576_v16 = vpack.c.bf16 %v4888_v30, %v13159_v35  ;;  %v4896_v20 = vmul.f32 %v4863_v25, %v17361_v3  ;;  %v17384_v2 = vld [vmem:[#allocation124_spill] sm:$0xff] }
 0x830   : > { %v5595_v38 = vpack.c.bf16 %v4995_v26, %v4987_v33  ;;  %v4985_v32 = vmul.f32 %v4955_v40, %v17353_v29  ;;  %v4959_v31 = vsel %vm2443_vm12, %v17382_v57, %v4929_v5  ;;  %5901 = vmatpush1.bf16.msra.mxu0 %v5586_v12  ;;  %5778 = vmatmul.mubr.bf16.vlgmr.msra.gmra.mrb[56].mxu1 %v13185_v47  ;;  %v13278_v57 = vpop.permute.xlu1 %5512 }
 0x831   : > { %v5585_v28 = vpack.c.bf16 %v13123_v17, %v4897_v10  ;;  %v4986_v60 = vmul.f32 %v4952_v22, %v17300_v56  ;;  %v5046_v35 = vsel %vm2508_vm13, %v17384_v2, %v17383_v46  ;;  %v5051_v26 = vsel %vm2508_vm13, %v12967_v62, %v13004_v24  ;;  %v4935_v30 = vpop.permute.xlu0 %4934  ;;  %5848 = vmatpush1.bf16.msra.mxu1 %v5576_v16  ;;  %v17389_v46 = vld [vmem:[#allocation231_spill] sm:$0xff] }
 0x832   : > { %5902 = vmatprep.subr.bf16.mxu0 %v5595_v38  ;;  %v5048_v17 = vsel %vm2508_vm13, %v13004_v24, %v17374_v19  ;;  %v4953_v25 = vsel %vm2443_vm12, %v4935_v30, %v17365_v49  ;;  %v4956_v10 = vsel %vm2443_vm12, %v4929_v5, %v4935_v30  ;;  %7419 = vmatprep.mubr.msk.bf16.mxu1 %vm5714_vm7, %v13173_v51  ;;  %v17385_v49 = vld [vmem:[#allocation72_spill] sm:$0xff] }
 0x833   : > { %5849 = vmatprep.subr.bf16.mxu1 %v5585_v28  ;;  %v5584_v6 = vpack.c.bf16 %v13120_v9, %v4896_v20  ;;  %v4992_v33 = vmul.f32 %v4959_v31, %v17352_v59  ;;  %v4993_v14 = vmul.f32 %v4956_v10, %v17353_v29  ;;  %v4994_v24 = vmul.f32 %v4953_v25, %v17300_v56  ;;  %v17386_v9 = vld [vmem:[#allocation109_spill] sm:$0xff]  ;;  %v17390_v25 = vld [vmem:[#allocation15_spill] sm:$0xff] }
 0x834   : > { %5839 = vmatmul.mubr.bf16.gmra.mrb[56].mxu0 %v13251_v61  ;;  %v4984_v19 = vmul.f32 %v4958_v55, %v17352_v59  ;;  %v5054_v40 = vsel %vm2508_vm13, %v17385_v49, %v12967_v62  ;;  %v5081_v5 = vmul.f32 %v5051_v26, %v17378_v39  ;;  %v5603_v22 = vpack.c.bf16 %v5083_v15, %v13032_v4  ;;  %v17387_v62 = vld [vmem:[#allocation103_spill] sm:$0xff]  ;;  %v17388_v15 = vld [vmem:[#allocation130_spill] sm:$0xff]  ;;  %v13331_v26 = vpop.permute.xlu1 %5516 }
 0x835   : > { %7427 = vmatprep.mubr.msk.bf16.mxu0 %vm5714_vm7, %v17386_v9  ;;  %v5082_v12 = vmul.f32 %v5048_v17, %v17329_v50  ;;  %v5052_v44 = vsel %vm2508_vm13, %v13028_v37, %v13196_v0  ;;  %v5594_v55 = vpack.c.bf16 %v4994_v24, %v4986_v60  ;;  %v13306_v16 = vpop.permute.xlu0 %5420  ;;  %5850 = vmatpush1.bf16.msra.mxu1 %v5584_v6  ;;  %v17392_v6 = vld [vmem:[#allocation215_spill] sm:$0xff] }
 0x836   : > { %v5593_v20 = vpack.c.bf16 %v4993_v14, %v4985_v32  ;;  %v5141_v4 = vsel %vm2198_vm2, %v17387_v62, %v12629_v48  ;;  %v5142_v38 = vsel %vm2198_vm2, %v17388_v15, %v12621_v21  ;;  %v5091_v31 = vmul.f32 %v5046_v35, %v17327_v63  ;;  %v17482_v59 = vld [vmem:[#allocation135_spill] sm:$0xff] }
 0x837   : > { %v5049_v28 = vsel %vm2508_vm13, %v13196_v0, %v17384_v2  ;;  %v5080_v60 = vmul.f32 %v5054_v40, %v17369_v42  ;;  %v5146_v32 = vsel %vm2198_vm2, %v13169_v34, %v17332_v54  ;;  %v5592_v48 = vpack.c.bf16 %v4992_v33, %v4984_v19  ;;  %5903 = vmatpush1.bf16.msra.mxu0 %v5594_v55  ;;  %v17393_v40 = vld [vmem:[#allocation211_spill] sm:$0xff] }
 0x838   : > { %5851 = vmatprep.subr.bf16.mxu1 %v5593_v20  ;;  %v5149_v21 = vsel %vm2198_vm2, %v17389_v46, %v13169_v34  ;;  %v5089_v35 = vmul.f32 %v5052_v44, %v17378_v39  ;;  %5904 = vmatprep.subr.bf16.mxu0 %v5603_v22  ;;  %v5601_v0 = vpack.c.bf16 %v5081_v5, %v13238_v18  ;;  %v7511_v34 = vld [vmem:[%s15564_s18 + $0x4] ss:$8 sps:$4 sm:$0xff]   ;;  %v17394_v22 = vld [vmem:[#allocation83_spill] sm:$0xff]  ;;  %v17395_v20 = vld [vmem:[#allocation66_spill] sm:$0xff] }
 0x839   : > { %5788 = vmatmul.mubr.bf16.gmra.mrb[60].mxu1 %v13251_v61  ;;  %v5187_v2 = vmul.f32 %v5142_v38, %v17328_v27  ;;  %v5602_v54 = vpack.c.bf16 %v5082_v12, %v13038_v1  ;;  %v5090_v30 = vmul.f32 %v5049_v28, %v17329_v50  ;;  %v5121_v17 = vpop.permute.xlu0 %5120  ;;  %v5144_v10 = vsel %vm2198_vm2, %v17390_v25, %v17387_v62  ;;  %v17391_v18 = vld [vmem:[#allocation92_spill] sm:$0xff]  ;;  %v5219_v38 = vpop.permute.xlu1 %5218 }
 0x83a   : > { %5852 = vmatpush1.bf16.msra.mxu1 %v5592_v48  ;;  %7424 = vmatprep.mubr.msk.bf16.mxu1 %vm5714_vm7, %v7511_v34  ;;  %v5055_v1 = vsel %vm2508_vm13, %v17391_v18, %v13028_v37  ;;  %v5169_v33 = vmul.f32 %v5146_v32, %v17392_v6  ;;  %v5611_v14 = vpack.c.bf16 %v13035_v43, %v5091_v31  ;;  %v17397_v46 = vld [vmem:[#allocation40_spill] sm:$0xff]  ;;  %v17401_v18 = vld [vmem:[#allocation18_spill] sm:$0xff] }
 0x83b   : > { %5853 = vmatprep.subr.bf16.mxu1 %v5601_v0  ;;  %v5179_v24 = vmul.f32 %v5141_v4, %v17328_v27  ;;  %v5600_v19 = vpack.c.bf16 %v5080_v60, %v13210_v8  ;;  %v5147_v49 = vsel %vm2198_vm2, %v13156_v58, %v17390_v25  ;;  %v5168_v5 = vmul.f32 %v5149_v21, %v17393_v40  ;;  %v17400_v34 = vld [vmem:[#allocation80_spill] sm:$0xff] }
 0x83c   : > { %5905 = vmatpush1.bf16.msra.mxu0 %v5602_v54  ;;  %v5151_v37 = vsel %vm2198_vm2, %v17394_v22, %v5121_v17  ;;  %v5609_v9 = vpack.c.bf16 %v5169_v33, %v5089_v35  ;;  %v5178_v43 = vmul.f32 %v5144_v10, %v17341_v23  ;;  %v5088_v12 = vmul.f32 %v5055_v1, %v17369_v42  ;;  %v17398_v35 = vld [vmem:[#allocation48_spill] sm:$0xff] }
 0x83d   : > { %5906 = vmatprep.subr.bf16.mxu0 %v5611_v14  ;;  %v5610_v8 = vpack.c.bf16 %v13079_v41, %v5090_v30  ;;  %v5127_v44 = vpop.permute.xlu0 %5126  ;;  %v5619_v55 = vpack.c.bf16 %v5187_v2, %v5179_v24  ;;  %v5150_v62 = vsel %vm2198_vm2, %v17395_v20, %v13156_v58  ;;  %v5177_v4 = vmul.f32 %v5147_v49, %v17392_v6  ;;  %v17396_v58 = vld [vmem:[#allocation16_spill] sm:$0xff]  ;;  %v17402_v14 = vld [vmem:[#allocation183_spill] sm:$0xff] }
 0x83e   : > { %5854 = vmatpush1.bf16.msra.mxu1 %v5600_v19  ;;  %v5145_v31 = vsel %vm2198_vm2, %v5127_v44, %v17388_v15  ;;  %v5148_v28 = vsel %vm2198_vm2, %v5121_v17, %v5127_v44  ;;  %v5608_v41 = vpack.c.bf16 %v5168_v5, %v5088_v12  ;;  %v5184_v60 = vmul.f32 %v5151_v37, %v17393_v40  ;;  %v17399_v17 = vld [vmem:[#allocation241_spill] sm:$0xff]  ;;  %v17403_v19 = vld [vmem:[#allocation236_spill] sm:$0xff]  ;;  %v17404_v5 = vld [vmem:[#allocation219_spill] sm:$0xff] }
 0x83f   : > { %5855 = vmatprep.subr.bf16.mxu1 %v5609_v9  ;;  %v5185_v32 = vmul.f32 %v5148_v28, %v17392_v6  ;;  %v5186_v48 = vmul.f32 %v5145_v31, %v17341_v23  ;;  %v5257_v21 = vsel %vm2215_vm5, %v17397_v46, %v17396_v58  ;;  %v5176_v15 = vmul.f32 %v5150_v62, %v17393_v40  ;;  %v17405_v37 = vld [vmem:[#allocation55_spill] sm:$0xff]  ;;  %v17406_v9 = vld [vmem:[#allocation82_spill] sm:$0xff]  ;;  %v17407_v12 = vld [vmem:[#allocation120_spill] sm:$0xff] }
 0x840   : > { %5907 = vmatpush1.bf16.msra.mxu0 %v5610_v8  ;;  %v5239_v0 = vsel %vm2215_vm5, %v5219_v38, %v17398_v35  ;;  %v5627_v25 = vpack.c.bf16 %v17400_v34, %v17399_v17  ;;  %v5236_v10 = vsel %vm2215_vm5, %v17398_v35, %v17397_v46  ;;  %v5259_v1 = vsel %vm2215_vm5, %v17401_v18, %v12419_v45  ;;  %v13409_v8 = vpop.permute.xlu1 %5316  ;;  %v17408_v44 = vld [vmem:[#allocation232_spill] sm:$0xff]  ;;  %v17410_v62 = vld [vmem:[#allocation131_spill] sm:$0xff]  ;;  %v17411_v31 = vld [vmem:[#allocation74_spill] sm:$0xff] }
 0x841   : > { %5908 = vmatprep.subr.bf16.mxu0 %v5619_v55  ;;  %v5618_v2 = vpack.c.bf16 %v5186_v48, %v5178_v43  ;;  %v13386_v54 = vpop.permute.xlu0 %5520  ;;  %v5617_v30 = vpack.c.bf16 %v5185_v32, %v5177_v4  ;;  %v5616_v33 = vpack.c.bf16 %v5184_v60, %v5176_v15  ;;  %v5267_v24 = vmul.f32 %v5257_v21, %v17402_v14  ;;  %v17409_v55 = vld [vmem:[#allocation73_spill] sm:$0xff]  ;;  %v17414_v48 = vld [vmem:[#allocation218_spill] sm:$0xff]  ;;  %v17416_v15 = vld [vmem:[#allocation88_spill] sm:$0xff] }
 0x842   : > { %5856 = vmatpush1.bf16.msra.mxu1 %v5608_v41  ;;  %v5242_v49 = vsel %vm2215_vm5, %v17403_v19, %v5219_v38  ;;  %v5265_v22 = vmul.f32 %v5239_v0, %v17404_v5  ;;  %v5625_v43 = vpack.c.bf16 %v17406_v9, %v17405_v37  ;;  %v5258_v45 = vsel %vm2215_vm5, %v17407_v12, %v17316_v7  ;;  %v17412_v41 = vld [vmem:[#allocation170_spill] sm:$0xff]  ;;  %v17413_v7 = vld [vmem:[#allocation128_spill] sm:$0xff]  ;;  %v17422_v19 = vld [vmem:[#allocation145_spill] sm:$0xff] }
 0x843   : > { %5857 = vmatprep.subr.bf16.mxu1 %v5617_v30  ;;  %v5626_v20 = vpack.c.bf16 %v17409_v55, %v17408_v44  ;;  %v5238_v4 = vsel %vm2215_vm5, %v17410_v62, %v17401_v18  ;;  %v5283_v38 = vmul.f32 %v5259_v1, %v17402_v14  ;;  %v5635_v28 = vpack.c.bf16 %v5267_v24, %v17411_v31  ;;  %v17415_v21 = vld [vmem:[#allocation34_spill] sm:$0xff]  ;;  %v17417_v0 = vld [vmem:[#allocation116_spill] sm:$0xff]  ;;  %v17420_v18 = vld [vmem:[#allocation81_spill] sm:$0xff] }
 0x844   : > { %5909 = vmatpush1.bf16.msra.mxu0 %v5618_v2  ;;  %v5266_v60 = vmul.f32 %v5236_v10, %v17412_v41  ;;  %v5354_v32 = vsel %vm2701_vm14, %v17413_v7, %v17319_v11  ;;  %v5264_v58 = vmul.f32 %v5242_v49, %v17414_v48  ;;  %v5624_v35 = vpack.c.bf16 %v17416_v15, %v17415_v21  ;;  %v17418_v17 = vld [vmem:[#allocation98_spill] sm:$0xff]  ;;  %v17419_v11 = vld [vmem:[#allocation45_spill] sm:$0xff]  ;;  %v13452_v44 = vpop.permute.xlu1 %5410  ;;  %v17430_v21 = vld [vmem:[#allocation180_spill] sm:$0xff] }
 0x845   : > { %5910 = vmatprep.subr.bf16.mxu0 %v5627_v25  ;;  %v13425_v46 = vpop.permute.xlu0 %5514  ;;  %v5237_v2 = vsel %vm2215_vm5, %v17417_v0, %v17407_v12  ;;  %v5275_v30 = vmul.f32 %v5258_v45, %v17402_v14  ;;  %v5633_v34 = vpack.c.bf16 %v5265_v22, %v17418_v17  ;;  %v5353_v25 = vsel %vm2701_vm14, %v17419_v11, %v17315_v53  ;;  %v17423_v9 = vld [vmem:[#allocation33_spill] sm:$0xff] }
 0x846   : > { %5858 = vmatpush1.bf16.msra.mxu1 %v5616_v33  ;;  %v5282_v10 = vmul.f32 %v5238_v4, %v17412_v41  ;;  %v5634_v1 = vpack.c.bf16 %v5266_v60, %v17420_v18  ;;  %v17421_v33 = vld [vmem:[#allocation114_spill] sm:$0xff]  ;;  %v5371_v49 = vmul.f32 %v5354_v32, %v17422_v19  ;;  %v5274_v22 = vmul.f32 %v5237_v2, %v17412_v41  ;;  %v17425_v12 = vld [vmem:[#allocation97_spill] sm:$0xff]  ;;  %v17428_v60 = vld [vmem:[#allocation99_spill] sm:$0xff] }
 0x847   : > { %5859 = vmatprep.subr.bf16.mxu1 %v5625_v43  ;;  %v5333_v24 = vsel %vm2701_vm14, %v17421_v33, %v17413_v7  ;;  %v5643_v37 = vpack.c.bf16 %v5283_v38, %v5275_v30  ;;  %v17424_v43 = vld [vmem:[#allocation176_spill] sm:$0xff]  ;;  %v5632_v45 = vpack.c.bf16 %v5264_v58, %v17425_v12  ;;  %v5363_v55 = vmul.f32 %v5353_v25, %v17422_v19  ;;  %v17427_v38 = vld [vmem:[#allocation194_spill] sm:$0xff]  ;;  %v17433_v17 = vld [vmem:[#allocation177_spill] sm:$0xff] }
 0x848   : > { %5911 = vmatpush1.bf16.msra.mxu0 %v5626_v20  ;;  %v5449_v53 = vsel %vm2766_vm15, %v17424_v43, %v17423_v9  ;;  %v17426_v20 = vld [vmem:[#allocation49_spill] sm:$0xff]  ;;  %v5370_v31 = vmul.f32 %v5333_v24, %v17427_v38  ;;  %v17429_v7 = vld [vmem:[#allocation178_spill] sm:$0xff]  ;;  %v13485_v12 = vpop.permute.xlu1 %5508 }
 0x849   : > { %5912 = vmatprep.subr.bf16.mxu0 %v5635_v28  ;;  %v5332_v4 = vsel %vm2701_vm14, %v17426_v20, %v17419_v11  ;;  %v5642_v28 = vpack.c.bf16 %v5282_v10, %v5274_v22  ;;  %v5355_v32 = vsel %vm2701_vm14, %v17429_v7, %v17428_v60  ;;  %v5523_v58 = vpop.permute.xlu0 %5522  ;;  %v5459_v15 = vmul.f32 %v5449_v53, %v17430_v21  ;;  %v17432_v30 = vld [vmem:[#allocation102_spill] sm:$0xff]  ;;  %v17435_v24 = vld [vmem:[#allocation101_spill] sm:$0xff] }
 0x84a   : > { %5860 = vmatpush1.bf16.msra.mxu1 %v5624_v35  ;;  %v17431_v35 = vld [vmem:[#allocation182_spill] sm:$0xff]  ;;  %v5651_v11 = vpack.c.bf16 %v5371_v49, %v5363_v55  ;;  %v5362_v25 = vmul.f32 %v5332_v4, %v17427_v38  ;;  %v5379_v10 = vmul.f32 %v5355_v32, %v17422_v19  ;;  %v17439_v32 = vld [vmem:[#allocation212_spill] sm:$0xff] }
 0x84b   : > { %5861 = vmatprep.subr.bf16.mxu1 %v5633_v34  ;;  %v5428_v2 = vsel %vm2766_vm15, %v17431_v35, %v17424_v43  ;;  %v5451_v34 = vsel %vm2766_vm15, %v17433_v17, %v17432_v30  ;;  %v17434_v18 = vld [vmem:[#allocation162_spill] sm:$0xff]  ;;  %v17437_v43 = vld [vmem:[#allocation4_spill] sm:$0xff] }
 0x84c   : > { %5913 = vmatpush1.bf16.msra.mxu0 %v5634_v1  ;;  %v5334_v1 = vsel %vm2701_vm14, %v17434_v18, %v17429_v7  ;;  %v5650_v9 = vpack.c.bf16 %v5370_v31, %v5362_v25  ;;  %v5458_v53 = vmul.f32 %v5428_v2, %v17437_v43  ;;  %v5475_v49 = vmul.f32 %v5451_v34, %v17430_v21  ;;  %v17438_v60 = vld [vmem:[#allocation94_spill] sm:$0xff] }
 0x84d   : > { %5914 = vmatprep.subr.bf16.mxu0 %v5643_v37  ;;  %v17436_v37 = vld [vmem:[#allocation166_spill] sm:$0xff]  ;;  %v5659_v55 = vpack.c.bf16 %v5459_v15, %v5379_v10  ;;  %v5378_v4 = vmul.f32 %v5334_v1, %v17427_v38  ;;  %v5546_v31 = vsel %vm2831_vm0, %v13386_v54, %v17438_v60  ;;  %v5221_v7 = vpop.permute.xlu0 %5220 }
 0x84e   : > { %5862 = vmatpush1.bf16.msra.mxu1 %v5632_v45  ;;  %v5450_v22 = vsel %vm2766_vm15, %v17436_v37, %v17435_v24  ;;  %v5430_v45 = vsel %vm2766_vm15, %v13306_v16, %v17433_v17  ;;  %v5429_v2 = vsel %vm2766_vm15, %v17439_v32, %v17436_v37  ;;  %v17440_v17 = vld [vmem:[#allocation29_spill] sm:$0xff]  ;;  %v7512_v10 = vld [vmem:[%s16574_s3 + $0x78] ss:$0 sm:$0xff]  ;;  %v5525_v24 = vsel %vm2831_vm0, %v13425_v46, %v13386_v54 }
 0x84f   : > { %v5658_v30 = vpack.c.bf16 %v5458_v53, %v5378_v4  ;;  %v5545_v15 = vsel %vm2831_vm0, %v13232_v36, %v17440_v17  ;;  %v5474_v34 = vmul.f32 %v5430_v45, %v17437_v43  ;;  %v5563_v1 = vmul.f32 %v7512_v10, %v5546_v31  ;;  %v7513_v54 = vld [vmem:[%s16574_s3 + $0x70] ss:$0 sm:$0xff] }
 0x850   : > { %5915 = vmatpush1.bf16.msra.mxu0 %v5642_v28  ;;  %v5467_v28 = vmul.f32 %v5450_v22, %v17430_v21  ;;  %v5526_v37 = vsel %vm2831_vm0, %v13331_v26, %v5523_v58  ;;  %v17441_v22 = vld [vmem:[#allocation112_spill] sm:$0xff]  ;;  %v5466_v53 = vmul.f32 %v5429_v2, %v17437_v43  ;;  %v5524_v45 = vsel %vm2831_vm0, %v13278_v57, %v13232_v36 }
 0x851   : > { %5916 = vmatprep.subr.bf16.mxu0 %v5651_v11  ;;  %v5562_v4 = vmul.f32 %v7513_v54, %v5525_v24  ;;  %v5315_v31 = vpop.permute.xlu0 %5314  ;;  %v5240_v17 = vsel %vm2215_vm5, %v5221_v7, %v17417_v0 }
 0x852   : > { %v5667_v25 = vpack.c.bf16 %v5475_v49, %v5467_v28  ;;  %v5555_v49 = vmul.f32 %v7512_v10, %v5545_v15  ;;  %v5570_v28 = vmul.f32 %v7513_v54, %v5526_v37  ;;  %v17442_v15 = vld [vmem:[#allocation23_spill] sm:$0xff] }
 0x853   : > { %v5243_v36 = vsel %vm2215_vm5, %v17442_v15, %v5221_v7 }
 0x854   : > { %5917 = vmatpush1.bf16.msra.mxu0 %v5650_v9  ;;  %v5547_v9 = vsel %vm2831_vm0, %v5523_v58, %v17441_v22  ;;  %v5675_v2 = vpack.c.bf16 %v5563_v1, %v5555_v49  ;;  %v5682_v1 = vpack.c.bf16 %v5570_v28, %v5570_v28  ;;  %v5272_v0 = vmul.f32 %v5243_v36, %v17414_v48  ;;  %v17445_v49 = vld [vmem:[#allocation221_spill] sm:$0xff] }
 0x855   : > { %5918 = vmatprep.subr.bf16.mxu0 %v5659_v55  ;;  %v13506_v11 = vpop.permute.xlu1 %5686  ;;  %v5666_v55 = vpack.c.bf16 %v5474_v34, %v5466_v53  ;;  %v5571_v60 = vmul.f32 %v7512_v10, %v5547_v9  ;;  %v5335_v34 = vsel %vm2701_vm14, %v5315_v31, %v17426_v20  ;;  %v5273_v22 = vmul.f32 %v5240_v17, %v17404_v5  ;;  %v17443_v9 = vld [vmem:[#allocation217_spill] sm:$0xff] }
 0x856   : > { %v17444_v53 = vld [vmem:[#allocation161_spill] sm:$0xff]  ;;  %v5740_v15 = vsel %vm2308_vm9, %v5682_v1, 0  ;;  %v17448_v1 = vld [vmem:[#allocation227_spill] sm:$0xff] }
 0x857   : > { %v5683_v24 = vpack.c.bf16 %v5571_v60, %v5571_v60 }
 0x858   : > { %5919 = vmatpush1.bf16.msra.mxu0 %v5658_v30  ;;  %v5554_v30 = vmul.f32 %v7513_v54, %v5524_v45  ;;  %v5361_v45 = vmul.f32 %v5335_v34, %v17445_v49 }
 0x859   : > { %5920 = vmatprep.subr.bf16.mxu0 %v5667_v25  ;;  %v13529_v58 = vpop.permute.xlu1 %5696  ;;  %v5336_v25 = vsel %vm2701_vm14, %v13409_v8, %v17421_v33  ;;  %v5338_v33 = vsel %vm2701_vm14, %v17444_v53, %v5315_v31  ;;  %v17447_v31 = vld [vmem:[#allocation220_spill] sm:$0xff]  ;;  %v17450_v53 = vld [vmem:[#allocation223_spill] sm:$0xff] }
 0x85a   : > { %v5674_v10 = vpack.c.bf16 %v5562_v4, %v5554_v30  ;;  %v5413_v4 = vpop.permute.xlu0 %5412  ;;  %v5369_v60 = vmul.f32 %v5336_v25, %v17445_v49  ;;  %v5360_v17 = vmul.f32 %v5338_v33, %v17447_v31 }
 0x85c   : > { %5921 = vmatpush1.bf16.msra.mxu0 %v5666_v55  ;;  %v5649_v36 = vpack.c.bf16 %v5369_v60, %v5361_v45  ;;  %v5432_v45 = vsel %vm2766_vm15, %v5413_v4, %v17439_v32 }
 0x85d   : > { %5922 = vmatprep.subr.bf16.mxu0 %v5675_v2  ;;  %v5223_v37 = vpop.permute.xlu1 %5222 }
 0x85e   : > { %v5241_v7 = vsel %vm2215_vm5, %v5223_v37, %v17410_v62  ;;  %v5244_v20 = vsel %vm2215_vm5, %v17443_v9, %v5223_v37  ;;  %v17446_v62 = vld [vmem:[#allocation118_spill] sm:$0xff]  ;;  %v5434_v37 = vsel %vm2766_vm15, %v17448_v1, %v13452_v44 }
 0x85f   : > { %v5280_v55 = vmul.f32 %v5244_v20, %v17414_v48  ;;  %v5281_v54 = vmul.f32 %v5241_v7, %v17404_v5  ;;  %v5339_v28 = vsel %vm2701_vm14, %v17446_v62, %v13409_v8  ;;  %v17449_v7 = vld [vmem:[#allocation222_spill] sm:$0xff] }
 0x860   : > { %5923 = vmatpush1.bf16.msra.mxu0 %v5674_v10  ;;  %v5368_v34 = vmul.f32 %v5339_v28, %v17447_v31  ;;  %v5456_v9 = vmul.f32 %v5434_v37, %v17449_v7 }
 0x861   : > { %7426 = vmatprep.subr.msk.bf16.mxu0 %vm2308_vm9, %v5683_v24  ;;  %v5640_v2 = vpack.c.bf16 %v5280_v55, %v5272_v0  ;;  %v5641_v30 = vpack.c.bf16 %v5281_v54, %v5273_v22  ;;  %v5507_v24 = vpop.permute.xlu0 %5506  ;;  %v5415_v8 = vpop.permute.xlu1 %5414  ;;  %v5431_v0 = vsel %vm2766_vm15, %v13452_v44, %v17431_v35  ;;  %v17451_v44 = vld [vmem:[#allocation172_spill] sm:$0xff] }
 0x862   : > { %v5648_v10 = vpack.c.bf16 %v5368_v34, %v5360_v17  ;;  %v5433_v22 = vsel %vm2766_vm15, %v5415_v8, %v13306_v16  ;;  %v5457_v33 = vmul.f32 %v5431_v0, %v17450_v53  ;;  %v17452_v16 = vld [vmem:[#allocation22_spill] sm:$0xff]  ;;  %v5527_v32 = vsel %vm2831_vm0, %v5507_v24, %v13278_v57 }
 0x863   : > { %5863 = vmatprep.subr.bf16.mxu1 %v5641_v30  ;;  %v5436_v54 = vsel %vm2766_vm15, %v17452_v16, %v5415_v8  ;;  %v5473_v62 = vmul.f32 %v5433_v22, %v17450_v53  ;;  %v5465_v30 = vmul.f32 %v5432_v45, %v17450_v53  ;;  %v5528_v34 = vsel %vm2831_vm0, %v13485_v12, %v13425_v46  ;;  %v17454_v8 = vld [vmem:[#allocation225_spill] sm:$0xff]  ;;  %v17455_v46 = vld [vmem:[#allocation202_spill] sm:$0xff]  ;;  %v7515_v45 = vld [vmem:[%s16574_s3 + $0x60] ss:$0 sm:$0xff] }
 0x864   : > { %5925 = vmatpush1.bf16.msra.mxu0 %v5740_v15  ;;  %5864 = vmatpush1.bf16.msra.mxu1 %v5640_v2  ;;  %v17453_v2 = vld [vmem:[#allocation173_spill] sm:$0xff]  ;;  %v5530_v57 = vsel %vm2831_vm0, %v17454_v8, %v5507_v24  ;;  %v17456_v24 = vld [vmem:[#allocation119_spill] sm:$0xff] }
 0x865   : > { %5865 = vmatprep.subr.bf16.mxu1 %v5649_v36  ;;  %v5665_v37 = vpack.c.bf16 %v5473_v62, %v5465_v30 }
 0x867   : > { %5931 = vmatmul.mubr.bf16.vlgmr.msra.gmra.mrb[60].mxu0 %v13185_v47 }
 0x868   : > { %7428 = vmatprep.mubr.msk.bf16.mxu0 %vm5714_vm7, %v13173_v51  ;;  %5866 = vmatpush1.bf16.msra.mxu1 %v5648_v10  ;;  %v5472_v10 = vmul.f32 %v5436_v54, %v17449_v7 }
 0x86a   : > { %v13570_v25 = vpop.permute.xlu0 %5691 }
 0x86e   : > { %v5319_v20 = vpop.permute.xlu0 %5318 }
 0x86f   : > { %5941 = vmatmul.mubr.bf16.gmra.mrb[64].mxu0 %v13251_v61  ;;  %v5337_v55 = vsel %vm2701_vm14, %v5319_v20, %v17434_v18  ;;  %v5340_v35 = vsel %vm2701_vm14, %v17451_v44, %v5319_v20  ;;  %v5435_v18 = vsel %vm2766_vm15, %v17453_v2, %v5413_v4  ;;  %v7514_v4 = vld [vmem:[%s16574_s3 + $0x68] ss:$0 sm:$0xff]  ;;  %v5531_v20 = vsel %vm2831_vm0, %v17456_v24, %v13485_v12 }
 0x870   : > { %v5376_v28 = vmul.f32 %v5340_v35, %v17447_v31  ;;  %v5377_v60 = vmul.f32 %v5337_v55, %v17445_v49  ;;  %v5553_v1 = vmul.f32 %v7514_v4, %v5527_v32  ;;  %v5464_v0 = vmul.f32 %v5435_v18, %v17449_v7 }
 0x871   : > { %v5552_v55 = vmul.f32 %v7515_v45, %v5530_v57  ;;  %v5560_v54 = vmul.f32 %v7515_v45, %v5531_v20 }
 0x872   : > { %v5656_v17 = vpack.c.bf16 %v5456_v9, %v5376_v28  ;;  %v5511_v15 = vpop.permute.xlu0 %5510  ;;  %v5657_v36 = vpack.c.bf16 %v5457_v33, %v5377_v60  ;;  %v5561_v33 = vmul.f32 %v7514_v4, %v5528_v34  ;;  %v5664_v44 = vpack.c.bf16 %v5472_v10, %v5464_v0 }
 0x873   : > { %v5529_v22 = vsel %vm2831_vm0, %v5511_v15, %v13331_v26  ;;  %v5532_v9 = vsel %vm2831_vm0, %v17455_v46, %v5511_v15  ;;  %v5672_v62 = vpack.c.bf16 %v5560_v54, %v5552_v55 }
 0x874   : > { %5867 = vmatprep.subr.bf16.mxu1 %v5657_v36  ;;  %v5568_v35 = vmul.f32 %v7515_v45, %v5532_v9  ;;  %v5569_v26 = vmul.f32 %v7514_v4, %v5529_v22  ;;  %v5673_v16 = vpack.c.bf16 %v5561_v33, %v5553_v1 }
 0x875   : > { %5868 = vmatpush1.bf16.msra.mxu1 %v5656_v17 }
 0x876   : > { %5869 = vmatprep.subr.bf16.mxu1 %v5665_v37  ;;  %v5680_v28 = vpack.c.bf16 %v5568_v35, %v5568_v35  ;;  %v5681_v60 = vpack.c.bf16 %v5569_v26, %v5569_v26 }
 0x878   : > { %v5734_v12 = vsel %vm2308_vm9, %v5680_v28, 0 }
 0x879   : > { %5870 = vmatpush1.bf16.msra.mxu1 %v5664_v44 }
 0x87a   : > { %5871 = vmatprep.subr.bf16.mxu1 %v5673_v16 }
 0x87d   : > { %5872 = vmatpush1.bf16.msra.mxu1 %v5672_v62 }
 0x87e   : > { %7423 = vmatprep.subr.msk.bf16.mxu1 %vm2308_vm9, %v5681_v60 }
 0x881   : > { %5874 = vmatpush1.bf16.msra.mxu1 %v5734_v12 }
 0x884   : > { %5880 = vmatmul.mubr.bf16.vlgmr.msra.gmra.mrb[64].mxu1 %v13185_v47 }
 0x885   : > { %7425 = vmatprep.mubr.msk.bf16.mxu1 %vm5714_vm7, %v13173_v51 }
 0x88c   : > { %5890 = vmatmul.mubr.bf16.gmra.mrb[68].mxu1 %v13251_v61 }
 0x8fe   : > { %v5830_v32 = vpop.f32.mrb[52].mxu0 }
 0x8ff   : > { %v13640_v2 = vadd.f32 %v5830_v32, %v13506_v11  ;;  %v5832_v18 = vpop.f32.mrb[53].mxu0 }
 0x900   : > { %v5834_v30 = vpop.f32.mrb[54].mxu0  ;;  %v13650_v51 = vadd.f32 %v5832_v18, %v13506_v11 }
 0x901   : > { %v13643_v17 = vadd.f32 %v5834_v30, %v13570_v25  ;;  %v5836_v15 = vpop.f32.mrb[55].mxu0  ;;  %6347 = vrot.lane.b32.xlu1 %v13640_v2, %s16560_s4  ;;  %5963 = vrot.lane.b32.xlu0 %v13640_v2, %s16551_s21 }
 0x902   : > { %v13653_v47 = vadd.f32 %v5836_v15, %v13570_v25 }
 0x903   : > { %v13655_v61 = vpop.f32.mrb[56].mxu1 }
 0x904   : > { %v13659_v34 = vpop.f32.mrb[57].mxu1  ;;  %v13791_v18 = vadd.f32 %v13655_v61, %v13506_v11 }
 0x905   : > { %6443 = vrot.lane.b32.xlu1 %v13640_v2, %s16600_s28  ;;  %6059 = vrot.lane.b32.xlu0 %v13640_v2, %s16552_s5  ;;  %v13667_v8 = vpop.f32.mrb[58].mxu1  ;;  %v13807_v61 = vadd.f32 %v13659_v34, %v13506_v11 }
 0x906   : > { %v13669_v4 = vpop.f32.mrb[59].mxu1  ;;  %17459 = vst [vmem:[#allocation26_spill] sm:$0xff] %v13791_v18 }
 0x907   : > { %v5840_v57 = vpop.f32.mrb[56].mxu0  ;;  %17460 = vst [vmem:[#allocation30_spill] sm:$0xff] %v13807_v61  ;;  %v13875_v7 = vadd.f32 %v13669_v4, %v13570_v25 }
 0x908   : > { %v5842_v1 = vpop.f32.mrb[57].mxu0  ;;  %v13740_v44 = vadd.f32 %v5840_v57, %v13529_v58 }
 0x909   : > { %v5844_v37 = vpop.f32.mrb[58].mxu0  ;;  %6635 = vrot.lane.b32.xlu1 %v13640_v2, %s16579_s24  ;;  %6155 = vrot.lane.b32.xlu0 %v13640_v2, %s16660_s0  ;;  %v13759_v62 = vadd.f32 %v5842_v1, %v13529_v58  ;;  %17470 = vst [vmem:[#allocation31_spill] sm:$0xff] %v13875_v7 }
 0x90a   : > { %v5845_v0 = vpop.f32.mrb[59].mxu0  ;;  %17457 = vst [vmem:[#allocation174_spill] sm:$0xff] %v13740_v44 }
 0x90b   : > { %17458 = vst [vmem:[#allocation27_spill] sm:$0xff] %v13759_v62 }
 0x90c   : > { %v13675_v22 = vpop.f32.mrb[60].mxu1 }
 0x90d   : > { %v13677_v46 = vpop.f32.mrb[61].mxu1  ;;  %6065 = vrot.lane.b32.xlu1 %v13650_v51, %s16552_s5  ;;  %6251 = vrot.lane.b32.xlu0 %v13640_v2, %s16655_s2  ;;  %v13911_v41 = vadd.f32 %v13675_v22, %v13529_v58 }
 0x90e   : > { %v5793_v9 = vpop.f32.mrb[62].mxu1 }
 0x90f   : > { %v5794_v24 = vpop.f32.mrb[63].mxu1  ;;  %17475 = vst [vmem:[#allocation233_spill] sm:$0xff] %v13911_v41 }
 0x910   : > { %v13839_v24 = vadd.f32 %v13667_v8, %v13570_v25 }
 0x911   : > { %6257 = vrot.lane.b32.xlu1 %v13650_v51, %s16655_s2  ;;  %6539 = vrot.lane.b32.xlu0 %v13640_v2, %s16563_s27 }
 0x912   : > { %17463 = vst [vmem:[#allocation47_spill] sm:$0xff] %v13839_v24 }
 0x915   : > { %6449 = vrot.lane.b32.xlu1 %v13650_v51, %s16600_s28  ;;  %5969 = vrot.lane.b32.xlu0 %v13650_v51, %s16551_s21 }
 0x919   : > { %6545 = vrot.lane.b32.xlu1 %v13650_v51, %s16563_s27  ;;  %6161 = vrot.lane.b32.xlu0 %v13650_v51, %s16660_s0 }
 0x91d   : > { %6641 = vrot.lane.b32.xlu1 %v13650_v51, %s16579_s24  ;;  %6353 = vrot.lane.b32.xlu0 %v13650_v51, %s16560_s4 }
 0x921   : > { %6061 = vrot.lane.b32.xlu0 %v13643_v17, %s16552_s5  ;;  %5965 = vrot.lane.b32.xlu1 %v13643_v17, %s16551_s21 }
 0x925   : > { %6253 = vrot.lane.b32.xlu0 %v13643_v17, %s16655_s2  ;;  %6157 = vrot.lane.b32.xlu1 %v13643_v17, %s16660_s0 }
 0x929   : > { %6445 = vrot.lane.b32.xlu0 %v13643_v17, %s16600_s28  ;;  %6349 = vrot.lane.b32.xlu1 %v13643_v17, %s16560_s4 }
 0x92d   : > { %6637 = vrot.lane.b32.xlu0 %v13643_v17, %s16579_s24  ;;  %6541 = vrot.lane.b32.xlu1 %v13643_v17, %s16563_s27 }
 0x931   : > { %6067 = vrot.lane.b32.xlu0 %v13653_v47, %s16552_s5  ;;  %5971 = vrot.lane.b32.xlu1 %v13653_v47, %s16551_s21 }
 0x935   : > { %6259 = vrot.lane.b32.xlu0 %v13653_v47, %s16655_s2  ;;  %6163 = vrot.lane.b32.xlu1 %v13653_v47, %s16660_s0 }
 0x939   : > { %6451 = vrot.lane.b32.xlu0 %v13653_v47, %s16600_s28  ;;  %6355 = vrot.lane.b32.xlu1 %v13653_v47, %s16560_s4 }
 0x93a   : > { %v13723_v20 = vpop.f32.mrb[60].mxu0 }
 0x93b   : > { %v13729_v33 = vpop.f32.mrb[61].mxu0 }
 0x93c   : > { %v13731_v45 = vpop.f32.mrb[62].mxu0 }
 0x93d   : > { %v13733_v55 = vpop.f32.mrb[63].mxu0  ;;  %6643 = vrot.lane.b32.xlu0 %v13653_v47, %s16579_s24  ;;  %6547 = vrot.lane.b32.xlu1 %v13653_v47, %s16563_s27 }
 0x941   : > { %5967 = vrot.lane.b32.xlu0 %v13740_v44, %s16551_s21  ;;  %6063 = vrot.lane.b32.xlu1 %v13740_v44, %s16552_s5 }
 0x942   : > { %v13742_v35 = vpop.f32.mrb[64].mxu0 }
 0x943   : > { %v13748_v26 = vpop.f32.mrb[65].mxu0 }
 0x944   : > { %v5946_v16 = vpop.f32.mrb[66].mxu0 }
 0x945   : > { %v5947_v54 = vpop.f32.mrb[67].mxu0  ;;  %6159 = vrot.lane.b32.xlu0 %v13740_v44, %s16660_s0  ;;  %6255 = vrot.lane.b32.xlu1 %v13740_v44, %s16655_s2 }
 0x949   : > { %6351 = vrot.lane.b32.xlu0 %v13740_v44, %s16560_s4  ;;  %6639 = vrot.lane.b32.xlu1 %v13740_v44, %s16579_s24 }
 0x94d   : > { %6447 = vrot.lane.b32.xlu0 %v13740_v44, %s16600_s28  ;;  %5973 = vrot.lane.b32.xlu1 %v13759_v62, %s16551_s21 }
 0x951   : > { %6543 = vrot.lane.b32.xlu0 %v13740_v44, %s16563_s27  ;;  %6069 = vrot.lane.b32.xlu1 %v13759_v62, %s16552_s5 }
 0x955   : > { %6357 = vrot.lane.b32.xlu0 %v13759_v62, %s16560_s4  ;;  %6165 = vrot.lane.b32.xlu1 %v13759_v62, %s16660_s0 }
 0x957   : > { %v13773_v28 = vpop.f32.mrb[64].mxu1 }
 0x958   : > { %v13775_v60 = vpop.f32.mrb[65].mxu1 }
 0x959   : > { %6549 = vrot.lane.b32.xlu0 %v13759_v62, %s16563_s27  ;;  %6261 = vrot.lane.b32.xlu1 %v13759_v62, %s16655_s2  ;;  %v13781_v12 = vpop.f32.mrb[66].mxu1 }
 0x95a   : > { %v13783_v32 = vpop.f32.mrb[67].mxu1 }
 0x95d   : > { %6645 = vrot.lane.b32.xlu0 %v13759_v62, %s16579_s24  ;;  %6453 = vrot.lane.b32.xlu1 %v13759_v62, %s16600_s28 }
 0x95f   : > { %v13793_v30 = vpop.f32.mrb[68].mxu1 }
 0x960   : > { %v13795_v15 = vpop.f32.mrb[69].mxu1 }
 0x961   : > { %5951 = vrot.lane.b32.xlu0 %v13791_v18, %s16551_s21  ;;  %6431 = vrot.lane.b32.xlu1 %v13791_v18, %s16600_s28  ;;  %v5895_v57 = vpop.f32.mrb[70].mxu1 }
 0x962   : > { %v5896_v1 = vpop.f32.mrb[71].mxu1 }
 0x965   : > { %6047 = vrot.lane.b32.xlu0 %v13791_v18, %s16552_s5  ;;  %6623 = vrot.lane.b32.xlu1 %v13791_v18, %s16579_s24 }
 0x969   : > { %6143 = vrot.lane.b32.xlu0 %v13791_v18, %s16660_s0  ;;  %6053 = vrot.lane.b32.xlu1 %v13807_v61, %s16552_s5 }
 0x96d   : > { %6239 = vrot.lane.b32.xlu0 %v13791_v18, %s16655_s2  ;;  %6245 = vrot.lane.b32.xlu1 %v13807_v61, %s16655_s2 }
 0x971   : > { %6335 = vrot.lane.b32.xlu0 %v13791_v18, %s16560_s4  ;;  %6437 = vrot.lane.b32.xlu1 %v13807_v61, %s16600_s28 }
 0x973   : > { %v13821_v34 = vpop.permute.xlu1 %6347  ;;  %v13823_v37 = vpop.permute.xlu0 %5963 }
 0x974   : > { %17461 = vst [vmem:[#allocation229_spill] sm:$0xff] %v13821_v34 }
 0x975   : > { %6527 = vrot.lane.b32.xlu0 %v13791_v18, %s16563_s27  ;;  %6533 = vrot.lane.b32.xlu1 %v13807_v61, %s16563_s27 }
 0x977   : > { %v13829_v0 = vpop.permute.xlu1 %6443  ;;  %v13831_v9 = vpop.permute.xlu0 %6059 }
 0x978   : > { %17462 = vst [vmem:[#allocation239_spill] sm:$0xff] %v13829_v0 }
 0x979   : > { %5957 = vrot.lane.b32.xlu0 %v13807_v61, %s16551_s21  ;;  %6629 = vrot.lane.b32.xlu1 %v13807_v61, %s16579_s24 }
 0x97b   : > { %v13841_v16 = vpop.permute.xlu1 %6635  ;;  %v13843_v54 = vpop.permute.xlu0 %6155 }
 0x97c   : > { %17464 = vst [vmem:[#allocation244_spill] sm:$0xff] %v13841_v16 }
 0x97d   : > { %6149 = vrot.lane.b32.xlu0 %v13807_v61, %s16660_s0  ;;  %5953 = vrot.lane.b32.xlu1 %v13839_v24, %s16551_s21 }
 0x97f   : > { %v13849_v57 = vpop.permute.xlu1 %6065  ;;  %v13851_v1 = vpop.permute.xlu0 %6251 }
 0x980   : > { %17465 = vst [vmem:[#allocation50_spill] sm:$0xff] %v13849_v57 }
 0x981   : > { %6341 = vrot.lane.b32.xlu0 %v13807_v61, %s16560_s4  ;;  %6145 = vrot.lane.b32.xlu1 %v13839_v24, %s16660_s0 }
 0x983   : > { %v13857_v8 = vpop.permute.xlu1 %6257  ;;  %v13859_v36 = vpop.permute.xlu0 %6539 }
 0x984   : > { %17466 = vst [vmem:[#allocation240_spill] sm:$0xff] %v13857_v8  ;;  %17467 = vst [vmem:[#allocation8_spill] sm:$0xff] %v13859_v36 }
 0x985   : > { %6049 = vrot.lane.b32.xlu0 %v13839_v24, %s16552_s5  ;;  %6337 = vrot.lane.b32.xlu1 %v13839_v24, %s16560_s4 }
 0x987   : > { %v13865_v10 = vpop.permute.xlu1 %6449  ;;  %v13867_v53 = vpop.permute.xlu0 %5969 }
 0x988   : > { %17468 = vst [vmem:[#allocation203_spill] sm:$0xff] %v13865_v10  ;;  %17469 = vst [vmem:[#allocation228_spill] sm:$0xff] %v13867_v53  ;;  %v6011_v22 = vsel %vm2378_vm11, %v13823_v37, %v13867_v53  ;;  %v14001_v53 = vadd.f32 %v13723_v20, %v13506_v11  ;;  %v14021_v20 = vadd.f32 %v13729_v33, %v13506_v11 }
 0x989   : > { %6241 = vrot.lane.b32.xlu0 %v13839_v24, %s16655_s2  ;;  %6529 = vrot.lane.b32.xlu1 %v13839_v24, %s16563_s27  ;;  %v6026_v56 = vmul.f32 %v6011_v22, %v17482_v59 }
 0x98a   : > { %17492 = vst [vmem:[#allocation10_spill] sm:$0xff] %v14001_v53  ;;  %17497 = vst [vmem:[#allocation11_spill] sm:$0xff] %v14021_v20 }
 0x98b   : > { %v13877_v21 = vpop.permute.xlu1 %6545  ;;  %v13879_v43 = vpop.permute.xlu0 %6161 }
 0x98c   : > { %17471 = vst [vmem:[#allocation51_spill] sm:$0xff] %v13877_v21  ;;  %17472 = vst [vmem:[#allocation165_spill] sm:$0xff] %v13879_v43 }
 0x98d   : > { %6433 = vrot.lane.b32.xlu0 %v13839_v24, %s16600_s28  ;;  %5959 = vrot.lane.b32.xlu1 %v13875_v7, %s16551_s21 }
 0x98f   : > { %v13885_v38 = vpop.permute.xlu1 %6641  ;;  %v13887_v19 = vpop.permute.xlu0 %6353 }
 0x990   : > { %17473 = vst [vmem:[#allocation6_spill] sm:$0xff] %v13885_v38  ;;  %17474 = vst [vmem:[#allocation54_spill] sm:$0xff] %v13887_v19  ;;  %v17523_v19 = vld [vmem:[#allocation179_spill] sm:$0xff] }
 0x991   : > { %6625 = vrot.lane.b32.xlu0 %v13839_v24, %s16579_s24  ;;  %6151 = vrot.lane.b32.xlu1 %v13875_v7, %s16660_s0 }
 0x993   : > { %v13893_v4 = vpop.permute.xlu1 %5965  ;;  %v13895_v49 = vpop.permute.xlu0 %6061 }
 0x995   : > { %6055 = vrot.lane.b32.xlu0 %v13875_v7, %s16552_s5  ;;  %6343 = vrot.lane.b32.xlu1 %v13875_v7, %s16560_s4 }
 0x997   : > { %v13901_v48 = vpop.permute.xlu1 %6157  ;;  %v13903_v14 = vpop.permute.xlu0 %6253 }
 0x999   : > { %6247 = vrot.lane.b32.xlu0 %v13875_v7, %s16655_s2  ;;  %6535 = vrot.lane.b32.xlu1 %v13875_v7, %s16563_s27 }
 0x99b   : > { %v13913_v23 = vpop.permute.xlu1 %6349  ;;  %v13915_v6 = vpop.permute.xlu0 %6445 }
 0x99c   : > { %17476 = vst [vmem:[#allocation38_spill] sm:$0xff] %v13913_v23  ;;  %17477 = vst [vmem:[#allocation243_spill] sm:$0xff] %v13915_v6 }
 0x99d   : > { %6439 = vrot.lane.b32.xlu0 %v13875_v7, %s16600_s28  ;;  %6051 = vrot.lane.b32.xlu1 %v13911_v41, %s16552_s5 }
 0x99f   : > { %v13921_v40 = vpop.permute.xlu1 %6541  ;;  %v13923_v50 = vpop.permute.xlu0 %6637 }
 0x9a0   : > { %17478 = vst [vmem:[#allocation168_spill] sm:$0xff] %v13921_v40  ;;  %17479 = vst [vmem:[#allocation7_spill] sm:$0xff] %v13923_v50 }
 0x9a1   : > { %6631 = vrot.lane.b32.xlu0 %v13875_v7, %s16579_s24  ;;  %6243 = vrot.lane.b32.xlu1 %v13911_v41, %s16655_s2 }
 0x9a3   : > { %v13933_v42 = vpop.permute.xlu1 %5971  ;;  %v13935_v39 = vpop.permute.xlu0 %6067 }
 0x9a4   : > { %17480 = vst [vmem:[#allocation42_spill] sm:$0xff] %v13933_v42  ;;  %17481 = vst [vmem:[#allocation235_spill] sm:$0xff] %v13935_v39  ;;  %v6012_v29 = vsel %vm2378_vm11, %v13893_v4, %v13933_v42 }
 0x9a5   : > { %v6034_v31 = vmul.f32 %v6012_v29, %v17482_v59  ;;  %5955 = vrot.lane.b32.xlu0 %v13911_v41, %s16551_s21  ;;  %6435 = vrot.lane.b32.xlu1 %v13911_v41, %s16600_s28  ;;  %v13957_v29 = vadd.f32 %v13677_v46, %v13529_v58 }
 0x9a7   : > { %v13947_v38 = vpop.permute.xlu1 %6163  ;;  %v13949_v21 = vpop.permute.xlu0 %6259  ;;  %v6722_v10 = vpack.c.bf16 %v6034_v31, %v6026_v56  ;;  %17485 = vst [vmem:[#allocation35_spill] sm:$0xff] %v13957_v29 }
 0x9a8   : > { %17483 = vst [vmem:[#allocation216_spill] sm:$0xff] %v13947_v38  ;;  %17484 = vst [vmem:[#allocation155_spill] sm:$0xff] %v13949_v21 }
 0x9a9   : > { %6147 = vrot.lane.b32.xlu0 %v13911_v41, %s16660_s0  ;;  %6627 = vrot.lane.b32.xlu1 %v13911_v41, %s16579_s24 }
 0x9aa   : > { %6932 = vmatprep.subr.bf16.mxu0 %v6722_v10 }
 0x9ab   : > { %v13959_v22 = vpop.permute.xlu1 %6355  ;;  %v13961_v3 = vpop.permute.xlu0 %6451 }
 0x9ac   : > { %17486 = vst [vmem:[#allocation238_spill] sm:$0xff] %v13959_v22  ;;  %17487 = vst [vmem:[#allocation39_spill] sm:$0xff] %v13961_v3 }
 0x9ad   : > { %6339 = vrot.lane.b32.xlu0 %v13911_v41, %s16560_s4  ;;  %5961 = vrot.lane.b32.xlu1 %v13957_v29, %s16551_s21 }
 0x9af   : > { %v13967_v56 = vpop.permute.xlu1 %6547  ;;  %v13969_v31 = vpop.permute.xlu0 %6643 }
 0x9b0   : > { %17488 = vst [vmem:[#allocation230_spill] sm:$0xff] %v13967_v56  ;;  %17489 = vst [vmem:[#allocation58_spill] sm:$0xff] %v13969_v31 }
 0x9b1   : > { %6531 = vrot.lane.b32.xlu0 %v13911_v41, %s16563_s27  ;;  %6057 = vrot.lane.b32.xlu1 %v13957_v29, %s16552_s5 }
 0x9b3   : > { %v13975_v10 = vpop.permute.xlu1 %6063  ;;  %v13977_v46 = vpop.permute.xlu0 %5967 }
 0x9b5   : > { %6345 = vrot.lane.b32.xlu0 %v13957_v29, %s16560_s4  ;;  %6153 = vrot.lane.b32.xlu1 %v13957_v29, %s16660_s0 }
 0x9b7   : > { %v13983_v3 = vpop.permute.xlu1 %6255  ;;  %v13985_v56 = vpop.permute.xlu0 %6159 }
 0x9b9   : > { %6537 = vrot.lane.b32.xlu0 %v13957_v29, %s16563_s27  ;;  %6249 = vrot.lane.b32.xlu1 %v13957_v29, %s16655_s2 }
 0x9bb   : > { %v13991_v31 = vpop.permute.xlu1 %6639  ;;  %v13993_v22 = vpop.permute.xlu0 %6351 }
 0x9bc   : > { %17490 = vst [vmem:[#allocation43_spill] sm:$0xff] %v13991_v31  ;;  %17491 = vst [vmem:[#allocation46_spill] sm:$0xff] %v13993_v22 }
 0x9bd   : > { %6441 = vrot.lane.b32.xlu1 %v13957_v29, %s16600_s28  ;;  %6633 = vrot.lane.b32.xlu0 %v13957_v29, %s16579_s24 }
 0x9bf   : > { %v14003_v42 = vpop.permute.xlu1 %5973  ;;  %v14005_v16 = vpop.permute.xlu0 %6447 }
 0x9c0   : > { %17493 = vst [vmem:[#allocation186_spill] sm:$0xff] %v14003_v42  ;;  %17494 = vst [vmem:[#allocation209_spill] sm:$0xff] %v14005_v16 }
 0x9c1   : > { %6083 = vrot.lane.b32.xlu1 %v14001_v53, %s16552_s5  ;;  %5987 = vrot.lane.b32.xlu0 %v14001_v53, %s16551_s21 }
 0x9c3   : > { %v14011_v31 = vpop.permute.xlu1 %6069  ;;  %v14013_v5 = vpop.permute.xlu0 %6543 }
 0x9c4   : > { %17495 = vst [vmem:[#allocation187_spill] sm:$0xff] %v14011_v31  ;;  %17496 = vst [vmem:[#allocation207_spill] sm:$0xff] %v14013_v5 }
 0x9c5   : > { %6275 = vrot.lane.b32.xlu1 %v14001_v53, %s16655_s2  ;;  %6179 = vrot.lane.b32.xlu0 %v14001_v53, %s16660_s0 }
 0x9c7   : > { %v14023_v50 = vpop.permute.xlu1 %6165  ;;  %v14025_v40 = vpop.permute.xlu0 %6357 }
 0x9c8   : > { %17498 = vst [vmem:[#allocation59_spill] sm:$0xff] %v14023_v50  ;;  %17499 = vst [vmem:[#allocation237_spill] sm:$0xff] %v14025_v40  ;;  %v14049_v40 = vadd.f32 %v13731_v45, %v13570_v25  ;;  %v14069_v45 = vadd.f32 %v13733_v55, %v13570_v25  ;;  %v14089_v55 = vadd.f32 %v13742_v35, %v13529_v58 }
 0x9c9   : > { %6371 = vrot.lane.b32.xlu1 %v14001_v53, %s16560_s4  ;;  %5993 = vrot.lane.b32.xlu0 %v14021_v20, %s16551_s21 }
 0x9ca   : > { %17504 = vst [vmem:[#allocation62_spill] sm:$0xff] %v14049_v40  ;;  %17507 = vst [vmem:[#allocation171_spill] sm:$0xff] %v14069_v45 }
 0x9cb   : > { %v14031_v5 = vpop.permute.xlu1 %6261  ;;  %v14033_v36 = vpop.permute.xlu0 %6549  ;;  %17509 = vst [vmem:[#allocation87_spill] sm:$0xff] %v14089_v55 }
 0x9cc   : > { %17500 = vst [vmem:[#allocation5_spill] sm:$0xff] %v14031_v5  ;;  %17501 = vst [vmem:[#allocation154_spill] sm:$0xff] %v14033_v36 }
 0x9cd   : > { %6089 = vrot.lane.b32.xlu1 %v14021_v20, %s16552_s5  ;;  %6185 = vrot.lane.b32.xlu0 %v14021_v20, %s16660_s0 }
 0x9cf   : > { %v14039_v33 = vpop.permute.xlu1 %6453  ;;  %v14041_v16 = vpop.permute.xlu0 %6645 }
 0x9d0   : > { %17502 = vst [vmem:[#allocation63_spill] sm:$0xff] %v14039_v33  ;;  %17503 = vst [vmem:[#allocation149_spill] sm:$0xff] %v14041_v16 }
 0x9d1   : > { %6281 = vrot.lane.b32.xlu1 %v14021_v20, %s16655_s2  ;;  %6377 = vrot.lane.b32.xlu0 %v14021_v20, %s16560_s4 }
 0x9d3   : > { %v14051_v36 = vpop.permute.xlu1 %6431  ;;  %v14053_v41 = vpop.permute.xlu0 %5951 }
 0x9d4   : > { %17505 = vst [vmem:[#allocation160_spill] sm:$0xff] %v14051_v36 }
 0x9d5   : > { %5989 = vrot.lane.b32.xlu1 %v14049_v40, %s16551_s21  ;;  %6085 = vrot.lane.b32.xlu0 %v14049_v40, %s16552_s5 }
 0x9d7   : > { %v14059_v16 = vpop.permute.xlu1 %6623  ;;  %v14061_v33 = vpop.permute.xlu0 %6047 }
 0x9d8   : > { %17506 = vst [vmem:[#allocation90_spill] sm:$0xff] %v14059_v16 }
 0x9d9   : > { %6181 = vrot.lane.b32.xlu1 %v14049_v40, %s16660_s0  ;;  %6277 = vrot.lane.b32.xlu0 %v14049_v40, %s16655_s2 }
 0x9db   : > { %v14071_v36 = vpop.permute.xlu1 %6053  ;;  %v14073_v0 = vpop.permute.xlu0 %6143 }
 0x9dd   : > { %6373 = vrot.lane.b32.xlu1 %v14049_v40, %s16560_s4  ;;  %6091 = vrot.lane.b32.xlu0 %v14069_v45, %s16552_s5 }
 0x9df   : > { %v14079_v16 = vpop.permute.xlu1 %6245  ;;  %v14081_v6 = vpop.permute.xlu0 %6239 }
 0x9e0   : > { %17508 = vst [vmem:[#allocation234_spill] sm:$0xff] %v14081_v6 }
 0x9e1   : > { %5995 = vrot.lane.b32.xlu1 %v14069_v45, %s16551_s21  ;;  %6283 = vrot.lane.b32.xlu0 %v14069_v45, %s16655_s2 }
 0x9e3   : > { %v14091_v29 = vpop.permute.xlu1 %6437  ;;  %v14093_v24 = vpop.permute.xlu0 %6335 }
 0x9e4   : > { %17510 = vst [vmem:[#allocation152_spill] sm:$0xff] %v14091_v29  ;;  %17511 = vst [vmem:[#allocation169_spill] sm:$0xff] %v14093_v24  ;;  %v14139_v24 = vadd.f32 %v13773_v28, %v13506_v11 }
 0x9e5   : > { %6187 = vrot.lane.b32.xlu1 %v14069_v45, %s16660_s0  ;;  %5991 = vrot.lane.b32.xlu0 %v14089_v55, %s16551_s21 }
 0x9e6   : > { %17519 = vst [vmem:[#allocation60_spill] sm:$0xff] %v14139_v24 }
 0x9e7   : > { %v14099_v18 = vpop.permute.xlu1 %6533  ;;  %v14101_v23 = vpop.permute.xlu0 %6527 }
 0x9e8   : > { %17512 = vst [vmem:[#allocation224_spill] sm:$0xff] %v14099_v18  ;;  %17513 = vst [vmem:[#allocation20_spill] sm:$0xff] %v14101_v23  ;;  %v14119_v23 = vadd.f32 %v13748_v26, %v13529_v58 }
 0x9e9   : > { %6379 = vrot.lane.b32.xlu1 %v14069_v45, %s16560_s4  ;;  %6183 = vrot.lane.b32.xlu0 %v14089_v55, %s16660_s0 }
 0x9ea   : > { %17515 = vst [vmem:[#allocation85_spill] sm:$0xff] %v14119_v23 }
 0x9eb   : > { %v14107_v35 = vpop.permute.xlu1 %6629  ;;  %v5958_v29 = vpop.permute.xlu0 %5957 }
 0x9ec   : > { %17514 = vst [vmem:[#allocation79_spill] sm:$0xff] %v14107_v35  ;;  %v6014_v28 = vsel %vm2378_vm11, %v5958_v29, %v13823_v37  ;;  %v6017_v62 = vsel %vm2378_vm11, %v14053_v41, %v5958_v29 }
 0x9ed   : > { %6087 = vrot.lane.b32.xlu1 %v14089_v55, %s16552_s5  ;;  %6375 = vrot.lane.b32.xlu0 %v14089_v55, %s16560_s4  ;;  %v6024_v27 = vmul.f32 %v6017_v62, %v17523_v19  ;;  %v6025_v6 = vmul.f32 %v6014_v28, %v17524_v52  ;;  %v14191_v28 = vadd.f32 %v13775_v60, %v13506_v11 }
 0x9ef   : > { %v14113_v22 = vpop.permute.xlu1 %5953  ;;  %v14115_v18 = vpop.permute.xlu0 %6149  ;;  %17527 = vst [vmem:[#allocation9_spill] sm:$0xff] %v14191_v28 }
 0x9f1   : > { %6279 = vrot.lane.b32.xlu1 %v14089_v55, %s16655_s2  ;;  %5997 = vrot.lane.b32.xlu0 %v14119_v23, %s16551_s21 }
 0x9f3   : > { %v14125_v35 = vpop.permute.xlu1 %6145  ;;  %v14127_v7 = vpop.permute.xlu0 %6341 }
 0x9f4   : > { %17516 = vst [vmem:[#allocation164_spill] sm:$0xff] %v14125_v35  ;;  %17517 = vst [vmem:[#allocation24_spill] sm:$0xff] %v14127_v7 }
 0x9f5   : > { %6093 = vrot.lane.b32.xlu1 %v14119_v23, %s16552_s5  ;;  %6189 = vrot.lane.b32.xlu0 %v14119_v23, %s16660_s0 }
 0x9f7   : > { %v14133_v61 = vpop.permute.xlu1 %6337  ;;  %v14135_v26 = vpop.permute.xlu0 %6049 }
 0x9f8   : > { %17518 = vst [vmem:[#allocation76_spill] sm:$0xff] %v14133_v61  ;;  %v6013_v61 = vsel %vm2378_vm11, %v13977_v46, %v14003_v42  ;;  %v6107_v42 = vsel %vm2443_vm12, %v13831_v9, %v13849_v57 }
 0x9f9   : > { %6285 = vrot.lane.b32.xlu1 %v14119_v23, %s16655_s2  ;;  %6551 = vrot.lane.b32.xlu0 %v14139_v24, %s16563_s27  ;;  %v6042_v34 = vmul.f32 %v6013_v61, %v17482_v59  ;;  %v17525_v59 = vld [vmem:[#allocation133_spill] sm:$0xff] }
 0x9fa   : > { %v6122_v61 = vmul.f32 %v6107_v42, %v17525_v59 }
 0x9fb   : > { %v14145_v7 = vpop.permute.xlu1 %6529  ;;  %v14147_v44 = vpop.permute.xlu0 %6241 }
 0x9fc   : > { %17520 = vst [vmem:[#allocation67_spill] sm:$0xff] %v14145_v7  ;;  %17521 = vst [vmem:[#allocation91_spill] sm:$0xff] %v14147_v44 }
 0x9fd   : > { %6359 = vrot.lane.b32.xlu1 %v14139_v24, %s16560_s4  ;;  %5975 = vrot.lane.b32.xlu0 %v14139_v24, %s16551_s21 }
 0x9ff   : > { %v5960_v7 = vpop.permute.xlu1 %5959  ;;  %v14163_v44 = vpop.permute.xlu0 %6433 }
 0xa00   : > { %17522 = vst [vmem:[#allocation57_spill] sm:$0xff] %v14163_v44  ;;  %v6015_v37 = vsel %vm2378_vm11, %v5960_v7, %v13893_v4  ;;  %v6018_v29 = vsel %vm2378_vm11, %v14113_v22, %v5960_v7 }
 0xa01   : > { %v6032_v44 = vmul.f32 %v6018_v29, %v17523_v19  ;;  %v6033_v35 = vmul.f32 %v6015_v37, %v17524_v52  ;;  %6455 = vrot.lane.b32.xlu1 %v14139_v24, %s16600_s28  ;;  %6167 = vrot.lane.b32.xlu0 %v14139_v24, %s16660_s0  ;;  %v6730_v37 = vpack.c.bf16 %v6122_v61, %v6042_v34  ;;  %v7547_v61 = vmov 1966171168  }
 0xa02   : > { %v14219_v34 = vadd.f32 %v13781_v12, %v13570_v25 }
 0xa03   : > { %v6721_v4 = vpack.c.bf16 %v6033_v35, %v6025_v6  ;;  %v14185_v57 = vpop.permute.xlu1 %6151  ;;  %v14187_v7 = vpop.permute.xlu0 %6625  ;;  %v6720_v62 = vpack.c.bf16 %v6032_v44, %v6024_v27 }
 0xa04   : > { %17526 = vst [vmem:[#allocation86_spill] sm:$0xff] %v14187_v7  ;;  %17530 = vst [vmem:[#allocation77_spill] sm:$0xff] %v14219_v34 }
 0xa05   : > { %6891 = vmatprep.subr.bf16.mxu1 %v6720_v62  ;;  %6933 = vmatpush1.bf16.msra.mxu0 %v6721_v4  ;;  %v6850_v4 = vunpack.c.l.s4 %v7547_v61  ;;  %v17534_v61 = vld [vmem:[#allocation138_spill] sm:$0xff] }
 0xa06   : > { %5981 = vrot.lane.b32.xlu0 %v14191_v28, %s16551_s21  ;;  %6647 = vrot.lane.b32.xlu1 %v14139_v24, %s16579_s24 }
 0xa07   : > { %6934 = vmatprep.subr.bf16.mxu0 %v6730_v37  ;;  %v14197_v42 = vpop.permute.xlu1 %6343  ;;  %v14199_v6 = vpop.permute.xlu0 %6055  ;;  %v6851_v37 = vunpack.c.0.s8 %v6850_v4 }
 0xa0a   : > { %6077 = vrot.lane.b32.xlu0 %v14191_v28, %s16552_s5  ;;  %6071 = vrot.lane.b32.xlu1 %v14139_v24, %s16552_s5 }
 0xa0b   : > { %v14205_v27 = vpop.permute.xlu1 %6535  ;;  %v14207_v11 = vpop.permute.xlu0 %6247 }
 0xa0c   : > { %17528 = vst [vmem:[#allocation71_spill] sm:$0xff] %v14205_v27 }
 0xa0e   : > { %6173 = vrot.lane.b32.xlu0 %v14191_v28, %s16660_s0  ;;  %6263 = vrot.lane.b32.xlu1 %v14139_v24, %s16655_s2  ;;  %v14240_v24 = vld.sshfl [vmem:[%s15566_s20] sm:$0x11 pattern:$0x75316420] }
 0xa0f   : > { %v14213_v44 = vpop.permute.xlu1 %6051  ;;  %v14215_v60 = vpop.permute.xlu0 %6439  ;;  %17533 = vst [vmem:[#allocation41_spill] sm:$0xff] %v14240_v24  ;;  %v6848_v7 = vcombine.high %v14240_v24, %v14240_v24 }
 0xa10   : > { %17529 = vst [vmem:[#allocation93_spill] sm:$0xff] %v14215_v60 }
 0xa12   : > { %6269 = vrot.lane.b32.xlu0 %v14191_v28, %s16655_s2  ;;  %6361 = vrot.lane.b32.xlu1 %v14219_v34, %s16560_s4 }
 0xa13   : > { %v14225_v35 = vpop.permute.xlu1 %6243  ;;  %v14227_v29 = vpop.permute.xlu0 %6631 }
 0xa14   : > { %17531 = vst [vmem:[#allocation78_spill] sm:$0xff] %v14227_v29  ;;  %v14245_v29 = vsub.s32 %v6851_v37, %v17534_v61  ;;  %v6109_v37 = vsel %vm2443_vm12, %v13975_v10, %v14011_v31  ;;  %v6110_v61 = vsel %vm2443_vm12, %v14071_v36, %v13831_v9  ;;  %v6108_v31 = vsel %vm2443_vm12, %v13895_v49, %v13935_v39 }
 0xa16   : > { %6365 = vrot.lane.b32.xlu0 %v14191_v28, %s16560_s4  ;;  %6553 = vrot.lane.b32.xlu1 %v14219_v34, %s16563_s27  ;;  %17535 = vst [vmem:[#allocation28_spill] sm:$0xff] %v14245_v29 }
 0xa17   : > { %v14233_v12 = vpop.permute.xlu1 %6435  ;;  %v14235_v62 = vpop.permute.xlu0 %5955 }
 0xa18   : > { %17532 = vst [vmem:[#allocation190_spill] sm:$0xff] %v14233_v12  ;;  %v14256_v12 = vrot.slane %v6848_v7, %v14245_v29  ;;  %v6138_v29 = vmul.f32 %v6109_v37, %v17525_v59 }
 0xa1a   : > { %6457 = vrot.lane.b32.xlu0 %v14219_v34, %s16600_s28  ;;  %5977 = vrot.lane.b32.xlu1 %v14219_v34, %s16551_s21  ;;  %17537 = vst [vmem:[#allocation242_spill] sm:$0xff] %v14256_v12 }
 0xa1b   : > { %v14251_v27 = vpop.permute.xlu1 %6627  ;;  %v14253_v4 = vpop.permute.xlu0 %6147  ;;  %7431 = vmatprep.mubr.msk.bf16.mxu1 %vm5714_vm7, %v14256_v12  ;;  %7433 = vmatprep.mubr.msk.bf16.mxu0 %vm5714_vm7, %v14256_v12  ;;  %v14280_v12 = vadd.f32 %v13783_v32, %v13570_v25  ;;  %v6204_v25 = vsel %vm2508_vm13, %v13901_v48, %v13947_v38  ;;  %v6111_v32 = vsel %vm2443_vm12, %v14199_v6, %v13895_v49 }
 0xa1c   : > { %17536 = vst [vmem:[#allocation70_spill] sm:$0xff] %v14251_v27  ;;  %v17540_v27 = vld [vmem:[#allocation132_spill] sm:$0xff]  ;;  %v6207_v49 = vsel %vm2508_vm13, %v14185_v57, %v13901_v48  ;;  %v6206_v48 = vsel %vm2508_vm13, %v14115_v18, %v13843_v54 }
 0xa1d   : > { %17539 = vst [vmem:[#allocation65_spill] sm:$0xff] %v14280_v12  ;;  %v6121_v60 = vmul.f32 %v6110_v61, %v17540_v27 }
 0xa1e   : > { %6649 = vrot.lane.b32.xlu0 %v14219_v34, %s16579_s24  ;;  %6169 = vrot.lane.b32.xlu1 %v14219_v34, %s16660_s0 }
 0xa1f   : > { %v14274_v7 = vpop.permute.xlu1 %5961  ;;  %v14276_v24 = vpop.permute.xlu0 %6339 }
 0xa20   : > { %17538 = vst [vmem:[#allocation32_spill] sm:$0xff] %v14276_v24  ;;  %v6016_v9 = vsel %vm2378_vm11, %v14274_v7, %v13977_v46  ;;  %v6130_v46 = vmul.f32 %v6108_v31, %v17525_v59 }
 0xa21   : > { %v6041_v24 = vmul.f32 %v6016_v9, %v17524_v52  ;;  %v6203_v9 = vsel %vm2508_vm13, %v13843_v54, %v13879_v43  ;;  %v6205_v43 = vsel %vm2508_vm13, %v13985_v56, %v14023_v50  ;;  %v6299_v54 = vsel %vm2198_vm2, %v13851_v1, %v13857_v8 }
 0xa22   : > { %6073 = vrot.lane.b32.xlu0 %v14219_v34, %s16552_s5  ;;  %5983 = vrot.lane.b32.xlu1 %v14280_v12, %s16551_s21  ;;  %v6738_v38 = vpack.c.bf16 %v6138_v29, %v6130_v46 }
 0xa23   : > { %v6729_v37 = vpack.c.bf16 %v6121_v60, %v6041_v24  ;;  %v14306_v52 = vpop.permute.xlu1 %6057  ;;  %v14308_v61 = vpop.permute.xlu0 %6531  ;;  %v17542_v24 = vld [vmem:[#allocation148_spill] sm:$0xff]  ;;  %v6129_v60 = vmul.f32 %v6111_v32, %v17540_v27 }
 0xa24   : > { %17541 = vst [vmem:[#allocation64_spill] sm:$0xff] %v14308_v61  ;;  %v6112_v31 = vsel %vm2443_vm12, %v14306_v52, %v13975_v10  ;;  %v6226_v59 = vmul.f32 %v6204_v25, %v17542_v24  ;;  %v6218_v10 = vmul.f32 %v6203_v9, %v17542_v24  ;;  %v6234_v9 = vmul.f32 %v6205_v43, %v17542_v24  ;;  %v17544_v43 = vld [vmem:[#allocation137_spill] sm:$0xff] }
 0xa25   : > { %v6137_v39 = vmul.f32 %v6112_v31, %v17540_v27  ;;  %6935 = vmatpush1.bf16.msra.mxu0 %v6729_v37  ;;  %v17543_v27 = vld [vmem:[#allocation147_spill] sm:$0xff]  ;;  %v6302_v31 = vsel %vm2198_vm2, %v14079_v16, %v13851_v1  ;;  %v6300_v1 = vsel %vm2198_vm2, %v13903_v14, %v13949_v21 }
 0xa26   : > { %6265 = vrot.lane.b32.xlu0 %v14219_v34, %s16655_s2  ;;  %6175 = vrot.lane.b32.xlu1 %v14280_v12, %s16660_s0  ;;  %v6225_v29 = vmul.f32 %v6207_v49, %v17543_v27  ;;  %v6217_v49 = vmul.f32 %v6206_v48, %v17543_v27 }
 0xa27   : > { %v6737_v25 = vpack.c.bf16 %v6137_v39, %v6129_v60  ;;  %6936 = vmatprep.subr.bf16.mxu0 %v6738_v38  ;;  %v14339_v32 = vpop.permute.xlu1 %6153  ;;  %v14341_v46 = vpop.permute.xlu0 %6345  ;;  %v6746_v39 = vpack.c.bf16 %v6226_v59, %v6218_v10  ;;  %v6301_v38 = vsel %vm2198_vm2, %v13983_v3, %v14031_v5  ;;  %v17559_v5 = vld [vmem:[#allocation157_spill] sm:$0xff] }
 0xa28   : > { %v6208_v37 = vsel %vm2508_vm13, %v14339_v32, %v13985_v56  ;;  %v6314_v56 = vmul.f32 %v6299_v54, %v17544_v43  ;;  %v6745_v24 = vpack.c.bf16 %v6225_v29, %v6217_v49  ;;  %v17545_v29 = vld [vmem:[#allocation136_spill] sm:$0xff]  ;;  %v6322_v49 = vmul.f32 %v6300_v1, %v17544_v43 }
 0xa29   : > { %6937 = vmatpush1.bf16.msra.mxu0 %v6737_v25  ;;  %v6233_v59 = vmul.f32 %v6208_v37, %v17543_v27  ;;  %v6330_v25 = vmul.f32 %v6301_v38, %v17544_v43  ;;  %v6313_v54 = vmul.f32 %v6302_v31, %v17545_v29  ;;  %v6303_v37 = vsel %vm2198_vm2, %v14207_v11, %v13903_v14 }
 0xa2a   : > { %6079 = vrot.lane.b32.xlu0 %v14280_v12, %s16552_s5  ;;  %6367 = vrot.lane.b32.xlu1 %v14280_v12, %s16560_s4  ;;  %v6754_v27 = vpack.c.bf16 %v6314_v56, %v6234_v9  ;;  %v14397_v31 = vadd.f32 %v13793_v30, %v13529_v58  ;;  %v6321_v14 = vmul.f32 %v6303_v37, %v17545_v29 }
 0xa2b   : > { %6938 = vmatprep.subr.bf16.mxu0 %v6746_v39  ;;  %v14367_v60 = vpop.permute.xlu1 %6249  ;;  %v14369_v48 = vpop.permute.xlu0 %6537  ;;  %v6762_v56 = vpack.c.bf16 %v6330_v25, %v6322_v49  ;;  %v17548_v30 = vpack.c.bf16 %v13653_v47, %v13650_v51  ;;  %v17550_v25 = vpack.c.bf16 %v13643_v17, %v13640_v2 }
 0xa2c   : > { %v6304_v10 = vsel %vm2198_vm2, %v14367_v60, %v13983_v3  ;;  %v6753_v3 = vpack.c.bf16 %v6313_v54, %v6233_v59  ;;  %17546 = vst [vmem:[#allocation105_spill] sm:$0xff] %v14397_v31 }
 0xa2d   : > { %6939 = vmatpush1.bf16.msra.mxu0 %v6745_v24  ;;  %v6329_v39 = vmul.f32 %v6304_v10, %v17545_v29 }
 0xa2e   : > { %6271 = vrot.lane.b32.xlu0 %v14280_v12, %s16655_s2  ;;  %6461 = vrot.lane.b32.xlu1 %v14191_v28, %s16600_s28 }
 0xa2f   : > { %6940 = vmatprep.subr.bf16.mxu0 %v6754_v27  ;;  %v14391_v38 = vpop.permute.xlu1 %6441  ;;  %v14393_v9 = vpop.permute.xlu0 %6633  ;;  %v6761_v43 = vpack.c.bf16 %v6329_v39, %v6321_v14  ;;  %v14462_v39 = vadd.f32 %v13795_v15, %v13529_v58 }
 0xa31   : > { %6941 = vmatpush1.bf16.msra.mxu0 %v6753_v3  ;;  %17556 = vst [vmem:[#allocation21_spill] sm:$0xff] %v14462_v39 }
 0xa32   : > { %6363 = vrot.lane.b32.xlu0 %v14397_v31, %s16560_s4  ;;  %6467 = vrot.lane.b32.xlu1 %v14001_v53, %s16600_s28 }
 0xa33   : > { %6942 = vmatprep.subr.bf16.mxu0 %v6762_v56  ;;  %v14404_v24 = vpop.permute.xlu1 %6083  ;;  %v14406_v59 = vpop.permute.xlu0 %5987 }
 0xa34   : > { %17547 = vst [vmem:[#allocation61_spill] sm:$0xff] %v14406_v59 }
 0xa35   : > { %6943 = vmatpush1.bf16.msra.mxu0 %v6761_v43  ;;  %v6019_v43 = vsel %vm2378_vm11, %v14235_v62, %v14274_v7  ;;  %v6113_v7 = vsel %vm2443_vm12, %v14061_v33, %v14071_v36  ;;  %v17562_v36 = vld [vmem:[#allocation181_spill] sm:$0xff] }
 0xa36   : > { %6381 = vrot.lane.b32.xlu0 %v14119_v23, %s16560_s4  ;;  %6473 = vrot.lane.b32.xlu1 %v14021_v20, %s16600_s28  ;;  %v6040_v34 = vmul.f32 %v6019_v43, %v17523_v19 }
 0xa37   : > { %6944 = vmatprep.subr.bf16.mxu0 %v17548_v30  ;;  %v14415_v1 = vpop.permute.xlu1 %6275  ;;  %v14417_v10 = vpop.permute.xlu0 %6179 }
 0xa38   : > { %17549 = vst [vmem:[#allocation13_spill] sm:$0xff] %v14417_v10 }
 0xa39   : > { %6945 = vmatpush1.bf16.msra.mxu0 %v17550_v25 }
 0xa3a   : > { %6459 = vrot.lane.b32.xlu0 %v14397_v31, %s16600_s28  ;;  %6651 = vrot.lane.b32.xlu1 %v14397_v31, %s16579_s24 }
 0xa3b   : > { %v14426_v29 = vpop.permute.xlu1 %6371  ;;  %v5994_v54 = vpop.permute.xlu0 %5993 }
 0xa3c   : > { %17551 = vst [vmem:[#allocation100_spill] sm:$0xff] %v14426_v29  ;;  %v5999_v30 = vsel %vm2378_vm11, %v14406_v59, %v5994_v54  ;;  %v6020_v58 = vsel %vm2378_vm11, %v5994_v54, %v14053_v41 }
 0xa3d   : > { %v14499_v50 = vmul.f32 %v5999_v30, %v17559_v5 }
 0xa3e   : > { %6555 = vrot.lane.b32.xlu0 %v14397_v31, %s16563_s27  ;;  %6477 = vrot.lane.b32.xlu1 %v14119_v23, %s16600_s28 }
 0xa3f   : > { %v14432_v51 = vpop.permute.xlu1 %6089  ;;  %v14434_v47 = vpop.permute.xlu0 %6185  ;;  %17560 = vst [vmem:[#allocation106_spill] sm:$0xff] %v14499_v50 }
 0xa40   : > { %v6191_v19 = vsel %vm2508_vm13, %v14417_v10, %v14434_v47 }
 0xa42   : > { %6463 = vrot.lane.b32.xlu0 %v14280_v12, %s16600_s28  ;;  %6563 = vrot.lane.b32.xlu1 %v14001_v53, %s16563_s27 }
 0xa43   : > { %v14440_v2 = vpop.permute.xlu1 %6281  ;;  %v14442_v17 = vpop.permute.xlu0 %6377 }
 0xa44   : > { %17552 = vst [vmem:[#allocation56_spill] sm:$0xff] %v14442_v17 }
 0xa46   : > { %6469 = vrot.lane.b32.xlu0 %v14049_v40, %s16600_s28  ;;  %6075 = vrot.lane.b32.xlu1 %v14397_v31, %s16552_s5 }
 0xa47   : > { %v14448_v27 = vpop.permute.xlu1 %5989  ;;  %v14450_v37 = vpop.permute.xlu0 %6085 }
 0xa48   : > { %17553 = vst [vmem:[#allocation104_spill] sm:$0xff] %v14450_v37 }
 0xa4a   : > { %6475 = vrot.lane.b32.xlu0 %v14069_v45, %s16600_s28  ;;  %6267 = vrot.lane.b32.xlu1 %v14397_v31, %s16655_s2 }
 0xa4b   : > { %v14456_v49 = vpop.permute.xlu1 %6181  ;;  %v14458_v3 = vpop.permute.xlu0 %6277 }
 0xa4c   : > { %17554 = vst [vmem:[#allocation17_spill] sm:$0xff] %v14456_v49  ;;  %17555 = vst [vmem:[#allocation37_spill] sm:$0xff] %v14458_v3 }
 0xa4e   : > { %5979 = vrot.lane.b32.xlu0 %v14397_v31, %s16551_s21  ;;  %5985 = vrot.lane.b32.xlu1 %v14462_v39, %s16551_s21 }
 0xa4f   : > { %v14468_v14 = vpop.permute.xlu1 %6373  ;;  %v6092_v56 = vpop.permute.xlu0 %6091 }
 0xa50   : > { %17557 = vst [vmem:[#allocation140_spill] sm:$0xff] %v14468_v14  ;;  %v17558_v14 = vld [vmem:[#allocation184_spill] sm:$0xff] }
 0xa51   : > { %v6023_v21 = vmul.f32 %v6020_v58, %v17558_v14 }
 0xa52   : > { %6471 = vrot.lane.b32.xlu0 %v14089_v55, %s16600_s28  ;;  %6081 = vrot.lane.b32.xlu1 %v14462_v39, %s16552_s5  ;;  %s17758_s5 = sshll.u32 %s17761_s30, 3 }
 0xa53   : > { %v5996_v15 = vpop.permute.xlu1 %5995  ;;  %v14484_v25 = vpop.permute.xlu0 %6283 }
 0xa54   : > { %v6000_v41 = vsel %vm2378_vm11, %v14448_v27, %v5996_v15  ;;  %v6021_v54 = vsel %vm2378_vm11, %v5996_v15, %v14113_v22  ;;  %v6120_v22 = vmul.f32 %v6113_v7, %v17562_v36  ;;  %v6116_v15 = vsel %vm2443_vm12, %v14432_v51, %v14061_v33  ;;  %v17571_v33 = vld [vmem:[#allocation189_spill] sm:$0xff] }
 0xa55   : > { %v6031_v17 = vmul.f32 %v6021_v54, %v17558_v14  ;;  %v14503_v8 = vmul.f32 %v6000_v41, %v17559_v5  ;;  %v14522_v54 = vmul.f32 %v6191_v19, %v17327_v63  ;;  %v6115_v19 = vsel %vm2443_vm12, %v14213_v44, %v14306_v52 }
 0xa56   : > { %6557 = vrot.lane.b32.xlu0 %v14191_v28, %s16563_s27  ;;  %6559 = vrot.lane.b32.xlu1 %v14280_v12, %s16563_s27  ;;  %v6728_v59 = vpack.c.bf16 %v6120_v22, %v6040_v34  ;;  %v6209_v52 = vsel %vm2508_vm13, %v14073_v0, %v14115_v18  ;;  %v6136_v7 = vmul.f32 %v6115_v19, %v17562_v36  ;;  %v17569_v18 = vld [vmem:[#allocation234_spill] sm:$0xff] }
 0xa57   : > { %17561 = vst [vmem:[#allocation44_spill] sm:$0xff] %v14503_v8  ;;  %v6719_v43 = vpack.c.bf16 %v6031_v17, %v6023_v21  ;;  %v6188_v30 = vpop.permute.xlu1 %6187  ;;  %v14514_v58 = vpop.permute.xlu0 %5991  ;;  %17563 = vst [vmem:[#allocation163_spill] sm:$0xff] %v14522_v54  ;;  %v6095_v19 = vsel %vm2443_vm12, %v14404_v24, %v14432_v51  ;;  %v6096_v54 = vsel %vm2443_vm12, %v14450_v37, %v6092_v56 }
 0xa58   : > { %v6192_v41 = vsel %vm2508_vm13, %v14456_v49, %v6188_v30  ;;  %v17573_v49 = vld [vmem:[#allocation156_spill] sm:$0xff] }
 0xa59   : > { %v14525_v10 = vmul.f32 %v6192_v41, %v17327_v63  ;;  %6892 = vmatpush1.bf16.msra.mxu1 %v6719_v43  ;;  %v17568_v43 = vld [vmem:[#allocation164_spill] sm:$0xff]  ;;  %v14597_v50 = vmul.f32 %v6095_v19, %v17573_v49  ;;  %v17602_v19 = vld [vmem:[#allocation93_spill] sm:$0xff] }
 0xa5a   : > { %6171 = vrot.lane.b32.xlu0 %v14397_v31, %s16660_s0  ;;  %6177 = vrot.lane.b32.xlu1 %v14462_v39, %s16660_s0  ;;  %v6210_v41 = vsel %vm2508_vm13, %v17568_v43, %v14185_v57 }
 0xa5b   : > { %17564 = vst [vmem:[#allocation25_spill] sm:$0xff] %v14525_v10  ;;  %6893 = vmatprep.subr.bf16.mxu1 %v6728_v59  ;;  %v14531_v21 = vpop.permute.xlu1 %6379  ;;  %v14533_v17 = vpop.permute.xlu0 %6183  ;;  %v6114_v59 = vsel %vm2443_vm12, %v14135_v26, %v14199_v6  ;;  %v6305_v6 = vsel %vm2198_vm2, %v17569_v18, %v14079_v16  ;;  %v6117_v16 = vsel %vm2443_vm12, %v6092_v56, %v14135_v26 }
 0xa5c   : > { %17565 = vst [vmem:[#allocation96_spill] sm:$0xff] %v14531_v21  ;;  %17566 = vst [vmem:[#allocation84_spill] sm:$0xff] %v14533_v17  ;;  %v6128_v57 = vmul.f32 %v6114_v59, %v17562_v36  ;;  %v6224_v21 = vmul.f32 %v6210_v41, %v17571_v33  ;;  %v17572_v59 = vld [vmem:[#allocation185_spill] sm:$0xff]  ;;  %v6211_v26 = vsel %vm2508_vm13, %v14253_v4, %v14339_v32 }
 0xa5d   : > { %v6119_v10 = vmul.f32 %v6116_v15, %v17572_v59 }
 0xa5e   : > { %6569 = vrot.lane.b32.xlu0 %v14021_v20, %s16563_s27  ;;  %6273 = vrot.lane.b32.xlu1 %v14462_v39, %s16655_s2  ;;  %v6736_v41 = vpack.c.bf16 %v6136_v7, %v6128_v57 }
 0xa5f   : > { %v14545_v34 = vpop.permute.xlu1 %6087  ;;  %v14551_v22 = vpop.permute.xlu0 %6375 }
 0xa60   : > { %17567 = vst [vmem:[#allocation95_spill] sm:$0xff] %v14551_v22  ;;  %v6216_v22 = vmul.f32 %v6209_v52, %v17571_v33 }
 0xa62   : > { %6567 = vrot.lane.b32.xlu0 %v14089_v55, %s16563_s27  ;;  %6565 = vrot.lane.b32.xlu1 %v14049_v40, %s16563_s27 }
 0xa63   : > { %v14579_v31 = vpop.permute.xlu1 %6279  ;;  %v5998_v36 = vpop.permute.xlu0 %5997 }
 0xa64   : > { %17570 = vst [vmem:[#allocation52_spill] sm:$0xff] %v14579_v31  ;;  %v6001_v51 = vsel %vm2378_vm11, %v14514_v58, %v5998_v36  ;;  %v6022_v52 = vsel %vm2378_vm11, %v5998_v36, %v14235_v62  ;;  %v6287_v62 = vsel %vm2198_vm2, %v14415_v1, %v14440_v2  ;;  %v17574_v36 = vld [vmem:[#allocation139_spill] sm:$0xff] }
 0xa65   : > { %v6039_v37 = vmul.f32 %v6022_v52, %v17558_v14  ;;  %v14601_v8 = vmul.f32 %v6001_v51, %v17559_v5  ;;  %v6127_v14 = vmul.f32 %v6117_v16, %v17572_v59  ;;  %v14617_v5 = vmul.f32 %v6096_v54, %v17573_v49 }
 0xa66   : > { %6573 = vrot.lane.b32.xlu0 %v14119_v23, %s16563_s27  ;;  %6571 = vrot.lane.b32.xlu1 %v14069_v45, %s16563_s27  ;;  %v6213_v16 = vsel %vm2508_vm13, %v6188_v30, %v17568_v43  ;;  %v14638_v51 = vmul.f32 %v6287_v62, %v17574_v36 }
 0xa67   : > { %v6094_v56 = vpop.permute.xlu1 %6093  ;;  %v6727_v15 = vpack.c.bf16 %v6119_v10, %v6039_v37  ;;  %v6190_v57 = vpop.permute.xlu0 %6189 }
 0xa68   : > { %v6097_v7 = vsel %vm2443_vm12, %v14545_v34, %v6094_v56  ;;  %v6118_v32 = vsel %vm2443_vm12, %v6094_v56, %v14213_v44  ;;  %v6193_v37 = vsel %vm2508_vm13, %v14533_v17, %v6190_v57  ;;  %17575 = vst [vmem:[#allocation108_spill] sm:$0xff] %v14638_v51  ;;  %v6288_v44 = vsel %vm2198_vm2, %v14458_v3, %v14484_v25 }
 0xa69   : > { %v6135_v54 = vmul.f32 %v6118_v32, %v17572_v59  ;;  %v14632_v10 = vmul.f32 %v6097_v7, %v17573_v49  ;;  %v14645_v52 = vmul.f32 %v6193_v37, %v17327_v63  ;;  %6894 = vmatpush1.bf16.msra.mxu1 %v6727_v15  ;;  %v6212_v49 = vsel %vm2508_vm13, %v14434_v47, %v14073_v0  ;;  %v17577_v63 = vld [vmem:[#allocation192_spill] sm:$0xff]  ;;  %v17601_v59 = vld [vmem:[#allocation243_spill] sm:$0xff] }
 0xa6a   : > { %6369 = vrot.lane.b32.xlu0 %v14462_v39, %s16560_s4  ;;  %6653 = vrot.lane.b32.xlu1 %v14191_v28, %s16579_s24  ;;  %v6223_v62 = vmul.f32 %v6213_v16, %v17577_v63  ;;  %v6744_v7 = vpack.c.bf16 %v6224_v21, %v6216_v22  ;;  %v6232_v47 = vmul.f32 %v6211_v26, %v17571_v33  ;;  %v17580_v16 = vld [vmem:[#allocation54_spill] sm:$0xff] }
 0xa6b   : > { %17576 = vst [vmem:[#allocation198_spill] sm:$0xff] %v14645_v52  ;;  %v6735_v30 = vpack.c.bf16 %v6135_v54, %v6127_v14  ;;  %6895 = vmatprep.subr.bf16.mxu1 %v6736_v41  ;;  %v6286_v43 = vpop.permute.xlu1 %6285  ;;  %v14661_v15 = vpop.permute.xlu0 %6551  ;;  %v14667_v41 = vmul.f32 %v6288_v44, %v17574_v36  ;;  %v6214_v14 = vsel %vm2508_vm13, %v6190_v57, %v14253_v4  ;;  %v17581_v54 = vld [vmem:[#allocation229_spill] sm:$0xff]  ;;  %v17582_v4 = vld [vmem:[#allocation191_spill] sm:$0xff] }
 0xa6c   : > { %v6289_v56 = vsel %vm2198_vm2, %v14579_v31, %v6286_v43  ;;  %v6395_v21 = vsel %vm2215_vm5, %v17581_v54, %v17580_v16  ;;  %v6307_v22 = vsel %vm2198_vm2, %v14225_v35, %v14367_v60  ;;  %v6215_v33 = vmul.f32 %v6212_v49, %v17577_v63  ;;  %v17617_v52 = vld [vmem:[#allocation201_spill] sm:$0xff] }
 0xa6d   : > { %17578 = vst [vmem:[#allocation107_spill] sm:$0xff] %v14667_v41  ;;  %v14673_v32 = vmul.f32 %v6289_v56, %v17574_v36  ;;  %6896 = vmatpush1.bf16.msra.mxu1 %v6735_v30  ;;  %v6312_v26 = vmul.f32 %v6305_v6, %v17582_v4  ;;  %v6308_v57 = vsel %vm2198_vm2, %v14440_v2, %v17569_v18  ;;  %v17583_v36 = vld [vmem:[#allocation91_spill] sm:$0xff] }
 0xa6e   : > { %6655 = vrot.lane.b32.xlu0 %v14280_v12, %s16579_s24  ;;  %6659 = vrot.lane.b32.xlu1 %v14001_v53, %s16579_s24  ;;  %v6306_v44 = vsel %vm2198_vm2, %v17583_v36, %v14207_v11  ;;  %v6743_v6 = vpack.c.bf16 %v6223_v62, %v6215_v33  ;;  %v6231_v49 = vmul.f32 %v6214_v14, %v17577_v63  ;;  %v17585_v11 = vld [vmem:[#allocation143_spill] sm:$0xff]  ;;  %v17606_v12 = vld [vmem:[#allocation233_spill] sm:$0xff] }
 0xa6f   : > { %17579 = vst [vmem:[#allocation115_spill] sm:$0xff] %v14673_v32  ;;  %6897 = vmatprep.subr.bf16.mxu1 %v6744_v7  ;;  %v14693_v37 = vpop.permute.xlu1 %6359  ;;  %v14702_v30 = vpop.permute.xlu0 %5975  ;;  %v6328_v18 = vmul.f32 %v6307_v22, %v17582_v4  ;;  %v6310_v56 = vsel %vm2198_vm2, %v6286_v43, %v14225_v35  ;;  %v17584_v7 = vld [vmem:[#allocation144_spill] sm:$0xff]  ;;  %v6752_v0 = vpack.c.bf16 %v6312_v26, %v6232_v47  ;;  %v17586_v33 = vld [vmem:[#allocation195_spill] sm:$0xff] }
 0xa70   : > { %v6392_v2 = vsel %vm2215_vm5, %v17580_v16, %v14693_v37  ;;  %v6409_v62 = vmul.f32 %v6395_v21, %v17585_v11  ;;  %v6311_v63 = vmul.f32 %v6308_v57, %v17586_v33  ;;  %v6320_v14 = vmul.f32 %v6306_v44, %v17582_v4  ;;  %v17587_v43 = vld [vmem:[#allocation27_spill] sm:$0xff]  ;;  %v17588_v57 = vld [vmem:[#allocation174_spill] sm:$0xff] }
 0xa71   : > { %v6410_v60 = vmul.f32 %v6392_v2, %v17584_v7  ;;  %6898 = vmatpush1.bf16.msra.mxu1 %v6743_v6  ;;  %v6309_v16 = vsel %vm2198_vm2, %v14484_v25, %v17583_v36  ;;  %v6327_v22 = vmul.f32 %v6310_v56, %v17586_v33  ;;  %v17589_v6 = vld [vmem:[#allocation24_spill] sm:$0xff]  ;;  %v17590_v2 = vld [vmem:[#allocation169_spill] sm:$0xff] }
 0xa72   : > { %6661 = vrot.lane.b32.xlu0 %v14049_v40, %s16579_s24  ;;  %6465 = vrot.lane.b32.xlu1 %v14462_v39, %s16600_s28  ;;  %v6751_v21 = vpack.c.bf16 %v6311_v63, %v6231_v49  ;;  %v6760_v4 = vpack.c.bf16 %v6328_v18, %v6320_v14  ;;  %v6777_v44 = vpack.c.bf16 %v6409_v62, %v17588_v57  ;;  %v17591_v18 = vld [vmem:[#allocation193_spill] sm:$0xff]  ;;  %v17592_v62 = vld [vmem:[#allocation30_spill] sm:$0xff] }
 0xa73   : > { %6899 = vmatprep.subr.bf16.mxu1 %v6752_v0  ;;  %v14724_v35 = vpop.permute.xlu1 %6455  ;;  %v6778_v47 = vpack.c.bf16 %v6410_v60, %v17587_v43  ;;  %v14728_v26 = vpop.permute.xlu0 %6167  ;;  %v6398_v25 = vsel %vm2215_vm5, %v17589_v6, %v17581_v54  ;;  %v6319_v0 = vmul.f32 %v6309_v16, %v17586_v33  ;;  %v6401_v54 = vsel %vm2215_vm5, %v17590_v2, %v17589_v6  ;;  %v17593_v33 = vld [vmem:[#allocation31_spill] sm:$0xff]  ;;  %v17594_v14 = vld [vmem:[#allocation46_spill] sm:$0xff]  ;;  %v17595_v43 = vld [vmem:[#allocation196_spill] sm:$0xff] }
 0xa74   : > { %v6408_v56 = vmul.f32 %v6398_v25, %v17591_v18  ;;  %v6768_v63 = vpack.c.bf16 %v17593_v33, %v17592_v62  ;;  %v6400_v16 = vsel %vm2215_vm5, %v14341_v46, %v17594_v14  ;;  %v17598_v6 = vld [vmem:[#allocation47_spill] sm:$0xff] }
 0xa75   : > { %6946 = vmatprep.subr.bf16.mxu0 %v6778_v47  ;;  %6900 = vmatpush1.bf16.msra.mxu1 %v6751_v21  ;;  %v6759_v60 = vpack.c.bf16 %v6327_v22, %v6319_v0  ;;  %v6407_v47 = vmul.f32 %v6401_v54, %v17595_v43  ;;  %v17596_v21 = vld [vmem:[#allocation38_spill] sm:$0xff]  ;;  %v17599_v0 = vld [vmem:[#allocation32_spill] sm:$0xff]  ;;  %v6424_v62 = vmul.f32 %v6400_v16, %v17591_v18  ;;  %v17600_v33 = vld [vmem:[#allocation35_spill] sm:$0xff] }
 0xa76   : > { %6561 = vrot.lane.b32.xlu0 %v14462_v39, %s16563_s27  ;;  %6665 = vrot.lane.b32.xlu1 %v14021_v20, %s16579_s24  ;;  %v6399_v22 = vsel %vm2215_vm5, %v14197_v42, %v17596_v21  ;;  %v17612_v20 = vld [vmem:[#allocation224_spill] sm:$0xff]  ;;  %s720_s27 = scalar_lea.vmem %s15568_s22, %s17758_s5 }
 0xa77   : > { %6901 = vmatprep.subr.bf16.mxu1 %v6760_v4  ;;  %6947 = vmatpush1.bf16.msra.mxu0 %v6777_v44  ;;  %v17597_v44 = vld [vmem:[#allocation26_spill] sm:$0xff]  ;;  %v6775_v28 = vpack.c.bf16 %v6407_v47, %v17606_v12 }
 0xa78   : > { %v14740_v36 = vpop.permute.xlu0 %5981  ;;  %v14742_v49 = vpop.permute.xlu1 %6647  ;;  %v6767_v25 = vpack.c.bf16 %v17598_v6, %v17597_v44  ;;  %v6495_v44 = vsel %vm2701_vm14, %v17602_v19, %v17601_v59  ;;  %v6416_v6 = vmul.f32 %v6399_v22, %v17591_v18  ;;  %v17608_v22 = vld [vmem:[#allocation197_spill] sm:$0xff] }
 0xa79   : > { %6902 = vmatpush1.bf16.msra.mxu1 %v6759_v60  ;;  %v6403_v60 = vsel %vm2215_vm5, %v17599_v0, %v14341_v46  ;;  %v17603_v46 = vld [vmem:[#allocation76_spill] sm:$0xff] }
 0xa7a   : > { %6667 = vrot.lane.b32.xlu0 %v14069_v45, %s16579_s24  ;;  %6657 = vrot.lane.b32.xlu1 %v14462_v39, %s16579_s24  ;;  %v6402_v16 = vsel %vm2215_vm5, %v17603_v46, %v14197_v42  ;;  %v17605_v0 = vld [vmem:[#allocation152_spill] sm:$0xff]  ;;  %v17607_v42 = vld [vmem:[#allocation57_spill] sm:$0xff]  ;;  %v6784_v12 = vpack.c.bf16 %v6424_v62, %v6416_v6  ;;  %v17613_v62 = vld [vmem:[#allocation199_spill] sm:$0xff] }
 0xa7b   : > { %6903 = vmatprep.subr.bf16.mxu1 %v6768_v63  ;;  %v6776_v63 = vpack.c.bf16 %v6408_v56, %v17600_v33  ;;  %v5950_v56 = vld [vmem:[#allocation2] sm:$0x1]  ;;  %v6498_v18 = vsel %vm2701_vm14, %v17607_v42, %v17602_v19  ;;  %v6415_v47 = vmul.f32 %v6402_v16, %v17595_v43  ;;  %v17610_v19 = vld [vmem:[#allocation160_spill] sm:$0xff] }
 0xa7c   : > { %v14764_v4 = vpop.permute.xlu0 %6077  ;;  %v14766_v57 = vpop.permute.xlu1 %6071  ;;  %v17604_v33 = vld [vmem:[#allocation239_spill] sm:$0xff]  ;;  %v17611_v45 = vld [vmem:[#allocation8_spill] sm:$0xff]  ;;  %v6511_v16 = vmul.f32 %v6498_v18, %v17613_v62 }
 0xa7d   : > { %v14779_v54 = vsel %vm2443_vm12, %v14766_v57, %v14764_v4  ;;  %6904 = vmatpush1.bf16.msra.mxu1 %v6767_v25  ;;  %v6494_v25 = vsel %vm2701_vm14, %v17605_v0, %v17604_v33  ;;  %v17616_v18 = vld [vmem:[#allocation207_spill] sm:$0xff] }
 0xa7e   : > { %6663 = vrot.lane.b32.xlu0 %v14089_v55, %s16579_s24  ;;  %6669 = vrot.lane.b32.xlu1 %v14119_v23, %s16579_s24  ;;  %v6423_v55 = vmul.f32 %v6403_v60, %v17595_v43  ;;  %v17609_v60 = vld [vmem:[#allocation209_spill] sm:$0xff]  ;;  %v6504_v42 = vmul.f32 %v6494_v25, %v17608_v22  ;;  %v6590_v43 = vsel %vm2766_vm15, %v17612_v20, %v17611_v45 }
 0xa7f   : > { %6905 = vmatprep.subr.bf16.mxu1 %v6776_v63  ;;  %v6512_v63 = vmul.f32 %v6495_v44, %v17608_v22  ;;  %v6496_v46 = vsel %vm2701_vm14, %v14391_v38, %v17609_v60  ;;  %v6497_v44 = vsel %vm2701_vm14, %v17610_v19, %v17605_v0  ;;  %v6600_v51 = vmul.f32 %v6590_v43, %v17617_v52 }
 0xa80   : > { %v14801_v41 = vpop.permute.xlu0 %6173  ;;  %v14803_v32 = vpop.permute.xlu1 %6263  ;;  %v6783_v6 = vpack.c.bf16 %v6423_v55, %v6415_v47  ;;  %v6520_v25 = vmul.f32 %v6496_v46, %v17608_v22  ;;  %v6503_v55 = vmul.f32 %v6497_v44, %v17613_v62  ;;  %v6592_v47 = vsel %vm2766_vm15, %v14369_v48, %v17616_v18  ;;  %v17619_v22 = vld [vmem:[#allocation168_spill] sm:$0xff] }
 0xa81   : > { %v14814_v23 = vsel %vm2508_vm13, %v14728_v26, %v14801_v41  ;;  %6906 = vmatpush1.bf16.msra.mxu1 %v6775_v28  ;;  %v6792_v19 = vpack.c.bf16 %v6512_v63, %v6504_v42  ;;  %v6595_v44 = vsel %vm2766_vm15, %v14308_v61, %v14369_v48  ;;  %v6616_v17 = vmul.f32 %v6592_v47, %v17617_v52  ;;  %v17623_v48 = vld [vmem:[#allocation7_spill] sm:$0xff]  ;;  %v17624_v61 = vld [vmem:[#allocation78_spill] sm:$0xff] }
 0xa82   : > { %6833 = vperm.xlu0 %7467, %v5950_v56   ;;  %6907 = vmatprep.subr.bf16.mxu1 %v6784_v12  ;;  %v17614_v56 = vld [vmem:[#allocation190_spill] sm:$0xff]  ;;  %v6791_v63 = vpack.c.bf16 %v6511_v16, %v6503_v55  ;;  %v6800_v16 = vpack.c.bf16 %v6600_v51, %v6520_v25  ;;  %v17622_v55 = vld [vmem:[#allocation200_spill] sm:$0xff]  ;;  %v17627_v47 = vld [vmem:[#allocation67_spill] sm:$0xff] }
 0xa83   : > { %v6499_v0 = vsel %vm2701_vm14, %v17614_v56, %v14391_v38  ;;  %v17618_v38 = vld [vmem:[#allocation20_spill] sm:$0xff]  ;;  %v17620_v56 = vld [vmem:[#allocation71_spill] sm:$0xff] }
 0xa84   : > { %v14831_v31 = vpop.permute.xlu0 %6269  ;;  %v14833_v28 = vpop.permute.xlu1 %6361  ;;  %v6593_v46 = vsel %vm2766_vm15, %v17618_v38, %v17612_v20  ;;  %v6591_v42 = vsel %vm2766_vm15, %v17620_v56, %v17619_v22  ;;  %v6594_v2 = vsel %vm2766_vm15, %v17627_v47, %v17620_v56  ;;  %v17628_v51 = vld [vmem:[#allocation244_spill] sm:$0xff]  ;;  %v17629_v25 = vld [vmem:[#allocation79_spill] sm:$0xff] }
 0xa85   : > { %v14844_v12 = vsel %vm2198_vm2, %v14803_v32, %v14831_v31  ;;  %6908 = vmatpush1.bf16.msra.mxu1 %v6783_v6  ;;  %v6519_v6 = vmul.f32 %v6499_v0, %v17613_v62  ;;  %v6599_v38 = vmul.f32 %v6593_v46, %v17622_v55  ;;  %v6687_v62 = vsel %vm2831_vm0, %v17624_v61, %v17623_v48  ;;  %v17625_v0 = vld [vmem:[#allocation219_spill] sm:$0xff]  ;;  %v7516_v56 = vld [vmem:[%s16574_s3 + $0x48] ss:$0 sm:$0xff] }
 0xa86   : > { %17615 = vst [vmem:[#allocation110_spill] sm:$0xff] %v14844_v12  ;;  %6909 = vmatprep.subr.bf16.mxu1 %v6792_v19  ;;  %v6686_v46 = vsel %vm2831_vm0, %v17629_v25, %v17628_v51 }
 0xa88   : > { %v6366_v43 = vpop.permute.xlu0 %6365  ;;  %v14865_v3 = vpop.permute.xlu1 %6553 }
 0xa89   : > { %v6386_v20 = vsel %vm2215_vm5, %v6366_v43, %v14426_v29  ;;  %v14874_v19 = vsel %vm2215_vm5, %v14693_v37, %v6366_v43  ;;  %6910 = vmatpush1.bf16.msra.mxu1 %v6791_v63  ;;  %v6608_v37 = vmul.f32 %v6591_v42, %v17617_v52  ;;  %v6615_v43 = vmul.f32 %v6595_v44, %v17622_v55  ;;  %v17632_v63 = vld [vmem:[#allocation70_spill] sm:$0xff] }
 0xa8a   : > { %17621 = vst [vmem:[#allocation36_spill] sm:$0xff] %v14874_v19  ;;  %v14882_v12 = vmul.f32 %v6386_v20, %v17625_v0  ;;  %6911 = vmatprep.subr.bf16.mxu1 %v6800_v16  ;;  %v6799_v19 = vpack.c.bf16 %v6599_v38, %v6519_v6  ;;  %v17630_v0 = vld [vmem:[#allocation86_spill] sm:$0xff]  ;;  %v6704_v42 = vmul.f32 %v7516_v56, %v6687_v62  ;;  %v17631_v38 = vld [vmem:[#allocation43_spill] sm:$0xff] }
 0xa8b   : > { %v6690_v52 = vsel %vm2831_vm0, %v17630_v0, %v17624_v61  ;;  %v6808_v16 = vpack.c.bf16 %v6616_v17, %v6608_v37  ;;  %v6607_v44 = vmul.f32 %v6594_v2, %v17622_v55  ;;  %v6688_v6 = vsel %vm2831_vm0, %v14393_v9, %v17631_v38  ;;  %v17633_v61 = vld [vmem:[#allocation90_spill] sm:$0xff]  ;;  %v7517_v17 = vld [vmem:[%s16574_s3 + $0x40] ss:$0 sm:$0xff] }
 0xa8c   : > { %17626 = vst [vmem:[#allocation14_spill] sm:$0xff] %v14882_v12  ;;  %v14894_v40 = vpop.permute.xlu0 %6457  ;;  %v5978_v20 = vpop.permute.xlu1 %5977  ;;  %v6691_v47 = vsel %vm2831_vm0, %v17632_v63, %v14393_v9  ;;  %v6689_v0 = vsel %vm2831_vm0, %v17633_v61, %v17629_v25  ;;  %v6696_v62 = vmul.f32 %v7516_v56, %v6686_v46  ;;  %v6703_v2 = vmul.f32 %v7517_v17, %v6690_v52  ;;  %v17634_v61 = vld [vmem:[#allocation42_spill] sm:$0xff] }
 0xa8d   : > { %6912 = vmatpush1.bf16.msra.mxu1 %v6799_v19  ;;  %v6807_v55 = vpack.c.bf16 %v6615_v43, %v6607_v44  ;;  %v6711_v12 = vmul.f32 %v7517_v17, %v6691_v47  ;;  %v6712_v9 = vmul.f32 %v7516_v56, %v6688_v6  ;;  %v6695_v63 = vmul.f32 %v7517_v17, %v6689_v0  ;;  %v17635_v56 = vld [vmem:[#allocation206_spill] sm:$0xff] }
 0xa8e   : > { %6913 = vmatprep.subr.bf16.mxu1 %v6808_v16  ;;  %v6816_v19 = vpack.c.bf16 %v6704_v42, %v6696_v62  ;;  %v6005_v25 = vsel %vm2378_vm11, %v14702_v30, %v14740_v36  ;;  %v6009_v47 = vsel %vm2378_vm11, %v17634_v61, %v5978_v20 }
 0xa8f   : > { %v6815_v46 = vpack.c.bf16 %v6703_v2, %v6695_v63  ;;  %v6823_v43 = vpack.c.bf16 %v6711_v12, %v6711_v12  ;;  %v6824_v44 = vpack.c.bf16 %v6712_v9, %v6712_v9  ;;  %v6028_v42 = vmul.f32 %v6005_v25, %v17635_v56  ;;  %v17636_v63 = vld [vmem:[#allocation228_spill] sm:$0xff] }
 0xa90   : > { %v14921_v37 = vpop.permute.xlu0 %6649  ;;  %v14923_v39 = vpop.permute.xlu1 %6169  ;;  %v6008_v62 = vsel %vm2378_vm11, %v17636_v63, %v14702_v30  ;;  %v17637_v12 = vld [vmem:[#allocation204_spill] sm:$0xff] }
 0xa91   : > { %6914 = vmatpush1.bf16.msra.mxu1 %v6807_v55  ;;  %v6035_v17 = vmul.f32 %v6009_v47, %v17637_v12  ;;  %v17639_v9 = vld [vmem:[#allocation28_spill] sm:$0xff] }
 0xa92   : > { %6915 = vmatprep.subr.bf16.mxu1 %v6816_v19  ;;  %v17640_v19 = vld [vmem:[#allocation41_spill] sm:$0xff] }
 0xa93   : > { %v14954_v25 = vrot.slane %v17640_v19, %v17639_v9  ;;  %v17648_v19 = vld [vmem:[#allocation39_spill] sm:$0xff] }
 0xa94   : > { %v14929_v16 = vpop.permute.xlu0 %6073  ;;  %v14931_v52 = vpop.permute.xlu1 %5983 }
 0xa95   : > { %v6006_v0 = vsel %vm2378_vm11, %v5978_v20, %v14931_v52  ;;  %6916 = vmatpush1.bf16.msra.mxu1 %v6815_v46  ;;  %v6868_v20 = vsel %vm2308_vm9, %v6823_v43, 0  ;;  %v6027_v46 = vmul.f32 %v6008_v62, %v17637_v12  ;;  %v17643_v43 = vld [vmem:[#allocation242_spill] sm:$0xff]  ;;  %v17646_v62 = vld [vmem:[#allocation237_spill] sm:$0xff] }
 0xa96   : > { %v6036_v6 = vmul.f32 %v6006_v0, %v17635_v56  ;;  %7430 = vmatprep.subr.msk.bf16.mxu1 %vm2308_vm9, %v6824_v44 }
 0xa97   : > { %v6723_v30 = vpack.c.bf16 %v6035_v17, %v6027_v46  ;;  %v6397_v17 = vsel %vm2215_vm5, %v17594_v14, %v17646_v62  ;;  %v6489_v46 = vsel %vm2701_vm14, %v17648_v19, %v14894_v40 }
 0xa98   : > { %v14947_v2 = vpop.permute.xlu0 %6265  ;;  %v14949_v61 = vpop.permute.xlu1 %6175  ;;  %v6724_v55 = vpack.c.bf16 %v6036_v6, %v6028_v42  ;;  %v6425_v14 = vmul.f32 %v6397_v17, %v17585_v11 }
 0xa99   : > { %17638 = vst [vmem:[#allocation123_spill] sm:$0xff] %v14947_v2  ;;  %6918 = vmatpush1.bf16.msra.mxu1 %v6868_v20 }
 0xa9a   : > { %6973 = vmatprep.subr.bf16.mxu1 %v6724_v55  ;;  %v17647_v55 = vld [vmem:[#allocation238_spill] sm:$0xff] }
 0xa9b   : > { %v6393_v20 = vsel %vm2215_vm5, %v17647_v55, %v14833_v28 }
 0xa9c   : > { %v14957_v0 = vpop.permute.xlu0 %6079  ;;  %v14959_v44 = vpop.permute.xlu1 %6367  ;;  %6924 = vmatmul.mubr.bf16.vlgmr.msra.gmra.mrb[72].mxu1 %v14954_v25 }
 0xa9d   : > { %17641 = vst [vmem:[#allocation12_spill] sm:$0xff] %v14959_v44  ;;  %v14965_v47 = vsel %vm2215_vm5, %v14833_v28, %v14959_v44  ;;  %6974 = vmatpush1.bf16.msra.mxu1 %v6723_v30  ;;  %7435 = vmatprep.mubr.msk.bf16.mxu1 %vm5714_vm7, %v17643_v43  ;;  %v6396_v30 = vsel %vm2215_vm5, %v17596_v21, %v17647_v55 }
 0xa9e   : > { %17642 = vst [vmem:[#allocation188_spill] sm:$0xff] %v14965_v47  ;;  %v6492_v21 = vsel %vm2701_vm14, %v17601_v59, %v17648_v19  ;;  %v6418_v55 = vmul.f32 %v6393_v20, %v17584_v7  ;;  %v17653_v19 = vld [vmem:[#allocation150_spill] sm:$0xff] }
 0xa9f   : > { %v6513_v20 = vmul.f32 %v6492_v21, %v17653_v19  ;;  %v17656_v21 = vld [vmem:[#allocation154_spill] sm:$0xff] }
 0xaa0   : > { %v14970_v42 = vpop.permute.xlu0 %6271  ;;  %v14972_v6 = vpop.permute.xlu1 %6461 }
 0xaa1   : > { %17644 = vst [vmem:[#allocation121_spill] sm:$0xff] %v14970_v42  ;;  %17645 = vst [vmem:[#allocation53_spill] sm:$0xff] %v14972_v6  ;;  %v14978_v63 = vsel %vm2701_vm14, %v14724_v35, %v14972_v6  ;;  %v17651_v6 = vld [vmem:[#allocation203_spill] sm:$0xff]  ;;  %v6417_v42 = vmul.f32 %v6396_v30, %v17585_v11 }
 0xaa2   : > { %v6488_v28 = vsel %vm2701_vm14, %v17651_v6, %v14724_v35  ;;  %v6491_v35 = vsel %vm2701_vm14, %v17604_v33, %v17651_v6  ;;  %v17655_v33 = vld [vmem:[#allocation51_spill] sm:$0xff] }
 0xaa3   : > { %v6785_v29 = vpack.c.bf16 %v6425_v14, %v6417_v42  ;;  %v6584_v6 = vsel %vm2766_vm15, %v17655_v33, %v14661_v15  ;;  %v6587_v42 = vsel %vm2766_vm15, %v17611_v45, %v17655_v33 }
 0xaa4   : > { %v14996_v9 = vpop.permute.xlu0 %6363  ;;  %v14998_v47 = vpop.permute.xlu1 %6467 }
 0xaa5   : > { %17649 = vst [vmem:[#allocation226_spill] sm:$0xff] %v14996_v9  ;;  %17650 = vst [vmem:[#allocation125_spill] sm:$0xff] %v14998_v47  ;;  %v6394_v44 = vsel %vm2215_vm5, %v17646_v62, %v14996_v9  ;;  %v17652_v47 = vld [vmem:[#allocation146_spill] sm:$0xff] }
 0xaa6   : > { %v6514_v2 = vmul.f32 %v6489_v46, %v17652_v47  ;;  %v6426_v17 = vmul.f32 %v6394_v44, %v17584_v7  ;;  %v6506_v62 = vmul.f32 %v6488_v28, %v17652_v47  ;;  %v17654_v46 = vld [vmem:[#allocation63_spill] sm:$0xff]  ;;  %v6505_v44 = vmul.f32 %v6491_v35, %v17653_v19  ;;  %v17658_v35 = vld [vmem:[#allocation153_spill] sm:$0xff] }
 0xaa7   : > { %v6493_v7 = vsel %vm2701_vm14, %v17609_v60, %v17654_v46 }
 0xaa8   : > { %v15022_v9 = vpop.permute.xlu0 %6381  ;;  %v15024_v53 = vpop.permute.xlu1 %6473  ;;  %v6786_v59 = vpack.c.bf16 %v6426_v17, %v6418_v55  ;;  %v6794_v11 = vpack.c.bf16 %v6514_v2, %v6506_v62  ;;  %v6793_v60 = vpack.c.bf16 %v6513_v20, %v6505_v44  ;;  %v6521_v2 = vmul.f32 %v6493_v7, %v17653_v19  ;;  %v17657_v55 = vld [vmem:[#allocation151_spill] sm:$0xff]  ;;  %v17660_v20 = vld [vmem:[#allocation58_spill] sm:$0xff] }
 0xaa9   : > { %v6602_v45 = vmul.f32 %v6584_v6, %v17657_v55  ;;  %v6601_v62 = vmul.f32 %v6587_v42, %v17658_v35  ;;  %v17661_v42 = vld [vmem:[#allocation6_spill] sm:$0xff] }
 0xaaa   : > { %6948 = vmatprep.subr.bf16.mxu0 %v6786_v59  ;;  %v17659_v59 = vld [vmem:[#allocation230_spill] sm:$0xff] }
 0xaab   : > { %6949 = vmatpush1.bf16.msra.mxu0 %v6785_v29  ;;  %v6589_v29 = vsel %vm2766_vm15, %v17616_v18, %v17656_v21  ;;  %v6585_v19 = vsel %vm2766_vm15, %v17659_v59, %v14865_v3  ;;  %v6588_v18 = vsel %vm2766_vm15, %v17619_v22, %v17659_v59  ;;  %v6801_v6 = vpack.c.bf16 %v6601_v62, %v6521_v2  ;;  %v7518_v2 = vld [vmem:[%s16574_s3 + $0x58] ss:$0 sm:$0xff] }
 0xaac   : > { %v15040_v30 = vpop.permute.xlu0 %6459  ;;  %6950 = vmatprep.subr.bf16.mxu0 %v6794_v11  ;;  %v15042_v14 = vpop.permute.xlu1 %6651  ;;  %v6617_v33 = vmul.f32 %v6589_v29, %v17658_v35  ;;  %v6609_v62 = vmul.f32 %v6588_v18, %v17658_v35  ;;  %v7519_v35 = vld [vmem:[%s16574_s3 + $0x50] ss:$0 sm:$0xff] }
 0xaad   : > { %v6490_v28 = vsel %vm2701_vm14, %v17654_v46, %v15040_v30  ;;  %v6681_v46 = vsel %vm2831_vm0, %v17660_v20, %v14921_v37 }
 0xaae   : > { %v6522_v17 = vmul.f32 %v6490_v28, %v17652_v47  ;;  %v6684_v47 = vsel %vm2831_vm0, %v17623_v48, %v17660_v20  ;;  %v17662_v28 = vld [vmem:[#allocation149_spill] sm:$0xff]  ;;  %v6706_v29 = vmul.f32 %v7518_v2, %v6681_v46  ;;  %v6809_v18 = vpack.c.bf16 %v6617_v33, %v6609_v62 }
 0xaaf   : > { %6951 = vmatpush1.bf16.msra.mxu0 %v6793_v60  ;;  %v6680_v60 = vsel %vm2831_vm0, %v17661_v42, %v14742_v49  ;;  %v6685_v48 = vsel %vm2831_vm0, %v17631_v38, %v17662_v28  ;;  %v6683_v38 = vsel %vm2831_vm0, %v17628_v51, %v17661_v42  ;;  %v6705_v46 = vmul.f32 %v7519_v35, %v6684_v47  ;;  %v17664_v62 = vld [vmem:[#allocation61_spill] sm:$0xff] }
 0xab0   : > { %v15072_v7 = vpop.permute.xlu0 %6555  ;;  %v15074_v11 = vpop.permute.xlu1 %6477  ;;  %v6802_v44 = vpack.c.bf16 %v6602_v45, %v6522_v17  ;;  %v6610_v45 = vmul.f32 %v6585_v19, %v17657_v55  ;;  %v6698_v59 = vmul.f32 %v7518_v2, %v6680_v60 }
 0xab1   : > { %v6586_v22 = vsel %vm2766_vm15, %v17656_v21, %v15072_v7  ;;  %v6682_v21 = vsel %vm2831_vm0, %v17662_v28, %v15042_v14 }
 0xab2   : > { %v6618_v17 = vmul.f32 %v6586_v22, %v17657_v55  ;;  %6952 = vmatprep.subr.bf16.mxu0 %v6802_v44  ;;  %v6713_v44 = vmul.f32 %v7519_v35, %v6685_v48  ;;  %v17663_v22 = vld [vmem:[#allocation220_spill] sm:$0xff]  ;;  %v6714_v42 = vmul.f32 %v7518_v2, %v6682_v21  ;;  %v6818_v28 = vpack.c.bf16 %v6706_v29, %v6698_v59 }
 0xab3   : > { %6953 = vmatpush1.bf16.msra.mxu0 %v6801_v6  ;;  %v15116_v51 = vmul.f32 %v14978_v63, %v17663_v22  ;;  %v6003_v63 = vsel %vm2378_vm11, %v14931_v52, %v14448_v27  ;;  %v6002_v29 = vsel %vm2378_vm11, %v14740_v36, %v17664_v62  ;;  %v6098_v21 = vsel %vm2443_vm12, %v14764_v4, %v14404_v24  ;;  %v17666_v52 = vld [vmem:[#allocation50_spill] sm:$0xff] }
 0xab4   : > { %v15103_v19 = vpop.permute.xlu0 %6463  ;;  %v15105_v20 = vpop.permute.xlu1 %6563  ;;  %v6810_v55 = vpack.c.bf16 %v6618_v17, %v6610_v45  ;;  %v6697_v45 = vmul.f32 %v7519_v35, %v6683_v38  ;;  %v6825_v2 = vpack.c.bf16 %v6713_v44, %v6713_v44  ;;  %v6826_v17 = vpack.c.bf16 %v6714_v42, %v6714_v42  ;;  %v17665_v38 = vld [vmem:[#allocation159_spill] sm:$0xff]  ;;  %v17668_v4 = vld [vmem:[#allocation158_spill] sm:$0xff] }
 0xab5   : > { %v6486_v6 = vsel %vm2701_vm14, %v14894_v40, %v15103_v19  ;;  %v6037_v59 = vmul.f32 %v6003_v63, %v17665_v38  ;;  %v6104_v35 = vsel %vm2443_vm12, %v17666_v52, %v14766_v57  ;;  %v6029_v36 = vmul.f32 %v6002_v29, %v17665_v38  ;;  %v17673_v62 = vld [vmem:[#allocation106_spill] sm:$0xff] }
 0xab6   : > { %v15119_v60 = vmul.f32 %v6486_v6, %v17663_v22  ;;  %6954 = vmatprep.subr.bf16.mxu0 %v6810_v55  ;;  %v6817_v40 = vpack.c.bf16 %v6705_v46, %v6697_v45  ;;  %v6874_v46 = vsel %vm2308_vm9, %v6825_v2, 0  ;;  %v6125_v44 = vmul.f32 %v6098_v21, %v17668_v4  ;;  %v17669_v6 = vld [vmem:[#allocation205_spill] sm:$0xff]  ;;  %v17675_v52 = vld [vmem:[#allocation186_spill] sm:$0xff] }
 0xab7   : > { %6955 = vmatpush1.bf16.msra.mxu0 %v6809_v18  ;;  %v17667_v18 = vld [vmem:[#allocation165_spill] sm:$0xff]  ;;  %v6123_v42 = vmul.f32 %v6104_v35, %v17669_v6  ;;  %v6725_v63 = vpack.c.bf16 %v6037_v59, %v6029_v36  ;;  %v6198_v21 = vsel %vm2508_vm13, %v14923_v39, %v14949_v61  ;;  %v17676_v36 = vld [vmem:[#allocation187_spill] sm:$0xff] }
 0xab8   : > { %v6795_v47 = vpack.c.bf16 %v15119_v60, %v15116_v51  ;;  %v15123_v33 = vpop.permute.xlu0 %6469  ;;  %6956 = vmatprep.subr.bf16.mxu0 %v6818_v28  ;;  %v6076_v48 = vpop.permute.xlu1 %6075  ;;  %v6200_v24 = vsel %vm2508_vm13, %v17667_v18, %v14728_v26  ;;  %v17670_v28 = vld [vmem:[#allocation208_spill] sm:$0xff] }
 0xab9   : > { %v6124_v45 = vmul.f32 %v14779_v54, %v17670_v28 }
 0xabb   : > { %6957 = vmatpush1.bf16.msra.mxu0 %v6817_v40  ;;  %v17671_v40 = vld [vmem:[#allocation216_spill] sm:$0xff] }
 0xabc   : > { %v15138_v55 = vpop.permute.xlu0 %6475  ;;  %7432 = vmatprep.subr.msk.bf16.mxu0 %vm2308_vm9, %v6826_v17  ;;  %v15141_v27 = vpop.permute.xlu1 %6267  ;;  %v6201_v57 = vsel %vm2508_vm13, %v17671_v40, %v14923_v39  ;;  %v17672_v17 = vld [vmem:[#allocation44_spill] sm:$0xff] }
 0xabd   : > { %v17674_v29 = vpack.c.bf16 %v17672_v17, %v17673_v62  ;;  %v17677_v17 = vld [vmem:[#allocation235_spill] sm:$0xff]  ;;  %v17678_v62 = vld [vmem:[#allocation104_spill] sm:$0xff] }
 0xabf   : > { %6959 = vmatpush1.bf16.msra.mxu0 %v6874_v46  ;;  %v6106_v46 = vsel %vm2443_vm12, %v17676_v36, %v6076_v48  ;;  %v17683_v36 = vld [vmem:[#allocation240_spill] sm:$0xff] }
 0xac0   : > { %v5980_v2 = vpop.permute.xlu0 %5979  ;;  %7014 = vmatprep.subr.bf16.mxu0 %v17674_v29  ;;  %v5986_v26 = vpop.permute.xlu1 %5985 }
 0xac1   : > { %v6010_v54 = vsel %vm2378_vm11, %v17675_v52, %v5980_v2  ;;  %v6004_v35 = vsel %vm2378_vm11, %v5986_v26, %v14514_v58  ;;  %v6007_v59 = vsel %vm2378_vm11, %v5980_v2, %v5986_v26  ;;  %v6105_v58 = vsel %vm2443_vm12, %v17677_v17, %v14929_v16 }
 0xac2   : > { %v6043_v18 = vmul.f32 %v6010_v54, %v17637_v12  ;;  %v6044_v40 = vmul.f32 %v6007_v59, %v17635_v56  ;;  %v6045_v39 = vmul.f32 %v6004_v35, %v17665_v38  ;;  %6965 = vmatmul.mubr.bf16.vlgmr.msra.gmra.mrb[68].mxu0 %v14954_v25  ;;  %v6099_v2 = vsel %vm2443_vm12, %v14957_v0, %v17678_v62  ;;  %v17679_v56 = vld [vmem:[#allocation17_spill] sm:$0xff]  ;;  %v17687_v62 = vld [vmem:[#allocation56_spill] sm:$0xff] }
 0xac3   : > { %v6102_v12 = vsel %vm2443_vm12, %v14929_v16, %v14957_v0  ;;  %7015 = vmatpush1.bf16.msra.mxu0 %v6725_v63  ;;  %7437 = vmatprep.mubr.msk.bf16.mxu0 %vm5714_vm7, %v17643_v43  ;;  %v6195_v38 = vsel %vm2508_vm13, %v14949_v61, %v17679_v56  ;;  %v17680_v54 = vpack.c.bf16 %v14597_v50, %v14601_v8  ;;  %v17681_v16 = vld [vmem:[#allocation213_spill] sm:$0xff]  ;;  %v17690_v56 = vld [vmem:[#allocation62_spill] sm:$0xff] }
 0xac4   : > { %v6731_v29 = vpack.c.bf16 %v6123_v42, %v6043_v18  ;;  %v6733_v26 = vpack.c.bf16 %v6125_v44, %v6045_v39  ;;  %v15201_v52 = vpop.permute.xlu0 %6471  ;;  %v6082_v35 = vpop.permute.xlu1 %6081  ;;  %v6732_v59 = vpack.c.bf16 %v6124_v45, %v6044_v40  ;;  %v6228_v0 = vmul.f32 %v6198_v21, %v17681_v16  ;;  %v17682_v45 = vld [vmem:[#allocation13_spill] sm:$0xff] }
 0xac5   : > { %7016 = vmatprep.subr.bf16.mxu0 %v17680_v54  ;;  %v6139_v63 = vmul.f32 %v6106_v46, %v17669_v6  ;;  %v6100_v43 = vsel %vm2443_vm12, %v6082_v35, %v14545_v34  ;;  %v6103_v61 = vsel %vm2443_vm12, %v6076_v48, %v6082_v35  ;;  %v6132_v44 = vmul.f32 %v6102_v12, %v17670_v28  ;;  %v17684_v46 = vld [vmem:[#allocation210_spill] sm:$0xff]  ;;  %v17693_v35 = vld [vmem:[#allocation215_spill] sm:$0xff] }
 0xac6   : > { %v6133_v42 = vmul.f32 %v6099_v2, %v17668_v4  ;;  %v6140_v50 = vmul.f32 %v6103_v61, %v17670_v28  ;;  %v6141_v8 = vmul.f32 %v6100_v43, %v17668_v4  ;;  %6975 = vmatprep.subr.bf16.mxu1 %v6732_v59  ;;  %v6194_v21 = vsel %vm2508_vm13, %v14801_v41, %v17682_v45  ;;  %v17694_v59 = vld [vmem:[#allocation110_spill] sm:$0xff] }
 0xac7   : > { %v6296_v34 = vsel %vm2198_vm2, %v17683_v36, %v14803_v32  ;;  %v6131_v48 = vmul.f32 %v6105_v58, %v17669_v6  ;;  %6976 = vmatpush1.bf16.msra.mxu1 %v6731_v29  ;;  %7017 = vmatpush1.bf16.msra.mxu0 %v6733_v26  ;;  %v6220_v28 = vmul.f32 %v14814_v23, %v17681_v16  ;;  %v17686_v6 = vld [vmem:[#allocation167_spill] sm:$0xff]  ;;  %v17691_v26 = vld [vmem:[#allocation169_spill] sm:$0xff] }
 0xac8   : > { %v6227_v4 = vmul.f32 %v6201_v57, %v17684_v46  ;;  %v6741_v18 = vpack.c.bf16 %v6141_v8, %v6133_v42  ;;  %v15229_v40 = vpop.permute.xlu0 %6557  ;;  %v17685_v41 = vpack.c.bf16 %v14632_v10, %v14617_v5  ;;  %v15234_v39 = vpop.permute.xlu1 %6559  ;;  %v6740_v17 = vpack.c.bf16 %v6140_v50, %v6132_v44  ;;  %v17688_v57 = vld [vmem:[#allocation100_spill] sm:$0xff]  ;;  %v17689_v10 = vld [vmem:[#allocation10_spill] sm:$0xff]  ;;  %v17696_v44 = vld [vmem:[#allocation25_spill] sm:$0xff] }
 0xac9   : > { %v6290_v32 = vsel %vm2198_vm2, %v14831_v31, %v14415_v1  ;;  %v6229_v58 = vmul.f32 %v6195_v38, %v17686_v6  ;;  %v6739_v23 = vpack.c.bf16 %v6139_v63, %v6131_v48  ;;  %v6383_v2 = vsel %vm2215_vm5, %v17688_v57, %v17687_v62  ;;  %v17692_v38 = vld [vmem:[#allocation211_spill] sm:$0xff]  ;;  %v17704_v57 = vld [vmem:[#allocation121_spill] sm:$0xff] }
 0xaca   : > { %7018 = vmatprep.subr.bf16.mxu0 %v17685_v41  ;;  %v6219_v12 = vmul.f32 %v6200_v24, %v17684_v46  ;;  %6977 = vmatprep.subr.bf16.mxu1 %v6740_v17  ;;  %v6748_v5 = vpack.c.bf16 %v6228_v0, %v6220_v28  ;;  %v6773_v29 = vpack.c.bf16 %v17690_v56, %v17689_v10  ;;  %v17695_v24 = vld [vmem:[#allocation142_spill] sm:$0xff]  ;;  %v17697_v42 = vld [vmem:[#allocation163_spill] sm:$0xff] }
 0xacb   : > { %v6404_v31 = vsel %vm2215_vm5, %v17687_v62, %v17691_v26  ;;  %v6221_v1 = vmul.f32 %v6194_v21, %v17686_v6  ;;  %v6315_v54 = vmul.f32 %v6296_v34, %v17692_v38  ;;  %6978 = vmatpush1.bf16.msra.mxu1 %v6739_v23  ;;  %7019 = vmatpush1.bf16.msra.mxu0 %v6741_v18  ;;  %v17699_v36 = vld [vmem:[#allocation59_spill] sm:$0xff]  ;;  %v17700_v34 = vld [vmem:[#allocation84_spill] sm:$0xff]  ;;  %v17703_v62 = vld [vmem:[#allocation37_spill] sm:$0xff] }
 0xacc   : > { %v6316_v63 = vmul.f32 %v17694_v59, %v17693_v35  ;;  %v6317_v43 = vmul.f32 %v6290_v32, %v17695_v24  ;;  %v6747_v0 = vpack.c.bf16 %v6227_v4, %v6219_v12  ;;  %v6172_v61 = vpop.permute.xlu0 %6171  ;;  %6979 = vmatprep.subr.bf16.mxu1 %v6748_v5  ;;  %v17698_v50 = vpack.c.bf16 %v17696_v44, %v17697_v42  ;;  %v6178_v8 = vpop.permute.xlu1 %6177  ;;  %v17701_v4 = vld [vmem:[#allocation5_spill] sm:$0xff]  ;;  %v17705_v5 = vld [vmem:[#allocation123_spill] sm:$0xff]  ;;  %v17707_v59 = vld [vmem:[#allocation108_spill] sm:$0xff] }
 0xacd   : > { %v6749_v45 = vpack.c.bf16 %v6229_v58, %v6221_v1  ;;  %v6202_v21 = vsel %vm2508_vm13, %v17699_v36, %v6172_v61  ;;  %v6196_v48 = vsel %vm2508_vm13, %v6178_v8, %v17700_v34  ;;  %v6199_v28 = vsel %vm2508_vm13, %v6172_v61, %v6178_v8  ;;  %v17702_v58 = vld [vmem:[#allocation170_spill] sm:$0xff]  ;;  %v17710_v8 = vld [vmem:[#allocation183_spill] sm:$0xff] }
 0xace   : > { %7020 = vmatprep.subr.bf16.mxu0 %v17698_v50  ;;  %v6298_v18 = vsel %vm2198_vm2, %v17701_v4, %v15141_v27  ;;  %v6235_v41 = vmul.f32 %v6202_v21, %v17684_v46  ;;  %v6236_v17 = vmul.f32 %v6199_v28, %v17681_v16  ;;  %v6237_v32 = vmul.f32 %v6196_v48, %v17686_v6  ;;  %v17706_v46 = vld [vmem:[#allocation155_spill] sm:$0xff]  ;;  %v17708_v61 = vld [vmem:[#allocation198_spill] sm:$0xff]  ;;  %v17713_v28 = vld [vmem:[#allocation140_spill] sm:$0xff] }
 0xacf   : > { %v15276_v23 = vmul.f32 %v6383_v2, %v17702_v58  ;;  %v6291_v12 = vsel %vm2198_vm2, %v17704_v57, %v17703_v62  ;;  %v6294_v26 = vsel %vm2198_vm2, %v17705_v5, %v17704_v57  ;;  %6980 = vmatpush1.bf16.msra.mxu1 %v6747_v0  ;;  %7021 = vmatpush1.bf16.msra.mxu0 %v6749_v45  ;;  %v17711_v45 = vld [vmem:[#allocation52_spill] sm:$0xff]  ;;  %v17717_v57 = vld [vmem:[#allocation115_spill] sm:$0xff]  ;;  %v17745_v10 = vld [vmem:[#allocation226_spill] sm:$0xff] }
 0xad0   : > { %v6297_v16 = vsel %vm2198_vm2, %v17706_v46, %v17705_v5  ;;  %v6755_v6 = vpack.c.bf16 %v6315_v54, %v6235_v41  ;;  %v6757_v2 = vpack.c.bf16 %v6317_v43, %v6237_v32  ;;  %v15290_v1 = vpop.permute.xlu0 %6569  ;;  %v17709_v44 = vpack.c.bf16 %v17707_v59, %v17708_v61  ;;  %v6274_v42 = vpop.permute.xlu1 %6273  ;;  %v17714_v41 = vld [vmem:[#allocation11_spill] sm:$0xff]  ;;  %v17716_v32 = vld [vmem:[#allocation76_spill] sm:$0xff] }
 0xad1   : > { %v6756_v50 = vpack.c.bf16 %v6316_v63, %v6236_v17  ;;  %v6414_v36 = vmul.f32 %v6404_v31, %v17710_v8  ;;  %v6331_v0 = vmul.f32 %v6298_v18, %v17692_v38  ;;  %v6292_v21 = vsel %vm2198_vm2, %v6274_v42, %v17711_v45  ;;  %v17712_v31 = vld [vmem:[#allocation96_spill] sm:$0xff]  ;;  %v17725_v45 = vld [vmem:[#allocation9_spill] sm:$0xff] }
 0xad2   : > { %7022 = vmatprep.subr.bf16.mxu0 %v17709_v44  ;;  %v6295_v54 = vsel %vm2198_vm2, %v15141_v27, %v6274_v42  ;;  %v6324_v43 = vmul.f32 %v6294_v26, %v17693_v35  ;;  %v6325_v34 = vmul.f32 %v6291_v12, %v17695_v24  ;;  %v6333_v63 = vmul.f32 %v6292_v21, %v17695_v24  ;;  %v17715_v27 = vld [vmem:[#allocation171_spill] sm:$0xff]  ;;  %v17720_v46 = vld [vmem:[#allocation60_spill] sm:$0xff]  ;;  %v17726_v21 = vld [vmem:[#allocation65_spill] sm:$0xff] }
 0xad3   : > { %v6332_v48 = vmul.f32 %v6295_v54, %v17693_v35  ;;  %6981 = vmatprep.subr.bf16.mxu1 %v6756_v50  ;;  %v6384_v4 = vsel %vm2215_vm5, %v17713_v28, %v17712_v31  ;;  %v6323_v18 = vmul.f32 %v6297_v16, %v17692_v38  ;;  %7023 = vmatpush1.bf16.msra.mxu0 %v6757_v2  ;;  %v17718_v12 = vld [vmem:[#allocation107_spill] sm:$0xff]  ;;  %v17721_v16 = vld [vmem:[#allocation77_spill] sm:$0xff]  ;;  %v17722_v2 = vld [vmem:[#allocation218_spill] sm:$0xff] }
 0xad4   : > { %6982 = vmatpush1.bf16.msra.mxu1 %v6755_v6  ;;  %v6774_v17 = vpack.c.bf16 %v17715_v27, %v17714_v41  ;;  %v6405_v35 = vsel %vm2215_vm5, %v17712_v31, %v17716_v32  ;;  %v6765_v62 = vpack.c.bf16 %v6333_v63, %v6325_v34  ;;  %v15318_v24 = vpop.permute.xlu0 %6567  ;;  %v17719_v5 = vpack.c.bf16 %v17717_v57, %v17718_v12  ;;  %v15323_v26 = vpop.permute.xlu1 %6565  ;;  %v17723_v59 = vld [vmem:[#allocation36_spill] sm:$0xff]  ;;  %v17724_v44 = vld [vmem:[#allocation95_spill] sm:$0xff]  ;;  %v17729_v41 = vld [vmem:[#allocation85_spill] sm:$0xff] }
 0xad5   : > { %v6764_v38 = vpack.c.bf16 %v6332_v48, %v6324_v43  ;;  %v6771_v6 = vpack.c.bf16 %v17721_v16, %v17720_v46  ;;  %v6411_v61 = vmul.f32 %v17723_v59, %v17722_v2  ;;  %v6385_v42 = vsel %vm2215_vm5, %v17724_v44, %v15022_v9  ;;  %v17727_v34 = vld [vmem:[#allocation87_spill] sm:$0xff]  ;;  %v17728_v48 = vld [vmem:[#allocation32_spill] sm:$0xff]  ;;  %v17732_v57 = vld [vmem:[#allocation53_spill] sm:$0xff] }
 0xad6   : > { %7024 = vmatprep.subr.bf16.mxu0 %v17719_v5  ;;  %v6763_v50 = vpack.c.bf16 %v6331_v0, %v6323_v18  ;;  %v6772_v54 = vpack.c.bf16 %v17726_v21, %v17725_v45  ;;  %v6781_v63 = vpack.c.bf16 %v15276_v23, %v17727_v34  ;;  %v15338_v43 = vmul.f32 %v6384_v4, %v17702_v58  ;;  %v17730_v0 = vld [vmem:[#allocation12_spill] sm:$0xff]  ;;  %v17731_v4 = vld [vmem:[#allocation125_spill] sm:$0xff]  ;;  %v17738_v45 = vld [vmem:[#allocation190_spill] sm:$0xff] }
 0xad7   : > { %v6406_v31 = vsel %vm2215_vm5, %v15022_v9, %v17728_v48  ;;  %6983 = vmatprep.subr.bf16.mxu1 %v6764_v38  ;;  %v6782_v27 = vpack.c.bf16 %v6414_v36, %v17729_v41  ;;  %v6422_v32 = vmul.f32 %v6405_v35, %v17710_v8  ;;  %v6387_v18 = vsel %vm2215_vm5, %v17730_v0, %v17713_v28  ;;  %v17733_v35 = vld [vmem:[#allocation57_spill] sm:$0xff]  ;;  %v17735_v16 = vld [vmem:[#allocation160_spill] sm:$0xff]  ;;  %v17741_v41 = vld [vmem:[#allocation194_spill] sm:$0xff] }
 0xad8   : > { %v6483_v23 = vsel %vm2701_vm14, %v15103_v19, %v15123_v33  ;;  %6984 = vmatpush1.bf16.msra.mxu1 %v6763_v50  ;;  %7025 = vmatpush1.bf16.msra.mxu0 %v6765_v62  ;;  %v6482_v9 = vsel %vm2701_vm14, %v17732_v57, %v17731_v4  ;;  %v6429_v36 = vmul.f32 %v6385_v42, %v17702_v58  ;;  %v6574_v28 = vpop.permute.xlu0 %6573  ;;  %v6572_v5 = vpop.permute.xlu1 %6571  ;;  %v17734_v38 = vld [vmem:[#allocation105_spill] sm:$0xff]  ;;  %v17736_v59 = vld [vmem:[#allocation188_spill] sm:$0xff]  ;;  %v17737_v50 = vld [vmem:[#allocation219_spill] sm:$0xff] }
 0xad9   : > { %v6501_v12 = vsel %vm2701_vm14, %v15138_v55, %v17733_v35  ;;  %6985 = vmatprep.subr.bf16.mxu1 %v6772_v54  ;;  %7026 = vmatprep.subr.bf16.mxu0 %v6774_v17  ;;  %v6779_v19 = vpack.c.bf16 %v6411_v61, %v17734_v38  ;;  %v6430_v62 = vmul.f32 %v6406_v31, %v17710_v8  ;;  %v17739_v61 = vld [vmem:[#allocation221_spill] sm:$0xff] }
 0xada   : > { %v6479_v46 = vsel %vm2701_vm14, %v17731_v4, %v15024_v53  ;;  %v6500_v58 = vsel %vm2701_vm14, %v15024_v53, %v17735_v16  ;;  %v6419_v42 = vmul.f32 %v17736_v59, %v17722_v2  ;;  %v6420_v17 = vmul.f32 %v6387_v18, %v17737_v50  ;;  %v17740_v53 = vld [vmem:[#allocation145_spill] sm:$0xff]  ;;  %v17742_v4 = vld [vmem:[#allocation14_spill] sm:$0xff]  ;;  %v17748_v59 = vld [vmem:[#allocation67_spill] sm:$0xff] }
 0xadb   : > { %v6502_v8 = vsel %vm2701_vm14, %v15074_v11, %v17738_v45  ;;  %v6516_v21 = vmul.f32 %v6483_v23, %v17739_v61  ;;  %v6508_v54 = vmul.f32 %v6482_v9, %v17739_v61  ;;  %v6480_v34 = vsel %vm2701_vm14, %v15123_v33, %v15138_v55  ;;  %v17743_v57 = vld [vmem:[#allocation21_spill] sm:$0xff] }
 0xadc   : > { %v6518_v48 = vmul.f32 %v6501_v12, %v17740_v53  ;;  %6986 = vmatpush1.bf16.msra.mxu1 %v6771_v6  ;;  %7027 = vmatpush1.bf16.msra.mxu0 %v6773_v29  ;;  %v6789_v31 = vpack.c.bf16 %v6429_v36, %v15338_v43  ;;  %v6509_v0 = vmul.f32 %v6479_v46, %v17741_v41  ;;  %v6370_v23 = vpop.permute.xlu0 %6369  ;;  %v15403_v29 = vpop.permute.xlu1 %6653 }
 0xadd   : > { %v6510_v18 = vmul.f32 %v6500_v58, %v17740_v53  ;;  %7028 = vmatprep.subr.bf16.mxu0 %v6782_v27  ;;  %v17744_v9 = vpack.c.bf16 %v17742_v4, %v17743_v57  ;;  %v6526_v33 = vmul.f32 %v6502_v8, %v17740_v53  ;;  %v6388_v55 = vsel %vm2215_vm5, %v6370_v23, %v17724_v44  ;;  %v17746_v44 = vld [vmem:[#allocation20_spill] sm:$0xff] }
 0xade   : > { %v6391_v56 = vsel %vm2215_vm5, %v17745_v10, %v6370_v23  ;;  %v6790_v6 = vpack.c.bf16 %v6430_v62, %v6422_v32  ;;  %v6517_v43 = vmul.f32 %v6480_v34, %v17741_v41  ;;  %v6428_v36 = vmul.f32 %v6388_v55, %v17737_v50  ;;  %v17750_v8 = vld [vmem:[#allocation180_spill] sm:$0xff]  ;;  %v17752_v23 = vld [vmem:[#allocation223_spill] sm:$0xff] }
 0xadf   : > { %6987 = vmatprep.subr.bf16.mxu1 %v17744_v9  ;;  %v6427_v27 = vmul.f32 %v6391_v56, %v17722_v2  ;;  %v6796_v35 = vpack.c.bf16 %v6516_v21, %v6508_v54  ;;  %v6575_v12 = vsel %vm2766_vm15, %v15105_v20, %v15290_v1  ;;  %v6596_v38 = vsel %vm2766_vm15, %v15290_v1, %v17746_v44  ;;  %v17753_v44 = vld [vmem:[#allocation90_spill] sm:$0xff] }
 0xae0   : > { %6988 = vmatpush1.bf16.msra.mxu1 %v6779_v19  ;;  %7029 = vmatpush1.bf16.msra.mxu0 %v6781_v63  ;;  %v6798_v32 = vpack.c.bf16 %v6518_v48, %v6510_v18  ;;  %v6481_v2 = vsel %vm2701_vm14, %v15201_v52, %v15074_v11  ;;  %v6577_v62 = vsel %vm2766_vm15, %v15318_v24, %v6574_v28  ;;  %v6656_v16 = vpop.permute.xlu0 %6655  ;;  %v17747_v63 = vld [vmem:[#allocation64_spill] sm:$0xff]  ;;  %v6660_v50 = vpop.permute.xlu1 %6659 }
 0xae1   : > { %v6787_v46 = vpack.c.bf16 %v6427_v27, %v6419_v42  ;;  %7030 = vmatprep.subr.bf16.mxu0 %v6790_v6  ;;  %v6788_v58 = vpack.c.bf16 %v6428_v36, %v6420_v17  ;;  %v6578_v1 = vsel %vm2766_vm15, %v15229_v40, %v15105_v20  ;;  %v6598_v19 = vsel %vm2766_vm15, %v6574_v28, %v17747_v63  ;;  %v17749_v28 = vld [vmem:[#allocation4_spill] sm:$0xff]  ;;  %v17754_v63 = vld [vmem:[#allocation86_spill] sm:$0xff] }
 0xae2   : > { %v6576_v11 = vsel %vm2766_vm15, %v15323_v26, %v6572_v5  ;;  %v6597_v42 = vsel %vm2766_vm15, %v6572_v5, %v17748_v59  ;;  %v6581_v17 = vsel %vm2766_vm15, %v14661_v15, %v15229_v40  ;;  %v6582_v20 = vsel %vm2766_vm15, %v14865_v3, %v15234_v39  ;;  %v7523_v59 = vld [vmem:[%s16574_s3 + $0x78] ss:$0 sm:$0xff] }
 0xae3   : > { %v6605_v45 = vmul.f32 %v6575_v12, %v17749_v28  ;;  %v6606_v21 = vmul.f32 %v6596_v38, %v17750_v8  ;;  %6989 = vmatprep.subr.bf16.mxu1 %v6788_v58  ;;  %v6525_v54 = vmul.f32 %v6481_v2, %v17741_v41  ;;  %v6579_v5 = vsel %vm2766_vm15, %v15234_v39, %v15323_v26  ;;  %v17751_v41 = vld [vmem:[#allocation222_spill] sm:$0xff] }
 0xae4   : > { %v15452_v34 = vmul.f32 %v6577_v62, %v17749_v28  ;;  %6990 = vmatpush1.bf16.msra.mxu1 %v6787_v46  ;;  %7031 = vmatpush1.bf16.msra.mxu0 %v6789_v31  ;;  %v6622_v15 = vmul.f32 %v6598_v19, %v17750_v8  ;;  %v6613_v3 = vmul.f32 %v6576_v11, %v17749_v28  ;;  %v6662_v53 = vpop.permute.xlu0 %6661  ;;  %v6466_v26 = vpop.permute.xlu1 %6465 }
 0xae5   : > { %v6614_v40 = vmul.f32 %v6597_v42, %v17750_v8  ;;  %7032 = vmatprep.subr.bf16.mxu0 %v6798_v32  ;;  %6991 = vmatprep.subr.bf16.mxu1 %v6796_v35  ;;  %v6797_v48 = vpack.c.bf16 %v6517_v43, %v6509_v0  ;;  %v6603_v18 = vmul.f32 %v6581_v17, %v17751_v41  ;;  %v7521_v32 = vld [vmem:[%s16574_s3 + $0x60] ss:$0 sm:$0xff] }
 0xae6   : > { %v6604_v4 = vmul.f32 %v6578_v1, %v17752_v23  ;;  %v6611_v39 = vmul.f32 %v6582_v20, %v17751_v41  ;;  %v6805_v57 = vpack.c.bf16 %v6605_v45, %v6525_v54  ;;  %v6484_v31 = vsel %vm2701_vm14, %v6466_v26, %v15201_v52 }
 0xae7   : > { %v6487_v9 = vsel %vm2701_vm14, %v15040_v30, %v6466_v26  ;;  %v6806_v55 = vpack.c.bf16 %v6606_v21, %v6526_v33  ;;  %v6612_v10 = vmul.f32 %v6579_v5, %v17752_v23  ;;  %v6524_v56 = vmul.f32 %v6484_v31, %v17739_v61 }
 0xae8   : > { %v6523_v0 = vmul.f32 %v6487_v9, %v17663_v22  ;;  %6992 = vmatpush1.bf16.msra.mxu1 %v6795_v47  ;;  %7033 = vmatpush1.bf16.msra.mxu0 %v6797_v48  ;;  %v6813_v6 = vpack.c.bf16 %v15452_v34, %v6613_v3  ;;  %v6678_v52 = vsel %vm2831_vm0, %v14921_v37, %v6656_v16  ;;  %v6562_v33 = vpop.permute.xlu0 %6561  ;;  %v6666_v60 = vpop.permute.xlu1 %6665  ;;  %v17756_v9 = vld [vmem:[#allocation141_spill] sm:$0xff] }
 0xae9   : > { %v6675_v30 = vsel %vm2831_vm0, %v6656_v16, %v6662_v53  ;;  %7034 = vmatprep.subr.bf16.mxu0 %v6806_v55  ;;  %v6814_v43 = vpack.c.bf16 %v6622_v15, %v6614_v40  ;;  %v6580_v61 = vsel %vm2766_vm15, %v6562_v33, %v15318_v24  ;;  %v6583_v51 = vsel %vm2766_vm15, %v15072_v7, %v6562_v33  ;;  %v7520_v7 = vld [vmem:[%s16574_s3 + $0x68] ss:$0 sm:$0xff]  ;;  %v7522_v16 = vld [vmem:[%s16574_s3 + $0x70] ss:$0 sm:$0xff] }
 0xaea   : > { %v6803_v22 = vpack.c.bf16 %v6603_v18, %v6523_v0  ;;  %v6804_v47 = vpack.c.bf16 %v6604_v4, %v6524_v56  ;;  %v6674_v37 = vsel %vm2831_vm0, %v15403_v29, %v6660_v50  ;;  %v6619_v27 = vmul.f32 %v6583_v51, %v17751_v41 }
 0xaeb   : > { %v6620_v36 = vmul.f32 %v6580_v61, %v17752_v23  ;;  %v6671_v35 = vsel %vm2831_vm0, %v6660_v50, %v6666_v60  ;;  %v6677_v24 = vsel %vm2831_vm0, %v14742_v49, %v15403_v29  ;;  %v6708_v12 = vmul.f32 %v7520_v7, %v6675_v30 }
 0xaec   : > { %v6692_v38 = vsel %vm2831_vm0, %v6666_v60, %v17753_v44  ;;  %6993 = vmatprep.subr.bf16.mxu1 %v6804_v47  ;;  %7035 = vmatpush1.bf16.msra.mxu0 %v6805_v57  ;;  %v6707_v2 = vmul.f32 %v7521_v32, %v6678_v52  ;;  %v6811_v62 = vpack.c.bf16 %v6619_v27, %v6611_v39  ;;  %v6668_v46 = vpop.permute.xlu0 %6667  ;;  %v6658_v11 = vpop.permute.xlu1 %6657  ;;  %v17757_v27 = vld [vmem:[#allocation28_spill] sm:$0xff] }
 0xaed   : > { %6994 = vmatpush1.bf16.msra.mxu1 %v6803_v22  ;;  %7036 = vmatprep.subr.bf16.mxu0 %v6814_v43  ;;  %v6812_v49 = vpack.c.bf16 %v6620_v36, %v6612_v10  ;;  %v6700_v29 = vmul.f32 %v7520_v7, %v6674_v37  ;;  %v6701_v58 = vmul.f32 %v7522_v16, %v6671_v35 }
 0xaee   : > { %v6672_v1 = vsel %vm2831_vm0, %v6662_v53, %v6668_v46  ;;  %v6693_v19 = vsel %vm2831_vm0, %v6668_v46, %v17754_v63  ;;  %v6702_v42 = vmul.f32 %v7523_v59, %v6692_v38  ;;  %v6679_v20 = vsel %vm2831_vm0, %v15042_v14, %v6658_v11  ;;  %v17755_v14 = vld [vmem:[#allocation70_spill] sm:$0xff] }
 0xaef   : > { %v6709_v50 = vmul.f32 %v7522_v16, %v6672_v1  ;;  %v6710_v17 = vmul.f32 %v7523_v59, %v6693_v19  ;;  %6995 = vmatprep.subr.bf16.mxu1 %v6812_v49  ;;  %v6715_v28 = vmul.f32 %v7521_v32, %v6679_v20  ;;  %v6820_v45 = vpack.c.bf16 %v6708_v12, %v6700_v29 }
 0xaf0   : > { %7037 = vmatpush1.bf16.msra.mxu0 %v6813_v6  ;;  %v6699_v8 = vmul.f32 %v7521_v32, %v6677_v24  ;;  %v6664_v54 = vpop.permute.xlu0 %6663  ;;  %v6670_v15 = vpop.permute.xlu1 %6669 }
 0xaf1   : > { %v6821_v21 = vpack.c.bf16 %v6709_v50, %v6701_v58  ;;  %6996 = vmatpush1.bf16.msra.mxu1 %v6811_v62  ;;  %v6822_v5 = vpack.c.bf16 %v6710_v17, %v6702_v42  ;;  %v6676_v34 = vsel %vm2831_vm0, %v6658_v11, %v6664_v54  ;;  %v6673_v53 = vsel %vm2831_vm0, %v6664_v54, %v6670_v15 }
 0xaf2   : > { %6997 = vmatprep.subr.bf16.mxu1 %v6820_v45  ;;  %v6819_v3 = vpack.c.bf16 %v6707_v2, %v6699_v8  ;;  %v6716_v40 = vmul.f32 %v7520_v7, %v6676_v34  ;;  %v6694_v48 = vsel %vm2831_vm0, %v6670_v15, %v17755_v14  ;;  %v6827_v41 = vpack.c.bf16 %v6715_v28, %v6715_v28 }
 0xaf3   : > { %7038 = vmatprep.subr.bf16.mxu0 %v6822_v5  ;;  %v6717_v18 = vmul.f32 %v7522_v16, %v6673_v53  ;;  %v6718_v23 = vmul.f32 %v7523_v59, %v6694_v48 }
 0xaf4   : > { %7039 = vmatpush1.bf16.msra.mxu0 %v6821_v21  ;;  %v6828_v4 = vpack.c.bf16 %v6716_v40, %v6716_v40  ;;  %v6880_v57 = vsel %vm2308_vm9, %v6827_v41, 0 }
 0xaf5   : > { %6998 = vmatpush1.bf16.msra.mxu1 %v6819_v3  ;;  %v6829_v39 = vpack.c.bf16 %v6717_v18, %v6717_v18  ;;  %v6830_v26 = vpack.c.bf16 %v6718_v23, %v6718_v23 }
 0xaf6   : > { %7434 = vmatprep.subr.msk.bf16.mxu1 %vm2308_vm9, %v6828_v4 }
 0xaf7   : > { %7436 = vmatprep.subr.msk.bf16.mxu0 %vm2308_vm9, %v6830_v26  ;;  %v6886_v31 = vsel %vm2308_vm9, %v6829_v39, 0 }
 0xaf8   : > { %7041 = vmatpush1.bf16.msra.mxu0 %v6886_v31 }
 0xaf9   : > { %7000 = vmatpush1.bf16.msra.mxu1 %v6880_v57 }
 0xafb   : > { %7047 = vmatmul.mubr.bf16.vlgmr.msra.gmra.mrb[72].mxu0 %v14954_v25 }
 0xafc   : > { %7006 = vmatmul.mubr.bf16.vlgmr.msra.gmra.mrb[76].mxu1 %v14954_v25 }
 0xb01   : > { %v6834_v13 = vpop.permute.xlu0 %6833 }
 0xb02   : > { %v6839_v55 = vrot.slane %v6834_v13, %v17756_v9 }
 0xb6f   : > { %v6925_v10 = vpop.f32.mrb[72].mxu1 }
 0xb70   : > { %v6926_v0 = vadd.f32 %v6925_v10, %v6839_v55  ;;  %v6927_v56 = vpop.f32.mrb[73].mxu1 }
 0xb71   : > { %v6928_v6 = vadd.f32 %v6927_v56, %v6839_v55  ;;  %v6929_v52 = vpop.f32.mrb[74].mxu1 }
 0xb72   : > { %v6930_v30 = vpop.f32.mrb[75].mxu1 }
 0xb73   : > { %v7063_v33 = vcombine.low %v6926_v0, %v6928_v6 }
 0xb75   : > { %v7073_v36 = vrot.slane %v7063_v33, %v17757_v27 }
 0xb95   : > { %v6966_v43 = vpop.f32.mrb[68].mxu0 }
 0xb96   : > { %v6967_v22 = vadd.f32 %v6966_v43, %v6839_v55  ;;  %v6968_v61 = vpop.f32.mrb[69].mxu0 }
 0xb97   : > { %v6969_v51 = vadd.f32 %v6968_v61, %v6839_v55  ;;  %v6970_v60 = vpop.f32.mrb[70].mxu0 }
 0xb98   : > { %v6971_v47 = vpop.f32.mrb[71].mxu0 }
 0xb99   : > { %v7064_v37 = vcombine.low %v6967_v22, %v6969_v51 }
 0xb9b   : > { %v7080_v25 = vrot.slane %v7064_v37, %v17757_v27 }
 0xb9d   : > { %v7095_v35 = vcombine.low %v7073_v36, %v7080_v25 }
 0xb9f   : > { %v7103_v59 = vrot.slane %v7095_v35, %v17757_v27 }
 0xbce   : > { %v7048_v7 = vpop.f32.mrb[72].mxu0 }
 0xbcf   : > { %v7007_v24 = vpop.f32.mrb[76].mxu1  ;;  %v7049_v44 = vadd.f32 %v7048_v7, %v6839_v55  ;;  %v7050_v32 = vpop.f32.mrb[73].mxu0 }
 0xbd0   : > { %v7008_v12 = vadd.f32 %v7007_v24, %v6839_v55  ;;  %v7009_v38 = vpop.f32.mrb[77].mxu1  ;;  %v7051_v62 = vadd.f32 %v7050_v32, %v6839_v55  ;;  %v7052_v49 = vpop.f32.mrb[74].mxu0 }
 0xbd1   : > { %v7010_v2 = vadd.f32 %v7009_v38, %v6839_v55  ;;  %v7011_v46 = vpop.f32.mrb[78].mxu1  ;;  %v7053_v16 = vpop.f32.mrb[75].mxu0 }
 0xbd2   : > { %v7012_v29 = vpop.f32.mrb[79].mxu1  ;;  %v7066_v1 = vcombine.low %v7049_v44, %v7051_v62 }
 0xbd3   : > { %v7065_v58 = vcombine.low %v7008_v12, %v7010_v2 }
 0xbd4   : > { %v7094_v19 = vrot.slane %v7066_v1, %v17757_v27 }
 0xbd5   : > { %v7087_v63 = vrot.slane %v7065_v58, %v17757_v27 }
 0xbd7   : > { %v7096_v11 = vcombine.low %v7087_v63, %v7094_v19 }
 0xbd9   : > { %v7110_v42 = vrot.slane %v7096_v11, %v17757_v27 }
 0xbdb   : > { %v7111_v50 = vcombine.low %v7103_v59, %v7110_v42 }
 0xbdd   : > { %7113 = vst [vmem:[%s720_s27] sm:$0xff] %v7111_v50 }
 0xbde PF: > { %s17759_s24 = sld [smem:[#allocation3_spill]] }
 0xbe4   : > { %s34_s29 = sadd.s32 1, %s17759_s24  }
 0xbe5   : > { %p31_p4 = scmp.ge.s32.totalorder %s34_s29, 4  }
 0xbe7   :  { %33 = sbr.rel (!%p31_p4) target bundleno = 11 (0xb), region = 144 }

</bundles_post_ra>
